<compile_context>
chip_gen: v5e
topology: v5e:2x2
jax: 0.10.0
libtpu: 0.0.40
codegen_flags: <defaults>
</compile_context>

<pallas_src>
import math
import functools
import numpy as np

import jax
import jax.numpy as jnp
from jax.experimental import pallas as pl
from jax.experimental.pallas import tpu as pltpu

MATMUL_DTYPE = jnp.bfloat16      # MXU-native; accumulation stays f32
NEG_INF = -1e30
_VMEM_LIMIT_BYTES = 48 * 1024 * 1024   # > v5e/v6e default scoped limit, < v7x physical


def _round_up(x, m):
    return (x + m - 1) // m * m


# --------------------------- in-kernel helpers ------------------------------

def _mm(a, b):
    """Matmul with bf16 operands and f32 accumulation."""
    return jnp.dot(a.astype(MATMUL_DTYPE), b.astype(MATMUL_DTYPE),
                   preferred_element_type=jnp.float32)


def _layernorm(x, g, b, eps=1e-5):
    mean = jnp.mean(x, axis=-1, keepdims=True)
    var = jnp.mean((x - mean) ** 2, axis=-1, keepdims=True)
    return (x - mean) * jax.lax.rsqrt(var + eps) * g + b


def _mha(q, k, v, wo, bo, nhead, *, causal=False, kv_len=None):
    """q:[Lq,D] f32, k/v:[Lk,D] f32, wo:[D,D] -> [Lq,D] f32.

    Heads are the batch dim of a single batched MXU matmul; the head merge is
    a lane-contiguous reshape and the output projection is ONE K=D matmul.
    """
    Lq, D = q.shape
    Lk = k.shape[0]
    Dh = D // nhead
    scale = 1.0 / math.sqrt(Dh)

    qh = jnp.swapaxes(q.astype(MATMUL_DTYPE).reshape(Lq, nhead, Dh), 0, 1)
    kh = jnp.swapaxes(k.astype(MATMUL_DTYPE).reshape(Lk, nhead, Dh), 0, 1)
    vh = jnp.swapaxes(v.astype(MATMUL_DTYPE).reshape(Lk, nhead, Dh), 0, 1)

    s = jnp.einsum('hqd,hkd->hqk', qh, kh,
                   preferred_element_type=jnp.float32) * scale    # [H,Lq,Lk]
    if causal:
        row = jax.lax.broadcasted_iota(jnp.int32, (Lq, Lk), 0)
        col = jax.lax.broadcasted_iota(jnp.int32, (Lq, Lk), 1)
        s = jnp.where((col <= row)[None, :, :], s, NEG_INF)
    if kv_len is not None and kv_len < Lk:
        col = jax.lax.broadcasted_iota(jnp.int32, (1, Lq, Lk), 2)
        s = jnp.where(col < kv_len, s, NEG_INF)

    s = s - jnp.max(s, axis=-1, keepdims=True)
    p = jnp.exp(s)
    p = p * pl.reciprocal(jnp.sum(p, axis=-1, keepdims=True), approx=True)

    ctx = jnp.einsum('hqk,hkd->hqd', p.astype(MATMUL_DTYPE), vh,
                     preferred_element_type=jnp.float32)          # [H,Lq,Dh]
    ctx = jnp.swapaxes(ctx, 0, 1).reshape(Lq, D)                  # [Lq,D]
    return _mm(ctx, wo) + bo


# ------------------------------- kernels ------------------------------------

def _embed_kernel(x_ref, w_ref, b_ref, g_ref, bb_ref, pe_ref, o_ref):
    """Fused trajectory embedding: linear + LayerNorm + positional encoding.

    input_dim is tiny (2), so the projection is an unrolled broadcast
    multiply-add on the VPU instead of a K=2 MXU matmul.
    """
    x = x_ref[...]                               # [L, idim] f32
    w = w_ref[...].astype(jnp.float32)           # [idim, D]
    acc = jnp.zeros((x.shape[0], w.shape[1]), jnp.float32)
    for i in range(x.shape[1]):
        acc = acc + x[:, i:i + 1] * w[i:i + 1, :]
    h = acc + b_ref[...]
    o_ref[...] = _layernorm(h, g_ref[...], bb_ref[...]) + pe_ref[...]


def _cond_kernel(c_ref, w1_ref, b1_ref, w2_ref, b2_ref, g_ref, bb_ref, o_ref):
    """Fused condition encoder: linear + ReLU + linear + LayerNorm."""
    c = c_ref[...]                               # [B, C]
    w1 = w1_ref[...].astype(jnp.float32)         # [C, D]
    acc = jnp.zeros((c.shape[0], w1.shape[1]), jnp.float32)
    for i in range(c.shape[1]):                  # tiny condition_dim: VPU path
        acc = acc + c[:, i:i + 1] * w1[i:i + 1, :]
    h = jnp.maximum(acc + b1_ref[...], 0.0)
    h = _mm(h, w2_ref[...]) + b2_ref[...]
    o_ref[...] = _layernorm(h, g_ref[...], bb_ref[...])


def _enc_stack_kernel(nhead, src_len,
                      c_ref, src_ref, wqkv_ref, wo_ref, w1_ref, w2_ref,
                      vec_ref, ffb_ref, fin_ref, mem_ref, carry_ref):
    """One grid step = one (batch, encoder-layer).  The activation lives in a
    VMEM scratch carry across the layer axis; the final encoder LayerNorm and
    the condition-token prepend (+ sublane padding) are fused in."""
    layer = pl.program_id(1)
    n_layers = pl.num_programs(1)
    D = carry_ref.shape[-1]
    kv_len = src_len + 1                         # valid memory rows

    @pl.when(layer == 0)
    def _():
        carry_ref[...] = jnp.zeros_like(carry_ref)
        carry_ref[pl.ds(0, 1), :] = c_ref[...]               # condition token
        carry_ref[pl.ds(1, src_len), :] = src_ref[...]        # embedded src

    x = carry_ref[...]                            # [Lm_pad, D] f32
    vec = vec_ref[...]                            # [9, D] packed small params

    # ---- self-attention (merged QKV projection, padded keys masked) --------
    qkv = _mm(x, wqkv_ref[...])                   # [Lm_pad, 3D]
    q = qkv[:, :D] + vec[0:1, :]
    k = qkv[:, D:2 * D] + vec[1:2, :]
    v = qkv[:, 2 * D:] + vec[2:3, :]
    a = _mha(q, k, v, wo_ref[...], vec[3:4, :], nhead, kv_len=kv_len)
    x = _layernorm(x + a, vec[4:5, :], vec[5:6, :])

    # ---- FFN ----------------------------------------------------------------
    h = jnp.maximum(_mm(x, w1_ref[...]) + ffb_ref[...], 0.0)
    h = _mm(h, w2_ref[...]) + vec[6:7, :]
    x = _layernorm(x + h, vec[7:8, :], vec[8:9, :])
    carry_ref[...] = x

    @pl.when(layer == n_layers - 1)
    def _():
        fin = fin_ref[...]                        # [2, D] encoder final norm
        mem_ref[...] = _layernorm(x, fin[0:1, :], fin[1:2, :])


def _dec_stack_kernel(nhead, mem_len,
                      tgt_ref, mem_ref, sa_wqkv_ref, sa_wo_ref,
                      ca_wq_ref, ca_wkv_ref, ca_wo_ref, w1_ref, w2_ref,
                      vec_ref, ffb_ref, fin_ref, wout_ref, bout_ref,
                      out_ref, carry_ref):
    """One grid step = one (batch, decoder-layer).  Fuses causal self-attn,
    cross-attn over the encoder memory, FFN, the final decoder LayerNorm and
    the lane-padded output projection (written only at the last layer)."""
    layer = pl.program_id(1)
    n_layers = pl.num_programs(1)
    D = carry_ref.shape[-1]

    @pl.when(layer == 0)
    def _():
        carry_ref[...] = tgt_ref[...]

    x = carry_ref[...]                            # [T_pad, D]
    mem = mem_ref[...]                            # [Lm_pad, D]
    vec = vec_ref[...]                            # [15, D]

    # ---- masked self-attention (causal mask generated in-kernel) -----------
    qkv = _mm(x, sa_wqkv_ref[...])
    q = qkv[:, :D] + vec[0:1, :]
    k = qkv[:, D:2 * D] + vec[1:2, :]
    v = qkv[:, 2 * D:] + vec[2:3, :]
    a = _mha(q, k, v, sa_wo_ref[...], vec[3:4, :], nhead, causal=True)
    x = _layernorm(x + a, vec[4:5, :], vec[5:6, :])

    # ---- cross-attention over encoder memory (padded mem rows masked) ------
    q = _mm(x, ca_wq_ref[...]) + vec[6:7, :]
    kv = _mm(mem, ca_wkv_ref[...])
    k = kv[:, :D] + vec[7:8, :]
    v = kv[:, D:] + vec[8:9, :]
    a = _mha(q, k, v, ca_wo_ref[...], vec[9:10, :], nhead, kv_len=mem_len)
    x = _layernorm(x + a, vec[10:11, :], vec[11:12, :])

    # ---- FFN ----------------------------------------------------------------
    h = jnp.maximum(_mm(x, w1_ref[...]) + ffb_ref[...], 0.0)
    h = _mm(h, w2_ref[...]) + vec[12:13, :]
    x = _layernorm(x + h, vec[13:14, :], vec[14:15, :])
    carry_ref[...] = x

    @pl.when(layer == n_layers - 1)
    def _():
        fin = fin_ref[...]                        # [2, D] decoder final norm
        y = _layernorm(x, fin[0:1, :], fin[1:2, :])
        out_ref[...] = _mm(y, wout_ref[...]) + bout_ref[...]   # lane-dense store


# ----------------------------- kernel wrappers -------------------------------

def run_embed(x, p, pe_slice):
    """x:[B,L,idim] -> [B,L,D]  (linear + LN + PE, batch grid)."""
    B, L, idim = x.shape
    D = p['emb_w'].shape[1]
    args = [x, p['emb_w'], p['emb_b'], p['emb_g'], p['emb_bb'], pe_slice]
    in_specs = [pl.BlockSpec((None, L, idim), lambda b: (b, 0, 0))]
    for a in args[1:]:
        nd = a.ndim
        in_specs.append(pl.BlockSpec(a.shape, lambda b, _n=nd: (0,) * _n))
    return pl.pallas_call(
        _embed_kernel,
        out_shape=jax.ShapeDtypeStruct((B, L, D), jnp.float32),
        grid=(B,),
        in_specs=in_specs,
        out_specs=pl.BlockSpec((None, L, D), lambda b: (b, 0, 0)),
        compiler_params=pltpu.CompilerParams(
            dimension_semantics=("parallel",)),
    )(*args)


def run_condition(cond, p):
    B = cond.shape[0]
    D = p['cond_w2'].shape[1]
    return pl.pallas_call(
        _cond_kernel,
        out_shape=jax.ShapeDtypeStruct((B, D), jnp.float32),
    )(cond, p['cond_w1'], p['cond_b1'], p['cond_w2'], p['cond_b2'],
      p['cond_g'], p['cond_bb'])


def run_encoder(c3, src_e, p, *, nhead):
    """c3:[B,1,D], src_e:[B,S,D] -> mem:[B,Lm_pad,D] (full encoder stack)."""
    B, S, D = src_e.shape
    n_layers = p['enc_wqkv'].shape[0]
    Lm_pad = _round_up(S + 1, 8)

    def batch_spec(L_, W_):
        return pl.BlockSpec((None, L_, W_), lambda b, l: (b, 0, 0))

    def layer_spec(a):
        shp = a.shape[1:]
        nd = len(shp)
        return pl.BlockSpec((None,) + shp,
                            lambda b, l, _nd=nd: (l,) + (0,) * _nd)

    def const_spec(a):
        nd = a.ndim
        return pl.BlockSpec(a.shape, lambda b, l, _nd=nd: (0,) * _nd)

    in_specs = [
        batch_spec(1, D), batch_spec(S, D),
        layer_spec(p['enc_wqkv']), layer_spec(p['enc_wo']),
        layer_spec(p['enc_w1']), layer_spec(p['enc_w2']),
        layer_spec(p['enc_vec']), layer_spec(p['enc_ffb']),
        const_spec(p['enc_fin']),
    ]
    kernel = functools.partial(_enc_stack_kernel, nhead, S)
    return pl.pallas_call(
        kernel,
        out_shape=jax.ShapeDtypeStruct((B, Lm_pad, D), jnp.float32),
        grid=(B, n_layers),
        in_specs=in_specs,
        out_specs=pl.BlockSpec((None, Lm_pad, D), lambda b, l: (b, 0, 0)),
        scratch_shapes=[pltpu.VMEM((Lm_pad, D), jnp.float32)],
        compiler_params=pltpu.CompilerParams(
            dimension_semantics=("parallel", "arbitrary"),
            vmem_limit_bytes=_VMEM_LIMIT_BYTES),
    )(c3, src_e, p['enc_wqkv'], p['enc_wo'], p['enc_w1'], p['enc_w2'],
      p['enc_vec'], p['enc_ffb'], p['enc_fin'])


def run_decoder(tgt_e, mem, p, *, nhead, mem_len):
    """tgt_e:[B,T_pad,D], mem:[B,Lm_pad,D] -> [B,T_pad,n_pad] head output."""
    B, T_pad, D = tgt_e.shape
    Lm_pad = mem.shape[1]
    n_layers = p['dec_sa_wqkv'].shape[0]
    n_out = p['out_w'].shape[1]

    def batch_spec(L_, W_):
        return pl.BlockSpec((None, L_, W_), lambda b, l: (b, 0, 0))

    def layer_spec(a):
        shp = a.shape[1:]
        nd = len(shp)
        return pl.BlockSpec((None,) + shp,
                            lambda b, l, _nd=nd: (l,) + (0,) * _nd)

    def const_spec(a):
        nd = a.ndim
        return pl.BlockSpec(a.shape, lambda b, l, _nd=nd: (0,) * _nd)

    in_specs = [
        batch_spec(T_pad, D), batch_spec(Lm_pad, D),
        layer_spec(p['dec_sa_wqkv']), layer_spec(p['dec_sa_wo']),
        layer_spec(p['dec_ca_wq']), layer_spec(p['dec_ca_wkv']),
        layer_spec(p['dec_ca_wo']),
        layer_spec(p['dec_w1']), layer_spec(p['dec_w2']),
        layer_spec(p['dec_vec']), layer_spec(p['dec_ffb']),
        const_spec(p['dec_fin']), const_spec(p['out_w']), const_spec(p['out_b']),
    ]
    kernel = functools.partial(_dec_stack_kernel, nhead, mem_len)
    return pl.pallas_call(
        kernel,
        out_shape=jax.ShapeDtypeStruct((B, T_pad, n_out), jnp.float32),
        grid=(B, n_layers),
        in_specs=in_specs,
        out_specs=pl.BlockSpec((None, T_pad, n_out), lambda b, l: (b, 0, 0)),
        scratch_shapes=[pltpu.VMEM((T_pad, D), jnp.float32)],
        compiler_params=pltpu.CompilerParams(
            dimension_semantics=("parallel", "arbitrary"),
            vmem_limit_bytes=_VMEM_LIMIT_BYTES),
    )(tgt_e, mem, p['dec_sa_wqkv'], p['dec_sa_wo'], p['dec_ca_wq'],
      p['dec_ca_wkv'], p['dec_ca_wo'], p['dec_w1'], p['dec_w2'],
      p['dec_vec'], p['dec_ffb'], p['dec_fin'], p['out_w'], p['out_b'])


# ------------------------------- forward -------------------------------------

def forward(params, src, cond, tgt, *, nhead):
    """src:[B,S,in], cond:[B,C], tgt:[B,T,in] -> [B,T,in] (teacher forcing)."""
    B, S, idim = src.shape
    T = tgt.shape[1]
    D = params['emb_w'].shape[1]

    T_pad = _round_up(T, 8)
    if T_pad != T:
        tgt = jnp.pad(tgt, ((0, 0), (0, T_pad - T), (0, 0)))

    src_e = run_embed(src, params, params['pe'][:S])          # [B, S, D]
    tgt_e = run_embed(tgt, params, params['pe'][:T_pad])      # [B, T_pad, D]
    c = run_condition(cond, params).reshape(B, 1, D)          # [B, 1, D]

    mem = run_encoder(c, src_e, params, nhead=nhead)          # [B, Lm_pad, D]
    out = run_decoder(tgt_e, mem, params, nhead=nhead, mem_len=S + 1)
    return out[:, :T, :idim]                                  # [B, T, in]


# ----------------------------- parameter init ---------------------------------

def init_params(key, *, input_dim, condition_dim, d_model, nhead,
                num_encoder_layers, num_decoder_layers, dim_feedforward,
                max_seq_len):
    D, Dff = d_model, dim_feedforward
    NE, ND = num_encoder_layers, num_decoder_layers
    keys = iter(jax.random.split(key, 256))

    def xavier(shape):
        din, dout = shape[-2], shape[-1]
        limit = math.sqrt(6.0 / (din + dout))
        return jax.random.uniform(next(keys), shape, jnp.float32, -limit, limit)

    def wmat(*shape):               # matmul weights live in HBM as bf16
        return xavier(shape).astype(jnp.bfloat16)

    def fzeros(*shape):
        return jnp.zeros(shape, jnp.float32)

    # packed per-layer small params (biases = 0, LN gamma = 1, LN beta = 0)
    # encoder rows: 0-2 qkv bias, 3 out bias, 4-5 ln1 g/b, 6 ff2 bias, 7-8 ln2 g/b
    enc_vec = np.zeros((NE, 9, D), np.float32)
    enc_vec[:, 4, :] = 1.0
    enc_vec[:, 7, :] = 1.0
    # decoder rows: 0-2 sa qkv bias, 3 sa out bias, 4-5 ln1, 6 ca q bias,
    # 7-8 ca kv bias, 9 ca out bias, 10-11 ln2, 12 ff2 bias, 13-14 ln3
    dec_vec = np.zeros((ND, 15, D), np.float32)
    dec_vec[:, 4, :] = 1.0
    dec_vec[:, 10, :] = 1.0
    dec_vec[:, 13, :] = 1.0

    fin = jnp.concatenate([jnp.ones((1, D), jnp.float32),
                           jnp.zeros((1, D), jnp.float32)], axis=0)   # [g; b]

    # sinusoidal positional encoding (same formula as the PyTorch module)
    pe = np.zeros((max_seq_len, D), np.float32)
    position = np.arange(max_seq_len, dtype=np.float32)[:, None]
    div_term = np.exp(np.arange(0, D, 2, dtype=np.float32)
                      * (-math.log(10000.0) / D))
    pe[:, 0::2] = np.sin(position * div_term)
    pe[:, 1::2] = np.cos(position * div_term)

    # output projection zero-padded to a lane-dense (multiple of 128) width
    n_pad = _round_up(input_dim, 128)
    w_out = xavier((D, input_dim))
    w_out_pad = jnp.zeros((D, n_pad), jnp.float32).at[:, :input_dim].set(w_out)

    return {
        # trajectory embedding (linear + LN), positional encoding
        'emb_w': wmat(input_dim, D), 'emb_b': fzeros(1, D),
        'emb_g': jnp.ones((1, D), jnp.float32), 'emb_bb': fzeros(1, D),
        'pe': jnp.asarray(pe),
        # condition encoder
        'cond_w1': wmat(condition_dim, D), 'cond_b1': fzeros(1, D),
        'cond_w2': wmat(D, D), 'cond_b2': fzeros(1, D),
        'cond_g': jnp.ones((1, D), jnp.float32), 'cond_bb': fzeros(1, D),
        # encoder stack (weights stacked along a leading layer axis)
        'enc_wqkv': wmat(NE, D, 3 * D), 'enc_wo': wmat(NE, D, D),
        'enc_w1': wmat(NE, D, Dff), 'enc_w2': wmat(NE, Dff, D),
        'enc_vec': jnp.asarray(enc_vec), 'enc_ffb': fzeros(NE, 1, Dff),
        'enc_fin': fin,
        # decoder stack
        'dec_sa_wqkv': wmat(ND, D, 3 * D), 'dec_sa_wo': wmat(ND, D, D),
        'dec_ca_wq': wmat(ND, D, D), 'dec_ca_wkv': wmat(ND, D, 2 * D),
        'dec_ca_wo': wmat(ND, D, D),
        'dec_w1': wmat(ND, D, Dff), 'dec_w2': wmat(ND, Dff, D),
        'dec_vec': jnp.asarray(dec_vec), 'dec_ffb': fzeros(ND, 1, Dff),
        'dec_fin': fin,
        # head (lane-padded)
        'out_w': w_out_pad.astype(jnp.bfloat16), 'out_b': fzeros(1, n_pad),
        # unused in the teacher-forcing path (kept for parity with the module)
        'start_token': jax.random.normal(next(keys), (1, 1, D), jnp.float32),
    }


# ----------------------------- demo / main ------------------------------------

if __name__ == "__main__":
    B, S, T = 2, 8, 8
    INPUT_DIM, COND_DIM = 2, 5
    D_MODEL, NHEAD = 128, 4          # lane-aligned small config
    N_ENC, N_DEC = 2, 2
    D_FF = 256
    MAX_SEQ_LEN = 32

    key = jax.random.PRNGKey(0)
    k_src, k_cond, k_tgt, k_par = jax.random.split(key, 4)

    src = jax.random.normal(k_src, (B, S, INPUT_DIM), jnp.float32)
    cond = jax.random.normal(k_cond, (B, COND_DIM), jnp.float32)
    tgt = jax.random.normal(k_tgt, (B, T, INPUT_DIM), jnp.float32)

    params = init_params(k_par, input_dim=INPUT_DIM, condition_dim=COND_DIM,
                         d_model=D_MODEL, nhead=NHEAD,
                         num_encoder_layers=N_ENC, num_decoder_layers=N_DEC,
                         dim_feedforward=D_FF, max_seq_len=MAX_SEQ_LEN)

    fwd = jax.jit(functools.partial(forward, nhead=NHEAD))
    preds = jax.block_until_ready(fwd(params, src, cond, tgt))

    assert preds.shape == (B, T, INPUT_DIM), preds.shape
    assert bool(jnp.all(jnp.isfinite(preds)))
    print("KERNEL_OK")
</pallas_src>

<mosaic_0001>
module attributes {stable_mosaic.version = 11 : i64} {
  func.func @_embed_kernel(%arg0: i32, %arg1: memref<1x8x2xf32, #tpu.memory_space<vmem>>, %arg2: memref<2x128xbf16, #tpu.memory_space<vmem>>, %arg3: memref<1x128xf32, #tpu.memory_space<vmem>>, %arg4: memref<1x128xf32, #tpu.memory_space<vmem>>, %arg5: memref<1x128xf32, #tpu.memory_space<vmem>>, %arg6: memref<8x128xf32, #tpu.memory_space<vmem>>, %arg7: memref<1x8x128xf32, #tpu.memory_space<vmem>>) attributes {dimension_semantics = [#tpu.dimension_semantics<parallel>], iteration_bounds = array<i64: 2>, scalar_prefetch = 0 : i64, scratch_operands = 0 : i64, tpu.core_type = #tpu.core_type<tc>, window_params = [{transform_indices = @transform_0, window_bounds = array<i64: 1, 8, 2>}, {pipeline_mode = #tpu.pipeline_mode<synchronous>, transform_indices = @transform_1, window_bounds = array<i64: 2, 128>}, {pipeline_mode = #tpu.pipeline_mode<synchronous>, transform_indices = @transform_2, window_bounds = array<i64: 1, 128>}, {pipeline_mode = #tpu.pipeline_mode<synchronous>, transform_indices = @transform_3, window_bounds = array<i64: 1, 128>}, {pipeline_mode = #tpu.pipeline_mode<synchronous>, transform_indices = @transform_4, window_bounds = array<i64: 1, 128>}, {pipeline_mode = #tpu.pipeline_mode<synchronous>, transform_indices = @transform_5, window_bounds = array<i64: 8, 128>}, {transform_indices = @transform_6, window_bounds = array<i64: 1, 8, 128>}]} {
    %c0 = arith.constant 0 : index
    %c0_0 = arith.constant 0 : index
    %c0_1 = arith.constant 0 : index
    %0 = vector.load %arg1[%c0, %c0_0, %c0_1] : memref<1x8x2xf32, #tpu.memory_space<vmem>>, vector<1x8x2xf32>
    %1 = vector.shape_cast %0 : vector<1x8x2xf32> to vector<8x2xf32>
    %c0_2 = arith.constant 0 : index
    %c0_3 = arith.constant 0 : index
    %2 = vector.load %arg2[%c0_2, %c0_3] : memref<2x128xbf16, #tpu.memory_space<vmem>>, vector<2x128xbf16>
    %3 = arith.extf %2 : vector<2x128xbf16> to vector<2x128xf32>
    %cst = arith.constant 0.000000e+00 : f32
    %4 = vector.broadcast %cst : f32 to vector<8x128xf32>
    %5 = vector.extract_strided_slice %1 {offsets = [0, 0], sizes = [8, 1], strides = [1, 1]} : vector<8x2xf32> to vector<8x1xf32>
    %6 = vector.extract_strided_slice %3 {offsets = [0, 0], sizes = [1, 128], strides = [1, 1]} : vector<2x128xf32> to vector<1x128xf32>
    %7 = vector.broadcast %5 : vector<8x1xf32> to vector<8x128xf32>
    %8 = vector.broadcast %6 : vector<1x128xf32> to vector<8x128xf32>
    %9 = arith.mulf %7, %8 : vector<8x128xf32>
    %10 = arith.addf %4, %9 : vector<8x128xf32>
    %11 = vector.extract_strided_slice %1 {offsets = [0, 1], sizes = [8, 1], strides = [1, 1]} : vector<8x2xf32> to vector<8x1xf32>
    %12 = vector.extract_strided_slice %3 {offsets = [1, 0], sizes = [1, 128], strides = [1, 1]} : vector<2x128xf32> to vector<1x128xf32>
    %13 = vector.broadcast %11 : vector<8x1xf32> to vector<8x128xf32>
    %14 = vector.broadcast %12 : vector<1x128xf32> to vector<8x128xf32>
    %15 = arith.mulf %13, %14 : vector<8x128xf32>
    %16 = arith.addf %10, %15 : vector<8x128xf32>
    %c0_4 = arith.constant 0 : index
    %c0_5 = arith.constant 0 : index
    %17 = vector.load %arg3[%c0_4, %c0_5] : memref<1x128xf32, #tpu.memory_space<vmem>>, vector<1x128xf32>
    %18 = vector.broadcast %17 : vector<1x128xf32> to vector<8x128xf32>
    %19 = arith.addf %16, %18 : vector<8x128xf32>
    %c0_6 = arith.constant 0 : index
    %c0_7 = arith.constant 0 : index
    %20 = vector.load %arg4[%c0_6, %c0_7] : memref<1x128xf32, #tpu.memory_space<vmem>>, vector<1x128xf32>
    %c0_8 = arith.constant 0 : index
    %c0_9 = arith.constant 0 : index
    %21 = vector.load %arg5[%c0_8, %c0_9] : memref<1x128xf32, #tpu.memory_space<vmem>>, vector<1x128xf32>
    %cst_10 = arith.constant dense<0.000000e+00> : vector<8xf32>
    %22 = vector.multi_reduction <add>, %19, %cst_10 [1] : vector<8x128xf32> to vector<8xf32>
    %23 = vector.shape_cast %22 : vector<8xf32> to vector<8x1xf32>
    %cst_11 = arith.constant 1.280000e+02 : f32
    %24 = vector.broadcast %cst_11 : f32 to vector<8x1xf32>
    %25 = arith.divf %23, %24 : vector<8x1xf32>
    %26 = vector.broadcast %25 : vector<8x1xf32> to vector<8x128xf32>
    %27 = arith.subf %19, %26 : vector<8x128xf32>
    %28 = arith.mulf %27, %27 : vector<8x128xf32>
    %cst_12 = arith.constant dense<0.000000e+00> : vector<8xf32>
    %29 = vector.multi_reduction <add>, %28, %cst_12 [1] : vector<8x128xf32> to vector<8xf32>
    %30 = vector.shape_cast %29 : vector<8xf32> to vector<8x1xf32>
    %cst_13 = arith.constant 1.280000e+02 : f32
    %31 = vector.broadcast %cst_13 : f32 to vector<8x1xf32>
    %32 = arith.divf %30, %31 : vector<8x1xf32>
    %33 = vector.broadcast %25 : vector<8x1xf32> to vector<8x128xf32>
    %34 = arith.subf %19, %33 : vector<8x128xf32>
    %cst_14 = arith.constant 9.99999974E-6 : f32
    %35 = vector.broadcast %cst_14 : f32 to vector<8x1xf32>
    %36 = arith.addf %32, %35 : vector<8x1xf32>
    %37 = math.rsqrt %36 : vector<8x1xf32>
    %38 = vector.broadcast %37 : vector<8x1xf32> to vector<8x128xf32>
    %39 = arith.mulf %34, %38 : vector<8x128xf32>
    %40 = vector.broadcast %20 : vector<1x128xf32> to vector<8x128xf32>
    %41 = arith.mulf %39, %40 : vector<8x128xf32>
    %42 = vector.broadcast %21 : vector<1x128xf32> to vector<8x128xf32>
    %43 = arith.addf %41, %42 : vector<8x128xf32>
    %c0_15 = arith.constant 0 : index
    %c0_16 = arith.constant 0 : index
    %44 = vector.load %arg6[%c0_15, %c0_16] : memref<8x128xf32, #tpu.memory_space<vmem>>, vector<8x128xf32>
    %45 = arith.addf %43, %44 : vector<8x128xf32>
    %c0_17 = arith.constant 0 : index
    %c0_18 = arith.constant 0 : index
    %c0_19 = arith.constant 0 : index
    %46 = vector.load %arg7[%c0_17, %c0_18, %c0_19] : memref<1x8x128xf32, #tpu.memory_space<vmem>>, vector<1x8x128xf32>
    %47 = vector.shape_cast %46 : vector<1x8x128xf32> to vector<8x128xf32>
    %48 = vector.shape_cast %45 : vector<8x128xf32> to vector<1x8x128xf32>
    tpu.vector_store %arg7[%c0_17, %c0_18, %c0_19], %48 {strides = array<i32>} : memref<1x8x128xf32, #tpu.memory_space<vmem>>, vector<1x8x128xf32>,
    return
  }
  func.func @transform_0(%arg0: i32) -> (i32, i32, i32) {
    %c0_i32 = arith.constant 0 : i32
    %c0_i32_0 = arith.constant 0 : i32
    %c0_i32_1 = arith.constant 0 : i32
    return %arg0, %c0_i32, %c0_i32_0 : i32, i32, i32
  }
  func.func @transform_1(%arg0: i32) -> (i32, i32) {
    %c0_i32 = arith.constant 0 : i32
    %c0_i32_0 = arith.constant 0 : i32
    %c0_i32_1 = arith.constant 0 : i32
    return %c0_i32, %c0_i32_0 : i32, i32
  }
  func.func @transform_2(%arg0: i32) -> (i32, i32) {
    %c0_i32 = arith.constant 0 : i32
    %c0_i32_0 = arith.constant 0 : i32
    %c0_i32_1 = arith.constant 0 : i32
    return %c0_i32, %c0_i32_0 : i32, i32
  }
  func.func @transform_3(%arg0: i32) -> (i32, i32) {
    %c0_i32 = arith.constant 0 : i32
    %c0_i32_0 = arith.constant 0 : i32
    %c0_i32_1 = arith.constant 0 : i32
    return %c0_i32, %c0_i32_0 : i32, i32
  }
  func.func @transform_4(%arg0: i32) -> (i32, i32) {
    %c0_i32 = arith.constant 0 : i32
    %c0_i32_0 = arith.constant 0 : i32
    %c0_i32_1 = arith.constant 0 : i32
    return %c0_i32, %c0_i32_0 : i32, i32
  }
  func.func @transform_5(%arg0: i32) -> (i32, i32) {
    %c0_i32 = arith.constant 0 : i32
    %c0_i32_0 = arith.constant 0 : i32
    %c0_i32_1 = arith.constant 0 : i32
    return %c0_i32, %c0_i32_0 : i32, i32
  }
  func.func @transform_6(%arg0: i32) -> (i32, i32, i32) {
    %c0_i32 = arith.constant 0 : i32
    %c0_i32_0 = arith.constant 0 : i32
    %c0_i32_1 = arith.constant 0 : i32
    return %arg0, %c0_i32, %c0_i32_0 : i32, i32, i32
  }
}

module attributes {stable_mosaic.version = 11 : i64} {
  func.func @_cond_kernel(%arg0: memref<2x5xf32, #tpu.memory_space<vmem>>, %arg1: memref<5x128xbf16, #tpu.memory_space<vmem>>, %arg2: memref<1x128xf32, #tpu.memory_space<vmem>>, %arg3: memref<128x128xbf16, #tpu.memory_space<vmem>>, %arg4: memref<1x128xf32, #tpu.memory_space<vmem>>, %arg5: memref<1x128xf32, #tpu.memory_space<vmem>>, %arg6: memref<1x128xf32, #tpu.memory_space<vmem>>, %arg7: memref<2x128xf32, #tpu.memory_space<vmem>>) attributes {dimension_semantics = [], scalar_prefetch = 0 : i64, scratch_operands = 0 : i64, tpu.core_type = #tpu.core_type<tc>} {
    %c0 = arith.constant 0 : index
    %c0_0 = arith.constant 0 : index
    %0 = vector.load %arg0[%c0, %c0_0] : memref<2x5xf32, #tpu.memory_space<vmem>>, vector<2x5xf32>
    %c0_1 = arith.constant 0 : index
    %c0_2 = arith.constant 0 : index
    %1 = vector.load %arg1[%c0_1, %c0_2] : memref<5x128xbf16, #tpu.memory_space<vmem>>, vector<5x128xbf16>
    %2 = arith.extf %1 : vector<5x128xbf16> to vector<5x128xf32>
    %cst = arith.constant 0.000000e+00 : f32
    %3 = vector.broadcast %cst : f32 to vector<2x128xf32>
    %4 = vector.extract_strided_slice %0 {offsets = [0, 0], sizes = [2, 1], strides = [1, 1]} : vector<2x5xf32> to vector<2x1xf32>
    %5 = vector.extract_strided_slice %2 {offsets = [0, 0], sizes = [1, 128], strides = [1, 1]} : vector<5x128xf32> to vector<1x128xf32>
    %6 = vector.broadcast %4 : vector<2x1xf32> to vector<2x128xf32>
    %7 = vector.broadcast %5 : vector<1x128xf32> to vector<2x128xf32>
    %8 = arith.mulf %6, %7 : vector<2x128xf32>
    %9 = arith.addf %3, %8 : vector<2x128xf32>
    %10 = vector.extract_strided_slice %0 {offsets = [0, 1], sizes = [2, 1], strides = [1, 1]} : vector<2x5xf32> to vector<2x1xf32>
    %11 = vector.extract_strided_slice %2 {offsets = [1, 0], sizes = [1, 128], strides = [1, 1]} : vector<5x128xf32> to vector<1x128xf32>
    %12 = vector.broadcast %10 : vector<2x1xf32> to vector<2x128xf32>
    %13 = vector.broadcast %11 : vector<1x128xf32> to vector<2x128xf32>
    %14 = arith.mulf %12, %13 : vector<2x128xf32>
    %15 = arith.addf %9, %14 : vector<2x128xf32>
    %16 = vector.extract_strided_slice %0 {offsets = [0, 2], sizes = [2, 1], strides = [1, 1]} : vector<2x5xf32> to vector<2x1xf32>
    %17 = vector.extract_strided_slice %2 {offsets = [2, 0], sizes = [1, 128], strides = [1, 1]} : vector<5x128xf32> to vector<1x128xf32>
    %18 = vector.broadcast %16 : vector<2x1xf32> to vector<2x128xf32>
    %19 = vector.broadcast %17 : vector<1x128xf32> to vector<2x128xf32>
    %20 = arith.mulf %18, %19 : vector<2x128xf32>
    %21 = arith.addf %15, %20 : vector<2x128xf32>
    %22 = vector.extract_strided_slice %0 {offsets = [0, 3], sizes = [2, 1], strides = [1, 1]} : vector<2x5xf32> to vector<2x1xf32>
    %23 = vector.extract_strided_slice %2 {offsets = [3, 0], sizes = [1, 128], strides = [1, 1]} : vector<5x128xf32> to vector<1x128xf32>
    %24 = vector.broadcast %22 : vector<2x1xf32> to vector<2x128xf32>
    %25 = vector.broadcast %23 : vector<1x128xf32> to vector<2x128xf32>
    %26 = arith.mulf %24, %25 : vector<2x128xf32>
    %27 = arith.addf %21, %26 : vector<2x128xf32>
    %28 = vector.extract_strided_slice %0 {offsets = [0, 4], sizes = [2, 1], strides = [1, 1]} : vector<2x5xf32> to vector<2x1xf32>
    %29 = vector.extract_strided_slice %2 {offsets = [4, 0], sizes = [1, 128], strides = [1, 1]} : vector<5x128xf32> to vector<1x128xf32>
    %30 = vector.broadcast %28 : vector<2x1xf32> to vector<2x128xf32>
    %31 = vector.broadcast %29 : vector<1x128xf32> to vector<2x128xf32>
    %32 = arith.mulf %30, %31 : vector<2x128xf32>
    %33 = arith.addf %27, %32 : vector<2x128xf32>
    %c0_3 = arith.constant 0 : index
    %c0_4 = arith.constant 0 : index
    %34 = vector.load %arg2[%c0_3, %c0_4] : memref<1x128xf32, #tpu.memory_space<vmem>>, vector<1x128xf32>
    %35 = vector.broadcast %34 : vector<1x128xf32> to vector<2x128xf32>
    %36 = arith.addf %33, %35 : vector<2x128xf32>
    %cst_5 = arith.constant 0.000000e+00 : f32
    %37 = vector.broadcast %cst_5 : f32 to vector<2x128xf32>
    %38 = arith.maximumf %36, %37 : vector<2x128xf32>
    %c0_6 = arith.constant 0 : index
    %c0_7 = arith.constant 0 : index
    %39 = vector.load %arg3[%c0_6, %c0_7] : memref<128x128xbf16, #tpu.memory_space<vmem>>, vector<128x128xbf16>
    %40 = arith.truncf %38 : vector<2x128xf32> to vector<2x128xbf16>
    %cst_8 = arith.constant dense<0.000000e+00> : vector<2x128xf32>
    %41 = tpu.matmul %40, %39, %cst_8 {dimension_numbers = #tpu.dot_dimension_numbers<[1], [0], [0], [1], [0, 0, 1, 1], [], []>} : vector<2x128xbf16>, vector<128x128xbf16>, vector<2x128xf32> -> vector<2x128xf32>
    %c0_9 = arith.constant 0 : index
    %c0_10 = arith.constant 0 : index
    %42 = vector.load %arg4[%c0_9, %c0_10] : memref<1x128xf32, #tpu.memory_space<vmem>>, vector<1x128xf32>
    %43 = vector.broadcast %42 : vector<1x128xf32> to vector<2x128xf32>
    %44 = arith.addf %41, %43 : vector<2x128xf32>
    %c0_11 = arith.constant 0 : index
    %c0_12 = arith.constant 0 : index
    %45 = vector.load %arg5[%c0_11, %c0_12] : memref<1x128xf32, #tpu.memory_space<vmem>>, vector<1x128xf32>
    %c0_13 = arith.constant 0 : index
    %c0_14 = arith.constant 0 : index
    %46 = vector.load %arg6[%c0_13, %c0_14] : memref<1x128xf32, #tpu.memory_space<vmem>>, vector<1x128xf32>
    %cst_15 = arith.constant dense<0.000000e+00> : vector<2xf32>
    %47 = vector.multi_reduction <add>, %44, %cst_15 [1] : vector<2x128xf32> to vector<2xf32>
    %48 = vector.shape_cast %47 : vector<2xf32> to vector<2x1xf32>
    %cst_16 = arith.constant 1.280000e+02 : f32
    %49 = vector.broadcast %cst_16 : f32 to vector<2x1xf32>
    %50 = arith.divf %48, %49 : vector<2x1xf32>
    %51 = vector.broadcast %50 : vector<2x1xf32> to vector<2x128xf32>
    %52 = arith.subf %44, %51 : vector<2x128xf32>
    %53 = arith.mulf %52, %52 : vector<2x128xf32>
    %cst_17 = arith.constant dense<0.000000e+00> : vector<2xf32>
    %54 = vector.multi_reduction <add>, %53, %cst_17 [1] : vector<2x128xf32> to vector<2xf32>
    %55 = vector.shape_cast %54 : vector<2xf32> to vector<2x1xf32>
    %cst_18 = arith.constant 1.280000e+02 : f32
    %56 = vector.broadcast %cst_18 : f32 to vector<2x1xf32>
    %57 = arith.divf %55, %56 : vector<2x1xf32>
    %58 = vector.broadcast %50 : vector<2x1xf32> to vector<2x128xf32>
    %59 = arith.subf %44, %58 : vector<2x128xf32>
    %cst_19 = arith.constant 9.99999974E-6 : f32
    %60 = vector.broadcast %cst_19 : f32 to vector<2x1xf32>
    %61 = arith.addf %57, %60 : vector<2x1xf32>
    %62 = math.rsqrt %61 : vector<2x1xf32>
    %63 = vector.broadcast %62 : vector<2x1xf32> to vector<2x128xf32>
    %64 = arith.mulf %59, %63 : vector<2x128xf32>
    %65 = vector.broadcast %45 : vector<1x128xf32> to vector<2x128xf32>
    %66 = arith.mulf %64, %65 : vector<2x128xf32>
    %67 = vector.broadcast %46 : vector<1x128xf32> to vector<2x128xf32>
    %68 = arith.addf %66, %67 : vector<2x128xf32>
    %c0_20 = arith.constant 0 : index
    %c0_21 = arith.constant 0 : index
    %69 = vector.load %arg7[%c0_20, %c0_21] : memref<2x128xf32, #tpu.memory_space<vmem>>, vector<2x128xf32>
    tpu.vector_store %arg7[%c0_20, %c0_21], %68 {strides = array<i32>} : memref<2x128xf32, #tpu.memory_space<vmem>>, vector<2x128xf32>,
    return
  }
}

module attributes {stable_mosaic.version = 11 : i64} {
  func.func @_enc_stack_kernel(%arg0: i32, %arg1: i32, %arg2: memref<1x1x128xf32, #tpu.memory_space<vmem>>, %arg3: memref<1x8x128xf32, #tpu.memory_space<vmem>>, %arg4: memref<1x128x384xbf16, #tpu.memory_space<vmem>>, %arg5: memref<1x128x128xbf16, #tpu.memory_space<vmem>>, %arg6: memref<1x128x256xbf16, #tpu.memory_space<vmem>>, %arg7: memref<1x256x128xbf16, #tpu.memory_space<vmem>>, %arg8: memref<1x9x128xf32, #tpu.memory_space<vmem>>, %arg9: memref<1x1x256xf32, #tpu.memory_space<vmem>>, %arg10: memref<2x128xf32, #tpu.memory_space<vmem>>, %arg11: memref<1x16x128xf32, #tpu.memory_space<vmem>>, %arg12: memref<16x128xf32, #tpu.memory_space<vmem>>) attributes {dimension_semantics = [#tpu.dimension_semantics<parallel>, #tpu.dimension_semantics<arbitrary>], iteration_bounds = array<i64: 2, 2>, scalar_prefetch = 0 : i64, scratch_operands = 1 : i64, tpu.core_type = #tpu.core_type<tc>, window_params = [{transform_indices = @transform_0, window_bounds = array<i64: 1, 1, 128>}, {transform_indices = @transform_1, window_bounds = array<i64: 1, 8, 128>}, {transform_indices = @transform_2, window_bounds = array<i64: 1, 128, 384>}, {transform_indices = @transform_3, window_bounds = array<i64: 1, 128, 128>}, {transform_indices = @transform_4, window_bounds = array<i64: 1, 128, 256>}, {transform_indices = @transform_5, window_bounds = array<i64: 1, 256, 128>}, {transform_indices = @transform_6, window_bounds = array<i64: 1, 9, 128>}, {transform_indices = @transform_7, window_bounds = array<i64: 1, 1, 256>}, {pipeline_mode = #tpu.pipeline_mode<synchronous>, transform_indices = @transform_8, window_bounds = array<i64: 2, 128>}, {transform_indices = @transform_9, window_bounds = array<i64: 1, 16, 128>}]} {
    %c0_i32 = arith.constant 0 : i32
    %0 = arith.cmpi eq, %arg1, %c0_i32 : i32
    %1 = arith.extui %0 : i1 to i32
    %c0_i32_0 = arith.constant 0 : i32
    %2 = arith.cmpi ne, %1, %c0_i32_0 : i32
    scf.if %2 {
      %cst_43 = arith.constant 0.000000e+00 : f32
      %133 = vector.broadcast %cst_43 : f32 to vector<16x128xf32>
      %c0_44 = arith.constant 0 : index
      %c0_45 = arith.constant 0 : index
      %134 = vector.load %arg12[%c0_44, %c0_45] : memref<16x128xf32, #tpu.memory_space<vmem>>, vector<16x128xf32>
      tpu.vector_store %arg12[%c0_44, %c0_45], %133 {strides = array<i32>} : memref<16x128xf32, #tpu.memory_space<vmem>>, vector<16x128xf32>,
      %c0_46 = arith.constant 0 : index
      %c0_47 = arith.constant 0 : index
      %c0_48 = arith.constant 0 : index
      %135 = vector.load %arg2[%c0_46, %c0_47, %c0_48] : memref<1x1x128xf32, #tpu.memory_space<vmem>>, vector<1x1x128xf32>
      %136 = vector.shape_cast %135 : vector<1x1x128xf32> to vector<1x128xf32>
      %c0_49 = arith.constant 0 : index
      %c0_50 = arith.constant 0 : index
      %137 = vector.load %arg12[%c0_49, %c0_50] : memref<16x128xf32, #tpu.memory_space<vmem>>, vector<1x128xf32>
      tpu.vector_store %arg12[%c0_49, %c0_50], %136 {strides = array<i32>} : memref<16x128xf32, #tpu.memory_space<vmem>>, vector<1x128xf32>,
      %c0_51 = arith.constant 0 : index
      %c0_52 = arith.constant 0 : index
      %c0_53 = arith.constant 0 : index
      %138 = vector.load %arg3[%c0_51, %c0_52, %c0_53] : memref<1x8x128xf32, #tpu.memory_space<vmem>>, vector<1x8x128xf32>
      %139 = vector.shape_cast %138 : vector<1x8x128xf32> to vector<8x128xf32>
      %c1 = arith.constant 1 : index
      %c0_54 = arith.constant 0 : index
      %140 = vector.load %arg12[%c1, %c0_54] : memref<16x128xf32, #tpu.memory_space<vmem>>, vector<8x128xf32>
      tpu.vector_store %arg12[%c1, %c0_54], %139 {strides = array<i32>} : memref<16x128xf32, #tpu.memory_space<vmem>>, vector<8x128xf32>,
    } else {
    }
    %c0 = arith.constant 0 : index
    %c0_1 = arith.constant 0 : index
    %3 = vector.load %arg12[%c0, %c0_1] : memref<16x128xf32, #tpu.memory_space<vmem>>, vector<16x128xf32>
    %c0_2 = arith.constant 0 : index
    %c0_3 = arith.constant 0 : index
    %c0_4 = arith.constant 0 : index
    %4 = vector.load %arg8[%c0_2, %c0_3, %c0_4] : memref<1x9x128xf32, #tpu.memory_space<vmem>>, vector<1x9x128xf32>
    %5 = vector.shape_cast %4 : vector<1x9x128xf32> to vector<9x128xf32>
    %c0_5 = arith.constant 0 : index
    %c0_6 = arith.constant 0 : index
    %c0_7 = arith.constant 0 : index
    %6 = vector.load %arg4[%c0_5, %c0_6, %c0_7] : memref<1x128x384xbf16, #tpu.memory_space<vmem>>, vector<1x128x384xbf16>
    %7 = vector.shape_cast %6 : vector<1x128x384xbf16> to vector<128x384xbf16>
    %8 = arith.truncf %3 : vector<16x128xf32> to vector<16x128xbf16>
    %cst = arith.constant dense<0.000000e+00> : vector<16x384xf32>
    %9 = tpu.matmul %8, %7, %cst {dimension_numbers = #tpu.dot_dimension_numbers<[1], [0], [0], [1], [0, 0, 1, 1], [], []>} : vector<16x128xbf16>, vector<128x384xbf16>, vector<16x384xf32> -> vector<16x384xf32>
    %10 = vector.extract_strided_slice %9 {offsets = [0, 0], sizes = [16, 128], strides = [1, 1]} : vector<16x384xf32> to vector<16x128xf32>
    %11 = vector.extract_strided_slice %5 {offsets = [0, 0], sizes = [1, 128], strides = [1, 1]} : vector<9x128xf32> to vector<1x128xf32>
    %12 = vector.broadcast %11 : vector<1x128xf32> to vector<16x128xf32>
    %13 = arith.addf %10, %12 : vector<16x128xf32>
    %14 = vector.extract_strided_slice %9 {offsets = [0, 128], sizes = [16, 128], strides = [1, 1]} : vector<16x384xf32> to vector<16x128xf32>
    %15 = vector.extract_strided_slice %5 {offsets = [1, 0], sizes = [1, 128], strides = [1, 1]} : vector<9x128xf32> to vector<1x128xf32>
    %16 = vector.broadcast %15 : vector<1x128xf32> to vector<16x128xf32>
    %17 = arith.addf %14, %16 : vector<16x128xf32>
    %18 = vector.extract_strided_slice %9 {offsets = [0, 256], sizes = [16, 128], strides = [1, 1]} : vector<16x384xf32> to vector<16x128xf32>
    %19 = vector.extract_strided_slice %5 {offsets = [2, 0], sizes = [1, 128], strides = [1, 1]} : vector<9x128xf32> to vector<1x128xf32>
    %20 = vector.broadcast %19 : vector<1x128xf32> to vector<16x128xf32>
    %21 = arith.addf %18, %20 : vector<16x128xf32>
    %c0_8 = arith.constant 0 : index
    %c0_9 = arith.constant 0 : index
    %c0_10 = arith.constant 0 : index
    %22 = vector.load %arg5[%c0_8, %c0_9, %c0_10] : memref<1x128x128xbf16, #tpu.memory_space<vmem>>, vector<1x128x128xbf16>
    %23 = vector.shape_cast %22 : vector<1x128x128xbf16> to vector<128x128xbf16>
    %24 = vector.extract_strided_slice %5 {offsets = [3, 0], sizes = [1, 128], strides = [1, 1]} : vector<9x128xf32> to vector<1x128xf32>
    %25 = arith.truncf %13 : vector<16x128xf32> to vector<16x128xbf16>
    %26 = vector.shape_cast %25 : vector<16x128xbf16> to vector<16x4x32xbf16>
    %27 = tpu.transpose %26, [1, 0, 2] : vector<16x4x32xbf16> -> vector<4x16x32xbf16>
    %28 = arith.truncf %17 : vector<16x128xf32> to vector<16x128xbf16>
    %29 = vector.shape_cast %28 : vector<16x128xbf16> to vector<16x4x32xbf16>
    %30 = tpu.transpose %29, [1, 0, 2] : vector<16x4x32xbf16> -> vector<4x16x32xbf16>
    %31 = arith.truncf %21 : vector<16x128xf32> to vector<16x128xbf16>
    %32 = vector.shape_cast %31 : vector<16x128xbf16> to vector<16x4x32xbf16>
    %33 = tpu.transpose %32, [1, 0, 2] : vector<16x4x32xbf16> -> vector<4x16x32xbf16>
    "tpu.trace_start"() <{level = 10 : i32, message = "hqd,hkd->hqk"}> : () -> ()
    %cst_11 = arith.constant dense<0.000000e+00> : vector<4x16x16xf32>
    %34 = tpu.matmul %27, %30, %cst_11 {dimension_numbers = #tpu.dot_dimension_numbers<[2], [2], [1], [1], [0, 0, 0, 1, 1, 1], [0], [0]>} : vector<4x16x32xbf16>, vector<4x16x32xbf16>, vector<4x16x16xf32> -> vector<4x16x16xf32>
    "tpu.trace_stop"() : () -> ()
    %cst_12 = arith.constant 0.176776692 : f32
    %35 = vector.broadcast %cst_12 : f32 to vector<4x16x16xf32>
    %36 = arith.mulf %34, %35 : vector<4x16x16xf32>
    %37 = tpu.iota {dimensions = array<i32: 2>} : vector<1x16x16xi32>
    %c9_i32 = arith.constant 9 : i32
    %38 = vector.broadcast %c9_i32 : i32 to vector<1x16x16xi32>
    %39 = arith.cmpi slt, %37, %38 : vector<1x16x16xi32>
    %cst_13 = arith.constant -1.000000e+30 : f32
    %40 = vector.shape_cast %39 : vector<1x16x16xi1> to vector<1x16x16xi1>
    %41 = vector.broadcast %40 : vector<1x16x16xi1> to vector<4x16x16xi1>
    %42 = vector.broadcast %cst_13 : f32 to vector<4x16x16xf32>
    %43 = arith.select %41, %36, %42 : vector<4x16x16xi1>, vector<4x16x16xf32>
    %cst_14 = arith.constant dense<0xFF800000> : vector<4x16xf32>
    %44 = vector.multi_reduction <maximumf>, %43, %cst_14 [2] : vector<4x16x16xf32> to vector<4x16xf32>
    %45 = vector.shape_cast %44 : vector<4x16xf32> to vector<4x16x1xf32>
    %46 = vector.broadcast %45 : vector<4x16x1xf32> to vector<4x16x16xf32>
    %47 = arith.subf %43, %46 : vector<4x16x16xf32>
    %48 = math.exp %47 : vector<4x16x16xf32>
    %cst_15 = arith.constant dense<0.000000e+00> : vector<4x16xf32>
    %49 = vector.multi_reduction <add>, %48, %cst_15 [2] : vector<4x16x16xf32> to vector<4x16xf32>
    %50 = vector.shape_cast %49 : vector<4x16xf32> to vector<4x16x1xf32>
    %51 = tpu.reciprocal %50 {approx = true} : vector<4x16x1xf32> -> vector<4x16x1xf32>
    %52 = vector.broadcast %51 : vector<4x16x1xf32> to vector<4x16x16xf32>
    %53 = arith.mulf %48, %52 : vector<4x16x16xf32>
    %54 = arith.truncf %53 : vector<4x16x16xf32> to vector<4x16x16xbf16>
    "tpu.trace_start"() <{level = 10 : i32, message = "hqk,hkd->hqd"}> : () -> ()
    %cst_16 = arith.constant dense<0.000000e+00> : vector<4x16x32xf32>
    %55 = tpu.matmul %54, %33, %cst_16 {dimension_numbers = #tpu.dot_dimension_numbers<[2], [1], [1], [2], [0, 0, 0, 1, 1, 2], [0], [0]>} : vector<4x16x16xbf16>, vector<4x16x32xbf16>, vector<4x16x32xf32> -> vector<4x16x32xf32>
    "tpu.trace_stop"() : () -> ()
    %56 = tpu.transpose %55, [1, 0, 2] : vector<4x16x32xf32> -> vector<16x4x32xf32>
    %57 = vector.shape_cast %56 : vector<16x4x32xf32> to vector<16x128xf32>
    %58 = arith.truncf %57 : vector<16x128xf32> to vector<16x128xbf16>
    %cst_17 = arith.constant dense<0.000000e+00> : vector<16x128xf32>
    %59 = tpu.matmul %58, %23, %cst_17 {dimension_numbers = #tpu.dot_dimension_numbers<[1], [0], [0], [1], [0, 0, 1, 1], [], []>} : vector<16x128xbf16>, vector<128x128xbf16>, vector<16x128xf32> -> vector<16x128xf32>
    %60 = vector.broadcast %24 : vector<1x128xf32> to vector<16x128xf32>
    %61 = arith.addf %59, %60 : vector<16x128xf32>
    %62 = arith.addf %3, %61 : vector<16x128xf32>
    %63 = vector.extract_strided_slice %5 {offsets = [4, 0], sizes = [1, 128], strides = [1, 1]} : vector<9x128xf32> to vector<1x128xf32>
    %64 = vector.extract_strided_slice %5 {offsets = [5, 0], sizes = [1, 128], strides = [1, 1]} : vector<9x128xf32> to vector<1x128xf32>
    %cst_18 = arith.constant dense<0.000000e+00> : vector<16xf32>
    %65 = vector.multi_reduction <add>, %62, %cst_18 [1] : vector<16x128xf32> to vector<16xf32>
    %66 = vector.shape_cast %65 : vector<16xf32> to vector<16x1xf32>
    %cst_19 = arith.constant 1.280000e+02 : f32
    %67 = vector.broadcast %cst_19 : f32 to vector<16x1xf32>
    %68 = arith.divf %66, %67 : vector<16x1xf32>
    %69 = vector.broadcast %68 : vector<16x1xf32> to vector<16x128xf32>
    %70 = arith.subf %62, %69 : vector<16x128xf32>
    %71 = arith.mulf %70, %70 : vector<16x128xf32>
    %cst_20 = arith.constant dense<0.000000e+00> : vector<16xf32>
    %72 = vector.multi_reduction <add>, %71, %cst_20 [1] : vector<16x128xf32> to vector<16xf32>
    %73 = vector.shape_cast %72 : vector<16xf32> to vector<16x1xf32>
    %cst_21 = arith.constant 1.280000e+02 : f32
    %74 = vector.broadcast %cst_21 : f32 to vector<16x1xf32>
    %75 = arith.divf %73, %74 : vector<16x1xf32>
    %76 = vector.broadcast %68 : vector<16x1xf32> to vector<16x128xf32>
    %77 = arith.subf %62, %76 : vector<16x128xf32>
    %cst_22 = arith.constant 9.99999974E-6 : f32
    %78 = vector.broadcast %cst_22 : f32 to vector<16x1xf32>
    %79 = arith.addf %75, %78 : vector<16x1xf32>
    %80 = math.rsqrt %79 : vector<16x1xf32>
    %81 = vector.broadcast %80 : vector<16x1xf32> to vector<16x128xf32>
    %82 = arith.mulf %77, %81 : vector<16x128xf32>
    %83 = vector.broadcast %63 : vector<1x128xf32> to vector<16x128xf32>
    %84 = arith.mulf %82, %83 : vector<16x128xf32>
    %85 = vector.broadcast %64 : vector<1x128xf32> to vector<16x128xf32>
    %86 = arith.addf %84, %85 : vector<16x128xf32>
    %c0_23 = arith.constant 0 : index
    %c0_24 = arith.constant 0 : index
    %c0_25 = arith.constant 0 : index
    %87 = vector.load %arg6[%c0_23, %c0_24, %c0_25] : memref<1x128x256xbf16, #tpu.memory_space<vmem>>, vector<1x128x256xbf16>
    %88 = vector.shape_cast %87 : vector<1x128x256xbf16> to vector<128x256xbf16>
    %89 = arith.truncf %86 : vector<16x128xf32> to vector<16x128xbf16>
    %cst_26 = arith.constant dense<0.000000e+00> : vector<16x256xf32>
    %90 = tpu.matmul %89, %88, %cst_26 {dimension_numbers = #tpu.dot_dimension_numbers<[1], [0], [0], [1], [0, 0, 1, 1], [], []>} : vector<16x128xbf16>, vector<128x256xbf16>, vector<16x256xf32> -> vector<16x256xf32>
    %c0_27 = arith.constant 0 : index
    %c0_28 = arith.constant 0 : index
    %c0_29 = arith.constant 0 : index
    %91 = vector.load %arg9[%c0_27, %c0_28, %c0_29] : memref<1x1x256xf32, #tpu.memory_space<vmem>>, vector<1x1x256xf32>
    %92 = vector.shape_cast %91 : vector<1x1x256xf32> to vector<1x256xf32>
    %93 = vector.broadcast %92 : vector<1x256xf32> to vector<16x256xf32>
    %94 = arith.addf %90, %93 : vector<16x256xf32>
    %cst_30 = arith.constant 0.000000e+00 : f32
    %95 = vector.broadcast %cst_30 : f32 to vector<16x256xf32>
    %96 = arith.maximumf %94, %95 : vector<16x256xf32>
    %c0_31 = arith.constant 0 : index
    %c0_32 = arith.constant 0 : index
    %c0_33 = arith.constant 0 : index
    %97 = vector.load %arg7[%c0_31, %c0_32, %c0_33] : memref<1x256x128xbf16, #tpu.memory_space<vmem>>, vector<1x256x128xbf16>
    %98 = vector.shape_cast %97 : vector<1x256x128xbf16> to vector<256x128xbf16>
    %99 = arith.truncf %96 : vector<16x256xf32> to vector<16x256xbf16>
    %cst_34 = arith.constant dense<0.000000e+00> : vector<16x128xf32>
    %100 = tpu.matmul %99, %98, %cst_34 {dimension_numbers = #tpu.dot_dimension_numbers<[1], [0], [0], [1], [0, 0, 1, 1], [], []>} : vector<16x256xbf16>, vector<256x128xbf16>, vector<16x128xf32> -> vector<16x128xf32>
    %101 = vector.extract_strided_slice %5 {offsets = [6, 0], sizes = [1, 128], strides = [1, 1]} : vector<9x128xf32> to vector<1x128xf32>
    %102 = vector.broadcast %101 : vector<1x128xf32> to vector<16x128xf32>
    %103 = arith.addf %100, %102 : vector<16x128xf32>
    %104 = arith.addf %86, %103 : vector<16x128xf32>
    %105 = vector.extract_strided_slice %5 {offsets = [7, 0], sizes = [1, 128], strides = [1, 1]} : vector<9x128xf32> to vector<1x128xf32>
    %106 = vector.extract_strided_slice %5 {offsets = [8, 0], sizes = [1, 128], strides = [1, 1]} : vector<9x128xf32> to vector<1x128xf32>
    %cst_35 = arith.constant dense<0.000000e+00> : vector<16xf32>
    %107 = vector.multi_reduction <add>, %104, %cst_35 [1] : vector<16x128xf32> to vector<16xf32>
    %108 = vector.shape_cast %107 : vector<16xf32> to vector<16x1xf32>
    %cst_36 = arith.constant 1.280000e+02 : f32
    %109 = vector.broadcast %cst_36 : f32 to vector<16x1xf32>
    %110 = arith.divf %108, %109 : vector<16x1xf32>
    %111 = vector.broadcast %110 : vector<16x1xf32> to vector<16x128xf32>
    %112 = arith.subf %104, %111 : vector<16x128xf32>
    %113 = arith.mulf %112, %112 : vector<16x128xf32>
    %cst_37 = arith.constant dense<0.000000e+00> : vector<16xf32>
    %114 = vector.multi_reduction <add>, %113, %cst_37 [1] : vector<16x128xf32> to vector<16xf32>
    %115 = vector.shape_cast %114 : vector<16xf32> to vector<16x1xf32>
    %cst_38 = arith.constant 1.280000e+02 : f32
    %116 = vector.broadcast %cst_38 : f32 to vector<16x1xf32>
    %117 = arith.divf %115, %116 : vector<16x1xf32>
    %118 = vector.broadcast %110 : vector<16x1xf32> to vector<16x128xf32>
    %119 = arith.subf %104, %118 : vector<16x128xf32>
    %cst_39 = arith.constant 9.99999974E-6 : f32
    %120 = vector.broadcast %cst_39 : f32 to vector<16x1xf32>
    %121 = arith.addf %117, %120 : vector<16x1xf32>
    %122 = math.rsqrt %121 : vector<16x1xf32>
    %123 = vector.broadcast %122 : vector<16x1xf32> to vector<16x128xf32>
    %124 = arith.mulf %119, %123 : vector<16x128xf32>
    %125 = vector.broadcast %105 : vector<1x128xf32> to vector<16x128xf32>
    %126 = arith.mulf %124, %125 : vector<16x128xf32>
    %127 = vector.broadcast %106 : vector<1x128xf32> to vector<16x128xf32>
    %128 = arith.addf %126, %127 : vector<16x128xf32>
    %c0_40 = arith.constant 0 : index
    %c0_41 = arith.constant 0 : index
    %129 = vector.load %arg12[%c0_40, %c0_41] : memref<16x128xf32, #tpu.memory_space<vmem>>, vector<16x128xf32>
    tpu.vector_store %arg12[%c0_40, %c0_41], %128 {strides = array<i32>} : memref<16x128xf32, #tpu.memory_space<vmem>>, vector<16x128xf32>,
    %c1_i32 = arith.constant 1 : i32
    %130 = arith.cmpi eq, %arg1, %c1_i32 : i32
    %131 = arith.extui %130 : i1 to i32
    %c0_i32_42 = arith.constant 0 : i32
    %132 = arith.cmpi ne, %131, %c0_i32_42 : i32
    scf.if %132 {
      %c0_43 = arith.constant 0 : index
      %c0_44 = arith.constant 0 : index
      %133 = vector.load %arg10[%c0_43, %c0_44] : memref<2x128xf32, #tpu.memory_space<vmem>>, vector<2x128xf32>
      %134 = vector.extract_strided_slice %133 {offsets = [0, 0], sizes = [1, 128], strides = [1, 1]} : vector<2x128xf32> to vector<1x128xf32>
      %135 = vector.extract_strided_slice %133 {offsets = [1, 0], sizes = [1, 128], strides = [1, 1]} : vector<2x128xf32> to vector<1x128xf32>
      %cst_45 = arith.constant dense<0.000000e+00> : vector<16xf32>
      %136 = vector.multi_reduction <add>, %128, %cst_45 [1] : vector<16x128xf32> to vector<16xf32>
      %137 = vector.shape_cast %136 : vector<16xf32> to vector<16x1xf32>
      %cst_46 = arith.constant 1.280000e+02 : f32
      %138 = vector.broadcast %cst_46 : f32 to vector<16x1xf32>
      %139 = arith.divf %137, %138 : vector<16x1xf32>
      %140 = vector.broadcast %139 : vector<16x1xf32> to vector<16x128xf32>
      %141 = arith.subf %128, %140 : vector<16x128xf32>
      %142 = arith.mulf %141, %141 : vector<16x128xf32>
      %cst_47 = arith.constant dense<0.000000e+00> : vector<16xf32>
      %143 = vector.multi_reduction <add>, %142, %cst_47 [1] : vector<16x128xf32> to vector<16xf32>
      %144 = vector.shape_cast %143 : vector<16xf32> to vector<16x1xf32>
      %cst_48 = arith.constant 1.280000e+02 : f32
      %145 = vector.broadcast %cst_48 : f32 to vector<16x1xf32>
      %146 = arith.divf %144, %145 : vector<16x1xf32>
      %147 = vector.broadcast %139 : vector<16x1xf32> to vector<16x128xf32>
      %148 = arith.subf %128, %147 : vector<16x128xf32>
      %cst_49 = arith.constant 9.99999974E-6 : f32
      %149 = vector.broadcast %cst_49 : f32 to vector<16x1xf32>
      %150 = arith.addf %146, %149 : vector<16x1xf32>
      %151 = math.rsqrt %150 : vector<16x1xf32>
      %152 = vector.broadcast %151 : vector<16x1xf32> to vector<16x128xf32>
      %153 = arith.mulf %148, %152 : vector<16x128xf32>
      %154 = vector.broadcast %134 : vector<1x128xf32> to vector<16x128xf32>
      %155 = arith.mulf %153, %154 : vector<16x128xf32>
      %156 = vector.broadcast %135 : vector<1x128xf32> to vector<16x128xf32>
      %157 = arith.addf %155, %156 : vector<16x128xf32>
      %c0_50 = arith.constant 0 : index
      %c0_51 = arith.constant 0 : index
      %c0_52 = arith.constant 0 : index
      %158 = vector.load %arg11[%c0_50, %c0_51, %c0_52] : memref<1x16x128xf32, #tpu.memory_space<vmem>>, vector<1x16x128xf32>
      %159 = vector.shape_cast %158 : vector<1x16x128xf32> to vector<16x128xf32>
      %160 = vector.shape_cast %157 : vector<16x128xf32> to vector<1x16x128xf32>
      tpu.vector_store %arg11[%c0_50, %c0_51, %c0_52], %160 {strides = array<i32>} : memref<1x16x128xf32, #tpu.memory_space<vmem>>, vector<1x16x128xf32>,
    } else {
    }
    return
  }
  func.func @transform_0(%arg0: i32, %arg1: i32) -> (i32, i32, i32) {
    %c0_i32 = arith.constant 0 : i32
    %c0_i32_0 = arith.constant 0 : i32
    %c0_i32_1 = arith.constant 0 : i32
    return %arg0, %c0_i32, %c0_i32_0 : i32, i32, i32
  }
  func.func @transform_1(%arg0: i32, %arg1: i32) -> (i32, i32, i32) {
    %c0_i32 = arith.constant 0 : i32
    %c0_i32_0 = arith.constant 0 : i32
    %c0_i32_1 = arith.constant 0 : i32
    return %arg0, %c0_i32, %c0_i32_0 : i32, i32, i32
  }
  func.func @transform_2(%arg0: i32, %arg1: i32) -> (i32, i32, i32) {
    %c0_i32 = arith.constant 0 : i32
    %c0_i32_0 = arith.constant 0 : i32
    %c0_i32_1 = arith.constant 0 : i32
    return %arg1, %c0_i32, %c0_i32_0 : i32, i32, i32
  }
  func.func @transform_3(%arg0: i32, %arg1: i32) -> (i32, i32, i32) {
    %c0_i32 = arith.constant 0 : i32
    %c0_i32_0 = arith.constant 0 : i32
    %c0_i32_1 = arith.constant 0 : i32
    return %arg1, %c0_i32, %c0_i32_0 : i32, i32, i32
  }
  func.func @transform_4(%arg0: i32, %arg1: i32) -> (i32, i32, i32) {
    %c0_i32 = arith.constant 0 : i32
    %c0_i32_0 = arith.constant 0 : i32
    %c0_i32_1 = arith.constant 0 : i32
    return %arg1, %c0_i32, %c0_i32_0 : i32, i32, i32
  }
  func.func @transform_5(%arg0: i32, %arg1: i32) -> (i32, i32, i32) {
    %c0_i32 = arith.constant 0 : i32
    %c0_i32_0 = arith.constant 0 : i32
    %c0_i32_1 = arith.constant 0 : i32
    return %arg1, %c0_i32, %c0_i32_0 : i32, i32, i32
  }
  func.func @transform_6(%arg0: i32, %arg1: i32) -> (i32, i32, i32) {
    %c0_i32 = arith.constant 0 : i32
    %c0_i32_0 = arith.constant 0 : i32
    %c0_i32_1 = arith.constant 0 : i32
    return %arg1, %c0_i32, %c0_i32_0 : i32, i32, i32
  }
  func.func @transform_7(%arg0: i32, %arg1: i32) -> (i32, i32, i32) {
    %c0_i32 = arith.constant 0 : i32
    %c0_i32_0 = arith.constant 0 : i32
    %c0_i32_1 = arith.constant 0 : i32
    return %arg1, %c0_i32, %c0_i32_0 : i32, i32, i32
  }
  func.func @transform_8(%arg0: i32, %arg1: i32) -> (i32, i32) {
    %c0_i32 = arith.constant 0 : i32
    %c0_i32_0 = arith.constant 0 : i32
    %c0_i32_1 = arith.constant 0 : i32
    return %c0_i32, %c0_i32_0 : i32, i32
  }
  func.func @transform_9(%arg0: i32, %arg1: i32) -> (i32, i32, i32) {
    %c0_i32 = arith.constant 0 : i32
    %c0_i32_0 = arith.constant 0 : i32
    %c0_i32_1 = arith.constant 0 : i32
    return %arg0, %c0_i32, %c0_i32_0 : i32, i32, i32
  }
}

module attributes {stable_mosaic.version = 11 : i64} {
  func.func @_dec_stack_kernel(%arg0: i32, %arg1: i32, %arg2: memref<1x8x128xf32, #tpu.memory_space<vmem>>, %arg3: memref<1x16x128xf32, #tpu.memory_space<vmem>>, %arg4: memref<1x128x384xbf16, #tpu.memory_space<vmem>>, %arg5: memref<1x128x128xbf16, #tpu.memory_space<vmem>>, %arg6: memref<1x128x128xbf16, #tpu.memory_space<vmem>>, %arg7: memref<1x128x256xbf16, #tpu.memory_space<vmem>>, %arg8: memref<1x128x128xbf16, #tpu.memory_space<vmem>>, %arg9: memref<1x128x256xbf16, #tpu.memory_space<vmem>>, %arg10: memref<1x256x128xbf16, #tpu.memory_space<vmem>>, %arg11: memref<1x15x128xf32, #tpu.memory_space<vmem>>, %arg12: memref<1x1x256xf32, #tpu.memory_space<vmem>>, %arg13: memref<2x128xf32, #tpu.memory_space<vmem>>, %arg14: memref<128x128xbf16, #tpu.memory_space<vmem>>, %arg15: memref<1x128xf32, #tpu.memory_space<vmem>>, %arg16: memref<1x8x128xf32, #tpu.memory_space<vmem>>, %arg17: memref<8x128xf32, #tpu.memory_space<vmem>>) attributes {dimension_semantics = [#tpu.dimension_semantics<parallel>, #tpu.dimension_semantics<arbitrary>], iteration_bounds = array<i64: 2, 2>, scalar_prefetch = 0 : i64, scratch_operands = 1 : i64, tpu.core_type = #tpu.core_type<tc>, window_params = [{transform_indices = @transform_0, window_bounds = array<i64: 1, 8, 128>}, {transform_indices = @transform_1, window_bounds = array<i64: 1, 16, 128>}, {transform_indices = @transform_2, window_bounds = array<i64: 1, 128, 384>}, {transform_indices = @transform_3, window_bounds = array<i64: 1, 128, 128>}, {transform_indices = @transform_4, window_bounds = array<i64: 1, 128, 128>}, {transform_indices = @transform_5, window_bounds = array<i64: 1, 128, 256>}, {transform_indices = @transform_6, window_bounds = array<i64: 1, 128, 128>}, {transform_indices = @transform_7, window_bounds = array<i64: 1, 128, 256>}, {transform_indices = @transform_8, window_bounds = array<i64: 1, 256, 128>}, {transform_indices = @transform_9, window_bounds = array<i64: 1, 15, 128>}, {transform_indices = @transform_10, window_bounds = array<i64: 1, 1, 256>}, {pipeline_mode = #tpu.pipeline_mode<synchronous>, transform_indices = @transform_11, window_bounds = array<i64: 2, 128>}, {pipeline_mode = #tpu.pipeline_mode<synchronous>, transform_indices = @transform_12, window_bounds = array<i64: 128, 128>}, {pipeline_mode = #tpu.pipeline_mode<synchronous>, transform_indices = @transform_13, window_bounds = array<i64: 1, 128>}, {transform_indices = @transform_14, window_bounds = array<i64: 1, 8, 128>}]} {
    %c0_i32 = arith.constant 0 : i32
    %0 = arith.cmpi eq, %arg1, %c0_i32 : i32
    %1 = arith.extui %0 : i1 to i32
    %c0_i32_0 = arith.constant 0 : i32
    %2 = arith.cmpi ne, %1, %c0_i32_0 : i32
    scf.if %2 {
      %c0_69 = arith.constant 0 : index
      %c0_70 = arith.constant 0 : index
      %c0_71 = arith.constant 0 : index
      %220 = vector.load %arg2[%c0_69, %c0_70, %c0_71] : memref<1x8x128xf32, #tpu.memory_space<vmem>>, vector<1x8x128xf32>
      %221 = vector.shape_cast %220 : vector<1x8x128xf32> to vector<8x128xf32>
      %c0_72 = arith.constant 0 : index
      %c0_73 = arith.constant 0 : index
      %222 = vector.load %arg17[%c0_72, %c0_73] : memref<8x128xf32, #tpu.memory_space<vmem>>, vector<8x128xf32>
      tpu.vector_store %arg17[%c0_72, %c0_73], %221 {strides = array<i32>} : memref<8x128xf32, #tpu.memory_space<vmem>>, vector<8x128xf32>,
    } else {
    }
    %c0 = arith.constant 0 : index
    %c0_1 = arith.constant 0 : index
    %3 = vector.load %arg17[%c0, %c0_1] : memref<8x128xf32, #tpu.memory_space<vmem>>, vector<8x128xf32>
    %c0_2 = arith.constant 0 : index
    %c0_3 = arith.constant 0 : index
    %c0_4 = arith.constant 0 : index
    %4 = vector.load %arg3[%c0_2, %c0_3, %c0_4] : memref<1x16x128xf32, #tpu.memory_space<vmem>>, vector<1x16x128xf32>
    %5 = vector.shape_cast %4 : vector<1x16x128xf32> to vector<16x128xf32>
    %c0_5 = arith.constant 0 : index
    %c0_6 = arith.constant 0 : index
    %c0_7 = arith.constant 0 : index
    %6 = vector.load %arg11[%c0_5, %c0_6, %c0_7] : memref<1x15x128xf32, #tpu.memory_space<vmem>>, vector<1x15x128xf32>
    %7 = vector.shape_cast %6 : vector<1x15x128xf32> to vector<15x128xf32>
    %c0_8 = arith.constant 0 : index
    %c0_9 = arith.constant 0 : index
    %c0_10 = arith.constant 0 : index
    %8 = vector.load %arg4[%c0_8, %c0_9, %c0_10] : memref<1x128x384xbf16, #tpu.memory_space<vmem>>, vector<1x128x384xbf16>
    %9 = vector.shape_cast %8 : vector<1x128x384xbf16> to vector<128x384xbf16>
    %10 = arith.truncf %3 : vector<8x128xf32> to vector<8x128xbf16>
    %cst = arith.constant dense<0.000000e+00> : vector<8x384xf32>
    %11 = tpu.matmul %10, %9, %cst {dimension_numbers = #tpu.dot_dimension_numbers<[1], [0], [0], [1], [0, 0, 1, 1], [], []>} : vector<8x128xbf16>, vector<128x384xbf16>, vector<8x384xf32> -> vector<8x384xf32>
    %12 = vector.extract_strided_slice %11 {offsets = [0, 0], sizes = [8, 128], strides = [1, 1]} : vector<8x384xf32> to vector<8x128xf32>
    %13 = vector.extract_strided_slice %7 {offsets = [0, 0], sizes = [1, 128], strides = [1, 1]} : vector<15x128xf32> to vector<1x128xf32>
    %14 = vector.broadcast %13 : vector<1x128xf32> to vector<8x128xf32>
    %15 = arith.addf %12, %14 : vector<8x128xf32>
    %16 = vector.extract_strided_slice %11 {offsets = [0, 128], sizes = [8, 128], strides = [1, 1]} : vector<8x384xf32> to vector<8x128xf32>
    %17 = vector.extract_strided_slice %7 {offsets = [1, 0], sizes = [1, 128], strides = [1, 1]} : vector<15x128xf32> to vector<1x128xf32>
    %18 = vector.broadcast %17 : vector<1x128xf32> to vector<8x128xf32>
    %19 = arith.addf %16, %18 : vector<8x128xf32>
    %20 = vector.extract_strided_slice %11 {offsets = [0, 256], sizes = [8, 128], strides = [1, 1]} : vector<8x384xf32> to vector<8x128xf32>
    %21 = vector.extract_strided_slice %7 {offsets = [2, 0], sizes = [1, 128], strides = [1, 1]} : vector<15x128xf32> to vector<1x128xf32>
    %22 = vector.broadcast %21 : vector<1x128xf32> to vector<8x128xf32>
    %23 = arith.addf %20, %22 : vector<8x128xf32>
    %c0_11 = arith.constant 0 : index
    %c0_12 = arith.constant 0 : index
    %c0_13 = arith.constant 0 : index
    %24 = vector.load %arg5[%c0_11, %c0_12, %c0_13] : memref<1x128x128xbf16, #tpu.memory_space<vmem>>, vector<1x128x128xbf16>
    %25 = vector.shape_cast %24 : vector<1x128x128xbf16> to vector<128x128xbf16>
    %26 = vector.extract_strided_slice %7 {offsets = [3, 0], sizes = [1, 128], strides = [1, 1]} : vector<15x128xf32> to vector<1x128xf32>
    %27 = arith.truncf %15 : vector<8x128xf32> to vector<8x128xbf16>
    %28 = vector.shape_cast %27 : vector<8x128xbf16> to vector<8x4x32xbf16>
    %29 = tpu.transpose %28, [1, 0, 2] : vector<8x4x32xbf16> -> vector<4x8x32xbf16>
    %30 = arith.truncf %19 : vector<8x128xf32> to vector<8x128xbf16>
    %31 = vector.shape_cast %30 : vector<8x128xbf16> to vector<8x4x32xbf16>
    %32 = tpu.transpose %31, [1, 0, 2] : vector<8x4x32xbf16> -> vector<4x8x32xbf16>
    %33 = arith.truncf %23 : vector<8x128xf32> to vector<8x128xbf16>
    %34 = vector.shape_cast %33 : vector<8x128xbf16> to vector<8x4x32xbf16>
    %35 = tpu.transpose %34, [1, 0, 2] : vector<8x4x32xbf16> -> vector<4x8x32xbf16>
    "tpu.trace_start"() <{level = 10 : i32, message = "hqd,hkd->hqk"}> : () -> ()
    %cst_14 = arith.constant dense<0.000000e+00> : vector<4x8x8xf32>
    %36 = tpu.matmul %29, %32, %cst_14 {dimension_numbers = #tpu.dot_dimension_numbers<[2], [2], [1], [1], [0, 0, 0, 1, 1, 1], [0], [0]>} : vector<4x8x32xbf16>, vector<4x8x32xbf16>, vector<4x8x8xf32> -> vector<4x8x8xf32>
    "tpu.trace_stop"() : () -> ()
    %cst_15 = arith.constant 0.176776692 : f32
    %37 = vector.broadcast %cst_15 : f32 to vector<4x8x8xf32>
    %38 = arith.mulf %36, %37 : vector<4x8x8xf32>
    %39 = tpu.iota {dimensions = array<i32: 0>} : vector<8x8xi32>
    %40 = tpu.iota {dimensions = array<i32: 1>} : vector<8x8xi32>
    %41 = arith.cmpi sle, %40, %39 : vector<8x8xi32>
    %42 = vector.shape_cast %41 : vector<8x8xi1> to vector<1x8x8xi1>
    %cst_16 = arith.constant -1.000000e+30 : f32
    %43 = vector.shape_cast %42 : vector<1x8x8xi1> to vector<1x8x8xi1>
    %44 = vector.broadcast %43 : vector<1x8x8xi1> to vector<4x8x8xi1>
    %45 = vector.broadcast %cst_16 : f32 to vector<4x8x8xf32>
    %46 = arith.select %44, %38, %45 : vector<4x8x8xi1>, vector<4x8x8xf32>
    %cst_17 = arith.constant dense<0xFF800000> : vector<4x8xf32>
    %47 = vector.multi_reduction <maximumf>, %46, %cst_17 [2] : vector<4x8x8xf32> to vector<4x8xf32>
    %48 = vector.shape_cast %47 : vector<4x8xf32> to vector<4x8x1xf32>
    %49 = vector.broadcast %48 : vector<4x8x1xf32> to vector<4x8x8xf32>
    %50 = arith.subf %46, %49 : vector<4x8x8xf32>
    %51 = math.exp %50 : vector<4x8x8xf32>
    %cst_18 = arith.constant dense<0.000000e+00> : vector<4x8xf32>
    %52 = vector.multi_reduction <add>, %51, %cst_18 [2] : vector<4x8x8xf32> to vector<4x8xf32>
    %53 = vector.shape_cast %52 : vector<4x8xf32> to vector<4x8x1xf32>
    %54 = tpu.reciprocal %53 {approx = true} : vector<4x8x1xf32> -> vector<4x8x1xf32>
    %55 = vector.broadcast %54 : vector<4x8x1xf32> to vector<4x8x8xf32>
    %56 = arith.mulf %51, %55 : vector<4x8x8xf32>
    %57 = arith.truncf %56 : vector<4x8x8xf32> to vector<4x8x8xbf16>
    "tpu.trace_start"() <{level = 10 : i32, message = "hqk,hkd->hqd"}> : () -> ()
    %cst_19 = arith.constant dense<0.000000e+00> : vector<4x8x32xf32>
    %58 = tpu.matmul %57, %35, %cst_19 {dimension_numbers = #tpu.dot_dimension_numbers<[2], [1], [1], [2], [0, 0, 0, 1, 1, 2], [0], [0]>} : vector<4x8x8xbf16>, vector<4x8x32xbf16>, vector<4x8x32xf32> -> vector<4x8x32xf32>
    "tpu.trace_stop"() : () -> ()
    %59 = tpu.transpose %58, [1, 0, 2] : vector<4x8x32xf32> -> vector<8x4x32xf32>
    %60 = vector.shape_cast %59 : vector<8x4x32xf32> to vector<8x128xf32>
    %61 = arith.truncf %60 : vector<8x128xf32> to vector<8x128xbf16>
    %cst_20 = arith.constant dense<0.000000e+00> : vector<8x128xf32>
    %62 = tpu.matmul %61, %25, %cst_20 {dimension_numbers = #tpu.dot_dimension_numbers<[1], [0], [0], [1], [0, 0, 1, 1], [], []>} : vector<8x128xbf16>, vector<128x128xbf16>, vector<8x128xf32> -> vector<8x128xf32>
    %63 = vector.broadcast %26 : vector<1x128xf32> to vector<8x128xf32>
    %64 = arith.addf %62, %63 : vector<8x128xf32>
    %65 = arith.addf %3, %64 : vector<8x128xf32>
    %66 = vector.extract_strided_slice %7 {offsets = [4, 0], sizes = [1, 128], strides = [1, 1]} : vector<15x128xf32> to vector<1x128xf32>
    %67 = vector.extract_strided_slice %7 {offsets = [5, 0], sizes = [1, 128], strides = [1, 1]} : vector<15x128xf32> to vector<1x128xf32>
    %cst_21 = arith.constant dense<0.000000e+00> : vector<8xf32>
    %68 = vector.multi_reduction <add>, %65, %cst_21 [1] : vector<8x128xf32> to vector<8xf32>
    %69 = vector.shape_cast %68 : vector<8xf32> to vector<8x1xf32>
    %cst_22 = arith.constant 1.280000e+02 : f32
    %70 = vector.broadcast %cst_22 : f32 to vector<8x1xf32>
    %71 = arith.divf %69, %70 : vector<8x1xf32>
    %72 = vector.broadcast %71 : vector<8x1xf32> to vector<8x128xf32>
    %73 = arith.subf %65, %72 : vector<8x128xf32>
    %74 = arith.mulf %73, %73 : vector<8x128xf32>
    %cst_23 = arith.constant dense<0.000000e+00> : vector<8xf32>
    %75 = vector.multi_reduction <add>, %74, %cst_23 [1] : vector<8x128xf32> to vector<8xf32>
    %76 = vector.shape_cast %75 : vector<8xf32> to vector<8x1xf32>
    %cst_24 = arith.constant 1.280000e+02 : f32
    %77 = vector.broadcast %cst_24 : f32 to vector<8x1xf32>
    %78 = arith.divf %76, %77 : vector<8x1xf32>
    %79 = vector.broadcast %71 : vector<8x1xf32> to vector<8x128xf32>
    %80 = arith.subf %65, %79 : vector<8x128xf32>
    %cst_25 = arith.constant 9.99999974E-6 : f32
    %81 = vector.broadcast %cst_25 : f32 to vector<8x1xf32>
    %82 = arith.addf %78, %81 : vector<8x1xf32>
    %83 = math.rsqrt %82 : vector<8x1xf32>
    %84 = vector.broadcast %83 : vector<8x1xf32> to vector<8x128xf32>
    %85 = arith.mulf %80, %84 : vector<8x128xf32>
    %86 = vector.broadcast %66 : vector<1x128xf32> to vector<8x128xf32>
    %87 = arith.mulf %85, %86 : vector<8x128xf32>
    %88 = vector.broadcast %67 : vector<1x128xf32> to vector<8x128xf32>
    %89 = arith.addf %87, %88 : vector<8x128xf32>
    %c0_26 = arith.constant 0 : index
    %c0_27 = arith.constant 0 : index
    %c0_28 = arith.constant 0 : index
    %90 = vector.load %arg6[%c0_26, %c0_27, %c0_28] : memref<1x128x128xbf16, #tpu.memory_space<vmem>>, vector<1x128x128xbf16>
    %91 = vector.shape_cast %90 : vector<1x128x128xbf16> to vector<128x128xbf16>
    %92 = arith.truncf %89 : vector<8x128xf32> to vector<8x128xbf16>
    %cst_29 = arith.constant dense<0.000000e+00> : vector<8x128xf32>
    %93 = tpu.matmul %92, %91, %cst_29 {dimension_numbers = #tpu.dot_dimension_numbers<[1], [0], [0], [1], [0, 0, 1, 1], [], []>} : vector<8x128xbf16>, vector<128x128xbf16>, vector<8x128xf32> -> vector<8x128xf32>
    %94 = vector.extract_strided_slice %7 {offsets = [6, 0], sizes = [1, 128], strides = [1, 1]} : vector<15x128xf32> to vector<1x128xf32>
    %95 = vector.broadcast %94 : vector<1x128xf32> to vector<8x128xf32>
    %96 = arith.addf %93, %95 : vector<8x128xf32>
    %c0_30 = arith.constant 0 : index
    %c0_31 = arith.constant 0 : index
    %c0_32 = arith.constant 0 : index
    %97 = vector.load %arg7[%c0_30, %c0_31, %c0_32] : memref<1x128x256xbf16, #tpu.memory_space<vmem>>, vector<1x128x256xbf16>
    %98 = vector.shape_cast %97 : vector<1x128x256xbf16> to vector<128x256xbf16>
    %99 = arith.truncf %5 : vector<16x128xf32> to vector<16x128xbf16>
    %cst_33 = arith.constant dense<0.000000e+00> : vector<16x256xf32>
    %100 = tpu.matmul %99, %98, %cst_33 {dimension_numbers = #tpu.dot_dimension_numbers<[1], [0], [0], [1], [0, 0, 1, 1], [], []>} : vector<16x128xbf16>, vector<128x256xbf16>, vector<16x256xf32> -> vector<16x256xf32>
    %101 = vector.extract_strided_slice %100 {offsets = [0, 0], sizes = [16, 128], strides = [1, 1]} : vector<16x256xf32> to vector<16x128xf32>
    %102 = vector.extract_strided_slice %7 {offsets = [7, 0], sizes = [1, 128], strides = [1, 1]} : vector<15x128xf32> to vector<1x128xf32>
    %103 = vector.broadcast %102 : vector<1x128xf32> to vector<16x128xf32>
    %104 = arith.addf %101, %103 : vector<16x128xf32>
    %105 = vector.extract_strided_slice %100 {offsets = [0, 128], sizes = [16, 128], strides = [1, 1]} : vector<16x256xf32> to vector<16x128xf32>
    %106 = vector.extract_strided_slice %7 {offsets = [8, 0], sizes = [1, 128], strides = [1, 1]} : vector<15x128xf32> to vector<1x128xf32>
    %107 = vector.broadcast %106 : vector<1x128xf32> to vector<16x128xf32>
    %108 = arith.addf %105, %107 : vector<16x128xf32>
    %c0_34 = arith.constant 0 : index
    %c0_35 = arith.constant 0 : index
    %c0_36 = arith.constant 0 : index
    %109 = vector.load %arg8[%c0_34, %c0_35, %c0_36] : memref<1x128x128xbf16, #tpu.memory_space<vmem>>, vector<1x128x128xbf16>
    %110 = vector.shape_cast %109 : vector<1x128x128xbf16> to vector<128x128xbf16>
    %111 = vector.extract_strided_slice %7 {offsets = [9, 0], sizes = [1, 128], strides = [1, 1]} : vector<15x128xf32> to vector<1x128xf32>
    %112 = arith.truncf %96 : vector<8x128xf32> to vector<8x128xbf16>
    %113 = vector.shape_cast %112 : vector<8x128xbf16> to vector<8x4x32xbf16>
    %114 = tpu.transpose %113, [1, 0, 2] : vector<8x4x32xbf16> -> vector<4x8x32xbf16>
    %115 = arith.truncf %104 : vector<16x128xf32> to vector<16x128xbf16>
    %116 = vector.shape_cast %115 : vector<16x128xbf16> to vector<16x4x32xbf16>
    %117 = tpu.transpose %116, [1, 0, 2] : vector<16x4x32xbf16> -> vector<4x16x32xbf16>
    %118 = arith.truncf %108 : vector<16x128xf32> to vector<16x128xbf16>
    %119 = vector.shape_cast %118 : vector<16x128xbf16> to vector<16x4x32xbf16>
    %120 = tpu.transpose %119, [1, 0, 2] : vector<16x4x32xbf16> -> vector<4x16x32xbf16>
    "tpu.trace_start"() <{level = 10 : i32, message = "hqd,hkd->hqk"}> : () -> ()
    %cst_37 = arith.constant dense<0.000000e+00> : vector<4x8x16xf32>
    %121 = tpu.matmul %114, %117, %cst_37 {dimension_numbers = #tpu.dot_dimension_numbers<[2], [2], [1], [1], [0, 0, 0, 1, 1, 1], [0], [0]>} : vector<4x8x32xbf16>, vector<4x16x32xbf16>, vector<4x8x16xf32> -> vector<4x8x16xf32>
    "tpu.trace_stop"() : () -> ()
    %cst_38 = arith.constant 0.176776692 : f32
    %122 = vector.broadcast %cst_38 : f32 to vector<4x8x16xf32>
    %123 = arith.mulf %121, %122 : vector<4x8x16xf32>
    %124 = tpu.iota {dimensions = array<i32: 2>} : vector<1x8x16xi32>
    %c9_i32 = arith.constant 9 : i32
    %125 = vector.broadcast %c9_i32 : i32 to vector<1x8x16xi32>
    %126 = arith.cmpi slt, %124, %125 : vector<1x8x16xi32>
    %cst_39 = arith.constant -1.000000e+30 : f32
    %127 = vector.shape_cast %126 : vector<1x8x16xi1> to vector<1x8x16xi1>
    %128 = vector.broadcast %127 : vector<1x8x16xi1> to vector<4x8x16xi1>
    %129 = vector.broadcast %cst_39 : f32 to vector<4x8x16xf32>
    %130 = arith.select %128, %123, %129 : vector<4x8x16xi1>, vector<4x8x16xf32>
    %cst_40 = arith.constant dense<0xFF800000> : vector<4x8xf32>
    %131 = vector.multi_reduction <maximumf>, %130, %cst_40 [2] : vector<4x8x16xf32> to vector<4x8xf32>
    %132 = vector.shape_cast %131 : vector<4x8xf32> to vector<4x8x1xf32>
    %133 = vector.broadcast %132 : vector<4x8x1xf32> to vector<4x8x16xf32>
    %134 = arith.subf %130, %133 : vector<4x8x16xf32>
    %135 = math.exp %134 : vector<4x8x16xf32>
    %cst_41 = arith.constant dense<0.000000e+00> : vector<4x8xf32>
    %136 = vector.multi_reduction <add>, %135, %cst_41 [2] : vector<4x8x16xf32> to vector<4x8xf32>
    %137 = vector.shape_cast %136 : vector<4x8xf32> to vector<4x8x1xf32>
    %138 = tpu.reciprocal %137 {approx = true} : vector<4x8x1xf32> -> vector<4x8x1xf32>
    %139 = vector.broadcast %138 : vector<4x8x1xf32> to vector<4x8x16xf32>
    %140 = arith.mulf %135, %139 : vector<4x8x16xf32>
    %141 = arith.truncf %140 : vector<4x8x16xf32> to vector<4x8x16xbf16>
    "tpu.trace_start"() <{level = 10 : i32, message = "hqk,hkd->hqd"}> : () -> ()
    %cst_42 = arith.constant dense<0.000000e+00> : vector<4x8x32xf32>
    %142 = tpu.matmul %141, %120, %cst_42 {dimension_numbers = #tpu.dot_dimension_numbers<[2], [1], [1], [2], [0, 0, 0, 1, 1, 2], [0], [0]>} : vector<4x8x16xbf16>, vector<4x16x32xbf16>, vector<4x8x32xf32> -> vector<4x8x32xf32>
    "tpu.trace_stop"() : () -> ()
    %143 = tpu.transpose %142, [1, 0, 2] : vector<4x8x32xf32> -> vector<8x4x32xf32>
    %144 = vector.shape_cast %143 : vector<8x4x32xf32> to vector<8x128xf32>
    %145 = arith.truncf %144 : vector<8x128xf32> to vector<8x128xbf16>
    %cst_43 = arith.constant dense<0.000000e+00> : vector<8x128xf32>
    %146 = tpu.matmul %145, %110, %cst_43 {dimension_numbers = #tpu.dot_dimension_numbers<[1], [0], [0], [1], [0, 0, 1, 1], [], []>} : vector<8x128xbf16>, vector<128x128xbf16>, vector<8x128xf32> -> vector<8x128xf32>
    %147 = vector.broadcast %111 : vector<1x128xf32> to vector<8x128xf32>
    %148 = arith.addf %146, %147 : vector<8x128xf32>
    %149 = arith.addf %89, %148 : vector<8x128xf32>
    %150 = vector.extract_strided_slice %7 {offsets = [10, 0], sizes = [1, 128], strides = [1, 1]} : vector<15x128xf32> to vector<1x128xf32>
    %151 = vector.extract_strided_slice %7 {offsets = [11, 0], sizes = [1, 128], strides = [1, 1]} : vector<15x128xf32> to vector<1x128xf32>
    %cst_44 = arith.constant dense<0.000000e+00> : vector<8xf32>
    %152 = vector.multi_reduction <add>, %149, %cst_44 [1] : vector<8x128xf32> to vector<8xf32>
    %153 = vector.shape_cast %152 : vector<8xf32> to vector<8x1xf32>
    %cst_45 = arith.constant 1.280000e+02 : f32
    %154 = vector.broadcast %cst_45 : f32 to vector<8x1xf32>
    %155 = arith.divf %153, %154 : vector<8x1xf32>
    %156 = vector.broadcast %155 : vector<8x1xf32> to vector<8x128xf32>
    %157 = arith.subf %149, %156 : vector<8x128xf32>
    %158 = arith.mulf %157, %157 : vector<8x128xf32>
    %cst_46 = arith.constant dense<0.000000e+00> : vector<8xf32>
    %159 = vector.multi_reduction <add>, %158, %cst_46 [1] : vector<8x128xf32> to vector<8xf32>
    %160 = vector.shape_cast %159 : vector<8xf32> to vector<8x1xf32>
    %cst_47 = arith.constant 1.280000e+02 : f32
    %161 = vector.broadcast %cst_47 : f32 to vector<8x1xf32>
    %162 = arith.divf %160, %161 : vector<8x1xf32>
    %163 = vector.broadcast %155 : vector<8x1xf32> to vector<8x128xf32>
    %164 = arith.subf %149, %163 : vector<8x128xf32>
    %cst_48 = arith.constant 9.99999974E-6 : f32
    %165 = vector.broadcast %cst_48 : f32 to vector<8x1xf32>
    %166 = arith.addf %162, %165 : vector<8x1xf32>
    %167 = math.rsqrt %166 : vector<8x1xf32>
    %168 = vector.broadcast %167 : vector<8x1xf32> to vector<8x128xf32>
    %169 = arith.mulf %164, %168 : vector<8x128xf32>
    %170 = vector.broadcast %150 : vector<1x128xf32> to vector<8x128xf32>
    %171 = arith.mulf %169, %170 : vector<8x128xf32>
    %172 = vector.broadcast %151 : vector<1x128xf32> to vector<8x128xf32>
    %173 = arith.addf %171, %172 : vector<8x128xf32>
    %c0_49 = arith.constant 0 : index
    %c0_50 = arith.constant 0 : index
    %c0_51 = arith.constant 0 : index
    %174 = vector.load %arg9[%c0_49, %c0_50, %c0_51] : memref<1x128x256xbf16, #tpu.memory_space<vmem>>, vector<1x128x256xbf16>
    %175 = vector.shape_cast %174 : vector<1x128x256xbf16> to vector<128x256xbf16>
    %176 = arith.truncf %173 : vector<8x128xf32> to vector<8x128xbf16>
    %cst_52 = arith.constant dense<0.000000e+00> : vector<8x256xf32>
    %177 = tpu.matmul %176, %175, %cst_52 {dimension_numbers = #tpu.dot_dimension_numbers<[1], [0], [0], [1], [0, 0, 1, 1], [], []>} : vector<8x128xbf16>, vector<128x256xbf16>, vector<8x256xf32> -> vector<8x256xf32>
    %c0_53 = arith.constant 0 : index
    %c0_54 = arith.constant 0 : index
    %c0_55 = arith.constant 0 : index
    %178 = vector.load %arg12[%c0_53, %c0_54, %c0_55] : memref<1x1x256xf32, #tpu.memory_space<vmem>>, vector<1x1x256xf32>
    %179 = vector.shape_cast %178 : vector<1x1x256xf32> to vector<1x256xf32>
    %180 = vector.broadcast %179 : vector<1x256xf32> to vector<8x256xf32>
    %181 = arith.addf %177, %180 : vector<8x256xf32>
    %cst_56 = arith.constant 0.000000e+00 : f32
    %182 = vector.broadcast %cst_56 : f32 to vector<8x256xf32>
    %183 = arith.maximumf %181, %182 : vector<8x256xf32>
    %c0_57 = arith.constant 0 : index
    %c0_58 = arith.constant 0 : index
    %c0_59 = arith.constant 0 : index
    %184 = vector.load %arg10[%c0_57, %c0_58, %c0_59] : memref<1x256x128xbf16, #tpu.memory_space<vmem>>, vector<1x256x128xbf16>
    %185 = vector.shape_cast %184 : vector<1x256x128xbf16> to vector<256x128xbf16>
    %186 = arith.truncf %183 : vector<8x256xf32> to vector<8x256xbf16>
    %cst_60 = arith.constant dense<0.000000e+00> : vector<8x128xf32>
    %187 = tpu.matmul %186, %185, %cst_60 {dimension_numbers = #tpu.dot_dimension_numbers<[1], [0], [0], [1], [0, 0, 1, 1], [], []>} : vector<8x256xbf16>, vector<256x128xbf16>, vector<8x128xf32> -> vector<8x128xf32>
    %188 = vector.extract_strided_slice %7 {offsets = [12, 0], sizes = [1, 128], strides = [1, 1]} : vector<15x128xf32> to vector<1x128xf32>
    %189 = vector.broadcast %188 : vector<1x128xf32> to vector<8x128xf32>
    %190 = arith.addf %187, %189 : vector<8x128xf32>
    %191 = arith.addf %173, %190 : vector<8x128xf32>
    %192 = vector.extract_strided_slice %7 {offsets = [13, 0], sizes = [1, 128], strides = [1, 1]} : vector<15x128xf32> to vector<1x128xf32>
    %193 = vector.extract_strided_slice %7 {offsets = [14, 0], sizes = [1, 128], strides = [1, 1]} : vector<15x128xf32> to vector<1x128xf32>
    %cst_61 = arith.constant dense<0.000000e+00> : vector<8xf32>
    %194 = vector.multi_reduction <add>, %191, %cst_61 [1] : vector<8x128xf32> to vector<8xf32>
    %195 = vector.shape_cast %194 : vector<8xf32> to vector<8x1xf32>
    %cst_62 = arith.constant 1.280000e+02 : f32
    %196 = vector.broadcast %cst_62 : f32 to vector<8x1xf32>
    %197 = arith.divf %195, %196 : vector<8x1xf32>
    %198 = vector.broadcast %197 : vector<8x1xf32> to vector<8x128xf32>
    %199 = arith.subf %191, %198 : vector<8x128xf32>
    %200 = arith.mulf %199, %199 : vector<8x128xf32>
    %cst_63 = arith.constant dense<0.000000e+00> : vector<8xf32>
    %201 = vector.multi_reduction <add>, %200, %cst_63 [1] : vector<8x128xf32> to vector<8xf32>
    %202 = vector.shape_cast %201 : vector<8xf32> to vector<8x1xf32>
    %cst_64 = arith.constant 1.280000e+02 : f32
    %203 = vector.broadcast %cst_64 : f32 to vector<8x1xf32>
    %204 = arith.divf %202, %203 : vector<8x1xf32>
    %205 = vector.broadcast %197 : vector<8x1xf32> to vector<8x128xf32>
    %206 = arith.subf %191, %205 : vector<8x128xf32>
    %cst_65 = arith.constant 9.99999974E-6 : f32
    %207 = vector.broadcast %cst_65 : f32 to vector<8x1xf32>
    %208 = arith.addf %204, %207 : vector<8x1xf32>
    %209 = math.rsqrt %208 : vector<8x1xf32>
    %210 = vector.broadcast %209 : vector<8x1xf32> to vector<8x128xf32>
    %211 = arith.mulf %206, %210 : vector<8x128xf32>
    %212 = vector.broadcast %192 : vector<1x128xf32> to vector<8x128xf32>
    %213 = arith.mulf %211, %212 : vector<8x128xf32>
    %214 = vector.broadcast %193 : vector<1x128xf32> to vector<8x128xf32>
    %215 = arith.addf %213, %214 : vector<8x128xf32>
    %c0_66 = arith.constant 0 : index
    %c0_67 = arith.constant 0 : index
    %216 = vector.load %arg17[%c0_66, %c0_67] : memref<8x128xf32, #tpu.memory_space<vmem>>, vector<8x128xf32>
    tpu.vector_store %arg17[%c0_66, %c0_67], %215 {strides = array<i32>} : memref<8x128xf32, #tpu.memory_space<vmem>>, vector<8x128xf32>,
    %c1_i32 = arith.constant 1 : i32
    %217 = arith.cmpi eq, %arg1, %c1_i32 : i32
    %218 = arith.extui %217 : i1 to i32
    %c0_i32_68 = arith.constant 0 : i32
    %219 = arith.cmpi ne, %218, %c0_i32_68 : i32
    scf.if %219 {
      %c0_69 = arith.constant 0 : index
      %c0_70 = arith.constant 0 : index
      %220 = vector.load %arg13[%c0_69, %c0_70] : memref<2x128xf32, #tpu.memory_space<vmem>>, vector<2x128xf32>
      %221 = vector.extract_strided_slice %220 {offsets = [0, 0], sizes = [1, 128], strides = [1, 1]} : vector<2x128xf32> to vector<1x128xf32>
      %222 = vector.extract_strided_slice %220 {offsets = [1, 0], sizes = [1, 128], strides = [1, 1]} : vector<2x128xf32> to vector<1x128xf32>
      %cst_71 = arith.constant dense<0.000000e+00> : vector<8xf32>
      %223 = vector.multi_reduction <add>, %215, %cst_71 [1] : vector<8x128xf32> to vector<8xf32>
      %224 = vector.shape_cast %223 : vector<8xf32> to vector<8x1xf32>
      %cst_72 = arith.constant 1.280000e+02 : f32
      %225 = vector.broadcast %cst_72 : f32 to vector<8x1xf32>
      %226 = arith.divf %224, %225 : vector<8x1xf32>
      %227 = vector.broadcast %226 : vector<8x1xf32> to vector<8x128xf32>
      %228 = arith.subf %215, %227 : vector<8x128xf32>
      %229 = arith.mulf %228, %228 : vector<8x128xf32>
      %cst_73 = arith.constant dense<0.000000e+00> : vector<8xf32>
      %230 = vector.multi_reduction <add>, %229, %cst_73 [1] : vector<8x128xf32> to vector<8xf32>
      %231 = vector.shape_cast %230 : vector<8xf32> to vector<8x1xf32>
      %cst_74 = arith.constant 1.280000e+02 : f32
      %232 = vector.broadcast %cst_74 : f32 to vector<8x1xf32>
      %233 = arith.divf %231, %232 : vector<8x1xf32>
      %234 = vector.broadcast %226 : vector<8x1xf32> to vector<8x128xf32>
      %235 = arith.subf %215, %234 : vector<8x128xf32>
      %cst_75 = arith.constant 9.99999974E-6 : f32
      %236 = vector.broadcast %cst_75 : f32 to vector<8x1xf32>
      %237 = arith.addf %233, %236 : vector<8x1xf32>
      %238 = math.rsqrt %237 : vector<8x1xf32>
      %239 = vector.broadcast %238 : vector<8x1xf32> to vector<8x128xf32>
      %240 = arith.mulf %235, %239 : vector<8x128xf32>
      %241 = vector.broadcast %221 : vector<1x128xf32> to vector<8x128xf32>
      %242 = arith.mulf %240, %241 : vector<8x128xf32>
      %243 = vector.broadcast %222 : vector<1x128xf32> to vector<8x128xf32>
      %244 = arith.addf %242, %243 : vector<8x128xf32>
      %c0_76 = arith.constant 0 : index
      %c0_77 = arith.constant 0 : index
      %245 = vector.load %arg14[%c0_76, %c0_77] : memref<128x128xbf16, #tpu.memory_space<vmem>>, vector<128x128xbf16>
      %246 = arith.truncf %244 : vector<8x128xf32> to vector<8x128xbf16>
      %cst_78 = arith.constant dense<0.000000e+00> : vector<8x128xf32>
      %247 = tpu.matmul %246, %245, %cst_78 {dimension_numbers = #tpu.dot_dimension_numbers<[1], [0], [0], [1], [0, 0, 1, 1], [], []>} : vector<8x128xbf16>, vector<128x128xbf16>, vector<8x128xf32> -> vector<8x128xf32>
      %c0_79 = arith.constant 0 : index
      %c0_80 = arith.constant 0 : index
      %248 = vector.load %arg15[%c0_79, %c0_80] : memref<1x128xf32, #tpu.memory_space<vmem>>, vector<1x128xf32>
      %249 = vector.broadcast %248 : vector<1x128xf32> to vector<8x128xf32>
      %250 = arith.addf %247, %249 : vector<8x128xf32>
      %c0_81 = arith.constant 0 : index
      %c0_82 = arith.constant 0 : index
      %c0_83 = arith.constant 0 : index
      %251 = vector.load %arg16[%c0_81, %c0_82, %c0_83] : memref<1x8x128xf32, #tpu.memory_space<vmem>>, vector<1x8x128xf32>
      %252 = vector.shape_cast %251 : vector<1x8x128xf32> to vector<8x128xf32>
      %253 = vector.shape_cast %250 : vector<8x128xf32> to vector<1x8x128xf32>
      tpu.vector_store %arg16[%c0_81, %c0_82, %c0_83], %253 {strides = array<i32>} : memref<1x8x128xf32, #tpu.memory_space<vmem>>, vector<1x8x128xf32>,
    } else {
    }
    return
  }
  func.func @transform_0(%arg0: i32, %arg1: i32) -> (i32, i32, i32) {
    %c0_i32 = arith.constant 0 : i32
    %c0_i32_0 = arith.constant 0 : i32
    %c0_i32_1 = arith.constant 0 : i32
    return %arg0, %c0_i32, %c0_i32_0 : i32, i32, i32
  }
  func.func @transform_1(%arg0: i32, %arg1: i32) -> (i32, i32, i32) {
    %c0_i32 = arith.constant 0 : i32
    %c0_i32_0 = arith.constant 0 : i32
    %c0_i32_1 = arith.constant 0 : i32
    return %arg0, %c0_i32, %c0_i32_0 : i32, i32, i32
  }
  func.func @transform_2(%arg0: i32, %arg1: i32) -> (i32, i32, i32) {
    %c0_i32 = arith.constant 0 : i32
    %c0_i32_0 = arith.constant 0 : i32
    %c0_i32_1 = arith.constant 0 : i32
    return %arg1, %c0_i32, %c0_i32_0 : i32, i32, i32
  }
  func.func @transform_3(%arg0: i32, %arg1: i32) -> (i32, i32, i32) {
    %c0_i32 = arith.constant 0 : i32
    %c0_i32_0 = arith.constant 0 : i32
    %c0_i32_1 = arith.constant 0 : i32
    return %arg1, %c0_i32, %c0_i32_0 : i32, i32, i32
  }
  func.func @transform_4(%arg0: i32, %arg1: i32) -> (i32, i32, i32) {
    %c0_i32 = arith.constant 0 : i32
    %c0_i32_0 = arith.constant 0 : i32
    %c0_i32_1 = arith.constant 0 : i32
    return %arg1, %c0_i32, %c0_i32_0 : i32, i32, i32
  }
  func.func @transform_5(%arg0: i32, %arg1: i32) -> (i32, i32, i32) {
    %c0_i32 = arith.constant 0 : i32
    %c0_i32_0 = arith.constant 0 : i32
    %c0_i32_1 = arith.constant 0 : i32
    return %arg1, %c0_i32, %c0_i32_0 : i32, i32, i32
  }
  func.func @transform_6(%arg0: i32, %arg1: i32) -> (i32, i32, i32) {
    %c0_i32 = arith.constant 0 : i32
    %c0_i32_0 = arith.constant 0 : i32
    %c0_i32_1 = arith.constant 0 : i32
    return %arg1, %c0_i32, %c0_i32_0 : i32, i32, i32
  }
  func.func @transform_7(%arg0: i32, %arg1: i32) -> (i32, i32, i32) {
    %c0_i32 = arith.constant 0 : i32
    %c0_i32_0 = arith.constant 0 : i32
    %c0_i32_1 = arith.constant 0 : i32
    return %arg1, %c0_i32, %c0_i32_0 : i32, i32, i32
  }
  func.func @transform_8(%arg0: i32, %arg1: i32) -> (i32, i32, i32) {
    %c0_i32 = arith.constant 0 : i32
    %c0_i32_0 = arith.constant 0 : i32
    %c0_i32_1 = arith.constant 0 : i32
    return %arg1, %c0_i32, %c0_i32_0 : i32, i32, i32
  }
  func.func @transform_9(%arg0: i32, %arg1: i32) -> (i32, i32, i32) {
    %c0_i32 = arith.constant 0 : i32
    %c0_i32_0 = arith.constant 0 : i32
    %c0_i32_1 = arith.constant 0 : i32
    return %arg1, %c0_i32, %c0_i32_0 : i32, i32, i32
  }
  func.func @transform_10(%arg0: i32, %arg1: i32) -> (i32, i32, i32) {
    %c0_i32 = arith.constant 0 : i32
    %c0_i32_0 = arith.constant 0 : i32
    %c0_i32_1 = arith.constant 0 : i32
    return %arg1, %c0_i32, %c0_i32_0 : i32, i32, i32
  }
  func.func @transform_11(%arg0: i32, %arg1: i32) -> (i32, i32) {
    %c0_i32 = arith.constant 0 : i32
    %c0_i32_0 = arith.constant 0 : i32
    %c0_i32_1 = arith.constant 0 : i32
    return %c0_i32, %c0_i32_0 : i32, i32
  }
  func.func @transform_12(%arg0: i32, %arg1: i32) -> (i32, i32) {
    %c0_i32 = arith.constant 0 : i32
    %c0_i32_0 = arith.constant 0 : i32
    %c0_i32_1 = arith.constant 0 : i32
    return %c0_i32, %c0_i32_0 : i32, i32
  }
  func.func @transform_13(%arg0: i32, %arg1: i32) -> (i32, i32) {
    %c0_i32 = arith.constant 0 : i32
    %c0_i32_0 = arith.constant 0 : i32
    %c0_i32_1 = arith.constant 0 : i32
    return %c0_i32, %c0_i32_0 : i32, i32
  }
  func.func @transform_14(%arg0: i32, %arg1: i32) -> (i32, i32, i32) {
    %c0_i32 = arith.constant 0 : i32
    %c0_i32_0 = arith.constant 0 : i32
    %c0_i32_1 = arith.constant 0 : i32
    return %arg0, %c0_i32, %c0_i32_0 : i32, i32, i32
  }
}

</mosaic_0001>

<bundles_post_ra>
// kernel: forward.5
= control target key start
LH: loop header
LB: loop body
LE: loop exit
PB: predicated region body
PF: predicated region fallthrough
CT: control target
= control target key end

     0   :  { %s438_s21 = smov 0   ;;  %s477_s0 = inlined_call_operand.vmem [shape: f32[2,8,2], index: 0, kind: input, shape index: {}]   ;;  %s478_s1 = inlined_call_operand.vmem [shape: bf16[2,128], index: 1, kind: input, shape index: {}]   ;;  %s479_s2 = inlined_call_operand.vmem [shape: f32[1,128], index: 2, kind: input, shape index: {}]   ;;  %s480_s3 = inlined_call_operand.vmem [shape: f32[1,128], index: 3, kind: input, shape index: {}]   ;;  %s481_s4 = inlined_call_operand.vmem [shape: f32[1,128], index: 4, kind: input, shape index: {}]   ;;  %s482_s5 = inlined_call_operand.vmem [shape: f32[8,128], index: 5, kind: input, shape index: {}]   ;;  %s483_s6 = inlined_call_operand.vmem [shape: f32[2,8,128], index: 6, kind: output, shape index: {}]  }
   0x1 LB: > { %s363_s22 = sadd.s32 4294967295, %s398_s21   ;;  %p367_p0 = scmp.ge.s32.totalorder %s398_s21, 1  ;;  %s398_s21 = sphi %s438_s21, %s16_s21  }
   0x2   : > { %p211_p1 = scmp.lt.s32.totalorder %s398_s21, 3 }
   0x4   : > { %p212_p2 = pnand %p367_p0, %p211_p1 }
   0x5   : > { %p239_p3 = scmp.lt.s32.totalorder (!%p212_p2), %s363_s22, 1 }
   0x6   : > { %215 = sbr.rel (%p212_p2) target bundleno = 414 (0x19e), region = 44 }
   0xb   : > { %v400_v0 = vmov 0   ;;  %s485_s22 = smov (!%p239_p3, %s363_s22), 1  ;;  %v401_v2 = vmov 1   ;;  %v248_v3 = vld [vmem:[%s478_s1] sm:$0x1]  ;;  %v402_v14 = vmov 128.0  }
   0xc   : > { %383 = vset.pattern.permute.xlu0 %v400_v0  ;;  %s368_s23 = sshll.u32 %s485_s22, 3  ;;  %v249_v5 = vunpack.c.l.bf16 %v248_v3  ;;  %v385_v11 = vld [vmem:[%s479_s2] ss:$0 sm:$0xff]  ;;  %388 = vrcp.f32 %v402_v14 }
   0xd   : > { %s242_s26 = scalar_lea.vmem %s477_s0, %s368_s23  ;;  %v386_v34 = vld [vmem:[%s480_s3] ss:$0 sm:$0xff]  ;;  %s246_s15 = scalar_lea.vmem %s483_s6, %s368_s23 }
   0xe   : > { %v247_v1 = vld [vmem:[%s242_s26] sm:$0xff]  ;;  %v255_v6 = vperm.slane %v249_v5, 0  ;;  %v262_v7 = vperm.slane %v249_v5, 1 }
   0xf   : > { %252 = vperm.xlu0 %383, %v247_v1   ;;  %v387_v36 = vld [vmem:[%s481_s4] ss:$0 sm:$0xff] }
  0x10   : > { %v307_v39 = vld [vmem:[%s482_s5] sm:$0xff] }
  0x12   : > { %v389_v15 = vpop.eup %388 }
  0x13   : > { %v275_v16 = vmul.f32 128.0, %v389_v15  ;;  %vm279_vm0 = vweird.f32 %v389_v15 }
  0x15   : > { %v276_v17 = vsub.f32 1.0, %v275_v16 }
  0x17   : > { %384 = vset.pattern.permute.xlu0 %v401_v2  ;;  %v277_v18 = vmul.f32 %v389_v15, %v276_v17 }
  0x18   : > { %259 = vperm.xlu0 %384, %v247_v1  }
  0x19   : > { %v278_v19 = vadd.f32 %v389_v15, %v277_v18 }
  0x1b   : > { %v280_v20 = vsel %vm279_vm0, %v389_v15, %v278_v19 }
  0x81   : > { %v253_v4 = vpop.permute.xlu0 %252 }
  0x82   : > { %v256_v9 = vmul.f32 %v255_v6, %v253_v4 }
  0x8a   : > { %v260_v8 = vpop.permute.xlu0 %259 }
  0x8b   : > { %v263_v10 = vmul.f32 %v262_v7, %v260_v8 }
  0x8d   : > { %v264_v12 = vadd.f32 %v263_v10, %v256_v9 }
  0x8f   : > { %v269_v13 = vadd.f32 %v385_v11, %v264_v12 }
  0x91   : > { %272 = vadd.xlane.f32.xlu1 %v269_v13 }
 0x104   : > { %v273_v21 = vpop.xlane.xlu1 %272 }
 0x105   : > { %v281_v22 = vmul.f32 %v280_v20, %v273_v21 }
 0x107   : > { %v282_v23 = vsub.f32 %v269_v13, %v281_v22 }
 0x109   : > { %v283_v24 = vmul.f32 %v282_v23, %v282_v23 }
 0x10b   : > { %284 = vadd.xlane.f32.xlu1 %v283_v24 }
 0x17e   : > { %v285_v25 = vpop.xlane.xlu1 %284 }
 0x17f   : > { %v286_v26 = vmul.f32 %v285_v25, %v280_v20 }
 0x181   : > { %v287_v27 = vadd.f32 1e-05, %v286_v26 }
 0x183   : > { %390 = vrsqrt.f32 %v287_v27  ;;  %vm294_vm2 = vweird.f32 %v287_v27 }
 0x189   : > { %v391_v28 = vpop.eup %390 }
 0x18a   : > { %v289_v29 = vmul.f32 %v391_v28, %v287_v27  ;;  %vm295_vm1 = vweird.f32 %v391_v28 }
 0x18b   : > { %vm296_vm3 = vmor %vm294_vm2, %vm295_vm1 }
 0x18c   : > { %v290_v30 = vmul.f32 %v391_v28, %v289_v29 }
 0x18e   : > { %v291_v31 = vmul.f32 0.5, %v290_v30 }
 0x190   : > { %v292_v32 = vsub.f32 1.5, %v291_v31 }
 0x192   : > { %v293_v33 = vmul.f32 %v391_v28, %v292_v32 }
 0x194   : > { %v297_v35 = vsel %vm296_vm3, %v391_v28, %v293_v33 }
 0x195   : > { %v298_v37 = vmul.f32 %v297_v35, %v282_v23 }
 0x197   : > { %v302_v38 = vmul.f32 %v386_v34, %v298_v37 }
 0x199   : > { %v306_v40 = vadd.f32 %v387_v36, %v302_v38 }
 0x19b   : > { %v308_v41 = vadd.f32 %v307_v39, %v306_v40 }
 0x19d   : > { %309 = vst [vmem:[%s246_s15] sm:$0xff] %v308_v41 }
 0x19e PF: > { %s16_s21 = sadd.s32 1, %s398_s21  }
 0x19f   : > { %p13_p4 = scmp.ge.s32.totalorder %s16_s21, 4  }
 0x1a1   :  { %15 = sbr.rel (!%p13_p4) target bundleno = 1 (0x1), region = 74 }

// kernel: forward.7
= control target key start
LH: loop header
LB: loop body
LE: loop exit
PB: predicated region body
PF: predicated region fallthrough
CT: control target
= control target key end

     0   :  { %12 = vsyncpa [#allocation3], 0  ;;  %s304_s27 = smov [#allocation2]   ;;  %s305_s29 = smov 64   ;;  %s379_s0 = inlined_call_operand.vmem [shape: f32[2,5], index: 0, kind: input, shape index: {}]   ;;  %s380_s1 = inlined_call_operand.vmem [shape: bf16[5,128], index: 1, kind: input, shape index: {}]   ;;  %s381_s2 = inlined_call_operand.vmem [shape: f32[1,128], index: 2, kind: input, shape index: {}]   ;;  %s382_s3 = inlined_call_operand.hbm [shape: bf16[128,128], index: 3, kind: input, shape index: {}]   ;;  %s383_s4 = inlined_call_operand.vmem [shape: f32[1,128], index: 4, kind: input, shape index: {}]   ;;  %s384_s5 = inlined_call_operand.vmem [shape: f32[1,128], index: 5, kind: input, shape index: {}]   ;;  %s385_s6 = inlined_call_operand.vmem [shape: f32[1,128], index: 6, kind: input, shape index: {}]   ;;  %s386_s7 = inlined_call_operand.vmem [shape: f32[2,128], index: 7, kind: output, shape index: {}]  }
   0x1   :  { %s23_s26 = sshll.u32 %s382_s3, 4  ;;  %s25_s28 = sshll.u32 %s304_s27, 4  ;;  %s24_s26 = int_to_ptr.hbm [resolvable:$true] %s23_s26  ;;  %s26_s28 = int_to_ptr.vmem [resolvable:$true] %s25_s28 }
   0x2   :  { %s306_s30 = smov 4  }
   0x3   :  { %31 = dma.hbm_to_vmem [thread:$0]  %s24_s26, 1024, %s26_s28, [#allocation3], %s305_s29, %s305_s29, %s306_s30  }
   0x4   :  { %302 = dma.done.wait [#allocation3], 1024  }
   0x5   :  { %303 = vsyncadd [#allocation3], 4294966272  ;;  %v307_v0 = vmov 0   ;;  %v308_v1 = vmov 2   ;;  %v309_v2 = vmov 4   ;;  %v254_v4 = vld [vmem:[#allocation2 + $0x38] sm:$0xff] }
   0x6   :  { %264 = vset.pattern.permute.xlu0 %v307_v0  ;;  %266 = vset.pattern.permute.xlu1 %v308_v1  ;;  %v42_v3 = vld [vmem:[%s379_s0] sm:$0x3]  ;;  %v253_v5 = vld [vmem:[#allocation2 + $0x30] sm:$0xff]  ;;  %v310_v6 = vmov 1   ;;  %v311_v7 = vmov 3   ;;  %v252_v8 = vld [vmem:[#allocation2 + $0x28] sm:$0xff] }
   0x7   :  { %268 = vset.pattern.permute.xlu2 %v309_v2  ;;  %47 = vperm.xlu0 %264, %v42_v3   ;;  %v251_v9 = vld [vmem:[#allocation2 + $0x20] sm:$0xff]  ;;  %v250_v10 = vld [vmem:[#allocation2 + $0x18] sm:$0xff]  ;;  %v249_v11 = vld [vmem:[#allocation2 + $0x10] sm:$0xff]  ;;  %vm171_vm0 = vcmask 1041408   ;;  %v312_v44 = vmov 128.0  }
   0x8   :  { %61 = vperm.xlu1 %266, %v42_v3   ;;  %75 = vperm.xlu2 %268, %v42_v3   ;;  %v248_v12 = vld [vmem:[#allocation2 + $0x8] sm:$0xff]  ;;  %v247_v13 = vld [vmem:[#allocation2] sm:$0xff]  ;;  %274 = vrcp.f32 %v312_v44 }
   0x9   :  { %156 = vmatpush.bf16.msra.mxu0 %v254_v4  ;;  %v43_v14 = vld [vmem:[%s380_s1] sm:$0x7] }
   0xa   :  { %v44_v17 = vunpack.c.l.bf16 %v43_v14  ;;  %v270_v34 = vld [vmem:[%s381_s2] ss:$0 sm:$0xff] }
   0xb   :  { %v271_v39 = vld [vmem:[%s383_s4] ss:$0 sm:$0xff] }
   0xc   :  { %v50_v18 = vperm.slane %v44_v17, 0  ;;  %v57_v19 = vperm.slane %v44_v17, 1  ;;  %v64_v20 = vperm.slane %v44_v17, 2  ;;  %v71_v21 = vperm.slane %v44_v17, 3  ;;  %v272_v1 = vld [vmem:[%s384_s5] ss:$0 sm:$0xff] }
   0xd   :  { %157 = vmatpush.bf16.msra.mxu0 %v253_v5  ;;  %v78_v26 = vperm.slane %v44_v17, 4 }
   0xe   :  { %v275_v45 = vpop.eup %274 }
   0xf   :  { %265 = vset.pattern.permute.xlu0 %v310_v6  ;;  %v176_v46 = vmul.f32 128.0, %v275_v45  ;;  %vm180_vm1 = vweird.f32 %v275_v45 }
  0x10   :  { %267 = vset.pattern.permute.xlu1 %v311_v7  ;;  %54 = vperm.xlu0 %265, %v42_v3  }
  0x11   :  { %68 = vperm.xlu1 %267, %v42_v3   ;;  %158 = vmatpush.bf16.msra.mxu0 %v252_v8  ;;  %v177_v47 = vsub.f32 1.0, %v176_v46  ;;  %v273_v3 = vld [vmem:[%s385_s6] ss:$0 sm:$0xff] }
  0x13   :  { %v178_v48 = vmul.f32 %v275_v45, %v177_v47 }
  0x15   :  { %159 = vmatpush.bf16.msra.mxu0 %v251_v9  ;;  %v179_v49 = vadd.f32 %v275_v45, %v178_v48 }
  0x17   :  { %v181_v50 = vsel %vm180_vm1, %v275_v45, %v179_v49 }
  0x18   :  { %269 = vset.pattern.permute.xlu0 %v309_v2 }
  0x19   :  { %160 = vmatpush.bf16.msra.mxu0 %v250_v10 }
  0x1d   :  { %161 = vmatpush.bf16.msra.mxu0 %v249_v11 }
  0x21   :  { %162 = vmatpush.bf16.msra.mxu0 %v248_v12 }
  0x25   :  { %163 = vmatpush.bf16.msra.mxu0 %v247_v13 }
  0x62   :  { %v76_v27 = vpop.permute.xlu2 %75 }
  0x63   :  { %v79_v32 = vmul.f32 %v78_v26, %v76_v27 }
  0x79   :  { %v48_v15 = vpop.permute.xlu0 %47 }
  0x7a   :  { %v62_v16 = vpop.permute.xlu1 %61  ;;  %v51_v24 = vmul.f32 %v50_v18, %v48_v15 }
  0x7b   :  { %v65_v28 = vmul.f32 %v64_v20, %v62_v16 }
  0x82   :  { %v55_v22 = vpop.permute.xlu0 %54 }
  0x83   :  { %v69_v23 = vpop.permute.xlu1 %68  ;;  %v58_v25 = vmul.f32 %v57_v19, %v55_v22 }
  0x84   :  { %v72_v30 = vmul.f32 %v71_v21, %v69_v23 }
  0x85   :  { %v59_v29 = vadd.f32 %v58_v25, %v51_v24 }
  0x87   :  { %v66_v31 = vadd.f32 %v65_v28, %v59_v29 }
  0x89   :  { %v73_v33 = vadd.f32 %v72_v30, %v66_v31 }
  0x8b   :  { %v80_v35 = vadd.f32 %v79_v32, %v73_v33 }
  0x8d   :  { %v85_v36 = vadd.f32 %v270_v34, %v80_v35 }
  0x8f   :  { %v86_v37 = vmax.f32 %v85_v36, 0.0 }
  0x91   :  { %v103_v38 = vpack.c.bf16 %v86_v37, %v86_v37 }
  0x93   :  { %164 = vmatmul.bf16.vlgmr.msra.gmra.mxu0 %v103_v38 }
 0x110   :  { %v165_v40 = vpop.f32.mrf.mxu0 }
 0x111   :  { %v166_v41 = vadd.f32 %v271_v39, %v165_v40 }
 0x113   :  { %v172_v42 = vsel %vm171_vm0, %v166_v41, 0.0 }
 0x114   :  { %173 = vadd.xlane.f32.xlu2 %v172_v42 }
 0x118   :  { %v167_v43 = vpop.f32.mrf.mxu0 }
 0x187   :  { %v174_v51 = vpop.xlane.xlu2 %173 }
 0x188   :  { %v182_v52 = vmul.f32 %v181_v50, %v174_v51 }
 0x18a   :  { %v183_v53 = vsub.f32 %v166_v41, %v182_v52 }
 0x18c   :  { %v184_v54 = vmul.f32 %v183_v53, %v183_v53 }
 0x18e   :  { %v185_v55 = vsel %vm171_vm0, %v184_v54, 0.0 }
 0x18f   :  { %186 = vadd.xlane.f32.xlu1 %v185_v55 }
 0x202   :  { %v187_v56 = vpop.xlane.xlu1 %186 }
 0x203   :  { %v188_v57 = vmul.f32 %v187_v56, %v181_v50 }
 0x205   :  { %v189_v58 = vadd.f32 1e-05, %v188_v57 }
 0x207   :  { %276 = vrsqrt.f32 %v189_v58  ;;  %vm196_vm3 = vweird.f32 %v189_v58 }
 0x20d   :  { %v277_v59 = vpop.eup %276 }
 0x20e   :  { %v191_v60 = vmul.f32 %v277_v59, %v189_v58  ;;  %vm197_vm2 = vweird.f32 %v277_v59 }
 0x20f   :  { %vm198_vm4 = vmor %vm196_vm3, %vm197_vm2 }
 0x210   :  { %v192_v61 = vmul.f32 %v277_v59, %v191_v60 }
 0x212   :  { %v193_v62 = vmul.f32 0.5, %v192_v61 }
 0x214   :  { %v194_v63 = vsub.f32 1.5, %v193_v62 }
 0x216   :  { %v195_v0 = vmul.f32 %v277_v59, %v194_v63 }
 0x218   :  { %v199_v2 = vsel %vm198_vm4, %v277_v59, %v195_v0 }
 0x219   :  { %v200_v4 = vmul.f32 %v199_v2, %v183_v53 }
 0x21b   :  { %v204_v5 = vmul.f32 %v272_v1, %v200_v4 }
 0x21d   :  { %v208_v6 = vadd.f32 %v273_v3, %v204_v5 }
 0x21f   :  { %209 = vst [vmem:[%s386_s7] sm:$0x3] %v208_v6 }
 0x220   :  { %214 = vsyncpa [#allocation3], 1 }

// kernel: forward.8
= control target key start
LH: loop header
LB: loop body
LE: loop exit
PB: predicated region body
PF: predicated region fallthrough
CT: control target
= control target key end

     0   :  { %s4441_s0 = inlined_call_operand.vmem [shape: f32[2,1,128], index: 0, kind: input, shape index: {}]   ;;  %s4442_s1 = inlined_call_operand.vmem [shape: f32[2,8,128], index: 1, kind: input, shape index: {}]   ;;  %s4443_s2 = inlined_call_operand.hbm [shape: bf16[2,128,384], index: 2, kind: input, shape index: {}]   ;;  %s4444_s3 = inlined_call_operand.hbm [shape: bf16[2,128,128], index: 3, kind: input, shape index: {}]   ;;  %s4445_s4 = inlined_call_operand.hbm [shape: bf16[2,128,256], index: 4, kind: input, shape index: {}]   ;;  %s4446_s5 = inlined_call_operand.hbm [shape: bf16[2,256,128], index: 5, kind: input, shape index: {}]   ;;  %s4447_s6 = inlined_call_operand.vmem [shape: f32[2,9,128], index: 6, kind: input, shape index: {}]   ;;  %s4448_s7 = inlined_call_operand.vmem [shape: f32[2,1,256], index: 7, kind: input, shape index: {}]   ;;  %s4449_s8 = inlined_call_operand.vmem [shape: f32[2,128], index: 8, kind: input, shape index: {}]   ;;  %s4450_s9 = inlined_call_operand.vmem [shape: f32[2,16,128], index: 9, kind: output, shape index: {}]  }
   0x1   :  { %4457 = sst [smem:[#allocation18_spill]] %s4441_s0 }
   0x2   :  { %4458 = sst [smem:[#allocation19_spill]] %s4443_s2 }
   0x3   :  { %4459 = sst [smem:[#allocation20_spill]] %s4444_s3 }
   0x4   :  { %4460 = sst [smem:[#allocation21_spill]] %s4445_s4 }
   0x5   :  { %4461 = sst [smem:[#allocation22_spill]] %s4446_s5 }
   0x6   :  { %4462 = sst [smem:[#allocation23_spill]] %s4447_s6 }
   0x7   :  { %4463 = sst [smem:[#allocation24_spill]] %s4448_s7 }
   0x8   :  { %4464 = sst [smem:[#allocation25_spill]] %s4449_s8 }
   0x9   :  { %4465 = sst [smem:[#allocation26_spill]] %s4450_s9 }
   0xa   :  { %14 = vsyncpa [#allocation4], 0 }
   0xb   :  { %16 = vsyncpa [#allocation4 + $0x1], 0 }
   0xc   :  { %17 = vsyncpa [#allocation6], 0 }
   0xd   :  { %19 = vsyncpa [#allocation6 + $0x1], 0 }
   0xe   :  { %20 = vsyncpa [#allocation9], 0 }
   0xf   :  { %22 = vsyncpa [#allocation9 + $0x1], 0  ;;  %s3606_s30 = smov 0   ;;  %s3608_s10 = smov 0  }
  0x10   :  { %s3610_s11 = smov 0   ;;  %s3612_s12 = smov 0  }
  0x11   :  { %s3614_s13 = smov 0   ;;  %s3616_s14 = smov 0  }
  0x12   :  { %s3618_s15 = smov 0   ;;  %s3620_s16 = smov 0  }
  0x13 LB: > { %4466 = sst [smem:[#allocation13_spill]] %s3521_s11  ;;  %s4451_s17 = sadd.s32 4294967295, %s3541_s16   ;;  %s3541_s16 = sphi %s3620_s16, %s28_s16   ;;  %s3537_s15 = sphi %s3618_s15, %s4490_s15   ;;  %s3533_s14 = sphi %s3616_s14, %s4494_s14   ;;  %s3529_s13 = sphi %s3614_s13, %s4488_s13   ;;  %s3525_s12 = sphi %s3612_s12, %s4493_s12   ;;  %s3521_s11 = sphi %s3610_s11, %s4487_s11   ;;  %s3517_s10 = sphi %s3608_s10, %s4492_s10   ;;  %s3513_s30 = sphi %s3606_s30, %s4491_s30  }
  0x14   : > { %4467 = sst [smem:[#allocation14_spill]] %s3537_s15  ;;  %s37_s18 = sadd.s32 1, %s3533_s14 }
  0x15   : > { %p38_p0 = scmp.ge.s32.totalorder %s37_s18, 2  ;;  %s40_s19 = sadd.s32 1, %s3537_s15 }
  0x16   : > { %s99_s20 = sadd.s32 1, %s3521_s11  ;;  %p106_p1 = scmp.ne.s32.totalorder %s3521_s11, %s3517_s10 }
  0x17   : > { %s4496_s18 = smov (%p38_p0, %s37_s18), 0  ;;  %s4498_s19 = smov (!%p38_p0, %s40_s19), %s3537_s15 }
  0x18   : > { %4468 = sst [smem:[#allocation15_spill]] %s4496_s18  ;;  %s96_s21 = ssub.s32 %s3533_s14, %s4496_s18 }
  0x19   : > { %p107_p2 = scmp.eq.s32.totalorder %s3541_s16, 0  ;;  %p42_p3 = scmp.ge.s32.totalorder %s4498_s19, 2 }
  0x1a   : > { %p97_p4 = scmp.eq.s32.totalorder %s96_s21, 0  ;;  %p112_p6 = scmp.ne.s32.totalorder %s3517_s10, %s3513_s30 }
  0x1b   : > { %p108_p5 = por %p107_p2, %p106_p1  ;;  %s4500_s19 = smov (%p42_p3, %s4498_s19), 0 }
  0x1c   : > { %4469 = sst [smem:[#allocation16_spill]] %s4500_s19  ;;  %p113_p7 = scmp.eq.s32.totalorder %s4451_s17, 0 }
  0x1d   : > { %s3660_s22 = scalar_select %p97_p4, %s3521_s11, %s99_s20  }
  0x1e   : > { %p3204_p8 = scmp.lt.s32.totalorder %s3541_s16, 4  ;;  %s3666_s23 = sand.u32 1, %s3521_s11  }
  0x1f   : > { %4470 = sst [smem:[#allocation17_spill]] %s3660_s22  ;;  %p3668_p9 = por %p113_p7, %p112_p6 }
  0x20   : > { %s351_s25 = sand.u32 1, %s3541_s16   ;;  %p3673_p10 = pnand %p3204_p8, %p108_p5 }
  0x21   : > { %s2824_s27 = sshll.u32 %s3666_s23, 6  ;;  %s3111_s28 = sshll.u32 %s3533_s14, 6 }
  0x22   : > { %s4473_s3 = sld [smem:[#allocation20_spill]]  ;;  %s355_s21 = scalar_lea.vmem [#allocation5], %s2824_s27 }
  0x23   : > { %s363_s17 = sshll.u32 %s355_s21, 4  ;;  %p2833_p11 = scmp.ge.s32.totalorder %s3541_s16, 1  ;;  %s364_s17 = int_to_ptr.vmem [resolvable:$true] %s363_s17 }
  0x24   : > { %s3683_s18 = scalar_lea.sflag [#allocation6], %s351_s25  ;;  %s4455_s15 = smov 64  }
  0x25   : > { %s4456_s22 = smov 4   ;;  %p430_p12 = scmp.lt.s32.totalorder %s3541_s16, 5 }
  0x26   : > { %s3181_s29 = smul.u32 192, %s3533_s14  ;;  %s4475_s2 = sld [smem:[#allocation19_spill]] }
  0x27   : > { %p3692_p13 = pnand %p2833_p11, %p430_p12  ;;  %s3112_s8 = sshll.u32 %s3533_s14, 7 }
  0x28   : > { %s360_s20 = scalar_lea.hbm %s4473_s3, %s3111_s28  ;;  %s3180_s28 = smul.u32 192, %s3666_s23 }
  0x29   : > { %s361_s19 = sshll.u32 %s360_s20, 4  ;;  %s4476_s4 = sld [smem:[#allocation21_spill]]  ;;  %s362_s19 = int_to_ptr.hbm [resolvable:$true] %s361_s19 }
  0x2a   : > { %3197 = dma.hbm_to_vmem [thread:$0]  (!%p3673_p10), %s362_s19, 1024, %s364_s17, %s3683_s18, %s4455_s15, %s4455_s15, %s4456_s22  }
  0x2b   : > { %s333_s21 = scalar_lea.vmem [#allocation3], %s3180_s28  ;;  %s2827_s17 = sshll.u32 %s3666_s23, 7 }
  0x2c   : > { %s338_s20 = scalar_lea.hbm %s4475_s2, %s3181_s29  ;;  %s341_s3 = sshll.u32 %s333_s21, 4  ;;  %s342_s3 = int_to_ptr.vmem [resolvable:$true] %s341_s3 }
  0x2d   : > { %s339_s11 = sshll.u32 %s338_s20, 4  ;;  %s330_s19 = scalar_lea.sflag [#allocation4], %s3666_s23  ;;  %s340_s11 = int_to_ptr.hbm [resolvable:$true] %s339_s11 }
  0x2e   : > { %s3545_s15 = smov 192   ;;  %s3546_s22 = smov 12  }
  0x2f   : > { %3194 = dma.hbm_to_vmem [thread:$0]  (!%p3673_p10), %s340_s11, 3072, %s342_s3, %s330_s19, %s3545_s15, %s3545_s15, %s3546_s22  }
  0x30   : > { %s382_s30 = scalar_lea.hbm %s4476_s4, %s3112_s8  ;;  %s377_s28 = scalar_lea.vmem [#allocation7], %s2827_s17 }
  0x31   : > { %s385_s29 = sshll.u32 %s377_s28, 4  ;;  %s383_s25 = sshll.u32 %s382_s30, 4  ;;  %s386_s29 = int_to_ptr.vmem [resolvable:$true] %s385_s29  ;;  %s384_s25 = int_to_ptr.hbm [resolvable:$true] %s383_s25 }
  0x32   : > { %s3547_s20 = smov 128   ;;  %s3548_s21 = smov 8  }
  0x33   : > { %3200 = dma.hbm_to_vmem [thread:$0]  (!%p3673_p10), %s384_s25, 2048, %s386_s29, %s3683_s18, %s3547_s20, %s3547_s20, %s3548_s21  }
  0x34   : > { %s4477_s5 = sld [smem:[#allocation22_spill]]  ;;  %s399_s15 = scalar_lea.vmem [#allocation8], %s2827_s17 }
  0x35   : > { %s407_s22 = sshll.u32 %s399_s15, 4  ;;  %s396_s7 = scalar_lea.sflag [#allocation9], %s3666_s23  ;;  %s408_s22 = int_to_ptr.vmem [resolvable:$true] %s407_s22 }
  0x36   : > { %s4478_s9 = smov 4   ;;  %s4479_s19 = smov 64  }
  0x37   : > { %s436_s18 = sand.u32 (!%p3692_p13), 1, %s3517_s10  }
  0x38   : > { %434 = sbr.rel (%p3692_p13) target bundleno = 2396 (0x95c), region = 56  ;;  %s437_s2 = scalar_lea.sflag (!%p3692_p13), [#allocation4], %s436_s18 }
  0x39   : > { %s3182_s30 = smul.u32 (!%p3692_p13), 192, %s436_s18 }
  0x3a   : > { %s404_s3 = scalar_lea.hbm %s4477_s5, %s3112_s8 }
  0x3b   : > { %s405_s11 = sshll.u32 %s404_s3, 4  ;;  %s3724_s6 = scalar_lea.vmem (!%p3692_p13), [#allocation3], %s3182_s30  ;;  %s406_s11 = int_to_ptr.hbm [resolvable:$true] %s405_s11 }
  0x3c   : > { %3203 = dma.hbm_to_vmem [thread:$0]  (!%p3673_p10), %s406_s11, 2048, %s408_s22, %s396_s7, %s4479_s19, %s4479_s19, %s4478_s9  }
  0x3d   : > { %3500 = dma.done.wait (%p3668_p9), %s437_s2, 3072  }
  0x3e   : > { %3502 = vsyncadd (%p3668_p9), %s437_s2, 4294964224  ;;  %s4480_s8 = sadd.s32 4294967295, %s3541_s16   ;;  %s2834_s26 = sshll.u32 %s436_s18, 6 }
  0x3f   : > { %s446_s23 = sand.u32 1, %s4480_s8   ;;  %s3732_s27 = scalar_lea.vmem [#allocation5], %s2834_s26 }
  0x40   : > { %s447_s17 = scalar_lea.sflag [#allocation6], %s446_s23 }
  0x41   : > { %3504 = dma.done.wait (%p3668_p9), %s447_s17, 3072  }
  0x42   : > { %3506 = vsyncadd (%p3668_p9), %s447_s17, 4294964224  ;;  %s2835_s28 = sshll.u32 %s436_s18, 7  ;;  %s467_s25 = scalar_lea.sflag [#allocation9], %s436_s18 }
  0x43   : > { %s3738_s29 = scalar_lea.vmem [#allocation7], %s2835_s28  ;;  %s3740_s20 = scalar_lea.vmem [#allocation8], %s2835_s28 }
  0x44   : > { %3508 = dma.done.wait (%p3668_p9), %s467_s25, 2048  }
  0x45   : > { %3510 = vsyncadd (%p3668_p9), %s467_s25, 4294965248  ;;  %p537_p0 = scmp.lt.s32.totalorder %s3529_s13, 1  ;;  %p544_p1 = scmp.lt.s32.totalorder %s3525_s12, 1 }
  0x46   : > { %s4481_s0 = sld [smem:[#allocation18_spill]]  ;;  %p2843_p2 = scmp.ne.s32.totalorder %s3525_s12, 0 }
  0x47   : > { %s4502_s13 = smov (!%p537_p0, %s3529_s13), 1  ;;  %s4482_s2 = sld [smem:[#allocation23_spill]] }
  0x48   : > { %s545_s21 = scalar_select %p544_p1, %s3525_s12, 1 }
  0x49   : > { %s2837_s22 = sshll.u32 %s4502_s13, 3  ;;  %s4483_s28 = sld [smem:[#allocation24_spill]] }
  0x4a   : > { %s543_s19 = scalar_lea.vmem %s4442_s1, %s2837_s22  ;;  %s3114_s18 = sshll.u32 %s545_s21, 4 }
  0x4b   : > { %s2840_s23 = sshll.u32 %s545_s21, 1  ;;  %s3115_s4 = sshll.u32 %s4502_s13, 4 }
  0x4c   : > { %s539_s15 = scalar_lea.vmem %s4481_s0, %s4502_s13  ;;  %s4484_s0 = sld [smem:[#allocation26_spill]] }
  0x4d   : > { %s3759_s8 = scalar_lea.vmem %s4482_s2, %s3114_s18 }
  0x4e   : > { %562 = sbr.rel (%p2843_p2) target bundleno = 88 (0x58), region = 76 }
  0x4f   : > { %s3764_s25 = scalar_lea.vmem %s4483_s28, %s2840_s23 }
  0x52   : > { %s3769_s5 = scalar_lea.vmem %s4484_s0, %s3115_s4 }
  0x53   : > { %v565_v0 = vld [vmem:[%s539_s15] sm:$0x1]  ;;  %v3549_v1 = vmov 0.0  }
  0x54   : > { %563 = vst [vmem:[#allocation2] sm:$0xff] %v3549_v1  ;;  %v567_v2 = vld [vmem:[%s543_s19] sm:$0xff] }
  0x55   : > { %564 = vst [vmem:[#allocation2 + $0x8] sm:$0xff] %v3549_v1 }
  0x56   : > { %566 = vst [vmem:[#allocation2] sm:$0x1] %v565_v0 }
  0x57   : > { %568 = vst [vmem:[#allocation2 + $0x1] sm:$0xff] %v567_v2 }
  0x58 PF: > { %v2930_v3 = vld [vmem:[%s3724_s6 + $0xa8] sm:$0xf]  ;;  %v3138_v4 = vld [vmem:[%s3724_s6 + $0xb0] sm:$0xf0]  ;;  %v3137_v5 = vld [vmem:[%s3724_s6 + $0xac] sm:$0xf] }
  0x59   : > { %v2931_v6 = vor.u32 %v3138_v4, %v2930_v3  ;;  %v2932_v7 = vld [vmem:[%s3724_s6 + $0xb4] sm:$0xf0]  ;;  %v2918_v8 = vld [vmem:[%s3724_s6 + $0x90] sm:$0xf]  ;;  %v3135_v9 = vld [vmem:[%s3724_s6 + $0x98] sm:$0xf0] }
  0x5a   : > { %v2935_v10 = vor.u32 %v3137_v5, %v2932_v7  ;;  %v3134_v11 = vld [vmem:[%s3724_s6 + $0x94] sm:$0xf]  ;;  %v2920_v12 = vld [vmem:[%s3724_s6 + $0x9c] sm:$0xf0]  ;;  %v2919_v13 = vor.u32 %v3135_v9, %v2918_v8  ;;  %v2906_v15 = vld [vmem:[%s3724_s6 + $0x78] sm:$0xf] }
  0x5b   : > { %734 = vmatpush.bf16.msra.mxu0 %v2931_v6  ;;  %v2923_v14 = vor.u32 %v3134_v11, %v2920_v12  ;;  %v3132_v16 = vld [vmem:[%s3724_s6 + $0x80] sm:$0xf0]  ;;  %v3131_v17 = vld [vmem:[%s3724_s6 + $0x7c] sm:$0xf]  ;;  %v2908_v18 = vld [vmem:[%s3724_s6 + $0x84] sm:$0xf0] }
  0x5c   : > { %748 = vmatpush.bf16.msra.mxu1 %v2935_v10  ;;  %v2907_v19 = vor.u32 %v3132_v16, %v2906_v15  ;;  %v2911_v20 = vor.u32 %v3131_v17, %v2908_v18  ;;  %v2894_v21 = vld [vmem:[%s3724_s6 + $0x60] sm:$0xf]  ;;  %v3129_v22 = vld [vmem:[%s3724_s6 + $0x68] sm:$0xf0]  ;;  %v3128_v23 = vld [vmem:[%s3724_s6 + $0x64] sm:$0xf] }
  0x5d   : > { %v2896_v24 = vld [vmem:[%s3724_s6 + $0x6c] sm:$0xf0]  ;;  %v2895_v25 = vor.u32 %v3129_v22, %v2894_v21  ;;  %v2882_v27 = vld [vmem:[%s3724_s6 + $0x48] sm:$0xf]  ;;  %v3126_v28 = vld [vmem:[%s3724_s6 + $0x50] sm:$0xf0] }
  0x5e   : > { %v2899_v26 = vor.u32 %v3128_v23, %v2896_v24  ;;  %v3125_v29 = vld [vmem:[%s3724_s6 + $0x4c] sm:$0xf]  ;;  %v2884_v30 = vld [vmem:[%s3724_s6 + $0x54] sm:$0xf0]  ;;  %v2883_v31 = vor.u32 %v3126_v28, %v2882_v27  ;;  %v2870_v33 = vld [vmem:[%s3724_s6 + $0x30] sm:$0xf] }
  0x5f   : > { %735 = vmatpush.bf16.msra.mxu0 %v2919_v13  ;;  %v2887_v32 = vor.u32 %v3125_v29, %v2884_v30  ;;  %v3123_v34 = vld [vmem:[%s3724_s6 + $0x38] sm:$0xf0]  ;;  %v3122_v35 = vld [vmem:[%s3724_s6 + $0x34] sm:$0xf]  ;;  %v2872_v36 = vld [vmem:[%s3724_s6 + $0x3c] sm:$0xf0] }
  0x60   : > { %749 = vmatpush.bf16.msra.mxu1 %v2923_v14  ;;  %v2871_v37 = vor.u32 %v3123_v34, %v2870_v33  ;;  %v2875_v38 = vor.u32 %v3122_v35, %v2872_v36  ;;  %v2858_v39 = vld [vmem:[%s3724_s6 + $0x18] sm:$0xf]  ;;  %v3120_v40 = vld [vmem:[%s3724_s6 + $0x20] sm:$0xf0]  ;;  %v3119_v41 = vld [vmem:[%s3724_s6 + $0x1c] sm:$0xf] }
  0x61   : > { %v2860_v42 = vld [vmem:[%s3724_s6 + $0x24] sm:$0xf0]  ;;  %v2859_v43 = vor.u32 %v3120_v40, %v2858_v39  ;;  %v2846_v45 = vld [vmem:[%s3724_s6] sm:$0xf]  ;;  %v3117_v46 = vld [vmem:[%s3724_s6 + $0x8] sm:$0xf0] }
  0x62   : > { %v2863_v44 = vor.u32 %v3119_v41, %v2860_v42  ;;  %v3116_v47 = vld [vmem:[%s3724_s6 + $0x4] sm:$0xf]  ;;  %v2848_v48 = vld [vmem:[%s3724_s6 + $0xc] sm:$0xf0]  ;;  %v2847_v49 = vor.u32 %v3117_v46, %v2846_v45  ;;  %v570_v51 = vld [vmem:[#allocation2 + $0x8] sm:$0xff]  ;;  %s3550_s0 = smov 32  }
  0x63   : > { %736 = vmatpush.bf16.msra.mxu0 %v2907_v19  ;;  %v569_v50 = vld [vmem:[#allocation2] sm:$0xff]  ;;  %v2851_v52 = vor.u32 %v3116_v47, %v2848_v48  ;;  %v3139_v55 = vld [vmem:[%s3724_s6 + $0xb8] sm:$0xf0]  ;;  %v2926_v57 = vld [vmem:[%s3724_s6 + $0x98] sm:$0xf]  ;;  %s3551_s4 = smov 64  }
  0x64   : > { %750 = vmatpush.bf16.msra.mxu1 %v2911_v20  ;;  %v605_v53 = vpack.c.bf16 %v570_v51, %v569_v50  ;;  %v2938_v54 = vld [vmem:[%s3724_s6 + $0xb0] sm:$0xf]  ;;  %v3136_v58 = vld [vmem:[%s3724_s6 + $0xa0] sm:$0xf0]  ;;  %v2914_v60 = vld [vmem:[%s3724_s6 + $0x80] sm:$0xf] }
  0x65   : > { %v2939_v56 = vor.u32 %v3139_v55, %v2938_v54  ;;  %v2927_v59 = vor.u32 %v3136_v58, %v2926_v57  ;;  %v3133_v61 = vld [vmem:[%s3724_s6 + $0x88] sm:$0xf0]  ;;  %v2902_v63 = vld [vmem:[%s3724_s6 + $0x68] sm:$0xf]  ;;  %v3130_v0 = vld [vmem:[%s3724_s6 + $0x70] sm:$0xf0] }
  0x66   : > { %v2915_v62 = vor.u32 %v3133_v61, %v2914_v60  ;;  %v2903_v1 = vor.u32 %v3130_v0, %v2902_v63  ;;  %v2890_v2 = vld [vmem:[%s3724_s6 + $0x50] sm:$0xf]  ;;  %v3127_v3 = vld [vmem:[%s3724_s6 + $0x58] sm:$0xf0]  ;;  %v2878_v5 = vld [vmem:[%s3724_s6 + $0x38] sm:$0xf] }
  0x67   : > { %737 = vmatpush.bf16.msra.mxu0 %v2895_v25  ;;  %762 = vmatpush.bf16.msra.mxu2 %v2939_v56  ;;  %v2891_v4 = vor.u32 %v3127_v3, %v2890_v2  ;;  %v3124_v6 = vld [vmem:[%s3724_s6 + $0x40] sm:$0xf0]  ;;  %v2866_v8 = vld [vmem:[%s3724_s6 + $0x20] sm:$0xf]  ;;  %v3121_v9 = vld [vmem:[%s3724_s6 + $0x28] sm:$0xf0] }
  0x68   : > { %751 = vmatpush.bf16.msra.mxu1 %v2899_v26  ;;  %v2879_v7 = vor.u32 %v3124_v6, %v2878_v5  ;;  %v2867_v10 = vor.u32 %v3121_v9, %v2866_v8  ;;  %v2854_v11 = vld [vmem:[%s3724_s6 + $0x8] sm:$0xf]  ;;  %v3118_v12 = vld [vmem:[%s3724_s6 + $0x10] sm:$0xf0]  ;;  %s3552_s13 = smov 96   ;;  %vm852_vm0 = vcmask 1047556  }
  0x69   : > { %v3821_v13 = vld [vmem:[%s3759_s8] sm:$0xff]  ;;  %v2855_v14 = vor.u32 %v3118_v12, %v2854_v11  ;;  %v3554_v36 = vmov 1934713408   ;;  %vm1540_vm1 = vcmask 261120   ;;  %vm1660_vm3 = vcmask 130048   ;;  %p3108_p3 = scmp.ne.s32.totalorder %s3525_s12, 1 }
  0x6a   : > { %v779_v15 = vperm.slane %v3821_v13, 1  ;;  %v776_v17 = vperm.slane %v3821_v13, 0  ;;  %vm2108_vm4 = vcmask 523264   ;;  %vm2111_vm5 = vcmask 785408  }
  0x6b   : > { %738 = vmatpush.bf16.msra.mxu0 %v2883_v31  ;;  %763 = vmatpush.bf16.msra.mxu2 %v2927_v59  ;;  %v3553_v31 = vmov 1983009808  }
  0x6c   : > { %752 = vmatpush.bf16.msra.mxu1 %v2887_v32  ;;  %v843_v32 = vunpack.c.l.s4 %v3553_v31 }
  0x6e   : > { %v3854_v34 = vunpack.c.0.s8 %v843_v32 }
  0x6f   : > { %739 = vmatpush.bf16.msra.mxu0 %v2871_v37  ;;  %764 = vmatpush.bf16.msra.mxu2 %v2915_v62  ;;  %v857_v37 = vunpack.c.l.s4 %v3554_v36 }
  0x70   : > { %753 = vmatpush.bf16.msra.mxu1 %v2875_v38 }
  0x71   : > { %v3857_v47 = vunpack.c.0.s8 %v857_v37 }
  0x73   : > { %740 = vmatpush.bf16.msra.mxu0 %v2859_v43  ;;  %765 = vmatpush.bf16.msra.mxu2 %v2903_v1 }
  0x74   : > { %754 = vmatpush.bf16.msra.mxu1 %v2863_v44 }
  0x77   : > { %741 = vmatpush.bf16.msra.mxu0 %v2847_v49  ;;  %766 = vmatpush.bf16.msra.mxu2 %v2891_v4 }
  0x78   : > { %755 = vmatpush.bf16.msra.mxu1 %v2851_v52 }
  0x7a   : > { %742 = vmatmul.bf16.vlgmr.msra.gmra.mxu0 %v605_v53 }
  0x7b   : > { %756 = vmatmul.bf16.vlgmr.msra.gmra.mxu1 %v605_v53  ;;  %767 = vmatpush.bf16.msra.mxu2 %v2879_v7 }
  0x7f   : > { %768 = vmatpush.bf16.msra.mxu2 %v2867_v10 }
  0x83   : > { %769 = vmatpush.bf16.msra.mxu2 %v2855_v14 }
  0x86   : > { %770 = vmatmul.bf16.vlgmr.msra.gmra.mxu2 %v605_v53 }
  0xf7   : > { %v743_v19 = vpop.f32.mrf.mxu0 }
  0xf8   : > { %v757_v16 = vpop.f32.mrf.mxu1  ;;  %v777_v21 = vadd.f32 %v776_v17, %v743_v19 }
  0xf9   : > { %v780_v18 = vadd.f32 %v779_v15, %v757_v16 }
  0xfa   : > { %v3828_v23 = vpack.c.bf16 %v777_v21, %v777_v21 }
  0xfb   : > { %v1046_v20 = vpack.c.bf16 %v780_v18, %v780_v18 }
  0xfc   : > { %v820_v54 = vshrl.u32 %v3828_v23, 16 }
  0xfd   : > { %1058 = vrot.lane.b32.xlu2 %v1046_v20, %s3550_s0  ;;  %1054 = vrot.lane.b32.xlu1 %v1046_v20, %s3551_s4  ;;  %v1065_v43 = vshrl.u32 %v1046_v20, 16 }
  0xfe   : > { %1050 = vrot.lane.b32.xlu0 %v1046_v20, %s3552_s13 }
  0xff   : > { %v745_v26 = vpop.f32.mrf.mxu0 }
 0x100   : > { %v759_v22 = vpop.f32.mrf.mxu1  ;;  %v778_v27 = vadd.f32 %v776_v17, %v745_v26 }
 0x101   : > { %v781_v24 = vadd.f32 %v779_v15, %v759_v22 }
 0x102   : > { %v3838_v28 = vpack.c.bf16 %v778_v27, %v778_v27 }
 0x103   : > { %v3830_v25 = vpack.c.bf16 %v781_v24, %v781_v24 }
 0x104   : > { %v832_v55 = vshrl.u32 %v3838_v28, 16 }
 0x105   : > { %1056 = vrot.lane.b32.xlu1 %v3830_v25, %s3551_s4  ;;  %809 = vrot.lane.b32.xlu2 %v3828_v23, %s3551_s4  ;;  %v1077_v59 = vshrl.u32 %v3830_v25, 16 }
 0x106   : > { %1052 = vrot.lane.b32.xlu0 %v3830_v25, %s3552_s13 }
 0x10d   : > { %1060 = vrot.lane.b32.xlu2 %v3830_v25, %s3550_s0  ;;  %807 = vrot.lane.b32.xlu1 %v3838_v28, %s3552_s13 }
 0x10e   : > { %805 = vrot.lane.b32.xlu0 %v3828_v23, %s3552_s13 }
 0x115   : > { %815 = vrot.lane.b32.xlu2 %v3838_v28, %s3550_s0  ;;  %813 = vrot.lane.b32.xlu1 %v3828_v23, %s3550_s0 }
 0x116   : > { %811 = vrot.lane.b32.xlu0 %v3838_v28, %s3551_s4 }
 0x157   : > { %v1059_v29 = vpop.permute.xlu2 %1058 }
 0x158   : > { %v1072_v38 = vshrl.u32 %v1059_v29, 16 }
 0x15f   : > { %v3852_v30 = vpop.permute.xlu2 %809 }
 0x160   : > { %v826_v56 = vshrl.u32 %v3852_v30, 16 }
 0x167   : > { %v1061_v33 = vpop.permute.xlu2 %1060 }
 0x168   : > { %v1084_v60 = vshrl.u32 %v1061_v33, 16 }
 0x16f   : > { %v1055_v35 = vpop.permute.xlu1 %1054  ;;  %v3871_v3 = vpop.permute.xlu2 %815 }
 0x170   : > { %v1070_v39 = vpack.i.b16 %v1059_v29, %v1055_v35  ;;  %v1071_v40 = vshrl.u32 %v1055_v35, 16  ;;  %v1051_v41 = vpop.permute.xlu0 %1050  ;;  %v839_v17 = vshrl.u32 %v3871_v3, 16 }
 0x171   : > { %v1064_v42 = vpack.i.b16 %v1051_v41, %v1046_v20  ;;  %v1066_v44 = vshrl.u32 %v1051_v41, 16 }
 0x172   : > { %v1073_v45 = vpack.i.b16 %v1072_v38, %v1071_v40  ;;  %v1095_v46 = vperm.slane %v1070_v39, %v3854_v34 }
 0x173   : > { %v1067_v48 = vpack.i.b16 %v1066_v44, %v1065_v43  ;;  %v1090_v49 = vperm.slane %v1064_v42, %v3854_v34 }
 0x174   : > { %v1096_v50 = vrot.slane %v1095_v46, 4  ;;  %v1121_v51 = vperm.slane %v1073_v45, %v3854_v34 }
 0x175   : > { %v1098_v52 = vrot.slane %v1090_v49, 4  ;;  %v1116_v53 = vperm.slane %v1067_v48, %v3854_v34 }
 0x176   : > { %v1122_v57 = vrot.slane %v1121_v51, 4  ;;  %v1097_v58 = vsel %vm852_vm0, %v1096_v50, %v1090_v49 }
 0x177   : > { %v1099_v61 = vsel %vm852_vm0, %v1095_v46, %v1098_v52  ;;  %v1103_v62 = vperm.slane %v1097_v58, %v3857_v47  ;;  %v1124_v63 = vrot.slane %v1116_v53, 4  ;;  %v1057_v0 = vpop.permute.xlu1 %1056 }
 0x178   : > { %v1107_v1 = vperm.slane %v1099_v61, %v3857_v47  ;;  %v1123_v2 = vsel %vm852_vm0, %v1122_v57, %v1116_v53  ;;  %v1082_v4 = vpack.i.b16 %v1061_v33, %v1057_v0  ;;  %v1083_v5 = vshrl.u32 %v1057_v0, 16  ;;  %v1053_v6 = vpop.permute.xlu0 %1052 }
 0x179   : > { %v1108_v7 = vrot.slane %v1103_v62, 4  ;;  %v1125_v8 = vsel %vm852_vm0, %v1121_v51, %v1124_v63  ;;  %v3875_v9 = vperm.slane %v1123_v2, %v3857_v47  ;;  %v1076_v10 = vpack.i.b16 %v1053_v6, %v3830_v25 }
 0x17a   : > { %v1110_v11 = vrot.slane %v1107_v1, 4  ;;  %v1133_v12 = vperm.slane %v1125_v8, %v3857_v47  ;;  %v1085_v14 = vpack.i.b16 %v1084_v60, %v1083_v5  ;;  %v1147_v15 = vperm.slane %v1082_v4, %v3854_v34 }
 0x17b   : > { %v1134_v16 = vrot.slane %v3875_v9, 4  ;;  %v1078_v18 = vshrl.u32 %v1053_v6, 16  ;;  %v1142_v19 = vperm.slane %v1076_v10, %v3854_v34  ;;  %v1109_v25 = vsel %vm852_vm0, 0, %v1108_v7 }
 0x17c   : > { %v1111_v20 = vsel %vm852_vm0, 0, %v1110_v11  ;;  %v1136_v21 = vrot.slane %v1133_v12, 4  ;;  %v3885_v22 = vsel %vm852_vm0, %v1110_v11, %v1103_v62  ;;  %v1148_v24 = vrot.slane %v1147_v15, 4 }
 0x17d   : > { %v1195_v26 = vrot.slane %v1111_v20, 4  ;;  %v1173_v27 = vperm.slane %v1085_v14, %v3854_v34  ;;  %v1079_v29 = vpack.i.b16 %v1078_v18, %v1077_v59  ;;  %v3890_v31 = vsel %vm852_vm0, 0, %v1134_v16 }
 0x17e   : > { %v3893_v32 = vsel %vm852_vm0, 0, %v1136_v21  ;;  %v1149_v33 = vsel %vm852_vm0, %v1148_v24, %v1142_v19  ;;  %v1150_v35 = vrot.slane %v1142_v19, 4  ;;  %v1194_v40 = vperm.slane %v3885_v22, %v3854_v34 }
 0x17f   : > { %v1196_v36 = vsel %vm852_vm0, %v1195_v26, %v1109_v25  ;;  %v1174_v37 = vrot.slane %v1173_v27, 4  ;;  %v1155_v38 = vperm.slane %v1149_v33, %v3857_v47  ;;  %v808_v39 = vpop.permute.xlu1 %807  ;;  %v1168_v42 = vperm.slane %v1079_v29, %v3854_v34 }
 0x180   : > { %v1151_v41 = vsel %vm852_vm0, %v1147_v15, %v1150_v35  ;;  %v806_v43 = vpop.permute.xlu0 %805  ;;  %v831_v44 = vpack.i.b16 %v808_v39, %v3838_v28  ;;  %v833_v45 = vshrl.u32 %v808_v39, 16  ;;  %v1214_v58 = vrot.slane %v3893_v32, 4 }
 0x181   : > { %v1159_v46 = vperm.slane %v1151_v41, %v3857_v47  ;;  %v1160_v48 = vrot.slane %v1155_v38, 4  ;;  %v819_v49 = vpack.i.b16 %v806_v43, %v3828_v23  ;;  %v821_v50 = vshrl.u32 %v806_v43, 16 }
 0x182   : > { %v1175_v51 = vsel %vm852_vm0, %v1174_v37, %v1168_v42  ;;  %v1176_v52 = vrot.slane %v1168_v42, 4  ;;  %v834_v53 = vpack.i.b16 %v833_v45, %v832_v55  ;;  %v898_v57 = vperm.slane %v831_v44, %v3854_v34 }
 0x183   : > { %v1162_v59 = vrot.slane %v1159_v46, 4  ;;  %v3909_v60 = vperm.slane %v1175_v51, %v3857_v47  ;;  %v822_v28 = vpack.i.b16 %v821_v50, %v820_v54  ;;  %v1161_v61 = vsel %vm852_vm0, 0, %v1160_v48 }
 0x184   : > { %v1177_v62 = vsel %vm852_vm0, %v1173_v27, %v1176_v52  ;;  %v845_v23 = vperm.slane %v819_v49, %v3854_v34  ;;  %v924_v63 = vperm.slane %v834_v53, %v3854_v34  ;;  %v906_v2 = vrot.slane %v898_v57, 4 }
 0x185   : > { %v1163_v0 = vsel %vm852_vm0, 0, %v1162_v59  ;;  %v1185_v55 = vperm.slane %v1177_v62, %v3857_v47  ;;  %v1186_v1 = vrot.slane %v3909_v60, 4  ;;  %v3919_v4 = vsel %vm852_vm0, %v1162_v59, %v1155_v38 }
 0x186   : > { %v1233_v5 = vrot.slane %v1163_v0, 4  ;;  %v854_v54 = vrot.slane %v845_v23, 4  ;;  %v872_v6 = vperm.slane %v822_v28, %v3854_v34  ;;  %v932_v10 = vrot.slane %v924_v63, 4 }
 0x187   : > { %v3923_v7 = vsel %vm852_vm0, 0, %v1186_v1  ;;  %v3925_v8 = vrot.slane %v1185_v55, 4  ;;  %v814_v11 = vpop.permute.xlu1 %813  ;;  %v1200_v12 = vperm.slane %v1196_v36, %v3854_v34  ;;  %v3934_v19 = vsel %vm852_vm0, %v1136_v21, %v3875_v9 }
 0x188   : > { %v3929_v14 = vsel %vm852_vm0, %v1233_v5, %v1161_v61  ;;  %v812_v15 = vpop.permute.xlu0 %811  ;;  %v825_v16 = vpack.i.b16 %v814_v11, %v3852_v30  ;;  %v827_v18 = vshrl.u32 %v814_v11, 16  ;;  %v880_v27 = vrot.slane %v872_v6, 4 }
 0x189   : > { %v3938_v20 = vsel %vm852_vm0, 0, %v3925_v8  ;;  %v837_v22 = vpack.i.b16 %v3871_v3, %v812_v15  ;;  %v838_v24 = vshrl.u32 %v812_v15, 16  ;;  %v1201_v25 = vrot.slane %v1200_v12, 4 }
 0x18a   : > { %v1252_v26 = vrot.slane %v3938_v20, 4  ;;  %v828_v29 = vpack.i.b16 %v827_v18, %v826_v56  ;;  %v850_v32 = vperm.slane %v825_v16, %v3854_v34  ;;  %v1213_v35 = vperm.slane %v3934_v19, %v3854_v34 }
 0x18b   : > { %v840_v9 = vpack.i.b16 %v839_v17, %v838_v24  ;;  %v903_v21 = vperm.slane %v837_v22, %v3854_v34  ;;  %v1202_v33 = vsel %vm852_vm0, %v1201_v25, %v1194_v40  ;;  %v1215_v30 = vsel %vm852_vm0, %v1214_v58, %v3890_v31 }
 0x18c   : > { %v851_v36 = vrot.slane %v850_v32, 4  ;;  %v855_v37 = vsel %vm852_vm0, %v850_v32, %v854_v54  ;;  %v877_v38 = vperm.slane %v828_v29, %v3854_v34  ;;  %v1206_v1 = vperm.slane %v1202_v33, %v3857_v47 }
 0x18d   : > { %v904_v56 = vrot.slane %v903_v21, 4  ;;  %v907_v39 = vsel %vm852_vm0, %v903_v21, %v906_v2  ;;  %v929_v3 = vperm.slane %v840_v9, %v3854_v34  ;;  %v863_v17 = vperm.slane %v855_v37, %v3857_v47 }
 0x18e   : > { %v915_v40 = vperm.slane %v907_v39, %v3857_v47  ;;  %v853_v41 = vsel %vm852_vm0, %v851_v36, %v845_v23  ;;  %v878_v42 = vrot.slane %v877_v38, 4  ;;  %v881_v43 = vsel %vm852_vm0, %v877_v38, %v880_v27 }
 0x18f   : > { %v905_v44 = vsel %vm852_vm0, %v904_v56, %v898_v57  ;;  %v930_v45 = vrot.slane %v929_v3, 4  ;;  %v933_v46 = vsel %vm852_vm0, %v929_v3, %v932_v10  ;;  %v859_v31 = vperm.slane %v853_v41, %v3857_v47 }
 0x190   : > { %v911_v48 = vperm.slane %v905_v44, %v3857_v47  ;;  %v918_v49 = vrot.slane %v915_v40, 4  ;;  %v941_v50 = vperm.slane %v933_v46, %v3857_v47  ;;  %v866_v51 = vrot.slane %v863_v17, 4 }
 0x191   : > { %v931_v52 = vsel %vm852_vm0, %v930_v45, %v924_v63  ;;  %v864_v53 = vrot.slane %v859_v31, 4  ;;  %v879_v58 = vsel %vm852_vm0, %v878_v42, %v872_v6  ;;  %v889_v59 = vperm.slane %v881_v43, %v3857_v47 }
 0x192   : > { %v916_v28 = vrot.slane %v911_v48, 4  ;;  %v919_v57 = vsel %vm852_vm0, 0, %v918_v49  ;;  %v937_v61 = vperm.slane %v931_v52, %v3857_v47  ;;  %v944_v62 = vrot.slane %v941_v50, 4 }
 0x193   : > { %v3972_v23 = vsel %vm852_vm0, %v918_v49, %v911_v48  ;;  %v989_v0 = vrot.slane %v919_v57, 4  ;;  %v867_v55 = vsel %vm852_vm0, 0, %v866_v51  ;;  %v865_v54 = vsel %vm852_vm0, 0, %v864_v53 }
 0x194   : > { %v917_v63 = vsel %vm852_vm0, 0, %v916_v28  ;;  %v942_v2 = vrot.slane %v937_v61, 4  ;;  %v3978_v5 = vsel %vm852_vm0, 0, %v944_v62  ;;  %v988_v6 = vperm.slane %v3972_v23, %v3854_v34 }
 0x195   : > { %v3984_v10 = vsel %vm852_vm0, %v989_v0, %v917_v63  ;;  %v3987_v11 = vsel %vm852_vm0, %v944_v62, %v937_v61  ;;  %v885_v12 = vperm.slane %v879_v58, %v3857_v47  ;;  %v1008_v15 = vrot.slane %v3978_v5, 4 }
 0x196   : > { %v892_v16 = vrot.slane %v889_v59, 4  ;;  %v946_v18 = vsel %vm852_vm0, %v866_v51, %v859_v31  ;;  %v951_v22 = vrot.slane %v867_v55, 4  ;;  %v3993_v24 = vsel %vm852_vm0, 0, %v942_v2 }
 0x197   : > { %v890_v25 = vrot.slane %v885_v12, 4  ;;  %v950_v27 = vperm.slane %v946_v18, %v3854_v34  ;;  %v1219_v29 = vperm.slane %v1215_v30, %v3854_v34  ;;  %v1232_v21 = vperm.slane %v3919_v4, %v3854_v34 }
 0x198   : > { %v893_v32 = vsel %vm852_vm0, 0, %v892_v16  ;;  %v952_v9 = vsel %vm852_vm0, %v951_v22, %v865_v54  ;;  %v1238_v33 = vperm.slane %v3929_v14, %v3854_v34  ;;  %v4005_v37 = vsel %vm852_vm0, %v892_v16, %v885_v12  ;;  %v771_v14 = vpop.f32.mrf.mxu2 }
 0x199   : > { %v891_v36 = vsel %vm852_vm0, 0, %v890_v25  ;;  %v1220_v38 = vrot.slane %v1219_v29, 4  ;;  %v1247_v30 = vsel %vm852_vm0, %v3925_v8, %v3909_v60  ;;  %v970_v56 = vrot.slane %v893_v32, 4 }
 0x19a   : > { %v1239_v39 = vrot.slane %v1238_v33, 4  ;;  %v1251_v3 = vperm.slane %v1247_v30, %v3854_v34  ;;  %v1253_v4 = vsel %vm852_vm0, %v1252_v26, %v3923_v7  ;;  %v1269_v41 = vshrl.u32 %v1206_v1, 16 }
 0x19b   : > { %v1221_v17 = vsel %vm852_vm0, %v1220_v38, %v1213_v35  ;;  %v1257_v40 = vperm.slane %v1253_v4, %v3854_v34  ;;  %v782_v60 = vperm.slane %v3821_v13, 2  ;;  %v1207_v43 = vrot.slane %v1206_v1, 4 }
 0x19c   : > { %v1225_v8 = vperm.slane %v1221_v17, %v3857_v47  ;;  %v1240_v42 = vsel %vm852_vm0, %v1239_v39, %v1232_v21  ;;  %v956_v20 = vperm.slane %v952_v9, %v3854_v34  ;;  %v969_v35 = vperm.slane %v4005_v37, %v3854_v34 }
 0x19d   : > { %v1244_v7 = vperm.slane %v1240_v42, %v3857_v47  ;;  %v1258_v26 = vrot.slane %v1257_v40, 4  ;;  %v783_v19 = vadd.f32 %v782_v60, %v771_v14  ;;  %v4030_v46 = vsel %vm852_vm0, 0, %v1207_v43 }
 0x19e   : > { %v1268_v44 = vpack.i.b16 %v1225_v8, %v1206_v1  ;;  %v1270_v45 = vshrl.u32 %v1225_v8, 16  ;;  %v1226_v31 = vrot.slane %v1225_v8, 4  ;;  %v1275_v57 = vshrl.u32 %v4030_v46, 16 }
 0x19f   : > { %v1259_v48 = vsel %vm852_vm0, %v1258_v26, %v1251_v3  ;;  %v1281_v49 = vshrl.u32 %v1244_v7, 16  ;;  %v4033_v50 = vpack.c.bf16 %v783_v19, %v783_v19  ;;  %v1245_v51 = vrot.slane %v1244_v7, 4 }
 0x1a0   : > { %v1263_v52 = vperm.slane %v1259_v48, %v3857_v47  ;;  %v1537_v53 = vunpack.c.l.b16 %v1268_v44  ;;  %v1271_v58 = vpack.i.b16 %v1270_v45, %v1269_v41  ;;  %v1227_v59 = vsel %vm852_vm0, 0, %v1226_v31  ;;  %v773_v42 = vpop.f32.mrf.mxu2 }
 0x1a1   : > { %v1246_v28 = vsel %vm852_vm0, 0, %v1245_v51  ;;  %v1276_v61 = vshrl.u32 %v1227_v59, 16  ;;  %1294 = vrot.lane.b32.xlu1 %v4033_v50, %s3552_s13  ;;  %v957_v62 = vrot.slane %v956_v20, 4  ;;  %1298 = vrot.lane.b32.xlu0 %v4033_v50, %s3551_s4  ;;  %v971_v16 = vsel %vm852_vm0, %v970_v56, %v891_v36 }
 0x1a2   : > { %v1280_v0 = vpack.i.b16 %v1263_v52, %v1244_v7  ;;  %v1282_v55 = vshrl.u32 %v1263_v52, 16  ;;  %v1564_v1 = vunpack.c.l.b16 %v1271_v58  ;;  %v1264_v63 = vrot.slane %v1263_v52, 4 }
 0x1a3   : > { %v1277_v2 = vpack.i.b16 %v1276_v61, %v1275_v57  ;;  %v1287_v54 = vshrl.u32 %v1246_v28, 16  ;;  %v958_v12 = vsel %vm852_vm0, %v957_v62, %v950_v27  ;;  %v975_v21 = vperm.slane %v971_v16, %v3854_v34 }
 0x1a4   : > { %v1538_v18 = vunpack.c.l.b16 %v1280_v0  ;;  %v1283_v22 = vpack.i.b16 %v1282_v55, %v1281_v49  ;;  %v1265_v25 = vsel %vm852_vm0, 0, %v1264_v63  ;;  %v4047_v29 = vperm.slane %v958_v12, %v3857_v47 }
 0x1a5   : > { %v1288_v32 = vshrl.u32 %v1265_v25, 16  ;;  %v1616_v9 = vunpack.c.l.b16 %v1277_v2  ;;  %v994_v33 = vperm.slane %v3984_v10, %v3854_v34  ;;  %v1007_v27 = vperm.slane %v3987_v11, %v3854_v34 }
 0x1a6   : > { %v1539_v37 = vpack.c.b16 %v1538_v18, %v1537_v53  ;;  %v1565_v38 = vunpack.c.l.b16 %v1283_v22  ;;  %v1009_v36 = vsel %vm852_vm0, %v1008_v15, %v3993_v24  ;;  %v976_v56 = vrot.slane %v975_v21, 4 }
 0x1a7   : > { %v1289_v30 = vpack.i.b16 %v1288_v32, %v1287_v54  ;;  %v995_v39 = vrot.slane %v994_v33, 4  ;;  %v1013_v3 = vperm.slane %v1009_v36, %v3854_v34  ;;  %v1274_v10 = vpack.i.b16 %v1227_v59, %v4030_v46 }
 0x1a8   : > { %v1545_v4 = vsel %vm1540_vm1, %v1539_v37, 0  ;;  %v1566_v14 = vpack.c.b16 %v1565_v38, %v1564_v1  ;;  %v1286_v17 = vpack.i.b16 %v1265_v25, %v1246_v28  ;;  %v977_v11 = vsel %vm852_vm0, %v976_v56, %v969_v35 }
 0x1a9   : > { %1554 = vmatpush.bf16.xpose.msra.mxu3 %v1545_v4  ;;  %v1617_v40 = vunpack.c.l.b16 %v1289_v30  ;;  %v996_v5 = vsel %vm852_vm0, %v995_v39, %v988_v6  ;;  %v1014_v15 = vrot.slane %v1013_v3, 4  ;;  %v981_v41 = vperm.slane %v977_v11, %v3857_v47 }
 0x1aa   : > { %v1571_v24 = vsel %vm1540_vm1, %v1566_v14, 0  ;;  %v1000_v8 = vperm.slane %v996_v5, %v3857_v47  ;;  %v1591_v7 = vunpack.c.l.b16 %v1286_v17  ;;  %v963_v26 = vrot.slane %v4047_v29, 4 }
 0x1ab   : > { %v1618_v43 = vpack.c.b16 %v1617_v40, %v1616_v9  ;;  %v1015_v20 = vsel %vm852_vm0, %v1014_v15, %v1007_v27  ;;  %v1024_v23 = vpack.i.b16 %v981_v41, %v4047_v29  ;;  %v982_v6 = vrot.slane %v981_v41, 4 }
 0x1ac   : > { %v1019_v19 = vperm.slane %v1015_v20, %v3857_v47  ;;  %v1001_v35 = vrot.slane %v1000_v8, 4  ;;  %v1590_v45 = vunpack.c.l.b16 %v1274_v10  ;;  %v964_v46 = vsel %vm852_vm0, 0, %v963_v26 }
 0x1ad   : > { %v1623_v44 = vsel %vm1540_vm1, %v1618_v43, 0  ;;  %v784_v31 = vadd.f32 %v782_v60, %v773_v42  ;;  %v1534_v49 = vunpack.c.l.b16 %v1024_v23  ;;  %v983_v51 = vsel %vm852_vm0, 0, %v982_v6 }
 0x1ae   : > { %1632 = vmatpush.bf16.xpose.msrb.mxu0 %v1623_v44  ;;  %v1036_v48 = vpack.i.b16 %v1019_v19, %v1000_v8  ;;  %v1592_v52 = vpack.c.b16 %v1591_v7, %v1590_v45  ;;  %v1002_v53 = vsel %vm852_vm0, 0, %v1001_v35  ;;  %v1020_v58 = vrot.slane %v1019_v19, 4 }
 0x1af   : > { %v1031_v28 = vshrl.u32 %v964_v46, 16  ;;  %v1032_v57 = vshrl.u32 %v983_v51, 16  ;;  %v4079_v61 = vpack.c.bf16 %v784_v31, %v784_v31  ;;  %v1043_v13 = vshrl.u32 %v1002_v53, 16 }
 0x1b0   : > { %v1535_v59 = vunpack.c.l.b16 %v1036_v48  ;;  %v1021_v62 = vsel %vm852_vm0, 0, %v1020_v58  ;;  %v1597_v1 = vsel %vm1540_vm1, %v1592_v52, 0  ;;  %v1026_v12 = vshrl.u32 %v981_v41, 16 }
 0x1b1   : > { %1580 = vmatpush.bf16.xpose.msrb.mxu3 %v1571_v24  ;;  %v1033_v55 = vpack.i.b16 %v1032_v57, %v1031_v28  ;;  %v1044_v60 = vshrl.u32 %v1021_v62, 16  ;;  %1296 = vrot.lane.b32.xlu2 %v4079_v61, %s3552_s13  ;;  %v1038_v16 = vshrl.u32 %v1019_v19, 16  ;;  %v1025_v22 = vshrl.u32 %v4047_v29, 16 }
 0x1b2   : > { %v1536_v0 = vpack.c.b16 %v1535_v59, %v1534_v49  ;;  %v1037_v25 = vshrl.u32 %v1000_v8, 16  ;;  %v1030_v38 = vpack.i.b16 %v983_v51, %v964_v46  ;;  %v1042_v27 = vpack.i.b16 %v1021_v62, %v1002_v53 }
 0x1b3   : > { %v1045_v63 = vpack.i.b16 %v1044_v60, %v1043_v13  ;;  %v1613_v2 = vunpack.c.l.b16 %v1033_v55  ;;  %v1027_v32 = vpack.i.b16 %v1026_v12, %v1025_v22  ;;  %v1647_v39 = vlaneseq }
 0x1b4   : > { %2940 = vmatmul.msk.bf16.vlgmr.msra.gmra.mxu3 %vm1540_vm1, %v1536_v0  ;;  %v1039_v9 = vpack.i.b16 %v1038_v16, %v1037_v25  ;;  %v1587_v36 = vunpack.c.l.b16 %v1030_v38  ;;  %v1588_v30 = vunpack.c.l.b16 %v1042_v27  ;;  %v1309_v38 = vshrl.u32 %v4033_v50, 16 }
 0x1b5   : > { %v1614_v54 = vunpack.c.l.b16 %v1045_v63  ;;  %v1561_v21 = vunpack.c.l.b16 %v1027_v32  ;;  %v1648_v3 = vand.u32 127, %v1647_v39 }
 0x1b6   : > { %v1562_v33 = vunpack.c.l.b16 %v1039_v9  ;;  %v1589_v56 = vpack.c.b16 %v1588_v30, %v1587_v36 }
 0x1b7   : > { %v1615_v18 = vpack.c.b16 %v1614_v54, %v1613_v2  ;;  %vm1649_vm2 = vcmp.lt.s32.totalorder %v1648_v3, 9 }
 0x1b8   : > { %v1563_v37 = vpack.c.b16 %v1562_v33, %v1561_v21 }
 0x1b9   : > { %1606 = vmatpush.bf16.xpose.msra.mxu3 %v1597_v1  ;;  %2943 = vmatmul.msk.bf16.vlgmr.msrb.gmra.mxu0 %vm1540_vm1, %v1615_v18 }
 0x1c4   : > { %2941 = vmatmul.msk.bf16.vlgmr.msrb.gmra.mxu3 %vm1540_vm1, %v1563_v37 }
 0x1d4   : > { %2942 = vmatmul.msk.bf16.vlgmr.msra.gmra.mxu3 %vm1540_vm1, %v1589_v56 }
 0x20b   : > { %v4125_v12 = vpop.permute.xlu2 %1296 }
 0x213   : > { %v1299_v28 = vpop.permute.xlu0 %1298  ;;  %v1295_v57 = vpop.permute.xlu1 %1294 }
 0x214   : > { %v1310_v27 = vshrl.u32 %v1295_v57, 16  ;;  %v1308_v30 = vpack.i.b16 %v1295_v57, %v4033_v50 }
 0x216   : > { %v1311_v56 = vpack.i.b16 %v1310_v27, %v1309_v38 }
 0x236   : > { %v1634_v29 = vpop.f32.mrf.mxu0 }
 0x237   : > { %v1556_v4 = vpop.f32.mrf.mxu3  ;;  %v1645_v14 = vmul.f32 0.17677669, %v1634_v29 }
 0x238   : > { %v1639_v10 = vmul.f32 0.17677669, %v1556_v4 }
 0x239   : > { %v4091_v17 = vsel %vm1649_vm2, %v1645_v14, -1e+30  ;;  %v1334_v14 = vperm.slane %v1308_v30, %v3854_v34 }
 0x23a   : > { %v1652_v40 = vsel %vm1649_vm2, %v1639_v10, -1e+30  ;;  %v1679_v11 = vsel %vm1660_vm3, %v4091_v17, -inf }
 0x23b   : > { %v1661_v5 = vsel %vm1660_vm3, %v1652_v40, -inf  ;;  %1680 = vmax.xlane.f32.xlu2 %v1679_v11 }
 0x23c   : > { %1662 = vmax.xlane.f32.xlu0 %v1661_v5 }
 0x23e   : > { %v1636_v15 = vpop.f32.mrf.mxu0 }
 0x23f   : > { %v1558_v24 = vpop.f32.mrf.mxu3  ;;  %v1646_v41 = vmul.f32 0.17677669, %v1636_v15  ;;  %v1315_v15 = vshrl.u32 %v1299_v28, 16 }
 0x240   : > { %v1640_v8 = vmul.f32 0.17677669, %v1558_v24 }
 0x241   : > { %v1659_v43 = vsel %vm1649_vm2, %v1646_v41, -1e+30 }
 0x242   : > { %v1653_v42 = vsel %vm1649_vm2, %v1640_v8, -1e+30  ;;  %v1682_v7 = vsel %vm1660_vm3, %v1659_v43, -inf  ;;  %v1342_v8 = vrot.slane %v1334_v14, 4 }
 0x243   : > { %v1664_v20 = vsel %vm1660_vm3, %v1653_v42, -inf }
 0x244   : > { %1665 = vmax.xlane.f32.xlu1 %v1664_v20  ;;  %1683 = vmax.xlane.f32.xlu0 %v1682_v7  ;;  %v1321_v7 = vshrl.u32 %v4079_v61, 16 }
 0x247   : > { %v1582_v26 = vpop.f32.mrf.mxu3 }
 0x248   : > { %v1641_v19 = vmul.f32 0.17677669, %v1582_v26  ;;  %v1322_v26 = vshrl.u32 %v4125_v12, 16 }
 0x24a   : > { %v1654_v23 = vsel %vm1649_vm2, %v1641_v19, -1e+30 }
 0x24b   : > { %v1667_v6 = vsel %vm1660_vm3, %v1654_v23, -inf }
 0x24c   : > { %1668 = vmax.xlane.f32.xlu0 %v1667_v6 }
 0x24f   : > { %v1584_v35 = vpop.f32.mrf.mxu3 }
 0x250   : > { %v1642_v44 = vmul.f32 0.17677669, %v1584_v35 }
 0x252   : > { %v4104_v45 = vsel %vm1649_vm2, %v1642_v44, -1e+30 }
 0x253   : > { %v1670_v46 = vsel %vm1660_vm3, %v4104_v45, -inf }
 0x254   : > { %1671 = vmax.xlane.f32.xlu1 %v1670_v46 }
 0x257   : > { %v1608_v31 = vpop.f32.mrf.mxu3 }
 0x258   : > { %v1643_v48 = vmul.f32 0.17677669, %v1608_v31 }
 0x25a   : > { %v1656_v49 = vsel %vm1649_vm2, %v1643_v48, -1e+30 }
 0x25b   : > { %v1673_v51 = vsel %vm1660_vm3, %v1656_v49, -inf }
 0x25c   : > { %1674 = vmax.xlane.f32.xlu2 %v1673_v51 }
 0x25f   : > { %v1610_v52 = vpop.f32.mrf.mxu3 }
 0x260   : > { %v1644_v53 = vmul.f32 0.17677669, %v1610_v52  ;;  %1302 = vrot.lane.b32.xlu0 %v4033_v50, %s3550_s0 }
 0x262   : > { %v4113_v58 = vsel %vm1649_vm2, %v1644_v53, -1e+30 }
 0x263   : > { %v1676_v59 = vsel %vm1660_vm3, %v4113_v58, -inf }
 0x264   : > { %1677 = vmax.xlane.f32.xlu2 %v1676_v59 }
 0x26d   : > { %1300 = vrot.lane.b32.xlu1 %v4079_v61, %s3551_s4 }
 0x27c   : > { %1304 = vrot.lane.b32.xlu2 %v4079_v61, %s3550_s0 }
 0x2ae   : > { %v1681_v33 = vpop.xlane.xlu2 %1680 }
 0x2af   : > { %v1663_v62 = vpop.xlane.xlu0 %1662  ;;  %v1691_v46 = vsub.f32 %v4091_v17, %v1681_v33 }
 0x2b0   : > { %v1685_v0 = vsub.f32 %v1652_v40, %v1663_v62  ;;  %v1360_v40 = vperm.slane %v1311_v56, %v3854_v34  ;;  %v1323_v62 = vpack.i.b16 %v1322_v26, %v1321_v7 }
 0x2b2   : > { %v1693_v55 = vmul.f32 1.442695, %v1685_v0  ;;  %v1368_v19 = vrot.slane %v1360_v40, 4 }
 0x2b4   : > { %3298 = vpow2.f32 %v1693_v55 }
 0x2b7   : > { %v1666_v13 = vpop.xlane.xlu1 %1665  ;;  %v1684_v60 = vpop.xlane.xlu0 %1683 }
 0x2b8   : > { %v1686_v1 = vsub.f32 %v1653_v42, %v1666_v13  ;;  %v1692_v25 = vsub.f32 %v1659_v43, %v1684_v60 }
 0x2ba   : > { %v1695_v63 = vmul.f32 1.442695, %v1686_v1  ;;  %v4121_v2 = vpop.eup %3298  ;;  %v1707_v21 = vmul.f32 1.442695, %v1692_v25 }
 0x2bb   : > { %v1709_v54 = vsel %vm1660_vm3, %v4121_v2, 0.0 }
 0x2bc   : > { %3300 = vpow2.f32 %v1695_v63  ;;  %1710 = vadd.xlane.f32.xlu1 %v1709_v54  ;;  %v1705_v63 = vmul.f32 1.442695, %v1691_v46 }
 0x2bf   : > { %v1669_v16 = vpop.xlane.xlu0 %1668 }
 0x2c0   : > { %v1687_v18 = vsub.f32 %v1654_v23, %v1669_v16 }
 0x2c2   : > { %v4127_v22 = vpop.eup %3300  ;;  %v1697_v32 = vmul.f32 1.442695, %v1687_v18 }
 0x2c3   : > { %v1712_v9 = vsel %vm1660_vm3, %v4127_v22, 0.0 }
 0x2c4   : > { %3302 = vpow2.f32 %v1697_v32  ;;  %1713 = vadd.xlane.f32.xlu0 %v1712_v9  ;;  %v1412_v32 = vperm.slane %v1323_v62, %v3854_v34 }
 0x2c5   : > { %3304 = vpow2.f32 %v1707_v21 }
 0x2c7   : > { %v1672_v39 = vpop.xlane.xlu1 %1671 }
 0x2c8   : > { %v1688_v10 = vsub.f32 %v4104_v45, %v1672_v39  ;;  %v1320_v45 = vpack.i.b16 %v4125_v12, %v4079_v61 }
 0x2ca   : > { %v4131_v37 = vpop.eup %3302  ;;  %v1699_v42 = vmul.f32 1.442695, %v1688_v10  ;;  %v1386_v1 = vperm.slane %v1320_v45, %v3854_v34 }
 0x2cb   : > { %v1715_v36 = vsel %vm1660_vm3, %v4131_v37, 0.0  ;;  %v4137_v29 = vpop.eup %3304 }
 0x2cc   : > { %1716 = vadd.xlane.f32.xlu0 %v1715_v36  ;;  %v1730_v50 = vsel %vm1660_vm3, %v4137_v29, 0.0  ;;  %v1394_v39 = vrot.slane %v1386_v1, 4 }
 0x2cf   : > { %v1675_v3 = vpop.xlane.xlu2 %1674 }
 0x2d0   : > { %v1689_v4 = vsub.f32 %v1656_v49, %v1675_v3 }
 0x2d2   : > { %v1701_v11 = vmul.f32 1.442695, %v1689_v4  ;;  %v1303_v5 = vpop.permute.xlu0 %1302 }
 0x2d3   : > { %v1314_v24 = vpack.i.b16 %v1303_v5, %v1299_v28  ;;  %v1316_v41 = vshrl.u32 %v1303_v5, 16 }
 0x2d4   : > { %3306 = vpow2.f32 %v1701_v11  ;;  %1731 = vadd.xlane.f32.xlu0 %v1730_v50 }
 0x2d5   : > { %v1317_v43 = vpack.i.b16 %v1316_v41, %v1315_v15  ;;  %v1339_v20 = vperm.slane %v1314_v24, %v3854_v34  ;;  %3308 = vpow2.f32 %v1699_v42  ;;  %v1420_v15 = vrot.slane %v1412_v32, 4 }
 0x2d7   : > { %v1340_v23 = vrot.slane %v1339_v20, 4  ;;  %v1343_v6 = vsel %vm852_vm0, %v1339_v20, %v1342_v8  ;;  %v1365_v35 = vperm.slane %v1317_v43, %v3854_v34  ;;  %v1678_v44 = vpop.xlane.xlu2 %1677 }
 0x2d8   : > { %v1351_v31 = vperm.slane %v1343_v6, %v3857_v47  ;;  %v1690_v48 = vsub.f32 %v4113_v58, %v1678_v44 }
 0x2d9   : > { %v1341_v49 = vsel %vm852_vm0, %v1340_v23, %v1334_v14  ;;  %v1366_v51 = vrot.slane %v1365_v35, 4  ;;  %v1369_v52 = vsel %vm852_vm0, %v1365_v35, %v1368_v19 }
 0x2da   : > { %v4156_v53 = vpop.eup %3306  ;;  %v1347_v59 = vperm.slane %v1341_v49, %v3857_v47  ;;  %v1354_v28 = vrot.slane %v1351_v31, 4  ;;  %v1377_v57 = vperm.slane %v1369_v52, %v3857_v47  ;;  %v1703_v61 = vmul.f32 1.442695, %v1690_v48 }
 0x2db   : > { %v1367_v17 = vsel %vm852_vm0, %v1366_v51, %v1360_v40  ;;  %v1721_v58 = vsel %vm1660_vm3, %v4156_v53, 0.0  ;;  %v4168_v25 = vpop.eup %3308 }
 0x2dc   : > { %v1352_v0 = vrot.slane %v1347_v59, 4  ;;  %v1355_v55 = vsel %vm852_vm0, 0, %v1354_v28  ;;  %v1373_v13 = vperm.slane %v1367_v17, %v3857_v47  ;;  %v1380_v60 = vrot.slane %v1377_v57, 4  ;;  %1722 = vadd.xlane.f32.xlu2 %v1721_v58 }
 0x2dd   : > { %v1439_v54 = vrot.slane %v1355_v55, 4  ;;  %3310 = vpow2.f32 %v1703_v61  ;;  %v1434_v24 = vsel %vm852_vm0, %v1354_v28, %v1347_v59  ;;  %v1718_v41 = vsel %vm1660_vm3, %v4168_v25, 0.0 }
 0x2de   : > { %v1353_v12 = vsel %vm852_vm0, 0, %v1352_v0  ;;  %v1378_v16 = vrot.slane %v1373_v13, 4  ;;  %v1381_v18 = vsel %vm852_vm0, 0, %v1380_v60  ;;  %3312 = vpow2.f32 %v1705_v63 }
 0x2df   : > { %v1458_v9 = vrot.slane %v1381_v18, 4  ;;  %v1301_v21 = vpop.permute.xlu1 %1300  ;;  %v1305_v33 = vpop.permute.xlu2 %1304  ;;  %v1440_v38 = vsel %vm852_vm0, %v1439_v54, %v1353_v12  ;;  %v1453_v40 = vsel %vm852_vm0, %v1380_v60, %v1373_v13  ;;  %v1438_v44 = vperm.slane %v1434_v24, %v3854_v34 }
 0x2e0   : > { %v1379_v27 = vsel %vm852_vm0, 0, %v1378_v16  ;;  %v1327_v36 = vshrl.u32 %v1301_v21, 16  ;;  %v1326_v30 = vpack.i.b16 %v1305_v33, %v1301_v21  ;;  %v1328_v56 = vshrl.u32 %v1305_v33, 16 }
 0x2e1   : > { %v1444_v3 = vperm.slane %v1440_v38, %v3854_v34  ;;  %v1459_v4 = vsel %vm852_vm0, %v1458_v9, %v1379_v27  ;;  %v1457_v26 = vperm.slane %v1453_v40, %v3854_v34 }
 0x2e2   : > { %v1329_v14 = vpack.i.b16 %v1328_v56, %v1327_v36  ;;  %v1391_v10 = vperm.slane %v1326_v30, %v3854_v34  ;;  %v1463_v11 = vperm.slane %v1459_v4, %v3854_v34 }
 0x2e3   : > { %v4178_v5 = vpop.eup %3310  ;;  %v1445_v50 = vrot.slane %v1444_v3, 4 }
 0x2e4   : > { %v1392_v8 = vrot.slane %v1391_v10, 4  ;;  %v1395_v42 = vsel %vm852_vm0, %v1391_v10, %v1394_v39  ;;  %v1417_v43 = vperm.slane %v1329_v14, %v3854_v34  ;;  %1719 = vadd.xlane.f32.xlu2 %v1718_v41  ;;  %v1724_v20 = vsel %vm1660_vm3, %v4178_v5, 0.0  ;;  %v4192_v45 = vpop.eup %3312 }
 0x2e5   : > { %v1403_v7 = vperm.slane %v1395_v42, %v3857_v47  ;;  %1725 = vadd.xlane.f32.xlu1 %v1724_v20  ;;  %v1464_v19 = vrot.slane %v1463_v11, 4  ;;  %v1446_v52 = vsel %vm852_vm0, %v1445_v50, %v1438_v44  ;;  %v1727_v13 = vsel %vm1660_vm3, %v4192_v45, 0.0 }
 0x2e6   : > { %v1393_v23 = vsel %vm852_vm0, %v1392_v8, %v1386_v1  ;;  %v1418_v6 = vrot.slane %v1417_v43, 4  ;;  %v1421_v35 = vsel %vm852_vm0, %v1417_v43, %v1420_v15  ;;  %v1450_v63 = vperm.slane %v1446_v52, %v3857_v47 }
 0x2e7   : > { %v1399_v46 = vperm.slane %v1393_v23, %v3857_v47  ;;  %v1406_v31 = vrot.slane %v1403_v7, 4  ;;  %v1429_v48 = vperm.slane %v1421_v35, %v3857_v47  ;;  %v1465_v49 = vsel %vm852_vm0, %v1464_v19, %v1457_v26 }
 0x2e8   : > { %v1419_v51 = vsel %vm852_vm0, %v1418_v6, %v1412_v32  ;;  %v1469_v17 = vperm.slane %v1465_v49, %v3857_v47  ;;  %v1451_v27 = vrot.slane %v1450_v63, 4  ;;  %v1513_v10 = vshrl.u32 %v1450_v63, 16 }
 0x2e9   : > { %v1404_v59 = vrot.slane %v1399_v46, 4  ;;  %v1407_v28 = vsel %vm852_vm0, 0, %v1406_v31  ;;  %v1425_v57 = vperm.slane %v1419_v51, %v3857_v47  ;;  %v1432_v61 = vrot.slane %v1429_v48, 4 }
 0x2ea   : > { %v1477_v62 = vrot.slane %v1407_v28, 4  ;;  %v1472_v60 = vsel %vm852_vm0, %v1406_v31, %v1399_v46  ;;  %v1470_v9 = vrot.slane %v1469_v17, 4  ;;  %v1514_v39 = vshrl.u32 %v1469_v17, 16 }
 0x2eb   : > { %v1405_v58 = vsel %vm852_vm0, 0, %v1404_v59  ;;  %v1430_v0 = vrot.slane %v1425_v57, 4  ;;  %v1433_v55 = vsel %vm852_vm0, 0, %v1432_v61  ;;  %v1491_v18 = vsel %vm852_vm0, %v1432_v61, %v1425_v57 }
 0x2ec   : > { %v1496_v1 = vrot.slane %v1433_v55, 4  ;;  %v1478_v54 = vsel %vm852_vm0, %v1477_v62, %v1405_v58  ;;  %v1476_v21 = vperm.slane %v1472_v60, %v3854_v34  ;;  %v1495_v30 = vperm.slane %v1491_v18, %v3854_v34 }
 0x2ed   : > { %v1431_v12 = vsel %vm852_vm0, 0, %v1430_v0  ;;  %1728 = vadd.xlane.f32.xlu1 %v1727_v13  ;;  %v1482_v16 = vperm.slane %v1478_v54, %v3854_v34  ;;  %v1471_v4 = vsel %vm852_vm0, 0, %v1470_v9  ;;  %v1512_v11 = vpack.i.b16 %v1469_v17, %v1450_v63 }
 0x2ee   : > { %v1497_v32 = vsel %vm852_vm0, %v1496_v1, %v1431_v12  ;;  %v1452_v15 = vsel %vm852_vm0, 0, %v1451_v27  ;;  %v1515_v41 = vpack.i.b16 %v1514_v39, %v1513_v10  ;;  %v1520_v8 = vshrl.u32 %v1471_v4, 16 }
 0x2ef   : > { %v1483_v33 = vrot.slane %v1482_v16, 4  ;;  %v1501_v38 = vperm.slane %v1497_v32, %v3854_v34  ;;  %v1518_v26 = vpack.i.b16 %v1471_v4, %v1452_v15  ;;  %v1519_v19 = vshrl.u32 %v1452_v15, 16 }
 0x2f0   : > { %v1762_v23 = vunpack.c.l.b16 %v1512_v11  ;;  %v1788_v52 = vunpack.c.l.b16 %v1515_v41 }
 0x2f1   : > { %v1484_v36 = vsel %vm852_vm0, %v1483_v33, %v1476_v21  ;;  %v1502_v56 = vrot.slane %v1501_v38, 4  ;;  %v1521_v31 = vpack.i.b16 %v1520_v8, %v1519_v19  ;;  %v1814_v28 = vunpack.c.l.b16 %v1518_v26 }
 0x2f2   : > { %v1488_v3 = vperm.slane %v1484_v36, %v3857_v47 }
 0x2f3   : > { %v1503_v14 = vsel %vm852_vm0, %v1502_v56, %v1495_v30  ;;  %v1840_v58 = vunpack.c.l.b16 %v1521_v31 }
 0x2f4   : > { %v1507_v40 = vperm.slane %v1503_v14, %v3857_v47  ;;  %v1489_v24 = vrot.slane %v1488_v3, 4  ;;  %v1525_v50 = vshrl.u32 %v1488_v3, 16 }
 0x2f6   : > { %v1524_v42 = vpack.i.b16 %v1507_v40, %v1488_v3  ;;  %v1526_v43 = vshrl.u32 %v1507_v40, 16  ;;  %v1490_v20 = vsel %vm852_vm0, 0, %v1489_v24  ;;  %v1508_v7 = vrot.slane %v1507_v40, 4 }
 0x2f7   : > { %v1531_v48 = vshrl.u32 %v1490_v20, 16 }
 0x2f8   : > { %v1763_v6 = vunpack.c.l.b16 %v1524_v42  ;;  %v1527_v35 = vpack.i.b16 %v1526_v43, %v1525_v50  ;;  %v1509_v44 = vsel %vm852_vm0, 0, %v1508_v7 }
 0x2f9   : > { %v1530_v46 = vpack.i.b16 %v1509_v44, %v1490_v20  ;;  %v1532_v49 = vshrl.u32 %v1509_v44, 16 }
 0x2fa   : > { %v1764_v51 = vpack.c.b16 %v1763_v6, %v1762_v23  ;;  %v1789_v59 = vunpack.c.l.b16 %v1527_v35 }
 0x2fb   : > { %v1815_v57 = vunpack.c.l.b16 %v1530_v46  ;;  %v1533_v61 = vpack.i.b16 %v1532_v49, %v1531_v48 }
 0x2fc   : > { %1776 = vmatpush.bf16.msrb.mxu2 %v1764_v51  ;;  %v1790_v62 = vpack.c.b16 %v1789_v59, %v1788_v52 }
 0x2fd   : > { %v1816_v17 = vpack.c.b16 %v1815_v57, %v1814_v28  ;;  %v1841_v0 = vunpack.c.l.b16 %v1533_v61 }
 0x2ff   : > { %1828 = vmatpush.bf16.msrb.mxu3 %v1816_v17  ;;  %v1842_v55 = vpack.c.b16 %v1841_v0, %v1840_v58 }
 0x300   : > { %1802 = vmatpush.bf16.msra.mxu2 %v1790_v62 }
 0x301   : > { %1854 = vmatpush.bf16.msra.mxu0 %v1842_v55 }
 0x32f   : > { %v1711_v13 = vpop.xlane.xlu1 %1710 }
 0x330   : > { %3314 = vrcp.f32 %v1711_v13 }
 0x336   : > { %v3315_v1 = vpop.eup %3314 }
 0x337   : > { %v1714_v60 = vpop.xlane.xlu0 %1713  ;;  %v1741_v63 = vmul.f32 %v3315_v1, %v4121_v2 }
 0x338   : > { %3316 = vrcp.f32 %v1714_v60 }
 0x339   : > { %v1749_v12 = vpack.c.bf16 %v1741_v63, %v1741_v63 }
 0x33b   : > { %v1759_v32 = vunpack.c.l.b16 %v1749_v12 }
 0x33e   : > { %v3317_v54 = vpop.eup %3316 }
 0x33f   : > { %v1742_v16 = vmul.f32 %v3317_v54, %v4127_v22  ;;  %v1717_v33 = vpop.xlane.xlu0 %1716 }
 0x340   : > { %3318 = vrcp.f32 %v1717_v33 }
 0x341   : > { %v1750_v18 = vpack.c.bf16 %v1742_v16, %v1742_v16 }
 0x343   : > { %v1760_v9 = vunpack.c.l.b16 %v1750_v18 }
 0x345   : > { %v1761_v21 = vpack.c.b16 %v1760_v9, %v1759_v32 }
 0x346   : > { %v3319_v36 = vpop.eup %3318 }
 0x347   : > { %2944 = vmatmul.msk.bf16.vlgmr.msrb.gmra.mxu2 %vm1660_vm3, %v1761_v21  ;;  %v1732_v30 = vpop.xlane.xlu0 %1731  ;;  %v1743_v39 = vmul.f32 %v3319_v36, %v4131_v37  ;;  %v3147_v36 = vld [vmem:[%s3732_s27 + $0x38] sm:$0xff] }
 0x348   : > { %2164 = vmatpush.bf16.msrb.mxu1 %v3147_v36 }
 0x349   : > { %v1751_v14 = vpack.c.bf16 %v1743_v39, %v1743_v39 }
 0x34b   : > { %v1785_v8 = vunpack.c.l.b16 %v1751_v14 }
 0x34f   : > { %v1723_v38 = vpop.xlane.xlu2 %1722 }
 0x350   : > { %3320 = vrcp.f32 %v1723_v38 }
 0x356   : > { %v3321_v2 = vpop.eup %3320 }
 0x357   : > { %v1720_v27 = vpop.xlane.xlu2 %1719  ;;  %v1745_v22 = vmul.f32 %v3321_v2, %v4156_v53 }
 0x358   : > { %v1726_v56 = vpop.xlane.xlu1 %1725  ;;  %3322 = vrcp.f32 %v1720_v27 }
 0x359   : > { %3324 = vrcp.f32 %v1726_v56  ;;  %v1753_v40 = vpack.c.bf16 %v1745_v22, %v1745_v22 }
 0x35a   : > { %3326 = vrcp.f32 %v1732_v30 }
 0x35b   : > { %v1811_v43 = vunpack.c.l.b16 %v1753_v40 }
 0x35e   : > { %v3323_v3 = vpop.eup %3322 }
 0x35f   : > { %v3325_v4 = vpop.eup %3324  ;;  %v1744_v10 = vmul.f32 %v3323_v3, %v4168_v25 }
 0x360   : > { %v1746_v11 = vmul.f32 %v3325_v4, %v4178_v5  ;;  %v1729_v15 = vpop.xlane.xlu1 %1728  ;;  %v3327_v24 = vpop.eup %3326 }
 0x361   : > { %v1752_v41 = vpack.c.bf16 %v1744_v10, %v1744_v10  ;;  %3328 = vrcp.f32 %v1729_v15  ;;  %v1748_v37 = vmul.f32 %v3327_v24, %v4137_v29 }
 0x362   : > { %v1754_v50 = vpack.c.bf16 %v1746_v11, %v1746_v11 }
 0x363   : > { %v1786_v42 = vunpack.c.l.b16 %v1752_v41  ;;  %v1756_v25 = vpack.c.bf16 %v1748_v37, %v1748_v37 }
 0x364   : > { %v1812_v20 = vunpack.c.l.b16 %v1754_v50 }
 0x365   : > { %v1787_v53 = vpack.c.b16 %v1786_v42, %v1785_v8  ;;  %v1838_v23 = vunpack.c.l.b16 %v1756_v25 }
 0x366   : > { %v1813_v7 = vpack.c.b16 %v1812_v20, %v1811_v43 }
 0x367   : > { %v3329_v26 = vpop.eup %3328  ;;  %2945 = vmatmul.msk.bf16.vlgmr.msra.gmra.mxu2 %vm1660_vm3, %v1787_v53 }
 0x368   : > { %v1747_v19 = vmul.f32 %v3329_v26, %v4192_v45  ;;  %2946 = vmatmul.msk.bf16.vlgmr.msrb.gmra.mxu3 %vm1660_vm3, %v1813_v7 }
 0x36a   : > { %v1755_v5 = vpack.c.bf16 %v1747_v19, %v1747_v19 }
 0x36c   : > { %v1837_v6 = vunpack.c.l.b16 %v1755_v5 }
 0x36e   : > { %v1839_v35 = vpack.c.b16 %v1838_v23, %v1837_v6 }
 0x370   : > { %2947 = vmatmul.msk.bf16.vlgmr.msra.gmra.mxu0 %vm1660_vm3, %v1839_v35 }
 0x3ca   : > { %v1778_v44 = vpop.f32.mrf.mxu2 }
 0x3cb   : > { %v1864_v46 = vrot.slane %v1778_v44, 4 }
 0x3d2   : > { %v1780_v29 = vpop.f32.mrf.mxu2 }
 0x3d3   : > { %v1920_v12 = vrot.slane %v1780_v29, 4 }
 0x3ea   : > { %v1804_v31 = vpop.f32.mrf.mxu2 }
 0x3eb   : > { %v1876_v48 = vrot.slane %v1804_v31, 4  ;;  %v1830_v49 = vpop.f32.mrf.mxu3 }
 0x3ec   : > { %v1861_v51 = vrot.slane %v1830_v49, 4  ;;  %v1865_v52 = vsel %vm852_vm0, %v1830_v49, %v1864_v46 }
 0x3ed   : > { %v1873_v59 = vperm.slane %v1865_v52, %v3854_v34  ;;  %v1856_v45 = vpop.f32.mrf.mxu0 }
 0x3ee   : > { %v1863_v28 = vsel %vm852_vm0, %v1861_v51, %v1778_v44  ;;  %v1874_v57 = vrot.slane %v1856_v45, 4  ;;  %v1877_v61 = vsel %vm852_vm0, %v1856_v45, %v1876_v48 }
 0x3ef   : > { %v1869_v62 = vperm.slane %v1863_v28, %v3854_v34  ;;  %v1900_v17 = vrot.slane %v1873_v59, 4  ;;  %v1885_v58 = vperm.slane %v1877_v61, %v3854_v34 }
 0x3f0   : > { %v1875_v0 = vsel %vm852_vm0, %v1874_v57, %v1804_v31 }
 0x3f1   : > { %v1888_v55 = vrot.slane %v1869_v62, 4  ;;  %v1881_v13 = vperm.slane %v1875_v0, %v3854_v34  ;;  %v1898_v60 = vrot.slane %v1885_v58, 4  ;;  %v1901_v1 = vsel %vm852_vm0, %v1885_v58, %v1900_v17 }
 0x3f2   : > { %v1909_v63 = vperm.slane %v1901_v1, %v3857_v47  ;;  %v1806_v54 = vpop.f32.mrf.mxu2 }
 0x3f3   : > { %v1886_v16 = vrot.slane %v1881_v13, 4  ;;  %v1889_v18 = vsel %vm852_vm0, %v1881_v13, %v1888_v55  ;;  %v1899_v32 = vsel %vm852_vm0, %v1898_v60, %v1873_v59  ;;  %v1832_v9 = vpop.f32.mrf.mxu3  ;;  %v1932_v56 = vrot.slane %v1806_v54, 4 }
 0x3f4   : > { %v1897_v21 = vperm.slane %v1889_v18, %v3857_v47  ;;  %v1905_v33 = vperm.slane %v1899_v32, %v3857_v47  ;;  %v1916_v38 = vrot.slane %v1909_v63, 4  ;;  %v1918_v27 = vrot.slane %v1832_v9, 4 }
 0x3f5   : > { %v1887_v30 = vsel %vm852_vm0, %v1886_v16, %v1869_v62  ;;  %v1921_v2 = vsel %vm852_vm0, %v1832_v9, %v1920_v12  ;;  %v1858_v15 = vpop.f32.mrf.mxu0 }
 0x3f6   : > { %v1893_v39 = vperm.slane %v1887_v30, %v3857_v47  ;;  %v1912_v22 = vrot.slane %v1897_v21, 4  ;;  %v1914_v3 = vrot.slane %v1905_v33, 4  ;;  %v1917_v4 = vsel %vm852_vm0, 0.0, %v1916_v38 }
 0x3f7   : > { %v1985_v14 = vsel %vm852_vm0, %v1916_v38, %v1905_v33  ;;  %v1990_v10 = vrot.slane %v1917_v4, 4  ;;  %v1919_v40 = vsel %vm852_vm0, %v1918_v27, %v1780_v29  ;;  %v1929_v11 = vperm.slane %v1921_v2, %v3854_v34 }
 0x3f8   : > { %v1910_v24 = vrot.slane %v1893_v39, 4  ;;  %v1913_v41 = vsel %vm852_vm0, 0.0, %v1912_v22  ;;  %v1915_v50 = vsel %vm852_vm0, 0.0, %v1914_v3  ;;  %v1974_v8 = vsel %vm852_vm0, %v1912_v22, %v1893_v39 }
 0x3f9   : > { %v1979_v42 = vrot.slane %v1913_v41, 4  ;;  %v1989_v37 = vperm.slane %v1985_v14, %v3854_v34  ;;  %v1991_v43 = vsel %vm852_vm0, %v1990_v10, %v1915_v50  ;;  %v1925_v20 = vperm.slane %v1919_v40, %v3854_v34 }
 0x3fa   : > { %v1995_v53 = vperm.slane %v1991_v43, %v3854_v34  ;;  %v1956_v7 = vrot.slane %v1929_v11, 4  ;;  %v1930_v26 = vrot.slane %v1858_v15, 4  ;;  %v1933_v25 = vsel %vm852_vm0, %v1858_v15, %v1932_v56 }
 0x3fb   : > { %v2010_v19 = vrot.slane %v1989_v37, 4  ;;  %v1944_v5 = vrot.slane %v1925_v20, 4  ;;  %v1941_v23 = vperm.slane %v1933_v25, %v3854_v34  ;;  %v1911_v6 = vsel %vm852_vm0, 0.0, %v1910_v24 }
 0x3fc   : > { %v1931_v35 = vsel %vm852_vm0, %v1930_v26, %v1806_v54  ;;  %v1978_v44 = vperm.slane %v1974_v8, %v3854_v34  ;;  %v1980_v29 = vsel %vm852_vm0, %v1979_v42, %v1911_v6  ;;  %v2008_v46 = vrot.slane %v1995_v53, 4 }
 0x3fd   : > { %v1937_v31 = vperm.slane %v1931_v35, %v3854_v34  ;;  %v1954_v48 = vrot.slane %v1941_v23, 4  ;;  %v1957_v49 = vsel %vm852_vm0, %v1941_v23, %v1956_v7  ;;  %v1984_v51 = vperm.slane %v1980_v29, %v3854_v34 }
 0x3fe   : > { %v1965_v52 = vperm.slane %v1957_v49, %v3857_v47  ;;  %v1998_v57 = vrot.slane %v1978_v44, 4  ;;  %v2011_v58 = vsel %vm852_vm0, %v1995_v53, %v2010_v19  ;;  %v2009_v13 = vsel %vm852_vm0, %v2008_v46, %v1989_v37 }
 0x3ff   : > { %v1942_v59 = vrot.slane %v1937_v31, 4  ;;  %v1945_v45 = vsel %vm852_vm0, %v1937_v31, %v1944_v5  ;;  %v1955_v28 = vsel %vm852_vm0, %v1954_v48, %v1929_v11  ;;  %v1996_v55 = vrot.slane %v1984_v51, 4 }
 0x400   : > { %v1953_v61 = vperm.slane %v1945_v45, %v3857_v47  ;;  %v1961_v62 = vperm.slane %v1955_v28, %v3857_v47  ;;  %v1972_v17 = vrot.slane %v1965_v52, 4  ;;  %v1999_v18 = vsel %vm852_vm0, %v1984_v51, %v1998_v57  ;;  %v3146_v28 = vld [vmem:[%s3732_s27 + $0x30] sm:$0xff]  ;;  %v3145_v57 = vld [vmem:[%s3732_s27 + $0x28] sm:$0xff] }
 0x401   : > { %v1943_v0 = vsel %vm852_vm0, %v1942_v59, %v1925_v20  ;;  %v2019_v32 = vperm.slane %v2011_v58, %v3857_v47  ;;  %v1997_v22 = vsel %vm852_vm0, %v1996_v55, %v1978_v44  ;;  %v2007_v4 = vperm.slane %v1999_v18, %v3857_v47  ;;  %2165 = vmatpush.bf16.msrb.mxu1 %v3146_v28  ;;  %v3141_v58 = vld [vmem:[%s3732_s27 + $0x8] sm:$0xff]  ;;  %v3024_v28 = vld [vmem:[%s3738_s29 + $0x58] sm:$0xf0] }
 0x402   : > { %v1949_v60 = vperm.slane %v1943_v0, %v3857_v47  ;;  %v1968_v1 = vrot.slane %v1953_v61, 4  ;;  %v1970_v63 = vrot.slane %v1961_v62, 4  ;;  %v1973_v54 = vsel %vm852_vm0, 0.0, %v1972_v17  ;;  %v3144_v61 = vld [vmem:[%s3732_s27 + $0x20] sm:$0xff] }
 0x403   : > { %v2039_v12 = vsel %vm852_vm0, %v1972_v17, %v1961_v62  ;;  %v2044_v16 = vrot.slane %v1973_v54, 4  ;;  %v2003_v11 = vperm.slane %v1997_v22, %v3857_v47  ;;  %v2015_v15 = vperm.slane %v2009_v13, %v3857_v47  ;;  %v3143_v62 = vld [vmem:[%s3732_s27 + $0x18] sm:$0xff]  ;;  %v3142_v17 = vld [vmem:[%s3732_s27 + $0x10] sm:$0xff]  ;;  %v3140_v0 = vld [vmem:[%s3732_s27] sm:$0xff]  ;;  %s4485_s27 = sld [smem:[#allocation25_spill]] (!%p3108_p3) }
 0x404   : > { %v1966_v9 = vrot.slane %v1949_v60, 4  ;;  %v1969_v21 = vsel %vm852_vm0, 0.0, %v1968_v1  ;;  %v1971_v33 = vsel %vm852_vm0, 0.0, %v1970_v63  ;;  %v2028_v38 = vsel %vm852_vm0, %v1968_v1, %v1949_v60  ;;  %v3341_v22 = vld [vmem:[#allocation2] sm:$0xff] }
 0x405   : > { %v2033_v27 = vrot.slane %v1969_v21, 4  ;;  %v2043_v36 = vperm.slane %v2039_v12, %v3854_v34  ;;  %v2045_v30 = vsel %vm852_vm0, %v2044_v16, %v1971_v33  ;;  %v2032_v56 = vperm.slane %v2028_v38, %v3854_v34  ;;  %2166 = vmatpush.bf16.msrb.mxu1 %v3145_v57 }
 0x406   : > { %v2049_v2 = vperm.slane %v2045_v30, %v3854_v34  ;;  %v1967_v39 = vsel %vm852_vm0, 0.0, %v1966_v9  ;;  %v2024_v41 = vrot.slane %v2019_v32, 4  ;;  %v2020_v37 = vrot.slane %v2015_v15, 4  ;;  %v4330_v30 = vld [vmem:[%s3759_s8] sm:$0xff] }
 0x407   : > { %v2064_v3 = vrot.slane %v2043_v36, 4  ;;  %v2034_v14 = vsel %vm852_vm0, %v2033_v27, %v1967_v39  ;;  %v2052_v10 = vrot.slane %v2032_v56, 4  ;;  %v2026_v53 = vrot.slane %v2007_v4, 4 }
 0x408   : > { %v2038_v40 = vperm.slane %v2034_v14, %v3854_v34  ;;  %v2062_v24 = vrot.slane %v2049_v2, 4  ;;  %v2021_v19 = vsel %vm852_vm0, %v2020_v37, %v2003_v11  ;;  %v2022_v23 = vrot.slane %v2003_v11, 4 }
 0x409   : > { %v2065_v50 = vsel %vm852_vm0, %v2049_v2, %v2064_v3  ;;  %v2025_v35 = vsel %vm852_vm0, %v2024_v41, %v2007_v4  ;;  %v2027_v31 = vsel %vm852_vm0, %v2019_v32, %v2026_v53  ;;  %2167 = vmatpush.bf16.msrb.mxu1 %v3144_v61  ;;  %v3555_v11 = vmov 128.0   ;;  %v3014_v61 = vld [vmem:[%s3738_s29 + $0x40] sm:$0xf] }
 0x40a   : > { %v2053_v8 = vsel %vm852_vm0, %v2038_v40, %v2052_v10  ;;  %v2073_v42 = vperm.slane %v2065_v50, %v3857_v47  ;;  %v2050_v43 = vrot.slane %v2038_v40, 4  ;;  %v2063_v7 = vsel %vm852_vm0, %v2062_v24, %v2043_v36  ;;  %v3342_v10 = vld [vmem:[#allocation2 + $0x8] sm:$0xff] }
 0x40b   : > { %v2061_v20 = vperm.slane %v2053_v8, %v3857_v47  ;;  %v2069_v25 = vperm.slane %v2063_v7, %v3857_v47  ;;  %3330 = vrcp.f32 %v3555_v11  ;;  %v2984_v11 = vld [vmem:[%s3738_s29 + $0x8] sm:$0xf0] }
 0x40c   : > { %v2078_v34 = vrot.slane %v2073_v42, 4  ;;  %v2051_v26 = vsel %vm852_vm0, %v2050_v43, %v2032_v56  ;;  %v2115_v56 = vperm.slane %v4330_v30, 3 }
 0x40d   : > { %v2080_v5 = vrot.slane %v2061_v20, 4  ;;  %v2057_v6 = vperm.slane %v2051_v26, %v3857_v47  ;;  %v2074_v29 = vrot.slane %v2069_v25, 4  ;;  %v2023_v47 = vsel %vm852_vm0, %v2015_v15, %v2022_v23  ;;  %2168 = vmatpush.bf16.msrb.mxu1 %v3143_v62  ;;  %v3162_v23 = vld [vmem:[%s3738_s29 + $0x74] sm:$0xf]  ;;  %v3157_v62 = vld [vmem:[%s3738_s29 + $0x44] sm:$0xf0] }
 0x40e   : > { %v2079_v44 = vsel %vm852_vm0, %v2078_v34, %v2061_v20 }
 0x40f   : > { %v3287_v46 = vpack.i.bf16 %v2079_v44, %v2025_v35  ;;  %v2081_v48 = vsel %vm852_vm0, %v2073_v42, %v2080_v5  ;;  %v2076_v49 = vrot.slane %v2057_v6, 4  ;;  %v2075_v52 = vsel %vm852_vm0, %v2074_v29, %v2057_v6  ;;  %v3163_v5 = vld [vmem:[%s3738_s29 + $0x74] sm:$0xf0]  ;;  %v3040_v35 = vld [vmem:[%s3738_s29 + $0x78] sm:$0xf0] }
 0x410   : > { %v3292_v51 = vpack.i.bf16 %v2081_v48, %v2027_v31  ;;  %v3043_v44 = vor.u32 %v3162_v23, %v3040_v35  ;;  %v3030_v29 = vld [vmem:[%s3738_s29 + $0x60] sm:$0xf]  ;;  %v3160_v31 = vld [vmem:[%s3738_s29 + $0x64] sm:$0xf]  ;;  %v3177_v23 = vld [vmem:[%s3740_s20 + $0x68] sm:$0xff] }
 0x411   : > { %3288 = vrot.lane.b32.xlu1 %v3287_v46, %s3551_s4  ;;  %v2077_v59 = vsel %vm852_vm0, %v2069_v25, %v2076_v49  ;;  %2169 = vmatpush.bf16.msrb.mxu1 %v3142_v17  ;;  %v3331_v15 = vpop.eup %3330  ;;  %v3161_v46 = vld [vmem:[%s3738_s29 + $0x64] sm:$0xf0]  ;;  %v3032_v49 = vld [vmem:[%s3738_s29 + $0x68] sm:$0xf0]  ;;  %v3156_v17 = vld [vmem:[%s3738_s29 + $0x44] sm:$0xf] }
 0x412   : > { %3293 = vrot.lane.b32.xlu0 %v3292_v51, %s3552_s13  ;;  %v3282_v45 = vpack.i.bf16 %v2077_v59, %v2023_v47  ;;  %v2185_v24 = vmul.f32 128.0, %v3331_v15  ;;  %vm2189_vm6 = vweird.f32 %v3331_v15  ;;  %2350 = vmatpush.bf16.msra.mxu3 %v3043_v44  ;;  %v3031_v48 = vor.u32 %v3161_v46, %v3030_v29  ;;  %v3159_v47 = vld [vmem:[%s3738_s29 + $0x54] sm:$0xf0]  ;;  %v3158_v59 = vld [vmem:[%s3738_s29 + $0x54] sm:$0xf]  ;;  %v3168_v35 = vld [vmem:[%s3740_s20 + $0x20] sm:$0xff] }
 0x413   : > { %v3035_v51 = vor.u32 %v3160_v31, %v3032_v49  ;;  %v3027_v57 = vor.u32 %v3158_v59, %v3024_v28  ;;  %v3176_v29 = vld [vmem:[%s3740_s20 + $0x60] sm:$0xff] }
 0x414   : > { %3283 = vrot.lane.b32.xlu2 %v3282_v45, %s3550_s0  ;;  %v2186_v41 = vsub.f32 1.0, %v2185_v24  ;;  %v3179_v24 = vld [vmem:[%s3740_s20 + $0x78] sm:$0xff] }
 0x415   : > { %2170 = vmatpush.bf16.msrb.mxu1 %v3141_v58  ;;  %v3015_v58 = vor.u32 %v3157_v62, %v3014_v61 }
 0x416   : > { %v2187_v50 = vmul.f32 %v3331_v15, %v2186_v41  ;;  %2351 = vmatpush.bf16.msra.mxu3 %v3035_v51 }
 0x418   : > { %v2188_v8 = vadd.f32 %v3331_v15, %v2187_v50 }
 0x419   : > { %2171 = vmatpush.bf16.msrb.mxu1 %v3140_v0  ;;  %v3016_v0 = vld [vmem:[%s3738_s29 + $0x48] sm:$0xf0] }
 0x41a   : > { %v4333_v42 = vsel %vm2189_vm6, %v3331_v15, %v2188_v8  ;;  %2352 = vmatpush.bf16.msra.mxu3 %v3027_v57  ;;  %v3171_v15 = vld [vmem:[%s3740_s20 + $0x38] sm:$0xff] }
 0x41b   : > { %2499 = vmatpush.bf16.msrb.mxu0 %v3171_v15 }
 0x41d   : > { %2513 = vmatpush.bf16.msra.mxu1 %v3179_v24 }
 0x46e   : > { %v3284_v55 = vpop.permute.xlu2 %3283 }
 0x46f   : > { %v3286_v13 = vunpack.i.h.bf16 %v3284_v55  ;;  %v3285_v60 = vunpack.i.l.bf16 %v3284_v55  ;;  %v3019_v55 = vor.u32 %v3156_v17, %v3016_v0  ;;  %v2230_v17 = vperm.slane %v4330_v30, 5 }
 0x471   : > { %v2106_v16 = vsel %vm1540_vm1, %v2021_v19, %v3285_v60  ;;  %v2107_v18 = vsel %vm1540_vm1, %v2075_v52, %v3286_v13  ;;  %v3038_v19 = vld [vmem:[%s3738_s29 + $0x70] sm:$0xf]  ;;  %2353 = vmatpush.bf16.msra.mxu3 %v3019_v55  ;;  %v3155_v60 = vld [vmem:[%s3738_s29 + $0x34] sm:$0xf0] }
 0x472   : > { %v3039_v6 = vor.u32 %v3163_v5, %v3038_v19  ;;  %v3022_v52 = vld [vmem:[%s3738_s29 + $0x50] sm:$0xf]  ;;  %v3169_v19 = vld [vmem:[%s3740_s20 + $0x28] sm:$0xff] }
 0x473   : > { %v3023_v45 = vor.u32 %v3159_v47, %v3022_v52  ;;  %v3006_v13 = vld [vmem:[%s3738_s29 + $0x30] sm:$0xf] }
 0x474   : > { %2336 = vmatpush.bf16.msrb.mxu2 %v3039_v6 }
 0x478   : > { %2337 = vmatpush.bf16.msrb.mxu2 %v3031_v48 }
 0x47c   : > { %2338 = vmatpush.bf16.msrb.mxu2 %v3023_v45  ;;  %v2227_v45 = vperm.slane %v4330_v30, 4 }
 0x480   : > { %2339 = vmatpush.bf16.msrb.mxu2 %v3015_v58 }
 0x483   : > { %v3289_v1 = vpop.permute.xlu1 %3288 }
 0x484   : > { %v3291_v63 = vunpack.i.h.bf16 %v3289_v1  ;;  %v3290_v54 = vunpack.i.l.bf16 %v3289_v1  ;;  %v3294_v12 = vpop.permute.xlu0 %3293  ;;  %v3154_v1 = vld [vmem:[%s3738_s29 + $0x34] sm:$0xf] }
 0x485   : > { %v3296_v32 = vunpack.i.h.bf16 %v3294_v12  ;;  %v3295_v9 = vunpack.i.l.bf16 %v3294_v12 }
 0x486   : > { %v2109_v21 = vsel %vm2108_vm4, %v2106_v16, %v3290_v54  ;;  %v2110_v33 = vsel %vm2108_vm4, %v2107_v18, %v3291_v63  ;;  %v3007_v63 = vor.u32 %v3155_v60, %v3006_v13  ;;  %v3008_v54 = vld [vmem:[%s3738_s29 + $0x38] sm:$0xf0]  ;;  %v2998_v16 = vld [vmem:[%s3738_s29 + $0x20] sm:$0xf]  ;;  %v3153_v18 = vld [vmem:[%s3738_s29 + $0x24] sm:$0xf0] }
 0x487   : > { %v2112_v38 = vsel %vm2111_vm5, %v2109_v21, %v3295_v9  ;;  %v2113_v27 = vsel %vm2111_vm5, %v2110_v33, %v3296_v32  ;;  %v3011_v12 = vor.u32 %v3154_v1, %v3008_v54  ;;  %v3152_v32 = vld [vmem:[%s3738_s29 + $0x24] sm:$0xf]  ;;  %v2999_v21 = vor.u32 %v3153_v18, %v2998_v16  ;;  %v3000_v33 = vld [vmem:[%s3738_s29 + $0x28] sm:$0xf0]  ;;  %v3167_v13 = vld [vmem:[%s3740_s20 + $0x18] sm:$0xff] }
 0x488   : > { %v2114_v36 = vpack.c.bf16 %v2113_v27, %v2112_v38  ;;  %2340 = vmatpush.bf16.msrb.mxu2 %v3007_v63  ;;  %v3003_v27 = vor.u32 %v3152_v32, %v3000_v33  ;;  %v3175_v60 = vld [vmem:[%s3740_s20 + $0x58] sm:$0xff]  ;;  %v3166_v1 = vld [vmem:[%s3740_s20 + $0x10] sm:$0xff]  ;;  %v3165_v63 = vld [vmem:[%s3740_s20 + $0x8] sm:$0xff] }
 0x489   : > { %2354 = vmatpush.bf16.msra.mxu3 %v3011_v12  ;;  %v3173_v54 = vld [vmem:[%s3740_s20 + $0x48] sm:$0xff]  ;;  %v3164_v12 = vld [vmem:[%s3740_s20] sm:$0xff]  ;;  %v2250_v18 = vld [vmem:[%s3764_s25] sm:$0x3] }
 0x48a   : > { %2172 = vmatmul.bf16.vlgmr.msrb.gmra.mxu1 %v2114_v36  ;;  %v2990_v36 = vld [vmem:[%s3738_s29 + $0x10] sm:$0xf]  ;;  %v3172_v16 = vld [vmem:[%s3740_s20 + $0x40] sm:$0xff]  ;;  %v2253_v33 = vperm.slane %v2250_v18, 1 }
 0x48c   : > { %2341 = vmatpush.bf16.msrb.mxu2 %v2999_v21  ;;  %v2252_v21 = vperm.slane %v2250_v18, 0 }
 0x48d   : > { %2355 = vmatpush.bf16.msra.mxu3 %v3003_v27 }
 0x507   : > { %v2173_v2 = vpop.f32.mrf.mxu1 }
 0x508   : > { %v2174_v39 = vadd.f32 %v2173_v2, %v2115_v56  ;;  %v3150_v2 = vld [vmem:[%s3738_s29 + $0x14] sm:$0xf] }
 0x50a   : > { %v2178_v3 = vadd.f32 %v3341_v22, %v2174_v39  ;;  %v2992_v39 = vld [vmem:[%s3738_s29 + $0x18] sm:$0xf0] }
 0x50c   : > { %2180 = vadd.xlane.f32.xlu2 %v2178_v3 }
 0x50f   : > { %v2175_v4 = vpop.f32.mrf.mxu1 }
 0x510   : > { %v2176_v14 = vadd.f32 %v2175_v4, %v2115_v56  ;;  %v3151_v56 = vld [vmem:[%s3738_s29 + $0x14] sm:$0xf0]  ;;  %v2995_v4 = vor.u32 %v3150_v2, %v2992_v39 }
 0x512   : > { %v2179_v40 = vadd.f32 %v3342_v10, %v2176_v14  ;;  %v2982_v14 = vld [vmem:[%s3738_s29] sm:$0xf]  ;;  %v3149_v10 = vld [vmem:[%s3738_s29 + $0x4] sm:$0xf0]  ;;  %2356 = vmatpush.bf16.msra.mxu3 %v2995_v4 }
 0x513   : > { %v2983_v50 = vor.u32 %v3149_v10, %v2982_v14 }
 0x514   : > { %2182 = vadd.xlane.f32.xlu0 %v2179_v40 }
 0x57f   : > { %v2181_v37 = vpop.xlane.xlu2 %2180 }
 0x580   : > { %v2191_v43 = vmul.f32 %v4333_v42, %v2181_v37 }
 0x582   : > { %v4336_v20 = vsub.f32 %v2178_v3, %v2191_v43  ;;  %v2991_v3 = vor.u32 %v3151_v56, %v2990_v36  ;;  %v3170_v43 = vld [vmem:[%s3740_s20 + $0x30] sm:$0xff] }
 0x583   : > { %2500 = vmatpush.bf16.msrb.mxu0 %v3170_v43 }
 0x584   : > { %v2195_v53 = vmul.f32 %v4336_v20, %v4336_v20  ;;  %2342 = vmatpush.bf16.msrb.mxu2 %v2991_v3 }
 0x586   : > { %2197 = vadd.xlane.f32.xlu1 %v2195_v53  ;;  %v3178_v53 = vld [vmem:[%s3740_s20 + $0x70] sm:$0xff] }
 0x587   : > { %v2183_v7 = vpop.xlane.xlu0 %2182  ;;  %2514 = vmatpush.bf16.msra.mxu1 %v3178_v53  ;;  %2501 = vmatpush.bf16.msrb.mxu0 %v3169_v19 }
 0x588   : > { %v2192_v34 = vmul.f32 %v4333_v42, %v2183_v7  ;;  %2343 = vmatpush.bf16.msrb.mxu2 %v2983_v50 }
 0x58a   : > { %v4341_v26 = vsub.f32 %v2179_v40, %v2192_v34  ;;  %v3148_v40 = vld [vmem:[%s3738_s29 + $0x4] sm:$0xf] }
 0x58b   : > { %v2987_v37 = vor.u32 %v3148_v40, %v2984_v11  ;;  %2515 = vmatpush.bf16.msra.mxu1 %v3177_v23  ;;  %2502 = vmatpush.bf16.msrb.mxu0 %v3168_v35  ;;  %v2402_v11 = vperm.slane %v4330_v30, 6 }
 0x58c   : > { %v2196_v25 = vmul.f32 %v4341_v26, %v4341_v26 }
 0x58d   : > { %2357 = vmatpush.bf16.msra.mxu3 %v2987_v37 }
 0x58e   : > { %2199 = vadd.xlane.f32.xlu2 %v2196_v25 }
 0x58f   : > { %2516 = vmatpush.bf16.msra.mxu1 %v3176_v29  ;;  %2503 = vmatpush.bf16.msrb.mxu0 %v3167_v13 }
 0x593   : > { %2517 = vmatpush.bf16.msra.mxu1 %v3175_v60  ;;  %2504 = vmatpush.bf16.msrb.mxu0 %v3166_v1 }
 0x597   : > { %2505 = vmatpush.bf16.msrb.mxu0 %v3165_v63 }
 0x59b   : > { %2506 = vmatpush.bf16.msrb.mxu0 %v3164_v12 }
 0x5f9   : > { %v2198_v9 = vpop.xlane.xlu1 %2197 }
 0x5fa   : > { %v2201_v38 = vmul.f32 %v2198_v9, %v4333_v42 }
 0x5fc   : > { %v2203_v22 = vadd.f32 1e-05, %v2201_v38 }
 0x5fe   : > { %3332 = vrsqrt.f32 %v2203_v22  ;;  %vm2211_vm8 = vweird.f32 %v2203_v22 }
 0x601   : > { %v2200_v41 = vpop.xlane.xlu2 %2199 }
 0x602   : > { %v2202_v8 = vmul.f32 %v2200_v41, %v4333_v42 }
 0x604   : > { %v3333_v7 = vpop.eup %3332  ;;  %v2204_v34 = vadd.f32 1e-05, %v2202_v8 }
 0x605   : > { %v2206_v25 = vmul.f32 %v3333_v7, %v2203_v22  ;;  %vm2212_vm7 = vweird.f32 %v3333_v7 }
 0x606   : > { %3334 = vrsqrt.f32 %v2204_v34  ;;  %vm2213_vm9 = vmor %vm2211_vm8, %vm2212_vm7  ;;  %vm2221_vm11 = vweird.f32 %v2204_v34 }
 0x607   : > { %v2207_v5 = vmul.f32 %v3333_v7, %v2206_v25 }
 0x609   : > { %v2208_v6 = vmul.f32 0.5, %v2207_v5 }
 0x60b   : > { %v2209_v44 = vsub.f32 1.5, %v2208_v6 }
 0x60c   : > { %v3335_v46 = vpop.eup %3334 }
 0x60d   : > { %v2210_v31 = vmul.f32 %v3333_v7, %v2209_v44  ;;  %v2216_v48 = vmul.f32 %v3335_v46, %v2204_v34  ;;  %vm2222_vm10 = vweird.f32 %v3335_v46 }
 0x60e   : > { %vm2223_vm12 = vmor %vm2221_vm11, %vm2222_vm10 }
 0x60f   : > { %v2217_v49 = vmul.f32 %v3335_v46, %v2216_v48  ;;  %v2214_v51 = vsel %vm2213_vm9, %v3333_v7, %v2210_v31 }
 0x610   : > { %v2225_v59 = vmul.f32 %v2214_v51, %v4336_v20 }
 0x611   : > { %v2218_v52 = vmul.f32 0.5, %v2217_v49 }
 0x612   : > { %v2228_v62 = vmul.f32 %v2227_v45, %v2225_v59 }
 0x613   : > { %v2219_v47 = vsub.f32 1.5, %v2218_v52 }
 0x614   : > { %v2231_v0 = vadd.f32 %v2230_v17, %v2228_v62 }
 0x615   : > { %v2220_v28 = vmul.f32 %v3335_v46, %v2219_v47 }
 0x617   : > { %v2224_v57 = vsel %vm2223_vm12, %v3335_v46, %v2220_v28 }
 0x618   : > { %v2226_v61 = vmul.f32 %v2224_v57, %v4341_v26  ;;  %v3174_v26 = vld [vmem:[%s3740_s20 + $0x50] sm:$0xff] }
 0x619   : > { %2518 = vmatpush.bf16.msra.mxu1 %v3174_v26 }
 0x61a   : > { %v2229_v58 = vmul.f32 %v2227_v45, %v2226_v61 }
 0x61c   : > { %v2232_v55 = vadd.f32 %v2230_v17, %v2229_v58  ;;  %v2569_v58 = vperm.slane %v4330_v30, 7 }
 0x61d   : > { %2519 = vmatpush.bf16.msra.mxu1 %v3173_v54 }
 0x61e   : > { %v2249_v20 = vpack.c.bf16 %v2232_v55, %v2231_v0 }
 0x620   : > { %2344 = vmatmul.bf16.vlgmr.msrb.gmra.mxu2 %v2249_v20  ;;  %2358 = vmatmul.bf16.vlgmr.msra.gmra.mxu3 %v2249_v20  ;;  %v3297_v20 = vld [vmem:[%s3759_s8 + $0x8] ss:$0 sm:$0xff] }
 0x621   : > { %2520 = vmatpush.bf16.msra.mxu1 %v3172_v16 }
 0x6a3   : > { %v2345_v32 = vpop.f32.mrf.mxu2  ;;  %v2359_v9 = vpop.f32.mrf.mxu3 }
 0x6a4   : > { %v2346_v38 = vadd.f32 %v2345_v32, %v2252_v21  ;;  %v2360_v27 = vadd.f32 %v2359_v9, %v2253_v33 }
 0x6a6   : > { %v2364_v22 = vmax.f32 %v2346_v38, 0.0  ;;  %v2365_v3 = vmax.f32 %v2360_v27, 0.0 }
 0x6ab   : > { %v2347_v36 = vpop.f32.mrf.mxu2  ;;  %v2361_v56 = vpop.f32.mrf.mxu3 }
 0x6ac   : > { %v2348_v2 = vadd.f32 %v2347_v36, %v2252_v21  ;;  %v2362_v39 = vadd.f32 %v2361_v56, %v2253_v33 }
 0x6ae   : > { %v2366_v4 = vmax.f32 %v2348_v2, 0.0  ;;  %v2367_v14 = vmax.f32 %v2362_v39, 0.0 }
 0x6b0   : > { %v2400_v10 = vpack.c.bf16 %v2366_v4, %v2364_v22  ;;  %v2401_v40 = vpack.c.bf16 %v2367_v14, %v2365_v3 }
 0x6b2   : > { %2507 = vmatmul.bf16.vlgmr.msrb.gmra.mxu0 %v2400_v10  ;;  %2521 = vmatmul.bf16.vlgmr.msra.gmra.mxu1 %v2401_v40 }
 0x72f   : > { %v2508_v15 = vpop.f32.mrf.mxu0  ;;  %v2522_v24 = vpop.f32.mrf.mxu1 }
 0x730   : > { %v2509_v41 = vadd.f32 %v2508_v15, %v2402_v11 }
 0x732   : > { %v2523_v50 = vadd.f32 %v2522_v24, %v2509_v41 }
 0x734   : > { %v2527_v8 = vadd.f32 %v2523_v50, %v2231_v0 }
 0x736   : > { %2529 = vadd.xlane.f32.xlu0 %v2527_v8 }
 0x737   : > { %v2510_v37 = vpop.f32.mrf.mxu0  ;;  %v2524_v53 = vpop.f32.mrf.mxu1 }
 0x738   : > { %v2511_v43 = vadd.f32 %v2510_v37, %v2402_v11 }
 0x73a   : > { %v2525_v7 = vadd.f32 %v2524_v53, %v2511_v43 }
 0x73c   : > { %v2528_v34 = vadd.f32 %v2525_v7, %v2232_v55 }
 0x73e   : > { %2531 = vadd.xlane.f32.xlu1 %v2528_v34 }
 0x7a9   : > { %v2530_v25 = vpop.xlane.xlu0 %2529 }
 0x7aa   : > { %v2533_v19 = vmul.f32 %v2530_v25, %v4333_v42 }
 0x7ac   : > { %v2535_v5 = vsub.f32 %v2527_v8, %v2533_v19 }
 0x7ae   : > { %v2537_v23 = vmul.f32 %v2535_v5, %v2535_v5 }
 0x7b0   : > { %2539 = vadd.xlane.f32.xlu2 %v2537_v23 }
 0x7b1   : > { %v2532_v6 = vpop.xlane.xlu1 %2531 }
 0x7b2   : > { %v2534_v35 = vmul.f32 %v2532_v6, %v4333_v42 }
 0x7b4   : > { %v2536_v44 = vsub.f32 %v2528_v34, %v2534_v35 }
 0x7b6   : > { %v2538_v29 = vmul.f32 %v2536_v44, %v2536_v44 }
 0x7b8   : > { %2541 = vadd.xlane.f32.xlu0 %v2538_v29 }
 0x823   : > { %v2540_v46 = vpop.xlane.xlu2 %2539 }
 0x824   : > { %v2543_v31 = vmul.f32 %v2540_v46, %v4333_v42 }
 0x826   : > { %v2545_v48 = vadd.f32 1e-05, %v2543_v31 }
 0x828   : > { %3336 = vrsqrt.f32 %v2545_v48  ;;  %vm2553_vm14 = vweird.f32 %v2545_v48 }
 0x82b   : > { %v2542_v49 = vpop.xlane.xlu0 %2541 }
 0x82c   : > { %v2544_v51 = vmul.f32 %v2542_v49, %v4333_v42 }
 0x82e   : > { %v3337_v52 = vpop.eup %3336  ;;  %v2546_v47 = vadd.f32 1e-05, %v2544_v51 }
 0x82f   : > { %v2548_v59 = vmul.f32 %v3337_v52, %v2545_v48  ;;  %vm2554_vm13 = vweird.f32 %v3337_v52 }
 0x830   : > { %3338 = vrsqrt.f32 %v2546_v47  ;;  %vm2555_vm15 = vmor %vm2553_vm14, %vm2554_vm13  ;;  %vm2563_vm1 = vweird.f32 %v2546_v47 }
 0x831   : > { %v2549_v45 = vmul.f32 %v3337_v52, %v2548_v59 }
 0x833   : > { %v2550_v28 = vmul.f32 0.5, %v2549_v45 }
 0x835   : > { %v2551_v57 = vsub.f32 1.5, %v2550_v28 }
 0x836   : > { %v3339_v61 = vpop.eup %3338 }
 0x837   : > { %v2552_v62 = vmul.f32 %v3337_v52, %v2551_v57  ;;  %v2558_v17 = vmul.f32 %v3339_v61, %v2546_v47  ;;  %vm2564_vm0 = vweird.f32 %v3339_v61 }
 0x838   : > { %vm2565_vm2 = vmor %vm2563_vm1, %vm2564_vm0 }
 0x839   : > { %v2556_v0 = vsel %vm2555_vm15, %v3337_v52, %v2552_v62  ;;  %v2559_v55 = vmul.f32 %v3339_v61, %v2558_v17 }
 0x83a   : > { %v2567_v13 = vmul.f32 %v2556_v0, %v2535_v5 }
 0x83b   : > { %v2560_v60 = vmul.f32 0.5, %v2559_v55 }
 0x83c   : > { %v2570_v1 = vmul.f32 %v2569_v58, %v2567_v13 }
 0x83d   : > { %v2561_v26 = vsub.f32 1.5, %v2560_v60 }
 0x83e   : > { %v2573_v63 = vadd.f32 %v3297_v20, %v2570_v1 }
 0x83f   : > { %v2562_v54 = vmul.f32 %v3339_v61, %v2561_v26 }
 0x840   : > { %2575 = vst [vmem:[#allocation2] sm:$0xff] %v2573_v63 }
 0x841   : > { %v2566_v12 = vsel %vm2565_vm2, %v3339_v61, %v2562_v54 }
 0x842   : > { %v2568_v16 = vmul.f32 %v2566_v12, %v2536_v44 }
 0x844   : > { %v2571_v18 = vmul.f32 %v2569_v58, %v2568_v16  ;;  %2580 = sbr.rel (%p3108_p3) target bundleno = 2396 (0x95c), region = 80 }
 0x846   : > { %v2574_v32 = vadd.f32 %v3297_v20, %v2571_v18 }
 0x848   : > { %2576 = vst [vmem:[#allocation2 + $0x8] sm:$0xff] %v2574_v32 }
 0x849   : > { %2582 = vadd.xlane.f32.xlu0 %v2573_v63  ;;  %v2581_v24 = vld [vmem:[%s4485_s27] sm:$0x3] }
 0x84a   : > { %v2622_v43 = vperm.slane %v2581_v24, 0  ;;  %v2625_v34 = vperm.slane %v2581_v24, 1 }
 0x851   : > { %2584 = vadd.xlane.f32.xlu0 %v2574_v32 }
 0x8bc   : > { %v2583_v30 = vpop.xlane.xlu0 %2582 }
 0x8bd   : > { %v2586_v9 = vmul.f32 %v2583_v30, %v4333_v42 }
 0x8bf   : > { %v2588_v21 = vsub.f32 %v2573_v63, %v2586_v9 }
 0x8c1   : > { %v2590_v33 = vmul.f32 %v2588_v21, %v2588_v21 }
 0x8c3   : > { %2592 = vadd.xlane.f32.xlu1 %v2590_v33 }
 0x8c4   : > { %v2585_v38 = vpop.xlane.xlu0 %2584 }
 0x8c5   : > { %v2587_v27 = vmul.f32 %v2585_v38, %v4333_v42 }
 0x8c7   : > { %v2589_v36 = vsub.f32 %v2574_v32, %v2587_v27 }
 0x8c9   : > { %v2591_v56 = vmul.f32 %v2589_v36, %v2589_v36 }
 0x8cb   : > { %2594 = vadd.xlane.f32.xlu1 %v2591_v56 }
 0x936   : > { %v2593_v2 = vpop.xlane.xlu1 %2592 }
 0x937   : > { %v2596_v39 = vmul.f32 %v2593_v2, %v4333_v42 }
 0x939   : > { %v2598_v22 = vadd.f32 1e-05, %v2596_v39 }
 0x93b   : > { %3343 = vrsqrt.f32 %v2598_v22  ;;  %vm2606_vm4 = vweird.f32 %v2598_v22 }
 0x93e   : > { %v2595_v3 = vpop.xlane.xlu1 %2594 }
 0x93f   : > { %v2597_v4 = vmul.f32 %v2595_v3, %v4333_v42 }
 0x941   : > { %v3344_v14 = vpop.eup %3343  ;;  %v2599_v10 = vadd.f32 1e-05, %v2597_v4 }
 0x942   : > { %v2601_v40 = vmul.f32 %v3344_v14, %v2598_v22  ;;  %vm2607_vm3 = vweird.f32 %v3344_v14 }
 0x943   : > { %3345 = vrsqrt.f32 %v2599_v10  ;;  %vm2608_vm5 = vmor %vm2606_vm4, %vm2607_vm3  ;;  %vm2616_vm7 = vweird.f32 %v2599_v10 }
 0x944   : > { %v2602_v11 = vmul.f32 %v3344_v14, %v2601_v40 }
 0x946   : > { %v2603_v15 = vmul.f32 0.5, %v2602_v11 }
 0x948   : > { %v2604_v41 = vsub.f32 1.5, %v2603_v15 }
 0x949   : > { %v3346_v50 = vpop.eup %3345 }
 0x94a   : > { %v2605_v8 = vmul.f32 %v3344_v14, %v2604_v41  ;;  %v2611_v37 = vmul.f32 %v3346_v50, %v2599_v10  ;;  %vm2617_vm6 = vweird.f32 %v3346_v50 }
 0x94b   : > { %vm2618_vm8 = vmor %vm2616_vm7, %vm2617_vm6 }
 0x94c   : > { %v2609_v42 = vsel %vm2608_vm5, %v3344_v14, %v2605_v8  ;;  %v2612_v53 = vmul.f32 %v3346_v50, %v2611_v37 }
 0x94d   : > { %v2620_v7 = vmul.f32 %v2609_v42, %v2588_v21 }
 0x94e   : > { %v2613_v25 = vmul.f32 0.5, %v2612_v53 }
 0x94f   : > { %v2623_v19 = vmul.f32 %v2622_v43, %v2620_v7 }
 0x950   : > { %v2614_v5 = vsub.f32 1.5, %v2613_v25 }
 0x951   : > { %v2626_v23 = vadd.f32 %v2625_v34, %v2623_v19 }
 0x952   : > { %v2615_v6 = vmul.f32 %v3346_v50, %v2614_v5 }
 0x953   : > { %2628 = vst [vmem:[%s3769_s5] sm:$0xff] %v2626_v23 }
 0x954   : > { %v2619_v35 = vsel %vm2618_vm8, %v3346_v50, %v2615_v6 }
 0x955   : > { %v2621_v44 = vmul.f32 %v2619_v35, %v2589_v36 }
 0x957   : > { %v2624_v29 = vmul.f32 %v2622_v43, %v2621_v44 }
 0x959   : > { %v2627_v46 = vadd.f32 %v2625_v34, %v2624_v29 }
 0x95b   : > { %2629 = vst [vmem:[%s3769_s5 + $0x8] sm:$0xff] %v2627_v46 }
 0x95c PF: > { %s28_s16 = sadd.s32 1, %s3541_s16   ;;  %s4486_s29 = sld [smem:[#allocation13_spill]] }
 0x95d   : > { %p25_p4 = scmp.ge.s32.totalorder %s28_s16, 6   ;;  %s4487_s11 = sld [smem:[#allocation17_spill]] }
 0x95e   : > { %s4488_s13 = sld [smem:[#allocation14_spill]]  ;;  %s4491_s30 = smov %s3517_s10 }
 0x95f   : > { %s4489_s20 = sld [smem:[#allocation15_spill]]  ;;  %s4493_s12 = smov %s3533_s14 }
 0x960   : > { %s4490_s15 = sld [smem:[#allocation16_spill]] }
 0x961   :  { %27 = sbr.rel (!%p25_p4) target bundleno = 19 (0x13), region = 153 }
 0x962   : > { %s4492_s10 = smov %s4486_s29 }
 0x965   : > { %s4494_s14 = smov %s4489_s20 }
 0x966   :  { %2651 = vsyncpa [#allocation4], 1 }
 0x967   :  { %2653 = vsyncpa [#allocation4 + $0x1], 1 }
 0x968   :  { %2654 = vsyncpa [#allocation6], 1 }
 0x969   :  { %2656 = vsyncpa [#allocation6 + $0x1], 1 }
 0x96a   :  { %2657 = vsyncpa [#allocation9], 1 }
 0x96b   :  { %2659 = vsyncpa [#allocation9 + $0x1], 1 }

// kernel: forward.9
= control target key start
LH: loop header
LB: loop body
LE: loop exit
PB: predicated region body
PF: predicated region fallthrough
CT: control target
= control target key end

     0   :  { %s5936_s0 = inlined_call_operand.vmem [shape: f32[2,8,128], index: 0, kind: input, shape index: {}]   ;;  %s5937_s1 = inlined_call_operand.vmem [shape: f32[2,16,128], index: 1, kind: input, shape index: {}]   ;;  %s5938_s2 = inlined_call_operand.hbm [shape: bf16[2,128,384], index: 2, kind: input, shape index: {}]   ;;  %s5939_s3 = inlined_call_operand.hbm [shape: bf16[2,128,128], index: 3, kind: input, shape index: {}]   ;;  %s5940_s4 = inlined_call_operand.hbm [shape: bf16[2,128,128], index: 4, kind: input, shape index: {}]   ;;  %s5941_s5 = inlined_call_operand.hbm [shape: bf16[2,128,256], index: 5, kind: input, shape index: {}]   ;;  %s5942_s6 = inlined_call_operand.hbm [shape: bf16[2,128,128], index: 6, kind: input, shape index: {}]   ;;  %s5943_s7 = inlined_call_operand.hbm [shape: bf16[2,128,256], index: 7, kind: input, shape index: {}]   ;;  %s5944_s8 = inlined_call_operand.hbm [shape: bf16[2,256,128], index: 8, kind: input, shape index: {}]   ;;  %s5945_s9 = inlined_call_operand.vmem [shape: f32[2,15,128], index: 9, kind: input, shape index: {}]   ;;  %s5946_s10 = inlined_call_operand.vmem [shape: f32[2,1,256], index: 10, kind: input, shape index: {}]   ;;  %s5947_s11 = inlined_call_operand.vmem [shape: f32[2,128], index: 11, kind: input, shape index: {}]   ;;  %s5948_s12 = inlined_call_operand.vmem [shape: bf16[128,128], index: 12, kind: input, shape index: {}]   ;;  %s5949_s13 = inlined_call_operand.vmem [shape: f32[1,128], index: 13, kind: input, shape index: {}]   ;;  %s5950_s14 = inlined_call_operand.vmem [shape: f32[2,8,128], index: 14, kind: output, shape index: {}]  }
   0x1   :  { %5966 = sst [smem:[#allocation27_spill]] %s5936_s0 }
   0x2   :  { %5967 = sst [smem:[#allocation28_spill]] %s5937_s1 }
   0x3   :  { %5968 = sst [smem:[#allocation29_spill]] %s5938_s2 }
   0x4   :  { %5969 = sst [smem:[#allocation30_spill]] %s5939_s3 }
   0x5   :  { %5970 = sst [smem:[#allocation31_spill]] %s5940_s4 }
   0x6   :  { %5971 = sst [smem:[#allocation32_spill]] %s5941_s5 }
   0x7   :  { %5972 = sst [smem:[#allocation33_spill]] %s5942_s6 }
   0x8   :  { %5973 = sst [smem:[#allocation34_spill]] %s5943_s7 }
   0x9   :  { %5974 = sst [smem:[#allocation35_spill]] %s5944_s8 }
   0xa   :  { %5975 = sst [smem:[#allocation36_spill]] %s5945_s9 }
   0xb   :  { %5976 = sst [smem:[#allocation37_spill]] %s5946_s10 }
   0xc   :  { %5977 = sst [smem:[#allocation38_spill]] %s5947_s11 }
   0xd   :  { %5978 = sst [smem:[#allocation39_spill]] %s5948_s12 }
   0xe   :  { %5979 = sst [smem:[#allocation40_spill]] %s5949_s13 }
   0xf   :  { %5980 = sst [smem:[#allocation41_spill]] %s5950_s14 }
  0x10   :  { %19 = vsyncpa [#allocation4], 0 }
  0x11   :  { %21 = vsyncpa [#allocation4 + $0x1], 0 }
  0x12   :  { %22 = vsyncpa [#allocation6], 0 }
  0x13   :  { %24 = vsyncpa [#allocation6 + $0x1], 0 }
  0x14   :  { %25 = vsyncpa [#allocation9], 0 }
  0x15   :  { %27 = vsyncpa [#allocation9 + $0x1], 0 }
  0x16   :  { %28 = vsyncpa [#allocation12], 0 }
  0x17   :  { %30 = vsyncpa [#allocation12 + $0x1], 0  ;;  %s4938_s29 = smov 0   ;;  %s4940_s30 = smov 0  }
  0x18   :  { %s4942_s15 = smov 0   ;;  %s4944_s16 = smov 0  }
  0x19   :  { %s4946_s17 = smov 0   ;;  %s4948_s18 = smov 0  }
  0x1a   :  { %s4950_s19 = smov 0   ;;  %s4952_s20 = smov 0  }
  0x1b LB: > { %5981 = sst [smem:[#allocation18_spill]] %s4825_s30  ;;  %s5952_s21 = sadd.s32 4294967295, %s4849_s20   ;;  %s4849_s20 = sphi %s4952_s20, %s36_s20   ;;  %s4845_s19 = sphi %s4950_s19, %s6023_s19   ;;  %s4841_s18 = sphi %s4948_s18, %s6022_s18   ;;  %s4837_s17 = sphi %s4946_s17, %s6021_s17   ;;  %s4833_s16 = sphi %s4944_s16, %s6020_s16   ;;  %s4829_s15 = sphi %s4942_s15, %s6019_s15   ;;  %s4825_s30 = sphi %s4940_s30, %s6018_s30   ;;  %s4821_s29 = sphi %s4938_s29, %s6017_s29  }
  0x1c   : > { %5982 = sst [smem:[#allocation19_spill]] %s4829_s15  ;;  %s45_s22 = sadd.s32 1, %s4841_s18 }
  0x1d   : > { %5983 = sst [smem:[#allocation20_spill]] %s4833_s16  ;;  %p46_p0 = scmp.ge.s32.totalorder %s45_s22, 2 }
  0x1e   : > { %5984 = sst [smem:[#allocation21_spill]] %s4837_s17  ;;  %s48_s23 = sadd.s32 1, %s4845_s19 }
  0x1f   : > { %5985 = sst [smem:[#allocation22_spill]] %s4841_s18  ;;  %s107_s24 = sadd.s32 1, %s4829_s15 }
  0x20   : > { %5986 = sst [smem:[#allocation23_spill]] %s4845_s19  ;;  %p114_p1 = scmp.ne.s32.totalorder %s4829_s15, %s4825_s30 }
  0x21   : > { %s6025_s22 = smov (%p46_p0, %s45_s22), 0  ;;  %s6027_s23 = smov (!%p46_p0, %s48_s23), %s4845_s19 }
  0x22   : > { %5987 = sst [smem:[#allocation24_spill]] %s6025_s22  ;;  %s104_s25 = ssub.s32 %s4841_s18, %s6025_s22 }
  0x23   : > { %p115_p2 = scmp.eq.s32.totalorder %s4849_s20, 0  ;;  %p50_p3 = scmp.ge.s32.totalorder %s6027_s23, 2 }
  0x24   : > { %p105_p4 = scmp.eq.s32.totalorder %s104_s25, 0  ;;  %p120_p6 = scmp.ne.s32.totalorder %s4825_s30, %s4821_s29 }
  0x25   : > { %p116_p5 = por %p115_p2, %p114_p1  ;;  %s6029_s23 = smov (%p50_p3, %s6027_s23), 0 }
  0x26   : > { %5988 = sst [smem:[#allocation25_spill]] %s6029_s23  ;;  %p121_p7 = scmp.eq.s32.totalorder %s5952_s21, 0 }
  0x27   : > { %s4992_s26 = scalar_select %p105_p4, %s4829_s15, %s107_s24  }
  0x28   : > { %p4439_p8 = scmp.lt.s32.totalorder %s4849_s20, 4  ;;  %s4998_s27 = sand.u32 1, %s4829_s15  }
  0x29   : > { %5989 = sst [smem:[#allocation26_spill]] %s4992_s26  ;;  %p5000_p9 = por %p121_p7, %p120_p6 }
  0x2a   : > { %s5005_s22 = sand.u32 1, %s4849_s20   ;;  %p5007_p10 = pnand %p4439_p8, %p116_p5 }
  0x2b   : > { %s5012_s24 = sshll.u32 %s4998_s27, 6  ;;  %s5015_s25 = sshll.u32 %s4841_s18, 6 }
  0x2c   : > { %s5992_s3 = sld [smem:[#allocation30_spill]]  ;;  %s491_s26 = scalar_lea.vmem [#allocation5], %s5012_s24 }
  0x2d   : > { %s499_s15 = sshll.u32 %s491_s26, 4  ;;  %p3838_p11 = scmp.ge.s32.totalorder %s4849_s20, 1  ;;  %s500_s15 = int_to_ptr.vmem [resolvable:$true] %s499_s15 }
  0x2e   : > { %s5956_s11 = scalar_lea.sflag [#allocation6], %s5005_s22  ;;  %s5957_s12 = smov 64  }
  0x2f   : > { %s5959_s14 = smov 4   ;;  %p632_p12 = scmp.lt.s32.totalorder %s4849_s20, 5 }
  0x30   : > { %s5033_s21 = sshll.u32 %s4998_s27, 7  ;;  %s5994_s5 = sld [smem:[#allocation32_spill]] }
  0x31   : > { %p5038_p13 = pnand %p3838_p11, %p632_p12  ;;  %s535_s9 = scalar_lea.vmem [#allocation8], %s5033_s21 }
  0x32   : > { %s496_s19 = scalar_lea.hbm %s5992_s3, %s5015_s25  ;;  %s5995_s7 = sld [smem:[#allocation34_spill]] }
  0x33   : > { %s497_s13 = sshll.u32 %s496_s19, 4  ;;  %s5036_s19 = sshll.u32 %s4841_s18, 7  ;;  %s498_s13 = int_to_ptr.hbm [resolvable:$true] %s497_s13 }
  0x34   : > { %4423 = dma.hbm_to_vmem [thread:$0]  (!%p5007_p10), %s498_s13, 1024, %s500_s15, %s5956_s11, %s5957_s12, %s5957_s12, %s5959_s14  }
  0x35   : > { %s543_s13 = sshll.u32 %s535_s9, 4  ;;  %s5963_s11 = scalar_lea.sflag [#allocation9], %s5005_s22  ;;  %s544_s13 = int_to_ptr.vmem [resolvable:$true] %s543_s13 }
  0x36   : > { %s540_s10 = scalar_lea.hbm %s5994_s5, %s5036_s19  ;;  %s4853_s12 = smov 128  }
  0x37   : > { %s541_s15 = sshll.u32 %s540_s10, 4  ;;  %s4854_s14 = smov 8   ;;  %s542_s15 = int_to_ptr.hbm [resolvable:$true] %s541_s15 }
  0x38   : > { %4429 = dma.hbm_to_vmem [thread:$0]  (!%p5007_p10), %s542_s15, 2048, %s544_s13, %s5963_s11, %s4853_s12, %s4853_s12, %s4854_s14  }
  0x39   : > { %s584_s3 = scalar_lea.hbm %s5995_s7, %s5036_s19  ;;  %s579_s5 = scalar_lea.vmem [#allocation11], %s5033_s21 }
  0x3a   : > { %s585_s26 = sshll.u32 %s584_s3, 4  ;;  %s587_s16 = sshll.u32 %s579_s5, 4  ;;  %s586_s26 = int_to_ptr.hbm [resolvable:$true] %s585_s26  ;;  %s588_s16 = int_to_ptr.vmem [resolvable:$true] %s587_s16 }
  0x3b   : > { %s576_s9 = scalar_lea.sflag [#allocation12], %s5005_s22  ;;  %s4400_s10 = smul.u32 192, %s4998_s27 }
  0x3c   : > { %4435 = dma.hbm_to_vmem [thread:$0]  (!%p5007_p10), %s586_s26, 2048, %s588_s16, %s576_s9, %s4853_s12, %s4853_s12, %s4854_s14  }
  0x3d   : > { %s4401_s17 = smul.u32 192, %s4841_s18  ;;  %s5996_s2 = sld [smem:[#allocation29_spill]] }
  0x3e   : > { %s469_s1 = scalar_lea.vmem [#allocation3], %s4400_s10  ;;  %s466_s11 = scalar_lea.sflag [#allocation4], %s4998_s27 }
  0x3f   : > { %s477_s5 = sshll.u32 %s469_s1, 4  ;;  %s4855_s7 = smov 192   ;;  %s478_s5 = int_to_ptr.vmem [resolvable:$true] %s477_s5 }
  0x40   : > { %s4856_s12 = smov 12   ;;  %s5997_s4 = sld [smem:[#allocation31_spill]] }
  0x41   : > { %s513_s26 = scalar_lea.vmem [#allocation7], %s5012_s24  ;;  %s5998_s27 = smov 4  }
  0x42   : > { %s521_s10 = sshll.u32 %s513_s26, 4  ;;  %s5999_s15 = smov 64   ;;  %s522_s10 = int_to_ptr.vmem [resolvable:$true] %s521_s10 }
  0x43   : > { %s474_s0 = scalar_lea.hbm %s5996_s2, %s4401_s17  ;;  %s6001_s6 = sld [smem:[#allocation33_spill]] }
  0x44   : > { %s475_s3 = sshll.u32 %s474_s0, 4  ;;  %s6000_s0 = scalar_lea.sflag [#allocation6], %s5005_s22  ;;  %s476_s3 = int_to_ptr.hbm [resolvable:$true] %s475_s3 }
  0x45   : > { %4420 = dma.hbm_to_vmem [thread:$0]  (!%p5007_p10), %s476_s3, 3072, %s478_s5, %s466_s11, %s4855_s7, %s4855_s7, %s4856_s12  }
  0x46   : > { %s518_s17 = scalar_lea.hbm %s5997_s4, %s5015_s25  ;;  %s557_s5 = scalar_lea.vmem [#allocation10], %s5012_s24 }
  0x47   : > { %s519_s13 = sshll.u32 %s518_s17, 4  ;;  %s565_s3 = sshll.u32 %s557_s5, 4  ;;  %s520_s13 = int_to_ptr.hbm [resolvable:$true] %s519_s13  ;;  %s566_s3 = int_to_ptr.vmem [resolvable:$true] %s565_s3 }
  0x48   : > { %4426 = dma.hbm_to_vmem [thread:$0]  (!%p5007_p10), %s520_s13, 1024, %s522_s10, %s6000_s0, %s5999_s15, %s5999_s15, %s5998_s27  }
  0x49   : > { %s562_s11 = scalar_lea.hbm %s6001_s6, %s5015_s25  ;;  %s6002_s14 = scalar_lea.sflag [#allocation9], %s5005_s22 }
  0x4a   : > { %s563_s12 = sshll.u32 %s562_s11, 4  ;;  %s6003_s8 = sld [smem:[#allocation35_spill]]  ;;  %s564_s12 = int_to_ptr.hbm [resolvable:$true] %s563_s12 }
  0x4b   : > { %4432 = dma.hbm_to_vmem [thread:$0]  (!%p5007_p10), %s564_s12, 1024, %s566_s3, %s6002_s14, %s5999_s15, %s5999_s15, %s5998_s27  }
  0x4c   : > { %s601_s10 = scalar_lea.vmem [#allocation13], %s5033_s21  ;;  %s638_s24 = sand.u32 (!%p5038_p13), 1, %s4825_s30  }
  0x4d   : > { %s609_s13 = sshll.u32 %s601_s10, 4  ;;  %s4402_s25 = smul.u32 (!%p5038_p13), 192, %s638_s24  ;;  %s610_s13 = int_to_ptr.vmem [resolvable:$true] %s609_s13 }
  0x4e   : > { %636 = sbr.rel (%p5038_p13) target bundleno = 3819 (0xeeb), region = 76  ;;  %s639_s1 = scalar_lea.sflag (!%p5038_p13), [#allocation4], %s638_s24 }
  0x50   : > { %s606_s26 = scalar_lea.hbm %s6003_s8, %s5036_s19  ;;  %s5109_s19 = scalar_lea.vmem (!%p5038_p13), [#allocation3], %s4402_s25 }
  0x51   : > { %s607_s0 = sshll.u32 %s606_s26, 4  ;;  %s608_s0 = int_to_ptr.hbm [resolvable:$true] %s607_s0 }
  0x52   : > { %4438 = dma.hbm_to_vmem [thread:$0]  (!%p5007_p10), %s608_s0, 2048, %s610_s13, %s576_s9, %s5999_s15, %s5999_s15, %s5998_s27  }
  0x53   : > { %4804 = dma.done.wait (%p5000_p9), %s639_s1, 3072  }
  0x54   : > { %4806 = vsyncadd (%p5000_p9), %s639_s1, 4294964224  ;;  %s6004_s29 = sadd.s32 4294967295, %s4849_s20   ;;  %s3839_s21 = sshll.u32 %s638_s24, 6 }
  0x55   : > { %s648_s22 = sand.u32 1, %s6004_s29   ;;  %s5117_s23 = scalar_lea.vmem [#allocation5], %s3839_s21 }
  0x56   : > { %s649_s9 = scalar_lea.sflag [#allocation6], %s648_s22 }
  0x57   : > { %4808 = dma.done.wait (%p5000_p9), %s649_s9, 2048  }
  0x58   : > { %4810 = vsyncadd (%p5000_p9), %s649_s9, 4294965248  ;;  %s3841_s27 = sshll.u32 %s638_s24, 7  ;;  %s5123_s15 = scalar_lea.vmem [#allocation7], %s3839_s21 }
  0x59   : > { %s669_s7 = scalar_lea.sflag [#allocation9], %s648_s22  ;;  %s5125_s11 = scalar_lea.vmem [#allocation8], %s3841_s27 }
  0x5a   : > { %4812 = dma.done.wait (%p5000_p9), %s669_s7, 3072  }
  0x5b   : > { %4814 = vsyncadd (%p5000_p9), %s669_s7, 4294964224  ;;  %s5131_s5 = scalar_lea.vmem [#allocation10], %s3839_s21  ;;  %s689_s3 = scalar_lea.sflag [#allocation12], %s648_s22 }
  0x5c   : > { %s5133_s12 = scalar_lea.vmem [#allocation11], %s3841_s27 }
  0x5d   : > { %4816 = dma.done.wait (%p5000_p9), %s689_s3, 4096  }
  0x5e   : > { %4818 = vsyncadd (%p5000_p9), %s689_s3, 4294963200  ;;  %s6005_s14 = sld [smem:[#allocation21_spill]]  ;;  %s5166_s1 = scalar_lea.vmem [#allocation13], %s3841_s27 }
  0x5f   : > { %s6006_s16 = sld [smem:[#allocation20_spill]] }
  0x60   : > { %s6007_s24 = sld [smem:[#allocation27_spill]] }
  0x61   : > { %s6008_s22 = sld [smem:[#allocation28_spill]] }
  0x62   : > { %s6009_s2 = sld [smem:[#allocation36_spill]] }
  0x63   : > { %s6010_s18 = sld [smem:[#allocation37_spill]] }
  0x64   : > { %p795_p0 = scmp.lt.s32.totalorder %s6005_s14, 1  ;;  %s6011_s0 = sld [smem:[#allocation41_spill]] }
  0x65   : > { %p804_p1 = scmp.lt.s32.totalorder %s6006_s16, 1  ;;  %p3852_p2 = scmp.ne.s32.totalorder %s6006_s16, 0 }
  0x66   : > { %s6031_s14 = smov (!%p795_p0, %s6005_s14), 1 }
  0x67   : > { %s805_s17 = scalar_select %p804_p1, %s6006_s16, 1 }
  0x68   : > { %s3845_s26 = sshll.u32 %s6031_s14, 3  ;;  %s4294_s10 = sshll.u32 %s6031_s14, 4 }
  0x69   : > { %s798_s25 = scalar_lea.vmem %s6007_s24, %s3845_s26  ;;  %s5149_s21 = scalar_lea.vmem %s6008_s22, %s4294_s10 }
  0x6a   : > { %s4295_s28 = sshll.u32 %s805_s17, 4  ;;  %s3850_s9 = sshll.u32 %s805_s17, 1 }
  0x6b   : > { %s5154_s4 = scalar_lea.vmem %s6009_s2, %s4295_s28  ;;  %s5159_s14 = scalar_lea.vmem %s6010_s18, %s3850_s9 }
  0x6c   : > { %s5164_s24 = scalar_lea.vmem %s6011_s0, %s3845_s26  ;;  %821 = sbr.rel (%p3852_p2) target bundleno = 115 (0x73), region = 108 }
  0x71   : > { %v822_v0 = vld [vmem:[%s798_s25] sm:$0xff] }
  0x72   : > { %823 = vst [vmem:[#allocation2] sm:$0xff] %v822_v0 }
  0x73 PF: > { %v4317_v1 = vld [vmem:[%s5109_s19 + $0xac] sm:$0xf]  ;;  %v3941_v2 = vld [vmem:[%s5109_s19 + $0xb4] sm:$0xf0]  ;;  %v4314_v3 = vld [vmem:[%s5109_s19 + $0x94] sm:$0xf] }
  0x74   : > { %v3944_v4 = vor.u32 %v4317_v1, %v3941_v2  ;;  %v3929_v5 = vld [vmem:[%s5109_s19 + $0x9c] sm:$0xf0]  ;;  %v3939_v6 = vld [vmem:[%s5109_s19 + $0xa8] sm:$0xf]  ;;  %v4318_v7 = vld [vmem:[%s5109_s19 + $0xb0] sm:$0xf0] }
  0x75   : > { %v3940_v8 = vor.u32 %v4318_v7, %v3939_v6  ;;  %v3927_v9 = vld [vmem:[%s5109_s19 + $0x90] sm:$0xf]  ;;  %v3932_v10 = vor.u32 %v4314_v3, %v3929_v5  ;;  %v4315_v11 = vld [vmem:[%s5109_s19 + $0x98] sm:$0xf0]  ;;  %v3917_v13 = vld [vmem:[%s5109_s19 + $0x84] sm:$0xf0] }
  0x76   : > { %1003 = vmatpush.bf16.msra.mxu1 %v3944_v4  ;;  %v4311_v12 = vld [vmem:[%s5109_s19 + $0x7c] sm:$0xf]  ;;  %v3928_v14 = vor.u32 %v4315_v11, %v3927_v9  ;;  %v3915_v15 = vld [vmem:[%s5109_s19 + $0x78] sm:$0xf]  ;;  %v4312_v16 = vld [vmem:[%s5109_s19 + $0x80] sm:$0xf0] }
  0x77   : > { %990 = vmatpush.bf16.msra.mxu0 %v3940_v8  ;;  %v3920_v17 = vor.u32 %v4311_v12, %v3917_v13  ;;  %v4308_v18 = vld [vmem:[%s5109_s19 + $0x64] sm:$0xf]  ;;  %v3905_v19 = vld [vmem:[%s5109_s19 + $0x6c] sm:$0xf0]  ;;  %v3916_v20 = vor.u32 %v4312_v16, %v3915_v15  ;;  %v3903_v21 = vld [vmem:[%s5109_s19 + $0x60] sm:$0xf] }
  0x78   : > { %v4309_v22 = vld [vmem:[%s5109_s19 + $0x68] sm:$0xf0]  ;;  %v3908_v23 = vor.u32 %v4308_v18, %v3905_v19  ;;  %v3893_v25 = vld [vmem:[%s5109_s19 + $0x54] sm:$0xf0]  ;;  %v3891_v27 = vld [vmem:[%s5109_s19 + $0x48] sm:$0xf] }
  0x79   : > { %v4305_v24 = vld [vmem:[%s5109_s19 + $0x4c] sm:$0xf]  ;;  %v3904_v26 = vor.u32 %v4309_v22, %v3903_v21  ;;  %v4306_v28 = vld [vmem:[%s5109_s19 + $0x50] sm:$0xf0]  ;;  %v3881_v31 = vld [vmem:[%s5109_s19 + $0x3c] sm:$0xf0] }
  0x7a   : > { %1004 = vmatpush.bf16.msra.mxu1 %v3932_v10  ;;  %v3896_v29 = vor.u32 %v4305_v24, %v3893_v25  ;;  %v4302_v30 = vld [vmem:[%s5109_s19 + $0x34] sm:$0xf]  ;;  %v3892_v32 = vor.u32 %v4306_v28, %v3891_v27  ;;  %v3879_v33 = vld [vmem:[%s5109_s19 + $0x30] sm:$0xf]  ;;  %v4303_v34 = vld [vmem:[%s5109_s19 + $0x38] sm:$0xf0] }
  0x7b   : > { %991 = vmatpush.bf16.msra.mxu0 %v3928_v14  ;;  %v3884_v35 = vor.u32 %v4302_v30, %v3881_v31  ;;  %v4299_v36 = vld [vmem:[%s5109_s19 + $0x1c] sm:$0xf]  ;;  %v3869_v37 = vld [vmem:[%s5109_s19 + $0x24] sm:$0xf0]  ;;  %v3880_v38 = vor.u32 %v4303_v34, %v3879_v33  ;;  %v3867_v39 = vld [vmem:[%s5109_s19 + $0x18] sm:$0xf] }
  0x7c   : > { %v4300_v40 = vld [vmem:[%s5109_s19 + $0x20] sm:$0xf0]  ;;  %v3872_v41 = vor.u32 %v4299_v36, %v3869_v37  ;;  %v3857_v43 = vld [vmem:[%s5109_s19 + $0xc] sm:$0xf0]  ;;  %v3855_v45 = vld [vmem:[%s5109_s19] sm:$0xf] }
  0x7d   : > { %v4296_v42 = vld [vmem:[%s5109_s19 + $0x4] sm:$0xf]  ;;  %v3868_v44 = vor.u32 %v4300_v40, %v3867_v39  ;;  %v4297_v46 = vld [vmem:[%s5109_s19 + $0x8] sm:$0xf0]  ;;  %v5201_v48 = vld [vmem:[#allocation2] sm:$0xff]  ;;  %s4857_s2 = smov 32  }
  0x7e   : > { %1005 = vmatpush.bf16.msra.mxu1 %v3920_v17  ;;  %v3860_v47 = vor.u32 %v4296_v42, %v3857_v43  ;;  %v3856_v49 = vor.u32 %v4297_v46, %v3855_v45  ;;  %v5205_v50 = vpack.c.bf16 %v5201_v48, %v5201_v48  ;;  %v5210_v51 = vld [vmem:[%s5154_s4] sm:$0xff]  ;;  %s4858_s6 = smov 96   ;;  %s4859_s8 = smov 64   ;;  %v3947_v63 = vld [vmem:[%s5109_s19 + $0xb0] sm:$0xf]  ;;  %vm1082_vm0 = vcmask 1047556  }
  0x7f   : > { %992 = vmatpush.bf16.msra.mxu0 %v3916_v20  ;;  %v1031_v52 = vperm.slane %v5210_v51, 1  ;;  %v1029_v53 = vperm.slane %v5210_v51, 0  ;;  %v4319_v0 = vld [vmem:[%s5109_s19 + $0xb8] sm:$0xf0]  ;;  %v3935_v1 = vld [vmem:[%s5109_s19 + $0x98] sm:$0xf] }
  0x80   : > { %v3948_v2 = vor.u32 %v4319_v0, %v3947_v63  ;;  %v4316_v3 = vld [vmem:[%s5109_s19 + $0xa0] sm:$0xf0]  ;;  %v4860_v5 = vmov 1983009808   ;;  %v3923_v19 = vld [vmem:[%s5109_s19 + $0x80] sm:$0xf] }
  0x81   : > { %v1073_v6 = vunpack.c.l.s4 %v4860_v5  ;;  %v3936_v7 = vor.u32 %v4316_v3, %v3935_v1  ;;  %v4313_v20 = vld [vmem:[%s5109_s19 + $0x88] sm:$0xf0]  ;;  %v3911_v39 = vld [vmem:[%s5109_s19 + $0x68] sm:$0xf]  ;;  %v4310_v40 = vld [vmem:[%s5109_s19 + $0x70] sm:$0xf0] }
  0x82   : > { %1006 = vmatpush.bf16.msra.mxu1 %v3908_v23  ;;  %1016 = vmatpush.bf16.msra.mxu2 %v3948_v2  ;;  %v4861_v23 = vmov 1934713408   ;;  %v3924_v25 = vor.u32 %v4313_v20, %v3923_v19  ;;  %v3899_v45 = vld [vmem:[%s5109_s19 + $0x50] sm:$0xf]  ;;  %v4307_v46 = vld [vmem:[%s5109_s19 + $0x58] sm:$0xf0] }
  0x83   : > { %993 = vmatpush.bf16.msra.mxu0 %v3904_v26  ;;  %v5229_v13 = vunpack.c.0.s8 %v1073_v6  ;;  %v1087_v24 = vunpack.c.l.s4 %v4861_v23  ;;  %vm1418_vm1 = vcmask 261120   ;;  %vm1510_vm3 = vcmask 64512  }
  0x84   : > { %vm1562_vm4 = vcmask 1043456   ;;  %vm1760_vm5 = vcmask 523264   ;;  %vm1762_vm6 = vcmask 785408   ;;  %vm2794_vm12 = vcmask 130048  }
  0x86   : > { %1007 = vmatpush.bf16.msra.mxu1 %v3896_v29  ;;  %1017 = vmatpush.bf16.msra.mxu2 %v3936_v7 }
  0x87   : > { %994 = vmatpush.bf16.msra.mxu0 %v3892_v32 }
  0x8a   : > { %1008 = vmatpush.bf16.msra.mxu1 %v3884_v35  ;;  %1018 = vmatpush.bf16.msra.mxu2 %v3924_v25 }
  0x8b   : > { %995 = vmatpush.bf16.msra.mxu0 %v3880_v38  ;;  %v5239_v38 = vunpack.c.0.s8 %v1087_v24 }
  0x8e   : > { %1009 = vmatpush.bf16.msra.mxu1 %v3872_v41 }
  0x8f   : > { %996 = vmatpush.bf16.msra.mxu0 %v3868_v44 }
  0x92   : > { %1010 = vmatpush.bf16.msra.mxu1 %v3860_v47 }
  0x93   : > { %997 = vmatpush.bf16.msra.mxu0 %v3856_v49 }
  0x95   : > { %1011 = vmatmul.bf16.vlgmr.msra.gmra.mxu1 %v5205_v50 }
  0x96   : > { %998 = vmatmul.bf16.vlgmr.msra.gmra.mxu0 %v5205_v50 }
 0x112   : > { %v1012_v54 = vpop.f32.mrf.mxu1 }
 0x113   : > { %v1032_v55 = vadd.f32 %v1031_v52, %v1012_v54  ;;  %v999_v56 = vpop.f32.mrf.mxu0  ;;  %v3912_v52 = vor.u32 %v4310_v40, %v3911_v39 }
 0x114   : > { %v1030_v57 = vadd.f32 %v1029_v53, %v999_v56 }
 0x115   : > { %v1174_v58 = vpack.c.bf16 %v1032_v55, %v1032_v55  ;;  %1019 = vmatpush.bf16.msra.mxu2 %v3912_v52 }
 0x116   : > { %v5214_v59 = vpack.c.bf16 %v1030_v57, %v1030_v57 }
 0x117   : > { %1180 = vrot.lane.b32.xlu1 %v1174_v58, %s4857_s2  ;;  %1176 = vrot.lane.b32.xlu0 %v1174_v58, %s4858_s6  ;;  %v1185_v16 = vshrl.u32 %v1174_v58, 16 }
 0x118   : > { %1055 = vrot.lane.b32.xlu2 %v5214_v59, %s4859_s8  ;;  %v1062_v26 = vshrl.u32 %v5214_v59, 16 }
 0x11a   : > { %v1014_v60 = vpop.f32.mrf.mxu1 }
 0x11b   : > { %v1001_v61 = vpop.f32.mrf.mxu0  ;;  %v3900_v60 = vor.u32 %v4307_v46, %v3899_v45  ;;  %v3875_v45 = vld [vmem:[%s5109_s19 + $0x20] sm:$0xf]  ;;  %v4301_v46 = vld [vmem:[%s5109_s19 + $0x28] sm:$0xf0] }
 0x11d   : > { %1020 = vmatpush.bf16.msra.mxu2 %v3900_v60 }
 0x11f   : > { %1178 = vrot.lane.b32.xlu0 %v1174_v58, %s4859_s8  ;;  %1053 = vrot.lane.b32.xlu1 %v5214_v59, %s4858_s6 }
 0x120   : > { %1057 = vrot.lane.b32.xlu2 %v5214_v59, %s4857_s2 }
 0x172   : > { %v1056_v62 = vpop.permute.xlu2 %1055 }
 0x173   : > { %v1068_v8 = vshrl.u32 %v1056_v62, 16 }
 0x17a   : > { %v1058_v4 = vpop.permute.xlu2 %1057 }
 0x17b   : > { %v1069_v9 = vshrl.u32 %v1058_v4, 16  ;;  %v1067_v14 = vpack.i.b16 %v1058_v4, %v1056_v62 }
 0x17d   : > { %v1070_v17 = vpack.i.b16 %v1069_v9, %v1068_v8  ;;  %v1080_v21 = vperm.slane %v1067_v14, %v5229_v13 }
 0x17f   : > { %v1107_v27 = vperm.slane %v1070_v17, %v5229_v13  ;;  %v1081_v36 = vrot.slane %v1080_v21, 4 }
 0x181   : > { %v1108_v47 = vrot.slane %v1107_v27, 4 }
 0x189   : > { %v1181_v10 = vpop.permute.xlu1 %1180  ;;  %v1177_v11 = vpop.permute.xlu0 %1176 }
 0x18a   : > { %v1186_v12 = vshrl.u32 %v1177_v11, 16  ;;  %v1184_v15 = vpack.i.b16 %v1177_v11, %v1174_v58  ;;  %v1192_v28 = vshrl.u32 %v1181_v10, 16 }
 0x18c   : > { %v1187_v18 = vpack.i.b16 %v1186_v12, %v1185_v16  ;;  %v1198_v22 = vperm.slane %v1184_v15, %v5229_v13 }
 0x18e   : > { %v1224_v29 = vperm.slane %v1187_v18, %v5229_v13  ;;  %v1206_v37 = vrot.slane %v1198_v22, 4 }
 0x190   : > { %v1232_v49 = vrot.slane %v1224_v29, 4 }
 0x191   : > { %v1179_v30 = vpop.permute.xlu0 %1178  ;;  %v1054_v31 = vpop.permute.xlu1 %1053 }
 0x192   : > { %v1190_v32 = vpack.i.b16 %v1181_v10, %v1179_v30  ;;  %v1191_v33 = vshrl.u32 %v1179_v30, 16  ;;  %v1061_v34 = vpack.i.b16 %v1054_v31, %v5214_v59  ;;  %v1063_v35 = vshrl.u32 %v1054_v31, 16 }
 0x194   : > { %v1193_v41 = vpack.i.b16 %v1192_v28, %v1191_v33  ;;  %v1203_v42 = vperm.slane %v1190_v32, %v5229_v13  ;;  %v1064_v43 = vpack.i.b16 %v1063_v35, %v1062_v26  ;;  %v1075_v44 = vperm.slane %v1061_v34, %v5229_v13  ;;  %v3887_v35 = vld [vmem:[%s5109_s19 + $0x38] sm:$0xf] }
 0x196   : > { %v1204_v53 = vrot.slane %v1203_v42, 4  ;;  %v1207_v54 = vsel %vm1082_vm0, %v1203_v42, %v1206_v37  ;;  %v1229_v55 = vperm.slane %v1193_v41, %v5229_v13  ;;  %v1083_v56 = vsel %vm1082_vm0, %v1081_v36, %v1075_v44  ;;  %v4304_v36 = vld [vmem:[%s5109_s19 + $0x40] sm:$0xf0] }
 0x197   : > { %v1215_v57 = vperm.slane %v1207_v54, %v5239_v38  ;;  %v1084_v58 = vrot.slane %v1075_v44, 4  ;;  %v1102_v59 = vperm.slane %v1064_v43, %v5229_v13  ;;  %v1089_v0 = vperm.slane %v1083_v56, %v5239_v38 }
 0x198   : > { %v1205_v61 = vsel %vm1082_vm0, %v1204_v53, %v1198_v22  ;;  %v1230_v62 = vrot.slane %v1229_v55, 4  ;;  %v1233_v63 = vsel %vm1082_vm0, %v1229_v55, %v1232_v49  ;;  %v3888_v53 = vor.u32 %v4304_v36, %v3887_v35 }
 0x199   : > { %v1211_v1 = vperm.slane %v1205_v61, %v5239_v38  ;;  %v1218_v2 = vrot.slane %v1215_v57, 4  ;;  %v1241_v3 = vperm.slane %v1233_v63, %v5239_v38  ;;  %v1085_v4 = vsel %vm1082_vm0, %v1080_v21, %v1084_v58 }
 0x19a   : > { %v1231_v5 = vsel %vm1082_vm0, %v1230_v62, %v1224_v29  ;;  %v1093_v6 = vperm.slane %v1085_v4, %v5239_v38  ;;  %v1109_v7 = vsel %vm1082_vm0, %v1108_v47, %v1102_v59  ;;  %v1094_v14 = vrot.slane %v1089_v0, 4  ;;  %1021 = vmatpush.bf16.msra.mxu2 %v3888_v53 }
 0x19b   : > { %v1216_v8 = vrot.slane %v1211_v1, 4  ;;  %v1219_v9 = vsel %vm1082_vm0, 0, %v1218_v2  ;;  %v1237_v10 = vperm.slane %v1231_v5, %v5239_v38  ;;  %v1244_v11 = vrot.slane %v1241_v3, 4  ;;  %v4298_v3 = vld [vmem:[%s5109_s19 + $0x10] sm:$0xf0] }
 0x19c   : > { %v1251_v12 = vrot.slane %v1219_v9, 4  ;;  %v1096_v15 = vrot.slane %v1093_v6, 4  ;;  %v1110_v16 = vrot.slane %v1102_v59, 4  ;;  %v1115_v20 = vperm.slane %v1109_v7, %v5239_v38 }
 0x19d   : > { %v1217_v17 = vsel %vm1082_vm0, 0, %v1216_v8  ;;  %v1242_v18 = vrot.slane %v1237_v10, 4  ;;  %v1245_v19 = vsel %vm1082_vm0, 0, %v1244_v11  ;;  %v1095_v28 = vsel %vm1082_vm0, 0, %v1094_v14 }
 0x19e   : > { %v1270_v21 = vrot.slane %v1245_v19, 4  ;;  %v1097_v22 = vsel %vm1082_vm0, 0, %v1096_v15  ;;  %v1111_v23 = vsel %vm1082_vm0, %v1107_v27, %v1110_v16  ;;  %v1246_v29 = vsel %vm1082_vm0, %v1218_v2, %v1211_v1  ;;  %v3863_v2 = vld [vmem:[%s5109_s19 + $0x8] sm:$0xf] }
 0x19f   : > { %v1119_v24 = vperm.slane %v1111_v23, %v5239_v38  ;;  %v1129_v25 = vrot.slane %v1097_v22, 4  ;;  %v1243_v26 = vsel %vm1082_vm0, 0, %v1242_v18  ;;  %v1252_v30 = vsel %vm1082_vm0, %v1251_v12, %v1217_v17 }
 0x1a0   : > { %v1271_v31 = vsel %vm1082_vm0, %v1270_v21, %v1243_v26  ;;  %v1120_v32 = vrot.slane %v1115_v20, 4  ;;  %v1256_v34 = vperm.slane %v1252_v30, %v5229_v13  ;;  %v1265_v27 = vsel %vm1082_vm0, %v1244_v11, %v1237_v10 }
 0x1a1   : > { %v1122_v33 = vrot.slane %v1119_v24, 4  ;;  %v1124_v37 = vsel %vm1082_vm0, %v1096_v15, %v1089_v0  ;;  %v1275_v39 = vperm.slane %v1271_v31, %v5229_v13  ;;  %v1130_v40 = vsel %vm1082_vm0, %v1129_v25, %v1095_v28 }
 0x1a2   : > { %v1250_v42 = vperm.slane %v1246_v29, %v5229_v13  ;;  %v1257_v43 = vrot.slane %v1256_v34, 4  ;;  %v1134_v44 = vperm.slane %v1130_v40, %v5229_v13  ;;  %v1269_v49 = vperm.slane %v1265_v27, %v5229_v13 }
 0x1a3   : > { %v1123_v41 = vsel %vm1082_vm0, 0, %v1122_v33  ;;  %v1276_v52 = vrot.slane %v1275_v39, 4  ;;  %v1121_v54 = vsel %vm1082_vm0, 0, %v1120_v32  ;;  %v1128_v56 = vperm.slane %v1124_v37, %v5229_v13 }
 0x1a4   : > { %v1148_v47 = vrot.slane %v1123_v41, 4  ;;  %v1258_v55 = vsel %vm1082_vm0, %v1257_v43, %v1250_v42  ;;  %v1135_v57 = vrot.slane %v1134_v44, 4  ;;  %v3876_v61 = vor.u32 %v4301_v46, %v3875_v45 }
 0x1a5   : > { %v1262_v58 = vperm.slane %v1258_v55, %v5239_v38  ;;  %v1277_v59 = vsel %vm1082_vm0, %v1276_v52, %v1269_v49  ;;  %v1143_v0 = vsel %vm1082_vm0, %v1122_v33, %v1115_v20  ;;  %v3864_v14 = vor.u32 %v4298_v3, %v3863_v2 }
 0x1a6   : > { %v1149_v60 = vsel %vm1082_vm0, %v1148_v47, %v1121_v54  ;;  %v1281_v62 = vperm.slane %v1277_v59, %v5239_v38  ;;  %v1136_v63 = vsel %vm1082_vm0, %v1135_v57, %v1128_v56  ;;  %v1147_v12 = vperm.slane %v1143_v0, %v5229_v13  ;;  %1022 = vmatpush.bf16.msra.mxu2 %v3876_v61 }
 0x1a7   : > { %v1153_v1 = vperm.slane %v1149_v60, %v5229_v13  ;;  %v1287_v4 = vshrl.u32 %v1262_v58, 16  ;;  %v1263_v5 = vrot.slane %v1262_v58, 4  ;;  %v1140_v6 = vperm.slane %v1136_v63, %v5239_v38 }
 0x1a8   : > { %v1286_v7 = vpack.i.b16 %v1281_v62, %v1262_v58  ;;  %v1288_v8 = vshrl.u32 %v1281_v62, 16  ;;  %v1282_v9 = vrot.slane %v1281_v62, 4  ;;  %v1499_v40 = vlaneseq }
 0x1a9   : > { %v1154_v10 = vrot.slane %v1153_v1, 4  ;;  %v1264_v11 = vsel %vm1082_vm0, 0, %v1263_v5  ;;  %v1141_v23 = vrot.slane %v1140_v6, 4  ;;  %v1165_v36 = vshrl.u32 %v1140_v6, 16 }
 0x1aa   : > { %v1423_v15 = vsel %vm1418_vm1, %v1286_v7, 0  ;;  %v1289_v16 = vpack.i.b16 %v1288_v8, %v1287_v4  ;;  %v1283_v17 = vsel %vm1082_vm0, 0, %v1282_v9  ;;  %v1293_v18 = vshrl.u32 %v1264_v11, 16  ;;  %1023 = vmatpush.bf16.msra.mxu2 %v3864_v14 }
 0x1ab   : > { %1432 = vmatpush.bf16.xpose.msra.mxu3 %v1423_v15  ;;  %v1294_v19 = vshrl.u32 %v1283_v17, 16  ;;  %v1155_v20 = vsel %vm1082_vm0, %v1154_v10, %v1147_v12  ;;  %v1292_v25 = vpack.i.b16 %v1283_v17, %v1264_v11  ;;  %v1142_v30 = vsel %vm1082_vm0, 0, %v1141_v23 }
 0x1ac   : > { %v1442_v21 = vsel %vm1418_vm1, %v1289_v16, 0  ;;  %v1159_v22 = vperm.slane %v1155_v20, %v5239_v38  ;;  %v1171_v34 = vshrl.u32 %v1142_v30, 16  ;;  %v5316_v41 = vand.u32 127, %v1499_v40 }
 0x1ad   : > { %v1295_v24 = vpack.i.b16 %v1294_v19, %v1293_v18  ;;  %1024 = vmatmul.bf16.vlgmr.msra.gmra.mxu2 %v5205_v50  ;;  %v1461_v33 = vsel %vm1418_vm1, %v1292_v25, 0  ;;  %v1500_v50 = vshrl.u32 %v1499_v40, 7  ;;  %v1033_v57 = vperm.slane %v5210_v51, 2 }
 0x1ae   : > { %v1160_v26 = vrot.slane %v1159_v22, 4  ;;  %v1164_v29 = vpack.i.b16 %v1159_v22, %v1140_v6  ;;  %v1166_v35 = vshrl.u32 %v1159_v22, 16  ;;  %vm2787_vm11 = vcmp.lt.s32.totalorder %v5316_v41, 9 }
 0x1af   : > { %v1480_v28 = vsel %vm1418_vm1, %v1295_v24, 0  ;;  %vm1503_vm2 = vcmp.le.s32.totalorder %v5316_v41, %v1500_v50 }
 0x1b0   : > { %1489 = vmatpush.bf16.xpose.msrb.mxu0 %v1480_v28  ;;  %v1161_v31 = vsel %vm1082_vm0, 0, %v1160_v26  ;;  %v1167_v37 = vpack.i.b16 %v1166_v35, %v1165_v36 }
 0x1b1   : > { %v1172_v32 = vshrl.u32 %v1161_v31, 16  ;;  %v1170_v39 = vpack.i.b16 %v1161_v31, %v1142_v30 }
 0x1b2   : > { %3949 = vmatmul.msk.bf16.vlgmr.msra.gmra.mxu3 %vm1418_vm1, %v1164_v29 }
 0x1b3   : > { %1451 = vmatpush.bf16.xpose.msrb.mxu3 %v1442_v21  ;;  %v1173_v27 = vpack.i.b16 %v1172_v32, %v1171_v34 }
 0x1b7   : > { %3952 = vmatmul.msk.bf16.vlgmr.msrb.gmra.mxu0 %vm1418_vm1, %v1173_v27 }
 0x1bb   : > { %1470 = vmatpush.bf16.xpose.msra.mxu3 %v1461_v33 }
 0x1c2   : > { %3950 = vmatmul.msk.bf16.vlgmr.msrb.gmra.mxu3 %vm1418_vm1, %v1167_v37 }
 0x1d2   : > { %3951 = vmatmul.msk.bf16.vlgmr.msra.gmra.mxu3 %vm1418_vm1, %v1170_v39 }
 0x230   : > { %v1025_v42 = vpop.f32.mrf.mxu2 }
 0x231   : > { %v1034_v60 = vadd.f32 %v1033_v57, %v1025_v42 }
 0x233   : > { %v1296_v63 = vpack.c.bf16 %v1034_v60, %v1034_v60 }
 0x234   : > { %v1491_v43 = vpop.f32.mrf.mxu0 }
 0x235   : > { %v1498_v44 = vmul.f32 0.17677669, %v1491_v43  ;;  %v1434_v45 = vpop.f32.mrf.mxu3  ;;  %v1307_v30 = vshrl.u32 %v1296_v63, 16 }
 0x236   : > { %v1495_v46 = vmul.f32 0.17677669, %v1434_v45 }
 0x237   : > { %v1509_v47 = vsel %vm1503_vm2, %v1498_v44, -1e+30 }
 0x238   : > { %v1520_v49 = vsel %vm1510_vm3, %v1509_v47, -inf  ;;  %v1506_v52 = vsel %vm1503_vm2, %v1495_v46, -1e+30  ;;  %v1027_v54 = vpop.f32.mrf.mxu2 }
 0x239   : > { %1521 = vmax.xlane.f32.xlu2 %v1520_v49  ;;  %v1511_v53 = vsel %vm1510_vm3, %v1506_v52, -inf }
 0x23a   : > { %1512 = vmax.xlane.f32.xlu0 %v1511_v53 }
 0x23c   : > { %v1493_v55 = vpop.f32.mrf.mxu0 }
 0x23d   : > { %v1436_v56 = vpop.f32.mrf.mxu3 }
 0x245   : > { %v1453_v58 = vpop.f32.mrf.mxu3 }
 0x246   : > { %v1496_v59 = vmul.f32 0.17677669, %v1453_v58 }
 0x248   : > { %v1507_v61 = vsel %vm1503_vm2, %v1496_v59, -1e+30 }
 0x249   : > { %v1514_v62 = vsel %vm1510_vm3, %v1507_v61, -inf }
 0x24a   : > { %1515 = vmax.xlane.f32.xlu2 %v1514_v62 }
 0x24d   : > { %v1455_v0 = vpop.f32.mrf.mxu3 }
 0x24e   : > { %1298 = vrot.lane.b32.xlu0 %v1296_v63, %s4858_s6 }
 0x255   : > { %v1472_v1 = vpop.f32.mrf.mxu3 }
 0x256   : > { %v1497_v2 = vmul.f32 0.17677669, %v1472_v1 }
 0x258   : > { %v1508_v3 = vsel %vm1503_vm2, %v1497_v2, -1e+30 }
 0x259   : > { %v1517_v4 = vsel %vm1510_vm3, %v1508_v3, -inf }
 0x25a   : > { %1518 = vmax.xlane.f32.xlu1 %v1517_v4 }
 0x25d   : > { %v1474_v5 = vpop.f32.mrf.mxu3 }
 0x262   : > { %1302 = vrot.lane.b32.xlu2 %v1296_v63, %s4857_s2 }
 0x273   : > { %1300 = vrot.lane.b32.xlu1 %v1296_v63, %s4859_s8 }
 0x2ac   : > { %v1522_v6 = vpop.xlane.xlu2 %1521 }
 0x2ad   : > { %v1513_v7 = vpop.xlane.xlu0 %1512  ;;  %v1526_v9 = vsub.f32 %v1509_v47, %v1522_v6 }
 0x2ae   : > { %v1523_v8 = vsub.f32 %v1506_v52, %v1513_v7 }
 0x2af   : > { %v1533_v11 = vmul.f32 1.442695, %v1526_v9 }
 0x2b0   : > { %v1527_v10 = vmul.f32 1.442695, %v1523_v8 }
 0x2b2   : > { %4516 = vpow2.f32 %v1527_v10 }
 0x2b3   : > { %4518 = vpow2.f32 %v1533_v11 }
 0x2b8   : > { %v5335_v12 = vpop.eup %4516 }
 0x2b9   : > { %v1535_v14 = vsel %vm1510_vm3, %v5335_v12, 0.0  ;;  %v5339_v16 = vpop.eup %4518 }
 0x2ba   : > { %1536 = vadd.xlane.f32.xlu0 %v1535_v14  ;;  %v1544_v19 = vsel %vm1510_vm3, %v5339_v16, 0.0 }
 0x2bd   : > { %v1516_v15 = vpop.xlane.xlu2 %1515 }
 0x2be   : > { %v1524_v17 = vsub.f32 %v1507_v61, %v1516_v15 }
 0x2c0   : > { %v1529_v18 = vmul.f32 1.442695, %v1524_v17  ;;  %v1299_v28 = vpop.permute.xlu0 %1298 }
 0x2c1   : > { %v1308_v29 = vshrl.u32 %v1299_v28, 16  ;;  %v1306_v31 = vpack.i.b16 %v1299_v28, %v1296_v63 }
 0x2c2   : > { %4520 = vpow2.f32 %v1529_v18  ;;  %1545 = vadd.xlane.f32.xlu0 %v1544_v19 }
 0x2c3   : > { %v1309_v33 = vpack.i.b16 %v1308_v29, %v1307_v30  ;;  %v1320_v34 = vperm.slane %v1306_v31, %v5229_v13 }
 0x2c5   : > { %v1303_v32 = vpop.permute.xlu2 %1302  ;;  %v1346_v36 = vperm.slane %v1309_v33, %v5229_v13  ;;  %v1328_v40 = vrot.slane %v1320_v34, 4 }
 0x2c6   : > { %v1314_v27 = vshrl.u32 %v1303_v32, 16 }
 0x2c7   : > { %v1354_v43 = vrot.slane %v1346_v36, 4 }
 0x2c8   : > { %v5343_v20 = vpop.eup %4520 }
 0x2c9   : > { %v1538_v21 = vsel %vm1510_vm3, %v5343_v20, 0.0 }
 0x2ca   : > { %1539 = vadd.xlane.f32.xlu2 %v1538_v21 }
 0x2cd   : > { %v1519_v22 = vpop.xlane.xlu1 %1518 }
 0x2ce   : > { %v1525_v23 = vsub.f32 %v1508_v3, %v1519_v22 }
 0x2d0   : > { %v1531_v24 = vmul.f32 1.442695, %v1525_v23 }
 0x2d2   : > { %4522 = vpow2.f32 %v1531_v24 }
 0x2d8   : > { %v5347_v25 = vpop.eup %4522 }
 0x2d9   : > { %v1541_v26 = vsel %vm1510_vm3, %v5347_v25, 0.0 }
 0x2da   : > { %1542 = vadd.xlane.f32.xlu1 %v1541_v26 }
 0x2e5   : > { %v1301_v35 = vpop.permute.xlu1 %1300 }
 0x2e6   : > { %v1313_v37 = vshrl.u32 %v1301_v35, 16  ;;  %v1312_v39 = vpack.i.b16 %v1303_v32, %v1301_v35 }
 0x2e8   : > { %v1315_v50 = vpack.i.b16 %v1314_v27, %v1313_v37  ;;  %v1325_v42 = vperm.slane %v1312_v39, %v5229_v13 }
 0x2ea   : > { %v1326_v44 = vrot.slane %v1325_v42, 4  ;;  %v1329_v45 = vsel %vm1082_vm0, %v1325_v42, %v1328_v40  ;;  %v1351_v46 = vperm.slane %v1315_v50, %v5229_v13 }
 0x2eb   : > { %v1337_v47 = vperm.slane %v1329_v45, %v5239_v38 }
 0x2ec   : > { %v1327_v49 = vsel %vm1082_vm0, %v1326_v44, %v1320_v34  ;;  %v1352_v52 = vrot.slane %v1351_v46, 4  ;;  %v1355_v53 = vsel %vm1082_vm0, %v1351_v46, %v1354_v43 }
 0x2ed   : > { %v1333_v54 = vperm.slane %v1327_v49, %v5239_v38  ;;  %v1340_v55 = vrot.slane %v1337_v47, 4  ;;  %v1363_v56 = vperm.slane %v1355_v53, %v5239_v38 }
 0x2ee   : > { %v1353_v57 = vsel %vm1082_vm0, %v1352_v52, %v1346_v36 }
 0x2ef   : > { %v1338_v58 = vrot.slane %v1333_v54, 4  ;;  %v1341_v59 = vsel %vm1082_vm0, 0, %v1340_v55  ;;  %v1359_v60 = vperm.slane %v1353_v57, %v5239_v38  ;;  %v1366_v61 = vrot.slane %v1363_v56, 4 }
 0x2f0   : > { %v1373_v62 = vrot.slane %v1341_v59, 4  ;;  %v1368_v3 = vsel %vm1082_vm0, %v1340_v55, %v1333_v54 }
 0x2f1   : > { %v1339_v63 = vsel %vm1082_vm0, 0, %v1338_v58  ;;  %v1364_v0 = vrot.slane %v1359_v60, 4  ;;  %v1367_v1 = vsel %vm1082_vm0, 0, %v1366_v61  ;;  %v1387_v7 = vsel %vm1082_vm0, %v1366_v61, %v1359_v60 }
 0x2f2   : > { %v1392_v2 = vrot.slane %v1367_v1, 4  ;;  %v1374_v4 = vsel %vm1082_vm0, %v1373_v62, %v1339_v63  ;;  %v1372_v9 = vperm.slane %v1368_v3, %v5229_v13  ;;  %v1391_v15 = vperm.slane %v1387_v7, %v5229_v13 }
 0x2f3   : > { %v1365_v5 = vsel %vm1082_vm0, 0, %v1364_v0  ;;  %v1378_v6 = vperm.slane %v1374_v4, %v5229_v13 }
 0x2f4   : > { %v1393_v8 = vsel %vm1082_vm0, %v1392_v2, %v1365_v5 }
 0x2f5   : > { %v1379_v10 = vrot.slane %v1378_v6, 4  ;;  %v1397_v11 = vperm.slane %v1393_v8, %v5229_v13 }
 0x2f7   : > { %v1380_v14 = vsel %vm1082_vm0, %v1379_v10, %v1372_v9  ;;  %v1398_v17 = vrot.slane %v1397_v11, 4 }
 0x2f8   : > { %v1384_v18 = vperm.slane %v1380_v14, %v5239_v38 }
 0x2f9   : > { %v1399_v19 = vsel %vm1082_vm0, %v1398_v17, %v1391_v15 }
 0x2fa   : > { %v1403_v21 = vperm.slane %v1399_v19, %v5239_v38  ;;  %v1385_v22 = vrot.slane %v1384_v18, 4  ;;  %v1409_v23 = vshrl.u32 %v1384_v18, 16 }
 0x2fc   : > { %v1408_v24 = vpack.i.b16 %v1403_v21, %v1384_v18  ;;  %v1410_v26 = vshrl.u32 %v1403_v21, 16  ;;  %v1386_v28 = vsel %vm1082_vm0, 0, %v1385_v22  ;;  %v1404_v29 = vrot.slane %v1403_v21, 4 }
 0x2fd   : > { %v1415_v34 = vshrl.u32 %v1386_v28, 16 }
 0x2fe   : > { %v1564_v30 = vsel %vm1562_vm4, %v1408_v24, 0  ;;  %v1411_v31 = vpack.i.b16 %v1410_v26, %v1409_v23  ;;  %v1405_v32 = vsel %vm1082_vm0, 0, %v1404_v29 }
 0x2ff   : > { %1573 = vmatpush.bf16.msrb.mxu2 %v1564_v30  ;;  %v1414_v33 = vpack.i.b16 %v1405_v32, %v1386_v28  ;;  %v1416_v27 = vshrl.u32 %v1405_v32, 16 }
 0x300   : > { %v1583_v35 = vsel %vm1562_vm4, %v1411_v31, 0 }
 0x301   : > { %v1602_v36 = vsel %vm1562_vm4, %v1414_v33, 0  ;;  %v1417_v37 = vpack.i.b16 %v1416_v27, %v1415_v34 }
 0x302   : > { %1611 = vmatpush.bf16.msrb.mxu3 %v1602_v36 }
 0x303   : > { %1592 = vmatpush.bf16.msra.mxu2 %v1583_v35  ;;  %v1621_v39 = vsel %vm1562_vm4, %v1417_v37, 0 }
 0x304   : > { %1630 = vmatpush.bf16.msra.mxu0 %v1621_v39 }
 0x32d   : > { %v1537_v40 = vpop.xlane.xlu0 %1536 }
 0x32e   : > { %4524 = vrcp.f32 %v1537_v40 }
 0x334   : > { %v4525_v50 = vpop.eup %4524 }
 0x335   : > { %v1551_v42 = vmul.f32 %v4525_v50, %v5335_v12  ;;  %v1546_v43 = vpop.xlane.xlu0 %1545 }
 0x336   : > { %4526 = vrcp.f32 %v1546_v43 }
 0x337   : > { %v1555_v44 = vpack.c.bf16 %v1551_v42, %v1551_v42 }
 0x339   : > { %3953 = vmatmul.msk.bf16.vlgmr.msrb.gmra.mxu2 %vm1510_vm3, %v1555_v44 }
 0x33c   : > { %v4527_v45 = vpop.eup %4526 }
 0x33d   : > { %v1554_v46 = vmul.f32 %v4527_v45, %v5339_v16  ;;  %v1540_v47 = vpop.xlane.xlu2 %1539 }
 0x33e   : > { %4528 = vrcp.f32 %v1540_v47 }
 0x33f   : > { %v1558_v49 = vpack.c.bf16 %v1554_v46, %v1554_v46 }
 0x341   : > { %3956 = vmatmul.msk.bf16.vlgmr.msra.gmra.mxu0 %vm1510_vm3, %v1558_v49 }
 0x344   : > { %v4529_v52 = vpop.eup %4528 }
 0x345   : > { %v1552_v53 = vmul.f32 %v4529_v52, %v5343_v20 }
 0x347   : > { %v1556_v54 = vpack.c.bf16 %v1552_v53, %v1552_v53 }
 0x349   : > { %3954 = vmatmul.msk.bf16.vlgmr.msra.gmra.mxu2 %vm1510_vm3, %v1556_v54 }
 0x34d   : > { %v1543_v12 = vpop.xlane.xlu1 %1542 }
 0x34e   : > { %4530 = vrcp.f32 %v1543_v12 }
 0x354   : > { %v4531_v55 = vpop.eup %4530 }
 0x355   : > { %v1553_v56 = vmul.f32 %v4531_v55, %v5347_v25 }
 0x357   : > { %v1557_v57 = vpack.c.bf16 %v1553_v56, %v1553_v56 }
 0x359   : > { %3955 = vmatmul.msk.bf16.vlgmr.msrb.gmra.mxu3 %vm1510_vm3, %v1557_v57 }
 0x3bc   : > { %v1575_v16 = vpop.f32.mrf.mxu2 }
 0x3bd   : > { %v1639_v3 = vrot.slane %v1575_v16, 4 }
 0x3be   : > { %v1632_v58 = vpop.f32.mrf.mxu0 }
 0x3bf   : > { %v1649_v0 = vrot.slane %v1632_v58, 4 }
 0x3c4   : > { %v1577_v59 = vpop.f32.mrf.mxu2 }
 0x3c6   : > { %v1634_v60 = vpop.f32.mrf.mxu0 }
 0x3cc   : > { %v1594_v61 = vpop.f32.mrf.mxu2 }
 0x3cd   : > { %v1651_v62 = vrot.slane %v1594_v61, 4  ;;  %v1650_v1 = vsel %vm1082_vm0, %v1649_v0, %v1594_v61 }
 0x3ce   : > { %v1656_v25 = vperm.slane %v1650_v1, %v5229_v13 }
 0x3cf   : > { %v1652_v20 = vsel %vm1082_vm0, %v1632_v58, %v1651_v62 }
 0x3d0   : > { %v1660_v2 = vperm.slane %v1652_v20, %v5229_v13  ;;  %v1661_v10 = vrot.slane %v1656_v25, 4 }
 0x3d2   : > { %v1673_v7 = vrot.slane %v1660_v2, 4 }
 0x3d4   : > { %v1596_v63 = vpop.f32.mrf.mxu2 }
 0x3dc   : > { %v1613_v4 = vpop.f32.mrf.mxu3 }
 0x3dd   : > { %v1636_v5 = vrot.slane %v1613_v4, 4  ;;  %v1640_v6 = vsel %vm1082_vm0, %v1613_v4, %v1639_v3  ;;  %v4327_v3 = vld [vmem:[%s5117_s23 + $0x38] sm:$0xff]  ;;  %v4325_v4 = vld [vmem:[%s5117_s23 + $0x28] sm:$0xff] }
 0x3de   : > { %v1648_v8 = vperm.slane %v1640_v6, %v5229_v13  ;;  %1814 = vmatpush.bf16.msrb.mxu1 %v4327_v3  ;;  %v4323_v6 = vld [vmem:[%s5117_s23 + $0x18] sm:$0xff] }
 0x3df   : > { %v1638_v9 = vsel %vm1082_vm0, %v1636_v5, %v1575_v16  ;;  %v4324_v5 = vld [vmem:[%s5117_s23 + $0x20] sm:$0xff]  ;;  %v5477_v3 = vld [vmem:[%s5154_s4] sm:$0xff] }
 0x3e0   : > { %v1644_v11 = vperm.slane %v1638_v9, %v5229_v13  ;;  %v1674_v14 = vsel %vm1082_vm0, %v1673_v7, %v1648_v8  ;;  %v1675_v15 = vrot.slane %v1648_v8, 4  ;;  %v4322_v7 = vld [vmem:[%s5117_s23 + $0x10] sm:$0xff]  ;;  %v4321_v8 = vld [vmem:[%s5117_s23 + $0x8] sm:$0xff]  ;;  %v4320_v9 = vld [vmem:[%s5117_s23] sm:$0xff] }
 0x3e1   : > { %v1680_v17 = vperm.slane %v1674_v14, %v5239_v38 }
 0x3e2   : > { %v1662_v18 = vsel %vm1082_vm0, %v1661_v10, %v1644_v11  ;;  %v1663_v19 = vrot.slane %v1644_v11, 4  ;;  %v1676_v21 = vsel %vm1082_vm0, %v1660_v2, %v1675_v15 }
 0x3e3   : > { %v1668_v22 = vperm.slane %v1662_v18, %v5239_v38  ;;  %v1684_v23 = vperm.slane %v1676_v21, %v5239_v38  ;;  %v1689_v29 = vrot.slane %v1680_v17, 4  ;;  %v4079_v21 = vld [vmem:[%s5125_s11 + $0x70] sm:$0xf] }
 0x3e4   : > { %v1664_v24 = vsel %vm1082_vm0, %v1656_v25, %v1663_v19  ;;  %v1615_v26 = vpop.f32.mrf.mxu3  ;;  %v4326_v25 = vld [vmem:[%s5117_s23 + $0x30] sm:$0xff] }
 0x3e5   : > { %v1672_v28 = vperm.slane %v1664_v24, %v5239_v38  ;;  %v1691_v30 = vrot.slane %v1684_v23, 4  ;;  %v1685_v31 = vrot.slane %v1668_v22, 4  ;;  %v1690_v37 = vsel %vm1082_vm0, 0.0, %v1689_v29  ;;  %1815 = vmatpush.bf16.msrb.mxu1 %v4326_v25  ;;  %v4071_v23 = vld [vmem:[%s5125_s11 + $0x60] sm:$0xf] }
 0x3e6   : > { %v4349_v26 = vld [vmem:[%s5125_s11 + $0x64] sm:$0xf0]  ;;  %v4063_v29 = vld [vmem:[%s5125_s11 + $0x50] sm:$0xf]  ;;  %v2063_v25 = vperm.slane %v5477_v3, 7 }
 0x3e7   : > { %v1687_v32 = vrot.slane %v1672_v28, 4  ;;  %v1692_v33 = vsel %vm1082_vm0, 0.0, %v1691_v30  ;;  %v1704_v34 = vsel %vm1082_vm0, %v1691_v30, %v1680_v17  ;;  %v1686_v44 = vsel %vm1082_vm0, 0.0, %v1685_v31  ;;  %v4347_v30 = vld [vmem:[%s5125_s11 + $0x54] sm:$0xf0] }
 0x3e8   : > { %v1708_v27 = vperm.slane %v1704_v34, %v5229_v13  ;;  %v1709_v35 = vrot.slane %v1692_v33, 4  ;;  %v4072_v28 = vor.u32 %v4349_v26, %v4071_v23  ;;  %v4064_v31 = vor.u32 %v4347_v30, %v4063_v29  ;;  %v4345_v33 = vld [vmem:[%s5125_s11 + $0x44] sm:$0xf0] }
 0x3e9   : > { %v1688_v36 = vsel %vm1082_vm0, 0.0, %v1687_v32  ;;  %v1693_v39 = vsel %vm1082_vm0, %v1687_v32, %v1668_v22  ;;  %1816 = vmatpush.bf16.msrb.mxu1 %v4325_v4  ;;  %v4351_v22 = vld [vmem:[%s5125_s11 + $0x74] sm:$0xf0]  ;;  %v4055_v32 = vld [vmem:[%s5125_s11 + $0x40] sm:$0xf]  ;;  %v1855_v30 = vperm.slane %v5477_v3, 4 }
 0x3ea   : > { %v1710_v40 = vsel %vm1082_vm0, %v1709_v35, %v1690_v37  ;;  %v1697_v50 = vperm.slane %v1693_v39, %v5229_v13  ;;  %v1698_v42 = vrot.slane %v1688_v36, 4  ;;  %v1729_v43 = vrot.slane %v1708_v27, 4  ;;  %v4343_v35 = vld [vmem:[%s5125_s11 + $0x34] sm:$0xf0]  ;;  %v4039_v37 = vld [vmem:[%s5125_s11 + $0x20] sm:$0xf] }
 0x3eb   : > { %v1714_v45 = vperm.slane %v1710_v40, %v5229_v13  ;;  %v4080_v24 = vor.u32 %v4351_v22, %v4079_v21  ;;  %v4056_v34 = vor.u32 %v4345_v33, %v4055_v32  ;;  %v4341_v39 = vld [vmem:[%s5125_s11 + $0x24] sm:$0xf0]  ;;  %v1857_v33 = vperm.slane %v5477_v3, 5 }
 0x3ec   : > { %v1699_v46 = vsel %vm1082_vm0, %v1698_v42, %v1686_v44  ;;  %v1717_v47 = vrot.slane %v1697_v50, 4  ;;  %v4040_v40 = vor.u32 %v4341_v39, %v4039_v37  ;;  %v4339_v42 = vld [vmem:[%s5125_s11 + $0x14] sm:$0xf0]  ;;  %v4081_v37 = vld [vmem:[%s5125_s11 + $0x78] sm:$0xf0] }
 0x3ed   : > { %v1703_v49 = vperm.slane %v1699_v46, %v5229_v13  ;;  %v1730_v52 = vsel %vm1082_vm0, %v1714_v45, %v1729_v43  ;;  %v1727_v53 = vrot.slane %v1714_v45, 4  ;;  %1817 = vmatpush.bf16.msrb.mxu1 %v4324_v5  ;;  %2035 = vmatpush.bf16.msra.mxu3 %v4080_v24  ;;  %v1765_v43 = vperm.slane %v5210_v51, 3  ;;  %v4023_v46 = vld [vmem:[%s5125_s11] sm:$0xf] }
 0x3ee   : > { %v1738_v54 = vperm.slane %v1730_v52, %v5239_v38  ;;  %v4862_v51 = vmov 128.0  }
 0x3ef   : > { %v1718_v12 = vsel %vm1082_vm0, %v1703_v49, %v1717_v47  ;;  %v1715_v55 = vrot.slane %v1703_v49, 4  ;;  %v1728_v56 = vsel %vm1082_vm0, %v1727_v53, %v1708_v27  ;;  %v4047_v27 = vld [vmem:[%s5125_s11 + $0x30] sm:$0xf]  ;;  %v4337_v47 = vld [vmem:[%s5125_s11 + $0x4] sm:$0xf0]  ;;  %4532 = vrcp.f32 %v4862_v51 }
 0x3f0   : > { %v1726_v57 = vperm.slane %v1718_v12, %v5239_v38  ;;  %v1743_v16 = vrot.slane %v1738_v54, 4  ;;  %v1734_v58 = vperm.slane %v1728_v56, %v5239_v38  ;;  %v4048_v36 = vor.u32 %v4343_v35, %v4047_v27  ;;  %v826_v12 = vld [vmem:[%s5149_s21 + $0x8] sm:$0xff] }
 0x3f1   : > { %v1716_v59 = vsel %vm1082_vm0, %v1715_v55, %v1697_v50  ;;  %1818 = vmatpush.bf16.msrb.mxu1 %v4323_v6  ;;  %2036 = vmatpush.bf16.msra.mxu3 %v4072_v28  ;;  %v4031_v50 = vld [vmem:[%s5125_s11 + $0x10] sm:$0xf]  ;;  %v4024_v53 = vor.u32 %v4337_v47, %v4023_v46  ;;  %v4332_v6 = vld [vmem:[%s5123_s15 + $0x20] sm:$0xff] }
 0x3f2   : > { %v1744_v60 = vsel %vm1082_vm0, %v1743_v16, %v1726_v57  ;;  %v1745_v61 = vrot.slane %v1726_v57, 4  ;;  %v1722_v62 = vperm.slane %v1716_v59, %v5239_v38  ;;  %v1739_v63 = vrot.slane %v1734_v58, 4  ;;  %v4335_v57 = vld [vmem:[%s5123_s15 + $0x38] sm:$0xff] }
 0x3f3   : > { %1752 = vrot.lane.b32.xlu0 %v1744_v60, %s4859_s8  ;;  %v4032_v44 = vor.u32 %v4339_v42, %v4031_v50  ;;  %1925 = vmatpush.bf16.msrb.mxu2 %v4335_v57  ;;  %v4073_v50 = vld [vmem:[%s5125_s11 + $0x68] sm:$0xf0]  ;;  %v4346_v42 = vld [vmem:[%s5125_s11 + $0x54] sm:$0xf]  ;;  %v4049_v57 = vld [vmem:[%s5125_s11 + $0x38] sm:$0xf0] }
 0x3f4   : > { %v1746_v0 = vsel %vm1082_vm0, %v1738_v54, %v1745_v61  ;;  %v1741_v20 = vrot.slane %v1722_v62, 4  ;;  %v1740_v1 = vsel %vm1082_vm0, %v1739_v63, %v1722_v62  ;;  %v825_v54 = vld [vmem:[%s5149_s21] sm:$0xff] }
 0x3f5   : > { %1756 = vrot.lane.b32.xlu2 %v1746_v0, %s4858_s6  ;;  %1819 = vmatpush.bf16.msrb.mxu1 %v4322_v7  ;;  %v5467_v55 = vpack.c.bf16 %v826_v12, %v825_v54  ;;  %v4533_v16 = vpop.eup %4532  ;;  %v4344_v54 = vld [vmem:[%s5125_s11 + $0x44] sm:$0xf]  ;;  %v4057_v12 = vld [vmem:[%s5125_s11 + $0x48] sm:$0xf0] }
 0x3f6   : > { %v1742_v2 = vsel %vm1082_vm0, %v1734_v58, %v1741_v20  ;;  %2037 = vmatpush.bf16.msra.mxu3 %v4064_v31  ;;  %vm1835_vm7 = vweird.f32 %v4533_v16  ;;  %v4060_v51 = vor.u32 %v4344_v54, %v4057_v12 }
 0x3f7   : > { %1748 = vrot.lane.b32.xlu1 %v1742_v2, %s4857_s2  ;;  %v4333_v2 = vld [vmem:[%s5123_s15 + $0x28] sm:$0xff] }
 0x3f9   : > { %1820 = vmatpush.bf16.msrb.mxu1 %v4321_v8  ;;  %v4331_v8 = vld [vmem:[%s5123_s15 + $0x18] sm:$0xff] }
 0x3fa   : > { %2038 = vmatpush.bf16.msra.mxu3 %v4056_v34 }
 0x3fd   : > { %1821 = vmatpush.bf16.msrb.mxu1 %v4320_v9 }
 0x3fe   : > { %2039 = vmatpush.bf16.msra.mxu3 %v4048_v36  ;;  %v4350_v36 = vld [vmem:[%s5125_s11 + $0x74] sm:$0xf] }
 0x3ff   : > { %v4084_v39 = vor.u32 %v4350_v36, %v4081_v37 }
 0x401   : > { %2049 = vmatpush.bf16.msrb.mxu0 %v4084_v39 }
 0x402   : > { %2040 = vmatpush.bf16.msra.mxu3 %v4040_v40  ;;  %v4348_v40 = vld [vmem:[%s5125_s11 + $0x64] sm:$0xf] }
 0x406   : > { %2041 = vmatpush.bf16.msra.mxu3 %v4032_v44  ;;  %v4065_v44 = vld [vmem:[%s5125_s11 + $0x58] sm:$0xf0] }
 0x40a   : > { %2042 = vmatpush.bf16.msra.mxu3 %v4024_v53 }
 0x40d   : > { %2043 = vmatmul.bf16.vlgmr.msra.gmra.mxu3 %v5467_v55 }
 0x44f   : > { %v1757_v15 = vpop.permute.xlu2 %1756 }
 0x465   : > { %v1753_v11 = vpop.permute.xlu0 %1752 }
 0x469   : > { %v1749_v10 = vpop.permute.xlu1 %1748 }
 0x46a   : > { %v1759_v14 = vsel %vm1418_vm1, %v1740_v1, %v1749_v10  ;;  %v4334_v1 = vld [vmem:[%s5123_s15 + $0x30] sm:$0xff] }
 0x46b   : > { %v1761_v17 = vsel %vm1760_vm5, %v1759_v14, %v1753_v11  ;;  %1926 = vmatpush.bf16.msrb.mxu2 %v4334_v1  ;;  %v4330_v11 = vld [vmem:[%s5123_s15 + $0x10] sm:$0xff] }
 0x46c   : > { %v1763_v18 = vsel %vm1762_vm6, %v1761_v17, %v1757_v15  ;;  %v4329_v15 = vld [vmem:[%s5123_s15 + $0x8] sm:$0xff]  ;;  %v4328_v17 = vld [vmem:[%s5123_s15] sm:$0xff] }
 0x46d   : > { %v1764_v19 = vpack.c.bf16 %v1763_v18, %v1763_v18 }
 0x46f   : > { %1822 = vmatmul.bf16.vlgmr.msrb.gmra.mxu1 %v1764_v19  ;;  %1927 = vmatpush.bf16.msrb.mxu2 %v4333_v2 }
 0x473   : > { %1928 = vmatpush.bf16.msrb.mxu2 %v4332_v6 }
 0x477   : > { %1929 = vmatpush.bf16.msrb.mxu2 %v4331_v8 }
 0x47b   : > { %1930 = vmatpush.bf16.msrb.mxu2 %v4330_v11 }
 0x47f   : > { %1931 = vmatpush.bf16.msrb.mxu2 %v4329_v15 }
 0x483   : > { %1932 = vmatpush.bf16.msrb.mxu2 %v4328_v17 }
 0x490   : > { %v2044_v4 = vpop.f32.mrf.mxu3 }
 0x491   : > { %v2064_v5 = vadd.f32 %v2063_v25, %v2044_v4  ;;  %v4033_v4 = vld [vmem:[%s5125_s11 + $0x18] sm:$0xf0] }
 0x493   : > { %v5481_v7 = vpack.c.bf16 %v2064_v5, %v2064_v5 }
 0x495   : > { %2211 = vrot.lane.b32.xlu2 %v5481_v7, %s4858_s6 }
 0x498   : > { %v2046_v9 = vpop.f32.mrf.mxu3 }
 0x499   : > { %v2065_v10 = vadd.f32 %v2063_v25, %v2046_v9  ;;  %v4338_v25 = vld [vmem:[%s5125_s11 + $0x14] sm:$0xf] }
 0x49a   : > { %v4036_v15 = vor.u32 %v4338_v25, %v4033_v4 }
 0x49b   : > { %v5487_v14 = vpack.c.bf16 %v2065_v10, %v2065_v10 }
 0x49d   : > { %2213 = vrot.lane.b32.xlu2 %v5487_v14, %s4858_s6 }
 0x4a5   : > { %2215 = vrot.lane.b32.xlu2 %v5481_v7, %s4859_s8 }
 0x4ad   : > { %2217 = vrot.lane.b32.xlu2 %v5487_v14, %s4859_s8 }
 0x4b5   : > { %2219 = vrot.lane.b32.xlu2 %v5481_v7, %s4857_s2 }
 0x4ec   : > { %v1823_v45 = vpop.f32.mrf.mxu1 }
 0x4ed   : > { %v1824_v49 = vadd.f32 %v1823_v45, %v1765_v43  ;;  %v4076_v43 = vor.u32 %v4348_v40, %v4073_v50  ;;  %v4068_v45 = vor.u32 %v4346_v42, %v4065_v44 }
 0x4ef   : > { %v1827_v52 = vadd.f32 %v1824_v49, %v5201_v48  ;;  %v1831_v48 = vmul.f32 128.0, %v4533_v16  ;;  %2050 = vmatpush.bf16.msrb.mxu0 %v4076_v43  ;;  %v2212_v46 = vpop.permute.xlu2 %2211 }
 0x4f0   : > { %v2227_v53 = vshrl.u32 %v2212_v46, 16 }
 0x4f1   : > { %1828 = vadd.xlane.f32.xlu0 %v1827_v52  ;;  %v1832_v58 = vsub.f32 1.0, %v1831_v48 }
 0x4f3   : > { %v1833_v59 = vmul.f32 %v4533_v16, %v1832_v58  ;;  %2051 = vmatpush.bf16.msrb.mxu0 %v4068_v45 }
 0x4f4   : > { %v1825_v56 = vpop.f32.mrf.mxu1 }
 0x4f5   : > { %v1834_v60 = vadd.f32 %v4533_v16, %v1833_v59  ;;  %v4342_v56 = vld [vmem:[%s5125_s11 + $0x34] sm:$0xf] }
 0x4f6   : > { %v4052_v58 = vor.u32 %v4342_v56, %v4049_v57 }
 0x4f7   : > { %v5471_v61 = vsel %vm1835_vm7, %v4533_v16, %v1834_v60  ;;  %v2214_v47 = vpop.permute.xlu2 %2213  ;;  %v2225_v16 = vpack.i.b16 %v2212_v46, %v5481_v7  ;;  %2052 = vmatpush.bf16.msrb.mxu0 %v4060_v51  ;;  %v2238_v60 = vshrl.u32 %v5487_v14, 16 }
 0x4f9   : > { %v2251_v1 = vperm.slane %v2225_v16, %v5229_v13 }
 0x4fb   : > { %2053 = vmatpush.bf16.msrb.mxu0 %v4052_v58  ;;  %v2259_v10 = vrot.slane %v2251_v1, 4 }
 0x4ff   : > { %v2216_v49 = vpop.permute.xlu2 %2215 }
 0x500   : > { %v2232_v8 = vshrl.u32 %v2216_v49, 16 }
 0x505   : > { %2221 = vrot.lane.b32.xlu0 %v5487_v14, %s4857_s2 }
 0x507   : > { %v2218_v48 = vpop.permute.xlu2 %2217 }
 0x508   : > { %v2244_v9 = vshrl.u32 %v2218_v48, 16 }
 0x50f   : > { %v2220_v11 = vpop.permute.xlu2 %2219 }
 0x510   : > { %v2231_v17 = vpack.i.b16 %v2220_v11, %v2216_v49 }
 0x564   : > { %v1829_v62 = vpop.xlane.xlu0 %1828 }
 0x565   : > { %v1837_v63 = vmul.f32 %v5471_v61, %v1829_v62  ;;  %v2237_v62 = vpack.i.b16 %v2214_v47, %v5487_v14 }
 0x567   : > { %v1838_v0 = vsub.f32 %v1827_v52, %v1837_v63  ;;  %v2226_v52 = vshrl.u32 %v5481_v7, 16  ;;  %v2239_v63 = vshrl.u32 %v2214_v47, 16  ;;  %v2303_v7 = vperm.slane %v2237_v62, %v5229_v13 }
 0x569   : > { %v1839_v20 = vmul.f32 %v1838_v0, %v1838_v0  ;;  %v2228_v59 = vpack.i.b16 %v2227_v53, %v2226_v52  ;;  %v2240_v6 = vpack.i.b16 %v2239_v63, %v2238_v60 }
 0x56b   : > { %1840 = vadd.xlane.f32.xlu1 %v1839_v20  ;;  %v4041_v20 = vld [vmem:[%s5125_s11 + $0x28] sm:$0xf0]  ;;  %v2277_v5 = vperm.slane %v2228_v59, %v5229_v13 }
 0x577   : > { %v2222_v14 = vpop.permute.xlu0 %2221 }
 0x5de   : > { %v1841_v18 = vpop.xlane.xlu1 %1840 }
 0x5df   : > { %v1842_v19 = vmul.f32 %v1841_v18, %v5471_v61  ;;  %v2233_v18 = vshrl.u32 %v2220_v11, 16 }
 0x5e1   : > { %v1843_v21 = vadd.f32 1e-05, %v1842_v19  ;;  %v2243_v19 = vpack.i.b16 %v2222_v14, %v2218_v48 }
 0x5e3   : > { %4534 = vrsqrt.f32 %v1843_v21  ;;  %vm1850_vm9 = vweird.f32 %v1843_v21 }
 0x5e9   : > { %v4535_v22 = vpop.eup %4534 }
 0x5ea   : > { %v1845_v23 = vmul.f32 %v4535_v22, %v1843_v21  ;;  %vm1851_vm8 = vweird.f32 %v4535_v22  ;;  %v2245_v21 = vshrl.u32 %v2222_v14, 16 }
 0x5eb   : > { %vm1852_vm10 = vmor %vm1850_vm9, %vm1851_vm8 }
 0x5ec   : > { %v1846_v24 = vmul.f32 %v4535_v22, %v1845_v23  ;;  %v4025_v23 = vld [vmem:[%s5125_s11 + $0x8] sm:$0xf0] }
 0x5ee   : > { %v1847_v26 = vmul.f32 0.5, %v1846_v24  ;;  %v2285_v24 = vrot.slane %v2277_v5, 4 }
 0x5f0   : > { %v1848_v28 = vsub.f32 1.5, %v1847_v26  ;;  %v2311_v26 = vrot.slane %v2303_v7, 4 }
 0x5f2   : > { %v1849_v29 = vmul.f32 %v4535_v22, %v1848_v28  ;;  %v2329_v28 = vperm.slane %v2240_v6, %v5229_v13 }
 0x5f4   : > { %v1853_v31 = vsel %vm1852_vm10, %v4535_v22, %v1849_v29  ;;  %v4336_v22 = vld [vmem:[%s5125_s11 + $0x4] sm:$0xf]  ;;  %v2234_v29 = vpack.i.b16 %v2233_v18, %v2232_v8  ;;  %v2337_v39 = vrot.slane %v2329_v28, 4 }
 0x5f5   : > { %v1854_v32 = vmul.f32 %v1853_v31, %v1838_v0  ;;  %v4340_v0 = vld [vmem:[%s5125_s11 + $0x24] sm:$0xf]  ;;  %v2246_v31 = vpack.i.b16 %v2245_v21, %v2244_v9 }
 0x5f6   : > { %v4044_v2 = vor.u32 %v4340_v0, %v4041_v20  ;;  %v2282_v36 = vperm.slane %v2234_v29, %v5229_v13 }
 0x5f7   : > { %v1856_v34 = vmul.f32 %v1855_v30, %v1854_v32  ;;  %v2256_v30 = vperm.slane %v2231_v17, %v5229_v13  ;;  %v2308_v32 = vperm.slane %v2243_v19, %v5229_v13  ;;  %v2334_v42 = vperm.slane %v2246_v31, %v5229_v13 }
 0x5f8   : > { %2054 = vmatpush.bf16.msrb.mxu0 %v4044_v2  ;;  %v2283_v44 = vrot.slane %v2282_v36, 4  ;;  %v2286_v45 = vsel %vm1082_vm0, %v2282_v36, %v2285_v24 }
 0x5f9   : > { %v5504_v27 = vadd.f32 %v1857_v33, %v1856_v34  ;;  %v4028_v33 = vor.u32 %v4336_v22, %v4025_v23  ;;  %v2257_v34 = vrot.slane %v2256_v30, 4  ;;  %v2309_v37 = vrot.slane %v2308_v32, 4 }
 0x5fa   : > { %v2312_v50 = vsel %vm1082_vm0, %v2308_v32, %v2311_v26  ;;  %v2294_v52 = vperm.slane %v2286_v45, %v5239_v38  ;;  %v2284_v54 = vsel %vm1082_vm0, %v2283_v44, %v2277_v5  ;;  %v2335_v56 = vrot.slane %v2334_v42, 4 }
 0x5fb   : > { %v1875_v35 = vpack.c.bf16 %v5504_v27, %v5504_v27  ;;  %v2258_v43 = vsel %vm1082_vm0, %v2257_v34, %v2251_v1  ;;  %v2310_v46 = vsel %vm1082_vm0, %v2309_v37, %v2303_v7  ;;  %v2320_v12 = vperm.slane %v2312_v50, %v5239_v38 }
 0x5fc   : > { %2055 = vmatpush.bf16.msrb.mxu0 %v4036_v15  ;;  %v2264_v47 = vperm.slane %v2258_v43, %v5239_v38  ;;  %v2316_v53 = vperm.slane %v2310_v46, %v5239_v38  ;;  %v2290_v16 = vperm.slane %v2284_v54, %v5239_v38  ;;  %v2297_v48 = vrot.slane %v2294_v52, 4 }
 0x5fd   : > { %1933 = vmatmul.bf16.vlgmr.msrb.gmra.mxu2 %v1875_v35  ;;  %v2260_v35 = vsel %vm1082_vm0, %v2256_v30, %v2259_v10  ;;  %v2323_v62 = vrot.slane %v2320_v12, 4  ;;  %v2338_v1 = vsel %vm1082_vm0, %v2334_v42, %v2337_v39  ;;  %v2336_v11 = vsel %vm1082_vm0, %v2335_v56, %v2329_v28 }
 0x5fe   : > { %v2268_v40 = vperm.slane %v2260_v35, %v5239_v38  ;;  %v2269_v51 = vrot.slane %v2264_v47, 4  ;;  %v2321_v60 = vrot.slane %v2316_v53, 4  ;;  %v2295_v0 = vrot.slane %v2290_v16, 4 }
 0x5ff   : > { %v2298_v20 = vsel %vm1082_vm0, 0, %v2297_v48  ;;  %v2370_v7 = vsel %vm1082_vm0, %v2297_v48, %v2290_v16  ;;  %v2324_v8 = vsel %vm1082_vm0, 0, %v2323_v62  ;;  %v2342_v14 = vperm.slane %v2336_v11, %v5239_v38 }
 0x600   : > { %v2271_v49 = vrot.slane %v2268_v40, 4  ;;  %2056 = vmatpush.bf16.msrb.mxu0 %v4028_v33  ;;  %v2270_v63 = vsel %vm1082_vm0, 0, %v2269_v51  ;;  %v2375_v4 = vrot.slane %v2298_v20, 4  ;;  %v2296_v5 = vsel %vm1082_vm0, 0, %v2295_v0 }
 0x601   : > { %v2322_v10 = vsel %vm1082_vm0, 0, %v2321_v60  ;;  %v2389_v15 = vsel %vm1082_vm0, %v2323_v62, %v2316_v53  ;;  %v2394_v17 = vrot.slane %v2324_v8, 4  ;;  %v2374_v22 = vperm.slane %v2370_v7, %v5229_v13 }
 0x602   : > { %v2272_v57 = vsel %vm1082_vm0, 0, %v2271_v49  ;;  %v2351_v58 = vsel %vm1082_vm0, %v2271_v49, %v2264_v47  ;;  %v2376_v9 = vsel %vm1082_vm0, %v2375_v4, %v2296_v5  ;;  %v2347_v23 = vrot.slane %v2342_v14, 4 }
 0x603   : > { %v2356_v59 = vrot.slane %v2272_v57, 4  ;;  %2057 = vmatmul.bf16.vlgmr.msrb.gmra.mxu0 %v5467_v55  ;;  %v2355_v2 = vperm.slane %v2351_v58, %v5229_v13  ;;  %v2346_v55 = vperm.slane %v2338_v1, %v5239_v38  ;;  %v2380_v21 = vperm.slane %v2376_v9, %v5229_v13 }
 0x604   : > { %v2395_v24 = vsel %vm1082_vm0, %v2394_v17, %v2322_v10  ;;  %v2393_v29 = vperm.slane %v2389_v15, %v5229_v13  ;;  %v2348_v32 = vsel %vm1082_vm0, 0, %v2347_v23 }
 0x605   : > { %v2357_v25 = vsel %vm1082_vm0, %v2356_v59, %v2270_v63  ;;  %v2349_v19 = vrot.slane %v2346_v55, 4  ;;  %v2399_v30 = vperm.slane %v2395_v24, %v5229_v13  ;;  %v2381_v35 = vrot.slane %v2380_v21, 4 }
 0x606   : > { %v2361_v6 = vperm.slane %v2357_v25, %v5229_v13 }
 0x607   : > { %v2350_v28 = vsel %vm1082_vm0, 0, %v2349_v19  ;;  %v2408_v31 = vsel %vm1082_vm0, %v2349_v19, %v2342_v14  ;;  %v2400_v36 = vrot.slane %v2399_v30, 4  ;;  %v2382_v39 = vsel %vm1082_vm0, %v2381_v35, %v2374_v22 }
 0x608   : > { %v2362_v18 = vrot.slane %v2361_v6, 4  ;;  %v2413_v33 = vrot.slane %v2350_v28, 4  ;;  %v2412_v40 = vperm.slane %v2408_v31, %v5229_v13  ;;  %v2386_v50 = vperm.slane %v2382_v39, %v5239_v38 }
 0x609   : > { %v2401_v42 = vsel %vm1082_vm0, %v2400_v36, %v2393_v29  ;;  %v1876_v29 = vperm.slane %v5477_v3, 6 }
 0x60a   : > { %v2363_v26 = vsel %vm1082_vm0, %v2362_v18, %v2355_v2  ;;  %v2414_v37 = vsel %vm1082_vm0, %v2413_v33, %v2348_v32  ;;  %v2405_v44 = vperm.slane %v2401_v42, %v5239_v38  ;;  %v2431_v49 = vshrl.u32 %v2386_v50, 16 }
 0x60b   : > { %v2367_v34 = vperm.slane %v2363_v26, %v5239_v38  ;;  %v2418_v43 = vperm.slane %v2414_v37, %v5229_v13  ;;  %v2387_v52 = vrot.slane %v2386_v50, 4 }
 0x60c   : > { %v2406_v12 = vrot.slane %v2405_v44, 4  ;;  %v2442_v51 = vshrl.u32 %v2405_v44, 16 }
 0x60d   : > { %v2430_v45 = vshrl.u32 %v2367_v34, 16  ;;  %v2368_v46 = vrot.slane %v2367_v34, 4  ;;  %v2419_v47 = vrot.slane %v2418_v43, 4  ;;  %v2429_v53 = vpack.i.b16 %v2386_v50, %v2367_v34  ;;  %v5598_v34 = vld [vmem:[%s5154_s4 + $0x8] sm:$0x7f] }
 0x60e   : > { %v2388_v57 = vsel %vm1082_vm0, 0, %v2387_v52  ;;  %v2407_v58 = vsel %vm1082_vm0, 0, %v2406_v12  ;;  %v2066_v35 = vperm.slane %v5598_v34, 0 }
 0x60f   : > { %v2369_v54 = vsel %vm1082_vm0, 0, %v2368_v46  ;;  %v2420_v56 = vsel %vm1082_vm0, %v2419_v47, %v2412_v40  ;;  %v2432_v48 = vpack.i.b16 %v2431_v49, %v2430_v45  ;;  %v2437_v62 = vshrl.u32 %v2388_v57, 16 }
 0x610   : > { %v2424_v16 = vperm.slane %v2420_v56, %v5239_v38  ;;  %v2436_v59 = vshrl.u32 %v2369_v54, 16  ;;  %v2435_v60 = vpack.i.b16 %v2388_v57, %v2369_v54  ;;  %v2695_v0 = vunpack.c.l.b16 %v2429_v53 }
 0x611   : > { %v2448_v25 = vshrl.u32 %v2407_v58, 16  ;;  %v2717_v6 = vunpack.c.l.b16 %v2432_v48 }
 0x612   : > { %v2441_v63 = vpack.i.b16 %v2424_v16, %v2405_v44  ;;  %v2443_v20 = vshrl.u32 %v2424_v16, 16  ;;  %v2425_v1 = vrot.slane %v2424_v16, 4  ;;  %v2438_v2 = vpack.i.b16 %v2437_v62, %v2436_v59 }
 0x613   : > { %v2739_v9 = vunpack.c.l.b16 %v2435_v60 }
 0x614   : > { %v2696_v4 = vunpack.c.l.b16 %v2441_v63  ;;  %v2444_v5 = vpack.i.b16 %v2443_v20, %v2442_v51  ;;  %v2426_v7 = vsel %vm1082_vm0, 0, %v2425_v1  ;;  %v2761_v17 = vunpack.c.l.b16 %v2438_v2 }
 0x615   : > { %v2447_v8 = vpack.i.b16 %v2426_v7, %v2407_v58  ;;  %v2449_v10 = vshrl.u32 %v2426_v7, 16 }
 0x616   : > { %v2697_v11 = vpack.c.b16 %v2696_v4, %v2695_v0  ;;  %v2718_v55 = vunpack.c.l.b16 %v2444_v5 }
 0x617   : > { %v2740_v14 = vunpack.c.l.b16 %v2447_v8  ;;  %v2450_v15 = vpack.i.b16 %v2449_v10, %v2448_v25 }
 0x618   : > { %v2702_v18 = vsel %vm1418_vm1, %v2697_v11, 0  ;;  %v2719_v19 = vpack.c.b16 %v2718_v55, %v2717_v6 }
 0x619   : > { %2711 = vmatpush.bf16.xpose.msra.mxu1 %v2702_v18  ;;  %v2741_v21 = vpack.c.b16 %v2740_v14, %v2739_v9  ;;  %v2762_v22 = vunpack.c.l.b16 %v2450_v15 }
 0x61a   : > { %v2724_v23 = vsel %vm1418_vm1, %v2719_v19, 0 }
 0x61b   : > { %2733 = vmatpush.bf16.xpose.msra.mxu2 %v2724_v23  ;;  %v2746_v24 = vsel %vm1418_vm1, %v2741_v21, 0  ;;  %v2763_v26 = vpack.c.b16 %v2762_v22, %v2761_v17 }
 0x61c   : > { %2755 = vmatpush.bf16.xpose.msrb.mxu3 %v2746_v24 }
 0x61d   : > { %v2768_v28 = vsel %vm1418_vm1, %v2763_v26, 0 }
 0x61e   : > { %2777 = vmatpush.bf16.xpose.msra.mxu0 %v2768_v28 }
 0x680   : > { %v1934_v30 = vpop.f32.mrf.mxu2  ;;  %v2058_v36 = vpop.f32.mrf.mxu0 }
 0x681   : > { %v1935_v31 = vadd.f32 %v1934_v30, %v1876_v29  ;;  %v2067_v37 = vadd.f32 %v2066_v35, %v2058_v36 }
 0x683   : > { %v2085_v32 = vpack.c.bf16 %v1935_v31, %v1935_v31  ;;  %v5601_v39 = vpack.c.bf16 %v2067_v37, %v2067_v37 }
 0x685   : > { %2089 = vrot.lane.b32.xlu2 %v2085_v32, %s4859_s8  ;;  %2087 = vrot.lane.b32.xlu1 %v2085_v32, %s4858_s6  ;;  %v2096_v47 = vshrl.u32 %v2085_v32, 16 }
 0x686   : > { %2455 = vrot.lane.b32.xlu0 %v5601_v39, %s4858_s6 }
 0x688   : > { %v1936_v33 = vpop.f32.mrf.mxu2  ;;  %v2060_v49 = vpop.f32.mrf.mxu0 }
 0x689   : > { %v2068_v12 = vadd.f32 %v2066_v35, %v2060_v49 }
 0x68b   : > { %v5610_v16 = vpack.c.bf16 %v2068_v12, %v2068_v12 }
 0x68d   : > { %2091 = vrot.lane.b32.xlu2 %v2085_v32, %s4857_s2 }
 0x68e   : > { %2461 = vrot.lane.b32.xlu0 %v5610_v16, %s4859_s8 }
 0x695   : > { %2459 = vrot.lane.b32.xlu2 %v5601_v39, %s4859_s8 }
 0x6df   : > { %v2090_v3 = vpop.permute.xlu2 %2089 }
 0x6e0   : > { %v2102_v42 = vshrl.u32 %v2090_v3, 16 }
 0x6e7   : > { %v2092_v40 = vpop.permute.xlu2 %2091 }
 0x6e8   : > { %v2103_v50 = vshrl.u32 %v2092_v40, 16  ;;  %v2101_v43 = vpack.i.b16 %v2092_v40, %v2090_v3 }
 0x6ea   : > { %v2104_v44 = vpack.i.b16 %v2103_v50, %v2102_v42  ;;  %v2114_v45 = vperm.slane %v2101_v43, %v5229_v13 }
 0x6ec   : > { %v2140_v52 = vperm.slane %v2104_v44, %v5229_v13  ;;  %v2115_v56 = vrot.slane %v2114_v45, 4 }
 0x6ee   : > { %v2141_v48 = vrot.slane %v2140_v52, 4 }
 0x6f7   : > { %v2088_v46 = vpop.permute.xlu1 %2087 }
 0x6f8   : > { %v2095_v53 = vpack.i.b16 %v2088_v46, %v2085_v32  ;;  %v2097_v54 = vshrl.u32 %v2088_v46, 16 }
 0x6fa   : > { %v2098_v51 = vpack.i.b16 %v2097_v54, %v2096_v47  ;;  %v2109_v57 = vperm.slane %v2095_v53, %v5229_v13 }
 0x6fc   : > { %v2116_v58 = vsel %vm1082_vm0, %v2115_v56, %v2109_v57  ;;  %v2117_v59 = vrot.slane %v2109_v57, 4  ;;  %v2135_v60 = vperm.slane %v2098_v51, %v5229_v13 }
 0x6fd   : > { %v2122_v62 = vperm.slane %v2116_v58, %v5239_v38 }
 0x6fe   : > { %v2118_v63 = vsel %vm1082_vm0, %v2114_v45, %v2117_v59  ;;  %v2142_v0 = vsel %vm1082_vm0, %v2141_v48, %v2135_v60  ;;  %v2143_v20 = vrot.slane %v2135_v60, 4 }
 0x6ff   : > { %v2126_v1 = vperm.slane %v2118_v63, %v5239_v38  ;;  %v2148_v2 = vperm.slane %v2142_v0, %v5239_v38  ;;  %v2127_v4 = vrot.slane %v2122_v62, 4 }
 0x700   : > { %v2144_v25 = vsel %vm1082_vm0, %v2140_v52, %v2143_v20 }
 0x701   : > { %v2129_v5 = vrot.slane %v2126_v1, 4  ;;  %v2152_v6 = vperm.slane %v2144_v25, %v5239_v38  ;;  %v2153_v8 = vrot.slane %v2148_v2, 4  ;;  %v2128_v11 = vsel %vm1082_vm0, 0, %v2127_v4 }
 0x703   : > { %v2130_v7 = vsel %vm1082_vm0, 0, %v2129_v5  ;;  %v2155_v9 = vrot.slane %v2152_v6, 4  ;;  %v2157_v14 = vsel %vm1082_vm0, %v2129_v5, %v2122_v62  ;;  %v2154_v18 = vsel %vm1082_vm0, 0, %v2153_v8  ;;  %v2456_v5 = vpop.permute.xlu0 %2455  ;;  %v5664_v6 = vpop.permute.xlu2 %2459 }
 0x704   : > { %v2162_v10 = vrot.slane %v2130_v7, 4  ;;  %v2161_v23 = vperm.slane %v2157_v14, %v5229_v13 }
 0x705   : > { %v2156_v55 = vsel %vm1082_vm0, 0, %v2155_v9  ;;  %v2176_v21 = vsel %vm1082_vm0, %v2155_v9, %v2148_v2 }
 0x706   : > { %v2163_v15 = vsel %vm1082_vm0, %v2162_v10, %v2128_v11  ;;  %v2181_v17 = vrot.slane %v2156_v55, 4  ;;  %v2180_v28 = vperm.slane %v2176_v21, %v5229_v13 }
 0x707   : > { %v2167_v19 = vperm.slane %v2163_v15, %v5229_v13 }
 0x708   : > { %v2182_v22 = vsel %vm1082_vm0, %v2181_v17, %v2154_v18 }
 0x709   : > { %v2168_v24 = vrot.slane %v2167_v19, 4  ;;  %v2186_v26 = vperm.slane %v2182_v22, %v5229_v13 }
 0x70b   : > { %v2187_v29 = vrot.slane %v2186_v26, 4  ;;  %v2169_v30 = vsel %vm1082_vm0, %v2168_v24, %v2161_v23  ;;  %v2462_v41 = vpop.permute.xlu0 %2461 }
 0x70c   : > { %v2173_v31 = vperm.slane %v2169_v30, %v5239_v38  ;;  %v2488_v30 = vshrl.u32 %v2462_v41, 16 }
 0x70d   : > { %v2188_v32 = vsel %vm1082_vm0, %v2187_v29, %v2180_v28  ;;  %v2469_v29 = vpack.i.b16 %v2456_v5, %v5601_v39 }
 0x70e   : > { %v2192_v33 = vperm.slane %v2188_v32, %v5239_v38  ;;  %v2174_v35 = vrot.slane %v2173_v31, 4  ;;  %v2198_v36 = vshrl.u32 %v2173_v31, 16 }
 0x710   : > { %v2197_v37 = vpack.i.b16 %v2192_v33, %v2173_v31  ;;  %v2199_v3 = vshrl.u32 %v2192_v33, 16  ;;  %v2175_v40 = vsel %vm1082_vm0, 0, %v2174_v35  ;;  %v2193_v50 = vrot.slane %v2192_v33, 4 }
 0x711   : > { %v2204_v45 = vshrl.u32 %v2175_v40, 16  ;;  %v2470_v35 = vshrl.u32 %v5601_v39, 16 }
 0x712   : > { %4085 = vmatmul.msk.bf16.vlgmr.msra.gmra.mxu1 %vm1418_vm1, %v2197_v37  ;;  %v2200_v42 = vpack.i.b16 %v2199_v3, %v2198_v36  ;;  %v2194_v43 = vsel %vm1082_vm0, 0, %v2193_v50  ;;  %v2471_v36 = vshrl.u32 %v2456_v5, 16 }
 0x713   : > { %v2203_v44 = vpack.i.b16 %v2194_v43, %v2175_v40  ;;  %v2205_v46 = vshrl.u32 %v2194_v43, 16  ;;  %v2482_v43 = vshrl.u32 %v5610_v16, 16 }
 0x714   : > { %4086 = vmatmul.msk.bf16.vlgmr.msra.gmra.mxu2 %vm1418_vm1, %v2200_v42 }
 0x715   : > { %4087 = vmatmul.msk.bf16.vlgmr.msrb.gmra.mxu3 %vm1418_vm1, %v2203_v44  ;;  %v2206_v47 = vpack.i.b16 %v2205_v46, %v2204_v45  ;;  %v2495_v46 = vperm.slane %v2469_v29, %v5229_v13 }
 0x717   : > { %4088 = vmatmul.msk.bf16.vlgmr.msra.gmra.mxu0 %vm1418_vm1, %v2206_v47 }
 0x78f   : > { %v2713_v49 = vpop.f32.mrf.mxu1 }
 0x790   : > { %v2783_v52 = vmul.f32 0.17677669, %v2713_v49 }
 0x792   : > { %v2790_v53 = vsel %vm2787_vm11, %v2783_v52, -1e+30 }
 0x793   : > { %v2795_v54 = vsel %vm2794_vm12, %v2790_v53, -inf }
 0x794   : > { %2796 = vmax.xlane.f32.xlu1 %v2795_v54  ;;  %v2779_v12 = vpop.f32.mrf.mxu0 }
 0x795   : > { %v2786_v56 = vmul.f32 0.17677669, %v2779_v12 }
 0x797   : > { %v2715_v51 = vpop.f32.mrf.mxu1  ;;  %v2735_v57 = vpop.f32.mrf.mxu2  ;;  %v2793_v48 = vsel %vm2787_vm11, %v2786_v56, -1e+30 }
 0x798   : > { %v2757_v58 = vpop.f32.mrf.mxu3  ;;  %v2804_v59 = vsel %vm2794_vm12, %v2793_v48, -inf  ;;  %v2784_v60 = vmul.f32 0.17677669, %v2735_v57 }
 0x799   : > { %v2785_v62 = vmul.f32 0.17677669, %v2757_v58  ;;  %2805 = vmax.xlane.f32.xlu2 %v2804_v59  ;;  %v2503_v58 = vrot.slane %v2495_v46, 4  ;;  %v2476_v59 = vshrl.u32 %v5664_v6, 16 }
 0x79a   : > { %v2791_v1 = vsel %vm2787_vm11, %v2784_v60, -1e+30 }
 0x79b   : > { %v2792_v63 = vsel %vm2787_vm11, %v2785_v62, -1e+30  ;;  %v2798_v4 = vsel %vm2794_vm12, %v2791_v1, -inf }
 0x79c   : > { %v2781_v0 = vpop.f32.mrf.mxu0  ;;  %v2801_v20 = vsel %vm2794_vm12, %v2792_v63, -inf }
 0x79d   : > { %2802 = vmax.xlane.f32.xlu0 %v2801_v20 }
 0x79f   : > { %v2737_v2 = vpop.f32.mrf.mxu2 }
 0x7a0   : > { %v2759_v25 = vpop.f32.mrf.mxu3 }
 0x7a1   : > { %2799 = vmax.xlane.f32.xlu2 %v2798_v4 }
 0x7ad   : > { %2457 = vrot.lane.b32.xlu1 %v5610_v16, %s4858_s6 }
 0x7b1   : > { %2463 = vrot.lane.b32.xlu0 %v5601_v39, %s4857_s2 }
 0x7b9   : > { %2465 = vrot.lane.b32.xlu2 %v5610_v16, %s4857_s2 }
 0x807   : > { %v2797_v7 = vpop.xlane.xlu1 %2796 }
 0x808   : > { %v2807_v8 = vsub.f32 %v2790_v53, %v2797_v7  ;;  %v2472_v53 = vpack.i.b16 %v2471_v36, %v2470_v35 }
 0x80a   : > { %v2811_v9 = vmul.f32 1.442695, %v2807_v8  ;;  %v2521_v2 = vperm.slane %v2472_v53, %v5229_v13 }
 0x80c   : > { %4536 = vpow2.f32 %v2811_v9  ;;  %v2806_v10 = vpop.xlane.xlu2 %2805 }
 0x80d   : > { %v2810_v15 = vsub.f32 %v2793_v48, %v2806_v10 }
 0x80f   : > { %v2817_v22 = vmul.f32 1.442695, %v2810_v15 }
 0x810   : > { %v2803_v11 = vpop.xlane.xlu0 %2802 }
 0x811   : > { %v2809_v55 = vsub.f32 %v2792_v63, %v2803_v11 }
 0x812   : > { %v5666_v14 = vpop.eup %4536 }
 0x813   : > { %v2815_v17 = vmul.f32 1.442695, %v2809_v55  ;;  %v2819_v18 = vsel %vm2794_vm12, %v5666_v14, 0.0 }
 0x814   : > { %v2800_v19 = vpop.xlane.xlu2 %2799  ;;  %2820 = vadd.xlane.f32.xlu2 %v2819_v18  ;;  %v2529_v18 = vrot.slane %v2521_v2, 4 }
 0x815   : > { %4538 = vpow2.f32 %v2815_v17  ;;  %v2808_v21 = vsub.f32 %v2791_v1, %v2800_v19 }
 0x817   : > { %v2813_v23 = vmul.f32 1.442695, %v2808_v21 }
 0x819   : > { %4540 = vpow2.f32 %v2813_v23 }
 0x81a   : > { %4542 = vpow2.f32 %v2817_v22 }
 0x81b   : > { %v5670_v24 = vpop.eup %4538 }
 0x81c   : > { %v2466_v26 = vpop.permute.xlu2 %2465  ;;  %v2825_v28 = vsel %vm2794_vm12, %v5670_v24, 0.0 }
 0x81d   : > { %v2487_v31 = vpack.i.b16 %v2466_v26, %v2462_v41  ;;  %v2489_v32 = vshrl.u32 %v2466_v26, 16  ;;  %2826 = vadd.xlane.f32.xlu1 %v2825_v28 }
 0x81f   : > { %v5675_v33 = vpop.eup %4540  ;;  %v2490_v37 = vpack.i.b16 %v2489_v32, %v2488_v30  ;;  %v2552_v3 = vperm.slane %v2487_v31, %v5229_v13  ;;  %v2458_v40 = vpop.permute.xlu1 %2457 }
 0x820   : > { %v5679_v50 = vpop.eup %4542  ;;  %v2481_v42 = vpack.i.b16 %v2458_v40, %v5610_v16  ;;  %v2483_v44 = vshrl.u32 %v2458_v40, 16  ;;  %v2822_v45 = vsel %vm2794_vm12, %v5675_v33, 0.0 }
 0x821   : > { %v2553_v47 = vrot.slane %v2552_v3, 4  ;;  %v2578_v39 = vperm.slane %v2490_v37, %v5229_v13  ;;  %2823 = vadd.xlane.f32.xlu0 %v2822_v45  ;;  %v2828_v56 = vsel %vm2794_vm12, %v5679_v50, 0.0 }
 0x822   : > { %v2484_v49 = vpack.i.b16 %v2483_v44, %v2482_v43  ;;  %v2547_v52 = vperm.slane %v2481_v42, %v5229_v13 }
 0x823   : > { %v2579_v54 = vrot.slane %v2578_v39, 4  ;;  %v2464_v12 = vpop.permute.xlu0 %2463 }
 0x824   : > { %v2554_v16 = vsel %vm1082_vm0, %v2553_v47, %v2547_v52  ;;  %v2555_v51 = vrot.slane %v2547_v52, 4  ;;  %v2573_v57 = vperm.slane %v2484_v49, %v5229_v13  ;;  %v2475_v48 = vpack.i.b16 %v2464_v12, %v5664_v6 }
 0x825   : > { %v2560_v60 = vperm.slane %v2554_v16, %v5239_v38  ;;  %v2477_v62 = vshrl.u32 %v2464_v12, 16  ;;  %2829 = vadd.xlane.f32.xlu1 %v2828_v56 }
 0x826   : > { %v2556_v63 = vsel %vm1082_vm0, %v2552_v3, %v2555_v51  ;;  %v2580_v0 = vsel %vm1082_vm0, %v2579_v54, %v2573_v57  ;;  %v2581_v20 = vrot.slane %v2573_v57, 4  ;;  %v2500_v1 = vperm.slane %v2475_v48, %v5229_v13 }
 0x827   : > { %v2564_v25 = vperm.slane %v2556_v63, %v5239_v38  ;;  %v2586_v4 = vperm.slane %v2580_v0, %v5239_v38  ;;  %v2478_v5 = vpack.i.b16 %v2477_v62, %v2476_v59  ;;  %v2565_v7 = vrot.slane %v2560_v60, 4 }
 0x828   : > { %v2582_v6 = vsel %vm1082_vm0, %v2578_v39, %v2581_v20  ;;  %v2501_v41 = vrot.slane %v2500_v1, 4  ;;  %v2504_v8 = vsel %vm1082_vm0, %v2500_v1, %v2503_v58 }
 0x829   : > { %v2567_v9 = vrot.slane %v2564_v25, 4  ;;  %v2590_v10 = vperm.slane %v2582_v6, %v5239_v38  ;;  %v2591_v11 = vrot.slane %v2586_v4, 4  ;;  %v2512_v15 = vperm.slane %v2504_v8, %v5239_v38 }
 0x82a   : > { %v2502_v55 = vsel %vm1082_vm0, %v2501_v41, %v2495_v46  ;;  %v2526_v17 = vperm.slane %v2478_v5, %v5229_v13  ;;  %v2566_v22 = vsel %vm1082_vm0, 0, %v2565_v7 }
 0x82b   : > { %v2568_v19 = vsel %vm1082_vm0, 0, %v2567_v9  ;;  %v2593_v21 = vrot.slane %v2590_v10, 4  ;;  %v2508_v26 = vperm.slane %v2502_v55, %v5239_v38  ;;  %v2515_v28 = vrot.slane %v2512_v15, 4 }
 0x82c   : > { %v2638_v23 = vrot.slane %v2568_v19, 4  ;;  %v2633_v30 = vsel %vm1082_vm0, %v2567_v9, %v2560_v60  ;;  %v2527_v31 = vrot.slane %v2526_v17, 4  ;;  %v2530_v32 = vsel %vm1082_vm0, %v2526_v17, %v2529_v18 }
 0x82d   : > { %v2594_v29 = vsel %vm1082_vm0, 0, %v2593_v21  ;;  %v2592_v35 = vsel %vm1082_vm0, 0, %v2591_v11  ;;  %v2513_v3 = vrot.slane %v2508_v26, 4  ;;  %v2516_v42 = vsel %vm1082_vm0, 0, %v2515_v28 }
 0x82e   : > { %v2639_v36 = vsel %vm1082_vm0, %v2638_v23, %v2566_v22  ;;  %v2657_v37 = vrot.slane %v2594_v29, 4  ;;  %v2528_v43 = vsel %vm1082_vm0, %v2527_v31, %v2521_v2  ;;  %v2538_v44 = vperm.slane %v2530_v32, %v5239_v38 }
 0x82f   : > { %v2643_v40 = vperm.slane %v2639_v36, %v5229_v13  ;;  %v2637_v45 = vperm.slane %v2633_v30, %v5229_v13  ;;  %v2652_v46 = vsel %vm1082_vm0, %v2593_v21, %v2586_v4  ;;  %v2534_v39 = vperm.slane %v2528_v43, %v5239_v38 }
 0x830   : > { %v2658_v47 = vsel %vm1082_vm0, %v2657_v37, %v2592_v35  ;;  %v2514_v53 = vsel %vm1082_vm0, 0, %v2513_v3  ;;  %v2541_v54 = vrot.slane %v2538_v44, 4  ;;  %v2600_v56 = vrot.slane %v2516_v42, 4 }
 0x831   : > { %v2644_v49 = vrot.slane %v2643_v40, 4  ;;  %v2662_v52 = vperm.slane %v2658_v47, %v5229_v13  ;;  %v2539_v12 = vrot.slane %v2534_v39, 4  ;;  %v2656_v16 = vperm.slane %v2652_v46, %v5229_v13 }
 0x832   : > { %v2542_v57 = vsel %vm1082_vm0, 0, %v2541_v54  ;;  %v2595_v59 = vsel %vm1082_vm0, %v2515_v28, %v2508_v26  ;;  %v2601_v60 = vsel %vm1082_vm0, %v2600_v56, %v2514_v53  ;;  %v2614_v1 = vsel %vm1082_vm0, %v2541_v54, %v2534_v39 }
 0x833   : > { %v2663_v51 = vrot.slane %v2662_v52, 4  ;;  %v2645_v48 = vsel %vm1082_vm0, %v2644_v49, %v2637_v45  ;;  %v2540_v58 = vsel %vm1082_vm0, 0, %v2539_v12  ;;  %v2619_v62 = vrot.slane %v2542_v57, 4 }
 0x834   : > { %v2605_v63 = vperm.slane %v2601_v60, %v5229_v13  ;;  %v2649_v0 = vperm.slane %v2645_v48, %v5239_v38  ;;  %v2599_v4 = vperm.slane %v2595_v59, %v5229_v13  ;;  %v2618_v8 = vperm.slane %v2614_v1, %v5229_v13 }
 0x835   : > { %v2664_v20 = vsel %vm1082_vm0, %v2663_v51, %v2656_v16  ;;  %v2620_v2 = vsel %vm1082_vm0, %v2619_v62, %v2540_v58 }
 0x836   : > { %v2668_v25 = vperm.slane %v2664_v20, %v5239_v38  ;;  %v2606_v5 = vrot.slane %v2605_v63, 4  ;;  %v2624_v7 = vperm.slane %v2620_v2, %v5229_v13  ;;  %v2650_v6 = vrot.slane %v2649_v0, 4 }
 0x837   : > { %v2686_v18 = vshrl.u32 %v2649_v0, 16 }
 0x838   : > { %v2669_v41 = vrot.slane %v2668_v25, 4  ;;  %v2607_v9 = vsel %vm1082_vm0, %v2606_v5, %v2599_v4  ;;  %v2625_v10 = vrot.slane %v2624_v7, 4  ;;  %v2687_v11 = vshrl.u32 %v2668_v25, 16 }
 0x839   : > { %v2611_v55 = vperm.slane %v2607_v9, %v5239_v38  ;;  %v2685_v21 = vpack.i.b16 %v2668_v25, %v2649_v0  ;;  %v2651_v23 = vsel %vm1082_vm0, 0, %v2650_v6 }
 0x83a   : > { %v2670_v15 = vsel %vm1082_vm0, 0, %v2669_v41  ;;  %v2626_v17 = vsel %vm1082_vm0, %v2625_v10, %v2618_v8  ;;  %v2688_v28 = vpack.i.b16 %v2687_v11, %v2686_v18  ;;  %v2692_v37 = vshrl.u32 %v2651_v23, 16 }
 0x83b   : > { %v2630_v19 = vperm.slane %v2626_v17, %v5239_v38  ;;  %v2612_v22 = vrot.slane %v2611_v55, 4  ;;  %v2674_v26 = vshrl.u32 %v2611_v55, 16  ;;  %v2693_v29 = vshrl.u32 %v2670_v15, 16 }
 0x83c   : > { %v2691_v36 = vpack.i.b16 %v2670_v15, %v2651_v23  ;;  %v2844_v40 = vunpack.c.l.b16 %v2685_v21  ;;  %v2864_v52 = vunpack.c.l.b16 %v2688_v28 }
 0x83d   : > { %v2673_v30 = vpack.i.b16 %v2630_v19, %v2611_v55  ;;  %v2675_v31 = vshrl.u32 %v2630_v19, 16  ;;  %v2613_v32 = vsel %vm1082_vm0, 0, %v2612_v22  ;;  %v2631_v35 = vrot.slane %v2630_v19, 4 }
 0x83e   : > { %v2680_v45 = vshrl.u32 %v2613_v32, 16  ;;  %v2694_v47 = vpack.i.b16 %v2693_v29, %v2692_v37  ;;  %v2884_v54 = vunpack.c.l.b16 %v2691_v36 }
 0x83f   : > { %v2843_v3 = vunpack.c.l.b16 %v2673_v30  ;;  %v2676_v42 = vpack.i.b16 %v2675_v31, %v2674_v26  ;;  %v2632_v43 = vsel %vm1082_vm0, 0, %v2631_v35 }
 0x840   : > { %v2679_v44 = vpack.i.b16 %v2632_v43, %v2613_v32  ;;  %v2681_v46 = vshrl.u32 %v2632_v43, 16  ;;  %v2904_v57 = vunpack.c.l.b16 %v2694_v47 }
 0x841   : > { %v2845_v39 = vpack.c.b16 %v2844_v40, %v2843_v3  ;;  %v2863_v49 = vunpack.c.l.b16 %v2676_v42 }
 0x842   : > { %v2883_v53 = vunpack.c.l.b16 %v2679_v44  ;;  %v2682_v12 = vpack.i.b16 %v2681_v46, %v2680_v45 }
 0x843   : > { %2857 = vmatpush.bf16.msrb.mxu1 %v2845_v39  ;;  %v2865_v56 = vpack.c.b16 %v2864_v52, %v2863_v49 }
 0x844   : > { %v2885_v16 = vpack.c.b16 %v2884_v54, %v2883_v53  ;;  %v2903_v51 = vunpack.c.l.b16 %v2682_v12 }
 0x845   : > { %2877 = vmatpush.bf16.msrb.mxu2 %v2865_v56 }
 0x846   : > { %2897 = vmatpush.bf16.msra.mxu3 %v2885_v16  ;;  %v2905_v48 = vpack.c.b16 %v2904_v57, %v2903_v51 }
 0x848   : > { %2917 = vmatpush.bf16.msrb.mxu0 %v2905_v48 }
 0x887   : > { %v2821_v58 = vpop.xlane.xlu2 %2820 }
 0x888   : > { %4544 = vrcp.f32 %v2821_v58 }
 0x88e   : > { %v4545_v59 = vpop.eup %4544 }
 0x88f   : > { %v2835_v60 = vmul.f32 %v4545_v59, %v5666_v14 }
 0x890   : > { %v2827_v62 = vpop.xlane.xlu1 %2826 }
 0x891   : > { %v2839_v63 = vpack.c.bf16 %v2835_v60, %v2835_v60  ;;  %4546 = vrcp.f32 %v2827_v62 }
 0x893   : > { %4089 = vmatmul.msk.bf16.vlgmr.msrb.gmra.mxu1 %vm2794_vm12, %v2839_v63 }
 0x894   : > { %v2824_v0 = vpop.xlane.xlu0 %2823 }
 0x895   : > { %4548 = vrcp.f32 %v2824_v0 }
 0x897   : > { %v4547_v20 = vpop.eup %4546 }
 0x898   : > { %v2837_v1 = vmul.f32 %v4547_v20, %v5670_v24  ;;  %v2830_v2 = vpop.xlane.xlu1 %2829  ;;  %v4359_v24 = vld [vmem:[%s5131_s5 + $0x38] sm:$0xff] }
 0x899   : > { %4550 = vrcp.f32 %v2830_v2  ;;  %3098 = vmatpush.bf16.msra.mxu1 %v4359_v24 }
 0x89a   : > { %v2841_v25 = vpack.c.bf16 %v2837_v1, %v2837_v1 }
 0x89b   : > { %v4549_v4 = vpop.eup %4548 }
 0x89c   : > { %v2836_v5 = vmul.f32 %v4549_v4, %v5675_v33  ;;  %4091 = vmatmul.msk.bf16.vlgmr.msra.gmra.mxu3 %vm2794_vm12, %v2841_v25 }
 0x89e   : > { %v2840_v14 = vpack.c.bf16 %v2836_v5, %v2836_v5 }
 0x89f   : > { %v4551_v7 = vpop.eup %4550 }
 0x8a0   : > { %v2838_v6 = vmul.f32 %v4551_v7, %v5679_v50  ;;  %4090 = vmatmul.msk.bf16.vlgmr.msrb.gmra.mxu2 %vm2794_vm12, %v2840_v14 }
 0x8a2   : > { %v2842_v41 = vpack.c.bf16 %v2838_v6, %v2838_v6 }
 0x8a4   : > { %4092 = vmatmul.msk.bf16.vlgmr.msrb.gmra.mxu0 %vm2794_vm12, %v2842_v41 }
 0x910   : > { %v2859_v8 = vpop.f32.mrf.mxu1 }
 0x911   : > { %v2925_v10 = vrot.slane %v2859_v8, 4 }
 0x918   : > { %v2861_v9 = vpop.f32.mrf.mxu1 }
 0x91f   : > { %v2899_v11 = vpop.f32.mrf.mxu3 }
 0x920   : > { %v2923_v55 = vrot.slane %v2899_v11, 4  ;;  %v2926_v33 = vsel %vm1082_vm0, %v2899_v11, %v2925_v10 }
 0x921   : > { %v2919_v15 = vpop.f32.mrf.mxu0  ;;  %v2934_v19 = vperm.slane %v2926_v33, %v5229_v13 }
 0x922   : > { %v2924_v17 = vsel %vm1082_vm0, %v2923_v55, %v2859_v8  ;;  %v2935_v18 = vrot.slane %v2919_v15, 4 }
 0x923   : > { %v2930_v50 = vperm.slane %v2924_v17, %v5229_v13  ;;  %v2879_v21 = vpop.f32.mrf.mxu2  ;;  %v2961_v30 = vrot.slane %v2934_v19, 4 }
 0x924   : > { %v2936_v22 = vsel %vm1082_vm0, %v2935_v18, %v2879_v21  ;;  %v2937_v23 = vrot.slane %v2879_v21, 4  ;;  %v4356_v21 = vld [vmem:[%s5131_s5 + $0x20] sm:$0xff] }
 0x925   : > { %v2949_v26 = vrot.slane %v2930_v50, 4  ;;  %v2942_v28 = vperm.slane %v2936_v22, %v5229_v13  ;;  %v4355_v22 = vld [vmem:[%s5131_s5 + $0x18] sm:$0xff] }
 0x926   : > { %v2938_v29 = vsel %vm1082_vm0, %v2919_v15, %v2937_v23  ;;  %v4354_v23 = vld [vmem:[%s5131_s5 + $0x10] sm:$0xff] }
 0x927   : > { %v2946_v31 = vperm.slane %v2938_v29, %v5229_v13  ;;  %v2947_v32 = vrot.slane %v2942_v28, 4  ;;  %v2950_v35 = vsel %vm1082_vm0, %v2942_v28, %v2949_v26  ;;  %v2901_v36 = vpop.f32.mrf.mxu3  ;;  %v4353_v26 = vld [vmem:[%s5131_s5 + $0x8] sm:$0xff]  ;;  %v4352_v28 = vld [vmem:[%s5131_s5] sm:$0xff] }
 0x928   : > { %v2958_v37 = vperm.slane %v2950_v35, %v5239_v38 }
 0x929   : > { %v2948_v3 = vsel %vm1082_vm0, %v2947_v32, %v2930_v50  ;;  %v2959_v40 = vrot.slane %v2946_v31, 4  ;;  %v2962_v42 = vsel %vm1082_vm0, %v2946_v31, %v2961_v30  ;;  %v2921_v43 = vpop.f32.mrf.mxu0 }
 0x92a   : > { %v2954_v44 = vperm.slane %v2948_v3, %v5239_v38  ;;  %v2970_v45 = vperm.slane %v2962_v42, %v5239_v38  ;;  %v2973_v46 = vrot.slane %v2958_v37, 4  ;;  %v3049_v3 = vperm.slane %v5598_v34, 1 }
 0x92b   : > { %v2960_v47 = vsel %vm1082_vm0, %v2959_v40, %v2934_v19  ;;  %v2881_v39 = vpop.f32.mrf.mxu2  ;;  %v4358_v19 = vld [vmem:[%s5131_s5 + $0x30] sm:$0xff] }
 0x92c   : > { %v2966_v49 = vperm.slane %v2960_v47, %v5239_v38  ;;  %v2971_v52 = vrot.slane %v2954_v44, 4  ;;  %v2974_v53 = vsel %vm1082_vm0, 0.0, %v2973_v46  ;;  %v2977_v54 = vrot.slane %v2970_v45, 4  ;;  %3099 = vmatpush.bf16.msra.mxu1 %v4358_v19  ;;  %v4183_v45 = vld [vmem:[%s5133_s12 + $0x70] sm:$0xf] }
 0x92d   : > { %v2979_v12 = vsel %vm1082_vm0, %v2973_v46, %v2954_v44  ;;  %v2984_v56 = vrot.slane %v2974_v53, 4  ;;  %v4375_v46 = vld [vmem:[%s5133_s12 + $0x74] sm:$0xf0]  ;;  %v4374_v47 = vld [vmem:[%s5133_s12 + $0x74] sm:$0xf] }
 0x92e   : > { %v2972_v16 = vsel %vm1082_vm0, 0.0, %v2971_v52  ;;  %v2975_v51 = vrot.slane %v2966_v49, 4  ;;  %v2978_v57 = vsel %vm1082_vm0, 0.0, %v2977_v54  ;;  %v2983_v48 = vperm.slane %v2979_v12, %v5229_v13 }
 0x92f   : > { %v2995_v58 = vrot.slane %v2978_v57, 4  ;;  %v2985_v59 = vsel %vm1082_vm0, %v2984_v56, %v2972_v16  ;;  %v2990_v60 = vsel %vm1082_vm0, %v2977_v54, %v2966_v49  ;;  %v4184_v39 = vor.u32 %v4375_v46, %v4183_v45  ;;  %v4185_v49 = vld [vmem:[%s5133_s12 + $0x78] sm:$0xf0]  ;;  %v4175_v56 = vld [vmem:[%s5133_s12 + $0x60] sm:$0xf] }
 0x930   : > { %v2976_v62 = vsel %vm1082_vm0, 0.0, %v2975_v51  ;;  %v2989_v63 = vperm.slane %v2985_v59, %v5229_v13  ;;  %v2994_v0 = vperm.slane %v2990_v60, %v5229_v13  ;;  %v3003_v20 = vrot.slane %v2983_v48, 4  ;;  %v4373_v16 = vld [vmem:[%s5133_s12 + $0x64] sm:$0xf0]  ;;  %v4372_v51 = vld [vmem:[%s5133_s12 + $0x64] sm:$0xf] }
 0x931   : > { %v2996_v1 = vsel %vm1082_vm0, %v2995_v58, %v2976_v62  ;;  %v4188_v52 = vor.u32 %v4374_v47, %v4185_v49  ;;  %3239 = vmatpush.bf16.msra.mxu2 %v4184_v39  ;;  %v4176_v57 = vor.u32 %v4373_v16, %v4175_v56  ;;  %v4167_v59 = vld [vmem:[%s5133_s12 + $0x50] sm:$0xf]  ;;  %v4371_v60 = vld [vmem:[%s5133_s12 + $0x54] sm:$0xf0]  ;;  %v4370_v62 = vld [vmem:[%s5133_s12 + $0x54] sm:$0xf] }
 0x932   : > { %v3000_v2 = vperm.slane %v2996_v1, %v5229_v13  ;;  %v3004_v25 = vsel %vm1082_vm0, %v2989_v63, %v3003_v20  ;;  %v3015_v4 = vrot.slane %v2994_v0, 4  ;;  %v3001_v5 = vrot.slane %v2989_v63, 4  ;;  %v4159_v1 = vld [vmem:[%s5133_s12 + $0x40] sm:$0xf]  ;;  %v4379_v39 = vld [vmem:[%s5166_s1 + $0x18] sm:$0xff]  ;;  %v4386_v56 = vld [vmem:[%s5166_s1 + $0x50] sm:$0xff] }
 0x933   : > { %v3012_v14 = vperm.slane %v3004_v25, %v5239_v38  ;;  %3252 = vmatpush.bf16.msrb.mxu3 %v4188_v52  ;;  %v4168_v63 = vor.u32 %v4371_v60, %v4167_v59  ;;  %v4368_v25 = vld [vmem:[%s5133_s12 + $0x44] sm:$0xf]  ;;  %v4387_v52 = vld [vmem:[%s5166_s1 + $0x58] sm:$0xff] }
 0x934   : > { %v3016_v7 = vsel %vm1082_vm0, %v3000_v2, %v3015_v4  ;;  %v3002_v6 = vsel %vm1082_vm0, %v3001_v5, %v2983_v48  ;;  %v3013_v41 = vrot.slane %v3000_v2, 4  ;;  %v4177_v48 = vld [vmem:[%s5133_s12 + $0x68] sm:$0xf0]  ;;  %v4369_v2 = vld [vmem:[%s5133_s12 + $0x44] sm:$0xf0]  ;;  %v4388_v45 = vld [vmem:[%s5166_s1 + $0x60] sm:$0xff] }
 0x935   : > { %v3024_v8 = vperm.slane %v3016_v7, %v5239_v38  ;;  %v3031_v9 = vrot.slane %v3012_v14, 4  ;;  %v3008_v24 = vperm.slane %v3002_v6, %v5239_v38  ;;  %v4180_v58 = vor.u32 %v4372_v51, %v4177_v48  ;;  %3240 = vmatpush.bf16.msra.mxu2 %v4176_v57  ;;  %v4161_v5 = vld [vmem:[%s5133_s12 + $0x48] sm:$0xf0]  ;;  %v4151_v7 = vld [vmem:[%s5133_s12 + $0x30] sm:$0xf] }
 0x936   : > { %v3014_v13 = vsel %vm1082_vm0, %v3013_v41, %v2994_v0  ;;  %v4169_v0 = vld [vmem:[%s5133_s12 + $0x58] sm:$0xf0]  ;;  %v4160_v4 = vor.u32 %v4369_v2, %v4159_v1  ;;  %v4367_v6 = vld [vmem:[%s5133_s12 + $0x34] sm:$0xf0]  ;;  %v4366_v41 = vld [vmem:[%s5133_s12 + $0x34] sm:$0xf] }
 0x937   : > { %v3032_v10 = vsel %vm1082_vm0, %v3024_v8, %v3031_v9  ;;  %v3029_v11 = vrot.slane %v3024_v8, 4  ;;  %v3020_v55 = vperm.slane %v3014_v13, %v5239_v38  ;;  %v3027_v33 = vrot.slane %v3008_v24, 4  ;;  %v4357_v38 = vld [vmem:[%s5131_s5 + $0x28] sm:$0xff]  ;;  %3253 = vmatpush.bf16.msrb.mxu3 %v4180_v58  ;;  %v4153_v9 = vld [vmem:[%s5133_s12 + $0x38] sm:$0xf0]  ;;  %v4384_v1 = vld [vmem:[%s5166_s1 + $0x40] sm:$0xff] }
 0x938   : > { %3042 = vrot.lane.b32.xlu1 %v3032_v10, %s4858_s6  ;;  %3100 = vmatpush.bf16.msra.mxu1 %v4357_v38  ;;  %v4172_v20 = vor.u32 %v4370_v62, %v4169_v0  ;;  %v4152_v8 = vor.u32 %v4367_v6, %v4151_v7  ;;  %v4143_v13 = vld [vmem:[%s5133_s12 + $0x20] sm:$0xf]  ;;  %v4365_v10 = vld [vmem:[%s5133_s12 + $0x24] sm:$0xf0]  ;;  %v4137_v38 = vld [vmem:[%s5133_s12 + $0x18] sm:$0xf0] }
 0x939   : > { %v3030_v15 = vsel %vm1082_vm0, %v3029_v11, %v3012_v14  ;;  %v3025_v17 = vrot.slane %v3020_v55, 4  ;;  %v3028_v18 = vsel %vm1082_vm0, %v3020_v55, %v3027_v33  ;;  %3241 = vmatpush.bf16.msra.mxu2 %v4168_v63  ;;  %v4164_v14 = vor.u32 %v4368_v25, %v4161_v5  ;;  %v4364_v11 = vld [vmem:[%s5133_s12 + $0x24] sm:$0xf]  ;;  %v4145_v33 = vld [vmem:[%s5133_s12 + $0x28] sm:$0xf0] }
 0x93a   : > { %3038 = vrot.lane.b32.xlu2 %v3030_v15, %s4859_s8  ;;  %3034 = vrot.lane.b32.xlu0 %v3028_v18, %s4857_s2  ;;  %v4144_v55 = vor.u32 %v4365_v10, %v4143_v13  ;;  %v4148_v15 = vor.u32 %v4364_v11, %v4145_v33  ;;  %v4363_v18 = vld [vmem:[%s5133_s12 + $0x14] sm:$0xf0]  ;;  %v3132_v51 = vperm.slane %v5598_v34, 2  ;;  %v5865_v58 = vld [vmem:[%s5154_s4 + $0x8] sm:$0x7f]  ;;  %s6012_s4 = sld [smem:[#allocation20_spill]] }
 0x93b   : > { %v3026_v50 = vsel %vm1082_vm0, %v3025_v17, %v3008_v24  ;;  %3254 = vmatpush.bf16.msrb.mxu3 %v4172_v20  ;;  %v4156_v24 = vor.u32 %v4366_v41, %v4153_v9  ;;  %v4135_v17 = vld [vmem:[%s5133_s12 + $0x10] sm:$0xf]  ;;  %v3134_v59 = vperm.slane %v5865_v58, 3  ;;  %v4377_v0 = vld [vmem:[%s5166_s1 + $0x8] sm:$0xff]  ;;  %v4376_v34 = vld [vmem:[%s5166_s1] sm:$0xff]  ;;  %v3301_v10 = vperm.slane %v5865_v58, 4 }
 0x93c   : > { %3101 = vmatpush.bf16.msra.mxu1 %v4356_v21  ;;  %v4136_v19 = vor.u32 %v4363_v18, %v4135_v17  ;;  %v4385_v20 = vld [vmem:[%s5166_s1 + $0x48] sm:$0xff]  ;;  %v3153_v2 = vld [vmem:[%s5159_s14] sm:$0x3] }
 0x93d   : > { %3242 = vmatpush.bf16.msra.mxu2 %v4160_v4  ;;  %v3156_v25 = vperm.slane %v3153_v2, 1 }
 0x93f   : > { %3255 = vmatpush.bf16.msrb.mxu3 %v4164_v14 }
 0x940   : > { %3102 = vmatpush.bf16.msra.mxu1 %v4355_v22  ;;  %v4127_v22 = vld [vmem:[%s5133_s12] sm:$0xf]  ;;  %p4253_p3 = scmp.ne.s32.totalorder %s6012_s4, 1 }
 0x941   : > { %3243 = vmatpush.bf16.msra.mxu2 %v4152_v8  ;;  %s6013_s19 = sld [smem:[#allocation39_spill]] (!%p4253_p3) }
 0x942   : > { %s6015_s3 = sld [smem:[#allocation38_spill]] (!%p4253_p3) }
 0x943   : > { %3256 = vmatpush.bf16.msrb.mxu3 %v4156_v24  ;;  %s6016_s0 = sld [smem:[#allocation40_spill]] (!%p4253_p3) }
 0x944   : > { %3103 = vmatpush.bf16.msra.mxu1 %v4354_v23  ;;  %v4361_v23 = vld [vmem:[%s5133_s12 + $0x4] sm:$0xf0] }
 0x945   : > { %3244 = vmatpush.bf16.msra.mxu2 %v4144_v55 }
 0x947   : > { %3257 = vmatpush.bf16.msrb.mxu3 %v4148_v15  ;;  %s6014_s23 = smov (!%p4253_p3), %s6013_s19 }
 0x948   : > { %3104 = vmatpush.bf16.msra.mxu1 %v4353_v26  ;;  %v4360_v26 = vld [vmem:[%s5133_s12 + $0x4] sm:$0xf] }
 0x949   : > { %3245 = vmatpush.bf16.msra.mxu2 %v4136_v19 }
 0x94c   : > { %3105 = vmatpush.bf16.msra.mxu1 %v4352_v28  ;;  %v4129_v28 = vld [vmem:[%s5133_s12 + $0x8] sm:$0xf0] }
 0x994   : > { %v3039_v30 = vpop.permute.xlu2 %3038 }
 0x9aa   : > { %v3043_v32 = vpop.permute.xlu1 %3042 }
 0x9ac   : > { %v3035_v29 = vpop.permute.xlu0 %3034 }
 0x9ad   : > { %v3045_v31 = vsel %vm1418_vm1, %v3026_v50, %v3035_v29  ;;  %v4362_v50 = vld [vmem:[%s5133_s12 + $0x14] sm:$0xf]  ;;  %v4128_v29 = vor.u32 %v4361_v23, %v4127_v22 }
 0x9ae   : > { %v3046_v35 = vsel %vm1760_vm5, %v3045_v31, %v3039_v30  ;;  %v4140_v21 = vor.u32 %v4362_v50, %v4137_v38  ;;  %v4132_v30 = vor.u32 %v4360_v26, %v4129_v28  ;;  %v4383_v31 = vld [vmem:[%s5166_s1 + $0x38] sm:$0xff] }
 0x9af   : > { %v3047_v36 = vsel %vm1762_vm6, %v3046_v35, %v3043_v32  ;;  %v4391_v32 = vld [vmem:[%s5166_s1 + $0x78] sm:$0xff]  ;;  %3246 = vmatpush.bf16.msra.mxu2 %v4128_v29  ;;  %3398 = vmatpush.bf16.msra.mxu0 %v4383_v31 }
 0x9b0   : > { %v3048_v37 = vpack.c.bf16 %v3047_v36, %v3047_v36  ;;  %3258 = vmatpush.bf16.msrb.mxu3 %v4140_v21  ;;  %3411 = vmatpush.bf16.msrb.mxu1 %v4391_v32 }
 0x9b2   : > { %3106 = vmatmul.bf16.vlgmr.msra.gmra.mxu1 %v3048_v37  ;;  %v4382_v37 = vld [vmem:[%s5166_s1 + $0x30] sm:$0xff] }
 0x9b3   : > { %3399 = vmatpush.bf16.msra.mxu0 %v4382_v37  ;;  %v3445_v37 = vperm.slane %v5865_v58, 5 }
 0x9b4   : > { %3259 = vmatpush.bf16.msrb.mxu3 %v4132_v30 }
 0xa2f   : > { %v3107_v40 = vpop.f32.mrf.mxu1 }
 0xa30   : > { %v3108_v42 = vadd.f32 %v3107_v40, %v3049_v3  ;;  %v4390_v3 = vld [vmem:[%s5166_s1 + $0x70] sm:$0xff] }
 0xa31   : > { %3412 = vmatpush.bf16.msrb.mxu1 %v4390_v3 }
 0xa32   : > { %v3111_v43 = vadd.f32 %v3108_v42, %v5504_v27  ;;  %v4381_v42 = vld [vmem:[%s5166_s1 + $0x28] sm:$0xff] }
 0xa33   : > { %3400 = vmatpush.bf16.msra.mxu0 %v4381_v42 }
 0xa34   : > { %3112 = vadd.xlane.f32.xlu0 %v3111_v43 }
 0xa37   : > { %v3109_v44 = vpop.f32.mrf.mxu1 }
 0xa38   : > { %v4380_v44 = vld [vmem:[%s5166_s1 + $0x20] sm:$0xff] }
 0xa39   : > { %3401 = vmatpush.bf16.msra.mxu0 %v4380_v44 }
 0xa3d   : > { %3402 = vmatpush.bf16.msra.mxu0 %v4379_v39 }
 0xaa7   : > { %v3113_v53 = vpop.xlane.xlu0 %3112 }
 0xaa8   : > { %v3114_v27 = vmul.f32 %v3113_v53, %v5471_v61 }
 0xaaa   : > { %v5817_v54 = vsub.f32 %v3111_v43, %v3114_v27  ;;  %v4389_v43 = vld [vmem:[%s5166_s1 + $0x68] sm:$0xff]  ;;  %v4378_v27 = vld [vmem:[%s5166_s1 + $0x10] sm:$0xff] }
 0xaab   : > { %3413 = vmatpush.bf16.msrb.mxu1 %v4389_v43  ;;  %3403 = vmatpush.bf16.msra.mxu0 %v4378_v27 }
 0xaac   : > { %v3116_v12 = vmul.f32 %v5817_v54, %v5817_v54 }
 0xaae   : > { %3117 = vadd.xlane.f32.xlu2 %v3116_v12 }
 0xaaf   : > { %3414 = vmatpush.bf16.msrb.mxu1 %v4388_v45  ;;  %3404 = vmatpush.bf16.msra.mxu0 %v4377_v0 }
 0xab3   : > { %3415 = vmatpush.bf16.msrb.mxu1 %v4387_v52  ;;  %3405 = vmatpush.bf16.msra.mxu0 %v4376_v34 }
 0xab7   : > { %3416 = vmatpush.bf16.msrb.mxu1 %v4386_v56 }
 0xabb   : > { %3417 = vmatpush.bf16.msrb.mxu1 %v4385_v20 }
 0xabf   : > { %3418 = vmatpush.bf16.msrb.mxu1 %v4384_v1 }
 0xb21   : > { %v3118_v35 = vpop.xlane.xlu2 %3117 }
 0xb22   : > { %v3119_v36 = vmul.f32 %v3118_v35, %v5471_v61 }
 0xb24   : > { %v3120_v40 = vadd.f32 1e-05, %v3119_v36 }
 0xb26   : > { %4552 = vrsqrt.f32 %v3120_v40  ;;  %vm3127_vm14 = vweird.f32 %v3120_v40 }
 0xb2c   : > { %v4553_v46 = vpop.eup %4552 }
 0xb2d   : > { %v3122_v47 = vmul.f32 %v4553_v46, %v3120_v40  ;;  %vm3128_vm13 = vweird.f32 %v4553_v46  ;;  %v3447_v40 = vperm.slane %v5865_v58, 6 }
 0xb2e   : > { %vm3129_vm15 = vmor %vm3127_vm14, %vm3128_vm13 }
 0xb2f   : > { %v3123_v49 = vmul.f32 %v4553_v46, %v3122_v47 }
 0xb31   : > { %v3124_v53 = vmul.f32 0.5, %v3123_v49 }
 0xb33   : > { %v3125_v12 = vsub.f32 1.5, %v3124_v53 }
 0xb35   : > { %v3126_v16 = vmul.f32 %v4553_v46, %v3125_v12 }
 0xb37   : > { %v3130_v57 = vsel %vm3129_vm15, %v4553_v46, %v3126_v16 }
 0xb38   : > { %v3131_v48 = vmul.f32 %v3130_v57, %v5817_v54  ;;  %v3155_v54 = vperm.slane %v3153_v2, 0 }
 0xb3a   : > { %v3133_v60 = vmul.f32 %v3132_v51, %v3131_v48 }
 0xb3c   : > { %v3135_v62 = vadd.f32 %v3134_v59, %v3133_v60 }
 0xb3e   : > { %v3152_v63 = vpack.c.bf16 %v3135_v62, %v3135_v62 }
 0xb40   : > { %3247 = vmatmul.bf16.vlgmr.msra.gmra.mxu2 %v3152_v63  ;;  %3260 = vmatmul.bf16.vlgmr.msrb.gmra.mxu3 %v3152_v63 }
 0xbc3   : > { %v3248_v4 = vpop.f32.mrf.mxu2  ;;  %v3261_v5 = vpop.f32.mrf.mxu3 }
 0xbc4   : > { %v3249_v14 = vadd.f32 %v3248_v4, %v3155_v54  ;;  %v3262_v7 = vadd.f32 %v3261_v5, %v3156_v25 }
 0xbc6   : > { %v3265_v6 = vmax.f32 %v3249_v14, 0.0  ;;  %v3266_v41 = vmax.f32 %v3262_v7, 0.0 }
 0xbc8   : > { %v3299_v8 = vpack.c.bf16 %v3265_v6, %v3265_v6  ;;  %v3300_v9 = vpack.c.bf16 %v3266_v41, %v3266_v41 }
 0xbca   : > { %3406 = vmatmul.bf16.vlgmr.msra.gmra.mxu0 %v3299_v8  ;;  %3419 = vmatmul.bf16.vlgmr.msrb.gmra.mxu1 %v3300_v9 }
 0xbcb   : > { %v3250_v24 = vpop.f32.mrf.mxu2  ;;  %v3263_v13 = vpop.f32.mrf.mxu3 }
 0xc47   : > { %v3407_v11 = vpop.f32.mrf.mxu0  ;;  %v3420_v55 = vpop.f32.mrf.mxu1 }
 0xc48   : > { %v3408_v33 = vadd.f32 %v3407_v11, %v3301_v10 }
 0xc4a   : > { %v3421_v15 = vadd.f32 %v3420_v55, %v3408_v33 }
 0xc4c   : > { %v3424_v17 = vadd.f32 %v3421_v15, %v3135_v62 }
 0xc4e   : > { %3425 = vadd.xlane.f32.xlu1 %v3424_v17 }
 0xc4f   : > { %v3409_v18 = vpop.f32.mrf.mxu0  ;;  %v3422_v50 = vpop.f32.mrf.mxu1 }
 0xcc1   : > { %v3426_v19 = vpop.xlane.xlu1 %3425 }
 0xcc2   : > { %v3427_v38 = vmul.f32 %v3426_v19, %v5471_v61 }
 0xcc4   : > { %v3428_v21 = vsub.f32 %v3424_v17, %v3427_v38 }
 0xcc6   : > { %v3429_v22 = vmul.f32 %v3428_v21, %v3428_v21 }
 0xcc8   : > { %3430 = vadd.xlane.f32.xlu0 %v3429_v22 }
 0xd3b   : > { %v3431_v23 = vpop.xlane.xlu0 %3430 }
 0xd3c   : > { %v3432_v26 = vmul.f32 %v3431_v23, %v5471_v61 }
 0xd3e   : > { %v3433_v28 = vadd.f32 1e-05, %v3432_v26 }
 0xd40   : > { %4554 = vrsqrt.f32 %v3433_v28  ;;  %vm3440_vm1 = vweird.f32 %v3433_v28 }
 0xd46   : > { %v4555_v29 = vpop.eup %4554 }
 0xd47   : > { %v3435_v30 = vmul.f32 %v4555_v29, %v3433_v28  ;;  %vm3441_vm0 = vweird.f32 %v4555_v29 }
 0xd48   : > { %vm3442_vm2 = vmor %vm3440_vm1, %vm3441_vm0 }
 0xd49   : > { %v3436_v31 = vmul.f32 %v4555_v29, %v3435_v30 }
 0xd4b   : > { %v3437_v32 = vmul.f32 0.5, %v3436_v31 }
 0xd4d   : > { %v3438_v35 = vsub.f32 1.5, %v3437_v32 }
 0xd4f   : > { %v3439_v36 = vmul.f32 %v4555_v29, %v3438_v35 }
 0xd51   : > { %v3443_v3 = vsel %vm3442_vm2, %v4555_v29, %v3439_v36 }
 0xd52   : > { %v3444_v42 = vmul.f32 %v3443_v3, %v3428_v21 }
 0xd54   : > { %v3446_v43 = vmul.f32 %v3445_v37, %v3444_v42  ;;  %3453 = sbr.rel (%p4253_p3) target bundleno = 3819 (0xeeb), region = 112 }
 0xd56   : > { %v3448_v44 = vadd.f32 %v3447_v40, %v3446_v43 }
 0xd58   : > { %3449 = vst [vmem:[#allocation2] sm:$0xff] %v3448_v44 }
 0xd59   : > { %3455 = vadd.xlane.f32.xlu0 %v3448_v44  ;;  %v4399_v49 = vld [vmem:[%s6013_s19 + $0x38] sm:$0xff]  ;;  %v4398_v52 = vld [vmem:[%s6014_s23 + $0x30] sm:$0xff]  ;;  %v4397_v53 = vld [vmem:[%s6014_s23 + $0x28] sm:$0xff] }
 0xd5a   : > { %3548 = vmatpush.bf16.msra.mxu0 %v4399_v49  ;;  %v4396_v27 = vld [vmem:[%s6014_s23 + $0x20] sm:$0xff]  ;;  %v4395_v12 = vld [vmem:[%s6014_s23 + $0x18] sm:$0xff]  ;;  %v4394_v56 = vld [vmem:[%s6014_s23 + $0x10] sm:$0xff] }
 0xd5b   : > { %v4393_v16 = vld [vmem:[%s6014_s23 + $0x8] sm:$0xff]  ;;  %v4392_v51 = vld [vmem:[%s6014_s23] sm:$0xff] }
 0xd5c   : > { %v3454_v20 = vld [vmem:[%s6015_s3] sm:$0x3] }
 0xd5d   : > { %v3475_v1 = vperm.slane %v3454_v20, 0  ;;  %v4558_v14 = vld [vmem:[%s6016_s0] ss:$0 sm:$0xff] }
 0xd5e   : > { %3549 = vmatpush.bf16.msra.mxu0 %v4398_v52 }
 0xd62   : > { %3550 = vmatpush.bf16.msra.mxu0 %v4397_v53 }
 0xd66   : > { %3551 = vmatpush.bf16.msra.mxu0 %v4396_v27 }
 0xd6a   : > { %3552 = vmatpush.bf16.msra.mxu0 %v4395_v12 }
 0xd6e   : > { %3553 = vmatpush.bf16.msra.mxu0 %v4394_v56 }
 0xd72   : > { %3554 = vmatpush.bf16.msra.mxu0 %v4393_v16 }
 0xd76   : > { %3555 = vmatpush.bf16.msra.mxu0 %v4392_v51 }
 0xdcc   : > { %v3456_v45 = vpop.xlane.xlu0 %3455 }
 0xdcd   : > { %v3457_v46 = vmul.f32 %v3456_v45, %v5471_v61 }
 0xdcf   : > { %v3458_v47 = vsub.f32 %v3448_v44, %v3457_v46 }
 0xdd1   : > { %v3459_v39 = vmul.f32 %v3458_v47, %v3458_v47 }
 0xdd3   : > { %3460 = vadd.xlane.f32.xlu0 %v3459_v39 }
 0xe46   : > { %v3461_v57 = vpop.xlane.xlu0 %3460 }
 0xe47   : > { %v3462_v48 = vmul.f32 %v3461_v57, %v5471_v61  ;;  %v3477_v61 = vperm.slane %v3454_v20, 1 }
 0xe49   : > { %v3463_v58 = vadd.f32 1e-05, %v3462_v48 }
 0xe4b   : > { %4559 = vrsqrt.f32 %v3463_v58  ;;  %vm3470_vm4 = vweird.f32 %v3463_v58 }
 0xe51   : > { %v4560_v59 = vpop.eup %4559 }
 0xe52   : > { %v3465_v60 = vmul.f32 %v4560_v59, %v3463_v58  ;;  %vm3471_vm3 = vweird.f32 %v4560_v59 }
 0xe53   : > { %vm3472_vm5 = vmor %vm3470_vm4, %vm3471_vm3 }
 0xe54   : > { %v3466_v62 = vmul.f32 %v4560_v59, %v3465_v60 }
 0xe56   : > { %v3467_v63 = vmul.f32 0.5, %v3466_v62 }
 0xe58   : > { %v3468_v0 = vsub.f32 1.5, %v3467_v63 }
 0xe5a   : > { %v3469_v34 = vmul.f32 %v4560_v59, %v3468_v0 }
 0xe5c   : > { %v3473_v2 = vsel %vm3472_vm5, %v4560_v59, %v3469_v34 }
 0xe5d   : > { %v3474_v54 = vmul.f32 %v3473_v2, %v3458_v47 }
 0xe5f   : > { %v3476_v25 = vmul.f32 %v3475_v1, %v3474_v54 }
 0xe61   : > { %v3478_v4 = vadd.f32 %v3477_v61, %v3476_v25 }
 0xe63   : > { %v3495_v5 = vpack.c.bf16 %v3478_v4, %v3478_v4 }
 0xe65   : > { %3556 = vmatmul.bf16.vlgmr.msra.gmra.mxu0 %v3495_v5 }
 0xee2   : > { %v3557_v7 = vpop.f32.mrf.mxu0 }
 0xee3   : > { %v3558_v6 = vadd.f32 %v4558_v14, %v3557_v7 }
 0xee5   : > { %3561 = vst [vmem:[%s5164_s24] sm:$0xff] %v3558_v6 }
 0xeea   : > { %v3559_v41 = vpop.f32.mrf.mxu0 }
 0xeeb PF: > { %s36_s20 = sadd.s32 1, %s4849_s20   ;;  %s6017_s29 = sld [smem:[#allocation18_spill]] }
 0xeec   : > { %p33_p4 = scmp.ge.s32.totalorder %s36_s20, 6   ;;  %s6018_s30 = sld [smem:[#allocation19_spill]] }
 0xeed   : > { %s6019_s15 = sld [smem:[#allocation26_spill]] }
 0xeee   : > { %s6020_s16 = sld [smem:[#allocation22_spill]]  ;;  %35 = sbr.rel (!%p33_p4) target bundleno = 27 (0x1b), region = 208 }
 0xeef   : > { %s6021_s17 = sld [smem:[#allocation23_spill]] }
 0xef0   : > { %s6022_s18 = sld [smem:[#allocation24_spill]] }
 0xef1   : > { %s6023_s19 = sld [smem:[#allocation25_spill]] }
 0xef3   :  { %3581 = vsyncpa [#allocation4], 1 }
 0xef4   :  { %3583 = vsyncpa [#allocation4 + $0x1], 1 }
 0xef5   :  { %3584 = vsyncpa [#allocation6], 1 }
 0xef6   :  { %3586 = vsyncpa [#allocation6 + $0x1], 1 }
 0xef7   :  { %3587 = vsyncpa [#allocation9], 1 }
 0xef8   :  { %3589 = vsyncpa [#allocation9 + $0x1], 1 }
 0xef9   :  { %3590 = vsyncpa [#allocation12], 1 }
 0xefa   :  { %3592 = vsyncpa [#allocation12 + $0x1], 1 }

</bundles_post_ra>
